<compile_context>
chip_gen: v5e
topology: v5e:2x2
jax: 0.10.0
libtpu: 0.0.40
codegen_flags: <defaults>
</compile_context>

<pallas_src>
import jax
import jax.numpy as jnp
from jax import lax
from jax.experimental import pallas as pl
from jax.experimental.pallas import tpu as pltpu

_ROWS_PER_STEP = 8  # sublane rows per grid step -> (8, Bt) id/score blocks


def _mf_score_kernel(uids_ref, iids_ref, ut_ref, vt_ref, o_ref):
    # uids_ref/iids_ref: (8, Bt) int32 id tiles for this grid step.
    # ut_ref: (dim_p, num_user_p) packed user table (VMEM resident, bf16).
    # vt_ref: (dim_p, num_item_p) packed item table (VMEM resident, bf16).
    # o_ref : (8, Bt) f32 lane-dense score tile.
    num_user_p = ut_ref.shape[1]
    num_item_p = vt_ref.shape[1]
    rows, bt = uids_ref.shape

    ut = ut_ref[...]                                        # hoisted table loads
    vt = vt_ref[...]
    iota_u = lax.broadcasted_iota(jnp.int32, (num_user_p, bt), 0)
    iota_i = lax.broadcasted_iota(jnp.int32, (num_item_p, bt), 0)

    out_rows = []
    for r in range(rows):                                   # static unroll (8)
        uid = uids_ref[r:r + 1, :]                          # (1, Bt)
        iid = iids_ref[r:r + 1, :]
        # One-hot gather masks (table-row index on sublanes, batch on lanes).
        onehot_u = (iota_u == uid).astype(ut.dtype)         # (Nu_p, Bt) bf16
        onehot_i = (iota_i == iid).astype(vt.dtype)         # (Ni_p, Bt) bf16
        # Gather via MXU: (dim, N) @ (N, Bt) -> gathered-and-transposed rows.
        g_u = jnp.dot(ut, onehot_u, preferred_element_type=jnp.float32)
        g_v = jnp.dot(vt, onehot_i, preferred_element_type=jnp.float32)
        # Elementwise product on (dim, Bt) f32 tiles, reduce over dim (sublanes).
        out_rows.append(jnp.sum(g_u * g_v, axis=0, keepdims=True))  # (1, Bt)
    o_ref[...] = jnp.concatenate(out_rows, axis=0)          # (8, Bt) full-tile store


def _device_defaults():
    """Pick Bt and a scoped-VMEM cap from the local TPU generation."""
    kind = ""
    try:
        kind = jax.devices()[0].device_kind.lower()
    except Exception:
        pass
    older = any(t in kind for t in ("v2", "v3", "v4", "v5"))
    bt = 128 if older else 256            # 128-wide MXU (<=v5e) vs 256-wide (v6e/v7x)
    vmem_cap = (56 << 20) if "7" in kind else (100 << 20)   # v7x: 64 MiB physical/TC
    return bt, vmem_cap


def mf_forward(x, u_t, v_t, *, bt=None, single_buffer_tables=True):
    """MF forward: score[b] = <user_embs[x[b,0]], item_embs[x[b,1]]>.

    u_t / v_t are the packed (dim_pad, N_pad) tables produced by prepare_params
    (stored in this layout at init, so no per-call transpose / re-pack).
    """
    default_bt, vmem_cap = _device_defaults()
    if bt is None:
        bt = default_bt

    B = x.shape[0]
    dim_p, nu_p = u_t.shape
    ni_p = v_t.shape[1]

    # Pad batch up to full (8, Bt) tiles; padding ids are 0 (results discarded).
    pairs_per_step = _ROWS_PER_STEP * bt
    g = pl.cdiv(B, pairs_per_step)
    total = g * pairs_per_step
    uids = jnp.zeros((total,), jnp.int32).at[:B].set(x[:, 0].astype(jnp.int32))
    iids = jnp.zeros((total,), jnp.int32).at[:B].set(x[:, 1].astype(jnp.int32))
    uids = uids.reshape(g * _ROWS_PER_STEP, bt)
    iids = iids.reshape(g * _ROWS_PER_STEP, bt)

    # Tables: constant block across the grid -> single-buffer them in VMEM.
    table_mode = dict(pipeline_mode=pl.Buffered(1)) if single_buffer_tables else {}
    u_spec = pl.BlockSpec((dim_p, nu_p), lambda i: (0, 0), **table_mode)
    v_spec = pl.BlockSpec((dim_p, ni_p), lambda i: (0, 0), **table_mode)

    # Explicit scoped-VMEM budget: tables (single copy) + double-buffered id/out
    # blocks + per-step one-hot / gathered intermediates, with headroom.
    tbl_bytes = u_t.size * u_t.dtype.itemsize + v_t.size * v_t.dtype.itemsize
    step_bytes = (4 * _ROWS_PER_STEP * bt * 4                       # id + out blocks
                  + (nu_p + ni_p) * bt * u_t.dtype.itemsize         # one-hot masks
                  + 2 * dim_p * bt * 4)                             # gathered f32 tiles
    vmem_limit = int(min(max(tbl_bytes + 4 * step_bytes + (4 << 20), 32 << 20),
                         vmem_cap))

    flops = 2 * dim_p * (nu_p + ni_p) * total + 3 * dim_p * total
    bytes_accessed = tbl_bytes + 3 * total * 4

    scores = pl.pallas_call(
        _mf_score_kernel,
        out_shape=jax.ShapeDtypeStruct((g * _ROWS_PER_STEP, bt), jnp.float32),
        grid=(g,),
        in_specs=[
            pl.BlockSpec((_ROWS_PER_STEP, bt), lambda i: (i, 0)),   # uid tile
            pl.BlockSpec((_ROWS_PER_STEP, bt), lambda i: (i, 0)),   # iid tile
            u_spec,                                                  # user table (resident)
            v_spec,                                                  # item table (resident)
        ],
        out_specs=pl.BlockSpec((_ROWS_PER_STEP, bt), lambda i: (i, 0)),
        compiler_params=pltpu.CompilerParams(
            # Pair tiles are independent; with >=2 grid steps this lets v7x split
            # them across its two TensorCores (each TC keeps its own table copy).
            dimension_semantics=("parallel",),
            vmem_limit_bytes=vmem_limit),
        cost_estimate=pl.CostEstimate(
            flops=int(flops), transcendentals=0,
            bytes_accessed=int(bytes_accessed)),
    )(uids, iids, u_t, v_t)

    return scores.reshape(-1)[:B]


def init_params(key, num_user, num_item, dim):
    # nn.Embedding default init ~ N(0, 1), stored (N, dim) f32.
    ku, ki = jax.random.split(key)
    user_embs = jax.random.normal(ku, (num_user, dim), dtype=jnp.float32)
    item_embs = jax.random.normal(ki, (num_item, dim), dtype=jnp.float32)
    return user_embs, item_embs


def prepare_params(user_embs, item_embs, table_dtype=jnp.bfloat16):
    """One-time packing of the (N, dim) tables into the kernel's stored layout:
    transpose to (dim, N), pad dim -> multiple of 16 and N -> multiple of 128,
    cast to bf16. Runs once at init, NOT per forward call."""
    def pack(t):
        n, d = t.shape
        d_p = -(-d // 16) * 16
        n_p = -(-n // 128) * 128
        t = jnp.pad(t, ((0, n_p - n), (0, d_p - d)))
        return jnp.transpose(t).astype(table_dtype)          # (d_p, n_p)
    return pack(user_embs), pack(item_embs)


if __name__ == "__main__":
    num_user, num_item, dim = 64, 96, 128
    B = 8

    key = jax.random.PRNGKey(0)
    kp, ku, ki = jax.random.split(key, 3)
    user_embs, item_embs = init_params(kp, num_user, num_item, dim)
    u_t, v_t = prepare_params(user_embs, item_embs)          # one-time param packing

    uids = jax.random.randint(ku, (B,), 0, num_user, dtype=jnp.int32)
    iids = jax.random.randint(ki, (B,), 0, num_item, dtype=jnp.int32)
    x = jnp.stack([uids, iids], axis=1)                      # (B, 2) int32

    def run(single_buffer):
        s = mf_forward(x, u_t, v_t, single_buffer_tables=single_buffer)
        jax.block_until_ready(s)
        return s

    try:
        scores = run(True)
    except Exception:
        # Compatibility guard: if this JAX build rejects Buffered(1) on a
        # pallas_call BlockSpec, fall back to default double-buffered tables.
        scores = run(False)

    # Pure-JAX reference against the same (bf16-stored) parameters.
    u_q = user_embs.astype(jnp.bfloat16).astype(jnp.float32)
    v_q = item_embs.astype(jnp.bfloat16).astype(jnp.float32)
    ref = jnp.sum(u_q[uids] * v_q[iids], axis=-1)
    assert scores.shape == (B,)
    assert jnp.allclose(scores, ref, rtol=1e-4, atol=1e-4), (scores, ref)

    print("KERNEL_OK")
</pallas_src>

<mosaic_0001>
module attributes {stable_mosaic.version = 11 : i64} {
  func.func @_mf_score_kernel(%arg0: i32, %arg1: memref<8x256xi32, #tpu.memory_space<vmem>>, %arg2: memref<8x256xi32, #tpu.memory_space<vmem>>, %arg3: memref<128x128xbf16, #tpu.memory_space<vmem>>, %arg4: memref<128x128xbf16, #tpu.memory_space<vmem>>, %arg5: memref<8x256xf32, #tpu.memory_space<vmem>>) attributes {dimension_semantics = [#tpu.dimension_semantics<parallel>], iteration_bounds = array<i64: 1>, scalar_prefetch = 0 : i64, scratch_operands = 0 : i64, tpu.core_type = #tpu.core_type<tc>, window_params = [{transform_indices = @transform_0, window_bounds = array<i64: 8, 256>}, {transform_indices = @transform_1, window_bounds = array<i64: 8, 256>}, {pipeline_mode = #tpu.pipeline_mode<synchronous>, transform_indices = @transform_2, window_bounds = array<i64: 128, 128>}, {pipeline_mode = #tpu.pipeline_mode<synchronous>, transform_indices = @transform_3, window_bounds = array<i64: 128, 128>}, {transform_indices = @transform_4, window_bounds = array<i64: 8, 256>}]} {
    %c0 = arith.constant 0 : index
    %c0_0 = arith.constant 0 : index
    %0 = vector.load %arg3[%c0, %c0_0] : memref<128x128xbf16, #tpu.memory_space<vmem>>, vector<128x128xbf16>
    %c0_1 = arith.constant 0 : index
    %c0_2 = arith.constant 0 : index
    %1 = vector.load %arg4[%c0_1, %c0_2] : memref<128x128xbf16, #tpu.memory_space<vmem>>, vector<128x128xbf16>
    %2 = tpu.iota {dimensions = array<i32: 0>} : vector<128x256xi32>
    %3 = tpu.iota {dimensions = array<i32: 0>} : vector<128x256xi32>
    %c0_3 = arith.constant 0 : index
    %c0_4 = arith.constant 0 : index
    %4 = vector.load %arg1[%c0_3, %c0_4] : memref<8x256xi32, #tpu.memory_space<vmem>>, vector<1x256xi32>
    %c0_5 = arith.constant 0 : index
    %c0_6 = arith.constant 0 : index
    %5 = vector.load %arg2[%c0_5, %c0_6] : memref<8x256xi32, #tpu.memory_space<vmem>>, vector<1x256xi32>
    %6 = vector.broadcast %4 : vector<1x256xi32> to vector<128x256xi32>
    %7 = arith.cmpi eq, %2, %6 : vector<128x256xi32>
    %8 = arith.extui %7 : vector<128x256xi1> to vector<128x256xi32>
    %9 = arith.sitofp %8 : vector<128x256xi32> to vector<128x256xf32>
    %10 = arith.truncf %9 : vector<128x256xf32> to vector<128x256xbf16>
    %11 = vector.broadcast %5 : vector<1x256xi32> to vector<128x256xi32>
    %12 = arith.cmpi eq, %3, %11 : vector<128x256xi32>
    %13 = arith.extui %12 : vector<128x256xi1> to vector<128x256xi32>
    %14 = arith.sitofp %13 : vector<128x256xi32> to vector<128x256xf32>
    %15 = arith.truncf %14 : vector<128x256xf32> to vector<128x256xbf16>
    %cst = arith.constant dense<0.000000e+00> : vector<128x256xf32>
    %16 = tpu.matmul %0, %10, %cst {dimension_numbers = #tpu.dot_dimension_numbers<[1], [0], [0], [1], [0, 0, 1, 1], [], []>} : vector<128x128xbf16>, vector<128x256xbf16>, vector<128x256xf32> -> vector<128x256xf32>
    %cst_7 = arith.constant dense<0.000000e+00> : vector<128x256xf32>
    %17 = tpu.matmul %1, %15, %cst_7 {dimension_numbers = #tpu.dot_dimension_numbers<[1], [0], [0], [1], [0, 0, 1, 1], [], []>} : vector<128x128xbf16>, vector<128x256xbf16>, vector<128x256xf32> -> vector<128x256xf32>
    %18 = arith.mulf %16, %17 : vector<128x256xf32>
    %cst_8 = arith.constant dense<0.000000e+00> : vector<256xf32>
    %19 = vector.multi_reduction <add>, %18, %cst_8 [0] : vector<128x256xf32> to vector<256xf32>
    %20 = vector.shape_cast %19 : vector<256xf32> to vector<1x256xf32>
    %c1 = arith.constant 1 : index
    %c0_9 = arith.constant 0 : index
    %21 = vector.load %arg1[%c1, %c0_9] : memref<8x256xi32, #tpu.memory_space<vmem>>, vector<1x256xi32>
    %c1_10 = arith.constant 1 : index
    %c0_11 = arith.constant 0 : index
    %22 = vector.load %arg2[%c1_10, %c0_11] : memref<8x256xi32, #tpu.memory_space<vmem>>, vector<1x256xi32>
    %23 = vector.broadcast %21 : vector<1x256xi32> to vector<128x256xi32>
    %24 = arith.cmpi eq, %2, %23 : vector<128x256xi32>
    %25 = arith.extui %24 : vector<128x256xi1> to vector<128x256xi32>
    %26 = arith.sitofp %25 : vector<128x256xi32> to vector<128x256xf32>
    %27 = arith.truncf %26 : vector<128x256xf32> to vector<128x256xbf16>
    %28 = vector.broadcast %22 : vector<1x256xi32> to vector<128x256xi32>
    %29 = arith.cmpi eq, %3, %28 : vector<128x256xi32>
    %30 = arith.extui %29 : vector<128x256xi1> to vector<128x256xi32>
    %31 = arith.sitofp %30 : vector<128x256xi32> to vector<128x256xf32>
    %32 = arith.truncf %31 : vector<128x256xf32> to vector<128x256xbf16>
    %cst_12 = arith.constant dense<0.000000e+00> : vector<128x256xf32>
    %33 = tpu.matmul %0, %27, %cst_12 {dimension_numbers = #tpu.dot_dimension_numbers<[1], [0], [0], [1], [0, 0, 1, 1], [], []>} : vector<128x128xbf16>, vector<128x256xbf16>, vector<128x256xf32> -> vector<128x256xf32>
    %cst_13 = arith.constant dense<0.000000e+00> : vector<128x256xf32>
    %34 = tpu.matmul %1, %32, %cst_13 {dimension_numbers = #tpu.dot_dimension_numbers<[1], [0], [0], [1], [0, 0, 1, 1], [], []>} : vector<128x128xbf16>, vector<128x256xbf16>, vector<128x256xf32> -> vector<128x256xf32>
    %35 = arith.mulf %33, %34 : vector<128x256xf32>
    %cst_14 = arith.constant dense<0.000000e+00> : vector<256xf32>
    %36 = vector.multi_reduction <add>, %35, %cst_14 [0] : vector<128x256xf32> to vector<256xf32>
    %37 = vector.shape_cast %36 : vector<256xf32> to vector<1x256xf32>
    %c2 = arith.constant 2 : index
    %c0_15 = arith.constant 0 : index
    %38 = vector.load %arg1[%c2, %c0_15] : memref<8x256xi32, #tpu.memory_space<vmem>>, vector<1x256xi32>
    %c2_16 = arith.constant 2 : index
    %c0_17 = arith.constant 0 : index
    %39 = vector.load %arg2[%c2_16, %c0_17] : memref<8x256xi32, #tpu.memory_space<vmem>>, vector<1x256xi32>
    %40 = vector.broadcast %38 : vector<1x256xi32> to vector<128x256xi32>
    %41 = arith.cmpi eq, %2, %40 : vector<128x256xi32>
    %42 = arith.extui %41 : vector<128x256xi1> to vector<128x256xi32>
    %43 = arith.sitofp %42 : vector<128x256xi32> to vector<128x256xf32>
    %44 = arith.truncf %43 : vector<128x256xf32> to vector<128x256xbf16>
    %45 = vector.broadcast %39 : vector<1x256xi32> to vector<128x256xi32>
    %46 = arith.cmpi eq, %3, %45 : vector<128x256xi32>
    %47 = arith.extui %46 : vector<128x256xi1> to vector<128x256xi32>
    %48 = arith.sitofp %47 : vector<128x256xi32> to vector<128x256xf32>
    %49 = arith.truncf %48 : vector<128x256xf32> to vector<128x256xbf16>
    %cst_18 = arith.constant dense<0.000000e+00> : vector<128x256xf32>
    %50 = tpu.matmul %0, %44, %cst_18 {dimension_numbers = #tpu.dot_dimension_numbers<[1], [0], [0], [1], [0, 0, 1, 1], [], []>} : vector<128x128xbf16>, vector<128x256xbf16>, vector<128x256xf32> -> vector<128x256xf32>
    %cst_19 = arith.constant dense<0.000000e+00> : vector<128x256xf32>
    %51 = tpu.matmul %1, %49, %cst_19 {dimension_numbers = #tpu.dot_dimension_numbers<[1], [0], [0], [1], [0, 0, 1, 1], [], []>} : vector<128x128xbf16>, vector<128x256xbf16>, vector<128x256xf32> -> vector<128x256xf32>
    %52 = arith.mulf %50, %51 : vector<128x256xf32>
    %cst_20 = arith.constant dense<0.000000e+00> : vector<256xf32>
    %53 = vector.multi_reduction <add>, %52, %cst_20 [0] : vector<128x256xf32> to vector<256xf32>
    %54 = vector.shape_cast %53 : vector<256xf32> to vector<1x256xf32>
    %c3 = arith.constant 3 : index
    %c0_21 = arith.constant 0 : index
    %55 = vector.load %arg1[%c3, %c0_21] : memref<8x256xi32, #tpu.memory_space<vmem>>, vector<1x256xi32>
    %c3_22 = arith.constant 3 : index
    %c0_23 = arith.constant 0 : index
    %56 = vector.load %arg2[%c3_22, %c0_23] : memref<8x256xi32, #tpu.memory_space<vmem>>, vector<1x256xi32>
    %57 = vector.broadcast %55 : vector<1x256xi32> to vector<128x256xi32>
    %58 = arith.cmpi eq, %2, %57 : vector<128x256xi32>
    %59 = arith.extui %58 : vector<128x256xi1> to vector<128x256xi32>
    %60 = arith.sitofp %59 : vector<128x256xi32> to vector<128x256xf32>
    %61 = arith.truncf %60 : vector<128x256xf32> to vector<128x256xbf16>
    %62 = vector.broadcast %56 : vector<1x256xi32> to vector<128x256xi32>
    %63 = arith.cmpi eq, %3, %62 : vector<128x256xi32>
    %64 = arith.extui %63 : vector<128x256xi1> to vector<128x256xi32>
    %65 = arith.sitofp %64 : vector<128x256xi32> to vector<128x256xf32>
    %66 = arith.truncf %65 : vector<128x256xf32> to vector<128x256xbf16>
    %cst_24 = arith.constant dense<0.000000e+00> : vector<128x256xf32>
    %67 = tpu.matmul %0, %61, %cst_24 {dimension_numbers = #tpu.dot_dimension_numbers<[1], [0], [0], [1], [0, 0, 1, 1], [], []>} : vector<128x128xbf16>, vector<128x256xbf16>, vector<128x256xf32> -> vector<128x256xf32>
    %cst_25 = arith.constant dense<0.000000e+00> : vector<128x256xf32>
    %68 = tpu.matmul %1, %66, %cst_25 {dimension_numbers = #tpu.dot_dimension_numbers<[1], [0], [0], [1], [0, 0, 1, 1], [], []>} : vector<128x128xbf16>, vector<128x256xbf16>, vector<128x256xf32> -> vector<128x256xf32>
    %69 = arith.mulf %67, %68 : vector<128x256xf32>
    %cst_26 = arith.constant dense<0.000000e+00> : vector<256xf32>
    %70 = vector.multi_reduction <add>, %69, %cst_26 [0] : vector<128x256xf32> to vector<256xf32>
    %71 = vector.shape_cast %70 : vector<256xf32> to vector<1x256xf32>
    %c4 = arith.constant 4 : index
    %c0_27 = arith.constant 0 : index
    %72 = vector.load %arg1[%c4, %c0_27] : memref<8x256xi32, #tpu.memory_space<vmem>>, vector<1x256xi32>
    %c4_28 = arith.constant 4 : index
    %c0_29 = arith.constant 0 : index
    %73 = vector.load %arg2[%c4_28, %c0_29] : memref<8x256xi32, #tpu.memory_space<vmem>>, vector<1x256xi32>
    %74 = vector.broadcast %72 : vector<1x256xi32> to vector<128x256xi32>
    %75 = arith.cmpi eq, %2, %74 : vector<128x256xi32>
    %76 = arith.extui %75 : vector<128x256xi1> to vector<128x256xi32>
    %77 = arith.sitofp %76 : vector<128x256xi32> to vector<128x256xf32>
    %78 = arith.truncf %77 : vector<128x256xf32> to vector<128x256xbf16>
    %79 = vector.broadcast %73 : vector<1x256xi32> to vector<128x256xi32>
    %80 = arith.cmpi eq, %3, %79 : vector<128x256xi32>
    %81 = arith.extui %80 : vector<128x256xi1> to vector<128x256xi32>
    %82 = arith.sitofp %81 : vector<128x256xi32> to vector<128x256xf32>
    %83 = arith.truncf %82 : vector<128x256xf32> to vector<128x256xbf16>
    %cst_30 = arith.constant dense<0.000000e+00> : vector<128x256xf32>
    %84 = tpu.matmul %0, %78, %cst_30 {dimension_numbers = #tpu.dot_dimension_numbers<[1], [0], [0], [1], [0, 0, 1, 1], [], []>} : vector<128x128xbf16>, vector<128x256xbf16>, vector<128x256xf32> -> vector<128x256xf32>
    %cst_31 = arith.constant dense<0.000000e+00> : vector<128x256xf32>
    %85 = tpu.matmul %1, %83, %cst_31 {dimension_numbers = #tpu.dot_dimension_numbers<[1], [0], [0], [1], [0, 0, 1, 1], [], []>} : vector<128x128xbf16>, vector<128x256xbf16>, vector<128x256xf32> -> vector<128x256xf32>
    %86 = arith.mulf %84, %85 : vector<128x256xf32>
    %cst_32 = arith.constant dense<0.000000e+00> : vector<256xf32>
    %87 = vector.multi_reduction <add>, %86, %cst_32 [0] : vector<128x256xf32> to vector<256xf32>
    %88 = vector.shape_cast %87 : vector<256xf32> to vector<1x256xf32>
    %c5 = arith.constant 5 : index
    %c0_33 = arith.constant 0 : index
    %89 = vector.load %arg1[%c5, %c0_33] : memref<8x256xi32, #tpu.memory_space<vmem>>, vector<1x256xi32>
    %c5_34 = arith.constant 5 : index
    %c0_35 = arith.constant 0 : index
    %90 = vector.load %arg2[%c5_34, %c0_35] : memref<8x256xi32, #tpu.memory_space<vmem>>, vector<1x256xi32>
    %91 = vector.broadcast %89 : vector<1x256xi32> to vector<128x256xi32>
    %92 = arith.cmpi eq, %2, %91 : vector<128x256xi32>
    %93 = arith.extui %92 : vector<128x256xi1> to vector<128x256xi32>
    %94 = arith.sitofp %93 : vector<128x256xi32> to vector<128x256xf32>
    %95 = arith.truncf %94 : vector<128x256xf32> to vector<128x256xbf16>
    %96 = vector.broadcast %90 : vector<1x256xi32> to vector<128x256xi32>
    %97 = arith.cmpi eq, %3, %96 : vector<128x256xi32>
    %98 = arith.extui %97 : vector<128x256xi1> to vector<128x256xi32>
    %99 = arith.sitofp %98 : vector<128x256xi32> to vector<128x256xf32>
    %100 = arith.truncf %99 : vector<128x256xf32> to vector<128x256xbf16>
    %cst_36 = arith.constant dense<0.000000e+00> : vector<128x256xf32>
    %101 = tpu.matmul %0, %95, %cst_36 {dimension_numbers = #tpu.dot_dimension_numbers<[1], [0], [0], [1], [0, 0, 1, 1], [], []>} : vector<128x128xbf16>, vector<128x256xbf16>, vector<128x256xf32> -> vector<128x256xf32>
    %cst_37 = arith.constant dense<0.000000e+00> : vector<128x256xf32>
    %102 = tpu.matmul %1, %100, %cst_37 {dimension_numbers = #tpu.dot_dimension_numbers<[1], [0], [0], [1], [0, 0, 1, 1], [], []>} : vector<128x128xbf16>, vector<128x256xbf16>, vector<128x256xf32> -> vector<128x256xf32>
    %103 = arith.mulf %101, %102 : vector<128x256xf32>
    %cst_38 = arith.constant dense<0.000000e+00> : vector<256xf32>
    %104 = vector.multi_reduction <add>, %103, %cst_38 [0] : vector<128x256xf32> to vector<256xf32>
    %105 = vector.shape_cast %104 : vector<256xf32> to vector<1x256xf32>
    %c6 = arith.constant 6 : index
    %c0_39 = arith.constant 0 : index
    %106 = vector.load %arg1[%c6, %c0_39] : memref<8x256xi32, #tpu.memory_space<vmem>>, vector<1x256xi32>
    %c6_40 = arith.constant 6 : index
    %c0_41 = arith.constant 0 : index
    %107 = vector.load %arg2[%c6_40, %c0_41] : memref<8x256xi32, #tpu.memory_space<vmem>>, vector<1x256xi32>
    %108 = vector.broadcast %106 : vector<1x256xi32> to vector<128x256xi32>
    %109 = arith.cmpi eq, %2, %108 : vector<128x256xi32>
    %110 = arith.extui %109 : vector<128x256xi1> to vector<128x256xi32>
    %111 = arith.sitofp %110 : vector<128x256xi32> to vector<128x256xf32>
    %112 = arith.truncf %111 : vector<128x256xf32> to vector<128x256xbf16>
    %113 = vector.broadcast %107 : vector<1x256xi32> to vector<128x256xi32>
    %114 = arith.cmpi eq, %3, %113 : vector<128x256xi32>
    %115 = arith.extui %114 : vector<128x256xi1> to vector<128x256xi32>
    %116 = arith.sitofp %115 : vector<128x256xi32> to vector<128x256xf32>
    %117 = arith.truncf %116 : vector<128x256xf32> to vector<128x256xbf16>
    %cst_42 = arith.constant dense<0.000000e+00> : vector<128x256xf32>
    %118 = tpu.matmul %0, %112, %cst_42 {dimension_numbers = #tpu.dot_dimension_numbers<[1], [0], [0], [1], [0, 0, 1, 1], [], []>} : vector<128x128xbf16>, vector<128x256xbf16>, vector<128x256xf32> -> vector<128x256xf32>
    %cst_43 = arith.constant dense<0.000000e+00> : vector<128x256xf32>
    %119 = tpu.matmul %1, %117, %cst_43 {dimension_numbers = #tpu.dot_dimension_numbers<[1], [0], [0], [1], [0, 0, 1, 1], [], []>} : vector<128x128xbf16>, vector<128x256xbf16>, vector<128x256xf32> -> vector<128x256xf32>
    %120 = arith.mulf %118, %119 : vector<128x256xf32>
    %cst_44 = arith.constant dense<0.000000e+00> : vector<256xf32>
    %121 = vector.multi_reduction <add>, %120, %cst_44 [0] : vector<128x256xf32> to vector<256xf32>
    %122 = vector.shape_cast %121 : vector<256xf32> to vector<1x256xf32>
    %c7 = arith.constant 7 : index
    %c0_45 = arith.constant 0 : index
    %123 = vector.load %arg1[%c7, %c0_45] : memref<8x256xi32, #tpu.memory_space<vmem>>, vector<1x256xi32>
    %c7_46 = arith.constant 7 : index
    %c0_47 = arith.constant 0 : index
    %124 = vector.load %arg2[%c7_46, %c0_47] : memref<8x256xi32, #tpu.memory_space<vmem>>, vector<1x256xi32>
    %125 = vector.broadcast %123 : vector<1x256xi32> to vector<128x256xi32>
    %126 = arith.cmpi eq, %2, %125 : vector<128x256xi32>
    %127 = arith.extui %126 : vector<128x256xi1> to vector<128x256xi32>
    %128 = arith.sitofp %127 : vector<128x256xi32> to vector<128x256xf32>
    %129 = arith.truncf %128 : vector<128x256xf32> to vector<128x256xbf16>
    %130 = vector.broadcast %124 : vector<1x256xi32> to vector<128x256xi32>
    %131 = arith.cmpi eq, %3, %130 : vector<128x256xi32>
    %132 = arith.extui %131 : vector<128x256xi1> to vector<128x256xi32>
    %133 = arith.sitofp %132 : vector<128x256xi32> to vector<128x256xf32>
    %134 = arith.truncf %133 : vector<128x256xf32> to vector<128x256xbf16>
    %cst_48 = arith.constant dense<0.000000e+00> : vector<128x256xf32>
    %135 = tpu.matmul %0, %129, %cst_48 {dimension_numbers = #tpu.dot_dimension_numbers<[1], [0], [0], [1], [0, 0, 1, 1], [], []>} : vector<128x128xbf16>, vector<128x256xbf16>, vector<128x256xf32> -> vector<128x256xf32>
    %cst_49 = arith.constant dense<0.000000e+00> : vector<128x256xf32>
    %136 = tpu.matmul %1, %134, %cst_49 {dimension_numbers = #tpu.dot_dimension_numbers<[1], [0], [0], [1], [0, 0, 1, 1], [], []>} : vector<128x128xbf16>, vector<128x256xbf16>, vector<128x256xf32> -> vector<128x256xf32>
    %137 = arith.mulf %135, %136 : vector<128x256xf32>
    %cst_50 = arith.constant dense<0.000000e+00> : vector<256xf32>
    %138 = vector.multi_reduction <add>, %137, %cst_50 [0] : vector<128x256xf32> to vector<256xf32>
    %139 = vector.shape_cast %138 : vector<256xf32> to vector<1x256xf32>
    %140 = tpu.concatenate %20, %37, %54, %71, %88, %105, %122, %139 in 0 : vector<1x256xf32>, vector<1x256xf32>, vector<1x256xf32>, vector<1x256xf32>, vector<1x256xf32>, vector<1x256xf32>, vector<1x256xf32>, vector<1x256xf32> -> vector<8x256xf32>
    %c0_51 = arith.constant 0 : index
    %c0_52 = arith.constant 0 : index
    %141 = vector.load %arg5[%c0_51, %c0_52] : memref<8x256xf32, #tpu.memory_space<vmem>>, vector<8x256xf32>
    tpu.vector_store %arg5[%c0_51, %c0_52], %140 {strides = array<i32>} : memref<8x256xf32, #tpu.memory_space<vmem>>, vector<8x256xf32>,
    return
  }
  func.func @transform_0(%arg0: i32) -> (i32, i32) {
    %c0_i32 = arith.constant 0 : i32
    %c0_i32_0 = arith.constant 0 : i32
    return %arg0, %c0_i32 : i32, i32
  }
  func.func @transform_1(%arg0: i32) -> (i32, i32) {
    %c0_i32 = arith.constant 0 : i32
    %c0_i32_0 = arith.constant 0 : i32
    return %arg0, %c0_i32 : i32, i32
  }
  func.func @transform_2(%arg0: i32) -> (i32, i32) {
    %c0_i32 = arith.constant 0 : i32
    %c0_i32_0 = arith.constant 0 : i32
    %c0_i32_1 = arith.constant 0 : i32
    return %c0_i32, %c0_i32_0 : i32, i32
  }
  func.func @transform_3(%arg0: i32) -> (i32, i32) {
    %c0_i32 = arith.constant 0 : i32
    %c0_i32_0 = arith.constant 0 : i32
    %c0_i32_1 = arith.constant 0 : i32
    return %c0_i32, %c0_i32_0 : i32, i32
  }
  func.func @transform_4(%arg0: i32) -> (i32, i32) {
    %c0_i32 = arith.constant 0 : i32
    %c0_i32_0 = arith.constant 0 : i32
    return %arg0, %c0_i32 : i32, i32
  }
}

module attributes {stable_mosaic.version = 11 : i64} {
  func.func @_mf_score_kernel(%arg0: i32, %arg1: memref<8x256xi32, #tpu.memory_space<vmem>>, %arg2: memref<8x256xi32, #tpu.memory_space<vmem>>, %arg3: memref<128x128xbf16, #tpu.memory_space<vmem>>, %arg4: memref<128x128xbf16, #tpu.memory_space<vmem>>, %arg5: memref<8x256xf32, #tpu.memory_space<vmem>>) attributes {dimension_semantics = [#tpu.dimension_semantics<parallel>], iteration_bounds = array<i64: 1>, scalar_prefetch = 0 : i64, scratch_operands = 0 : i64, tpu.core_type = #tpu.core_type<tc>, window_params = [{transform_indices = @transform_0, window_bounds = array<i64: 8, 256>}, {transform_indices = @transform_1, window_bounds = array<i64: 8, 256>}, {pipeline_mode = #tpu.pipeline_mode<synchronous>, transform_indices = @transform_2, window_bounds = array<i64: 128, 128>}, {pipeline_mode = #tpu.pipeline_mode<synchronous>, transform_indices = @transform_3, window_bounds = array<i64: 128, 128>}, {transform_indices = @transform_4, window_bounds = array<i64: 8, 256>}]} {
    %c0 = arith.constant 0 : index
    %c0_0 = arith.constant 0 : index
    %0 = vector.load %arg3[%c0, %c0_0] : memref<128x128xbf16, #tpu.memory_space<vmem>>, vector<128x128xbf16>
    %c0_1 = arith.constant 0 : index
    %c0_2 = arith.constant 0 : index
    %1 = vector.load %arg4[%c0_1, %c0_2] : memref<128x128xbf16, #tpu.memory_space<vmem>>, vector<128x128xbf16>
    %2 = tpu.iota {dimensions = array<i32: 0>} : vector<128x256xi32>
    %3 = tpu.iota {dimensions = array<i32: 0>} : vector<128x256xi32>
    %c0_3 = arith.constant 0 : index
    %c0_4 = arith.constant 0 : index
    %4 = vector.load %arg1[%c0_3, %c0_4] : memref<8x256xi32, #tpu.memory_space<vmem>>, vector<1x256xi32>
    %c0_5 = arith.constant 0 : index
    %c0_6 = arith.constant 0 : index
    %5 = vector.load %arg2[%c0_5, %c0_6] : memref<8x256xi32, #tpu.memory_space<vmem>>, vector<1x256xi32>
    %6 = vector.broadcast %4 : vector<1x256xi32> to vector<128x256xi32>
    %7 = arith.cmpi eq, %2, %6 : vector<128x256xi32>
    %8 = arith.extui %7 : vector<128x256xi1> to vector<128x256xi32>
    %9 = arith.sitofp %8 : vector<128x256xi32> to vector<128x256xf32>
    %10 = arith.truncf %9 : vector<128x256xf32> to vector<128x256xbf16>
    %11 = vector.broadcast %5 : vector<1x256xi32> to vector<128x256xi32>
    %12 = arith.cmpi eq, %3, %11 : vector<128x256xi32>
    %13 = arith.extui %12 : vector<128x256xi1> to vector<128x256xi32>
    %14 = arith.sitofp %13 : vector<128x256xi32> to vector<128x256xf32>
    %15 = arith.truncf %14 : vector<128x256xf32> to vector<128x256xbf16>
    %cst = arith.constant dense<0.000000e+00> : vector<128x256xf32>
    %16 = tpu.matmul %0, %10, %cst {dimension_numbers = #tpu.dot_dimension_numbers<[1], [0], [0], [1], [0, 0, 1, 1], [], []>} : vector<128x128xbf16>, vector<128x256xbf16>, vector<128x256xf32> -> vector<128x256xf32>
    %cst_7 = arith.constant dense<0.000000e+00> : vector<128x256xf32>
    %17 = tpu.matmul %1, %15, %cst_7 {dimension_numbers = #tpu.dot_dimension_numbers<[1], [0], [0], [1], [0, 0, 1, 1], [], []>} : vector<128x128xbf16>, vector<128x256xbf16>, vector<128x256xf32> -> vector<128x256xf32>
    %18 = arith.mulf %16, %17 : vector<128x256xf32>
    %cst_8 = arith.constant dense<0.000000e+00> : vector<256xf32>
    %19 = vector.multi_reduction <add>, %18, %cst_8 [0] : vector<128x256xf32> to vector<256xf32>
    %20 = vector.shape_cast %19 : vector<256xf32> to vector<1x256xf32>
    %c1 = arith.constant 1 : index
    %c0_9 = arith.constant 0 : index
    %21 = vector.load %arg1[%c1, %c0_9] : memref<8x256xi32, #tpu.memory_space<vmem>>, vector<1x256xi32>
    %c1_10 = arith.constant 1 : index
    %c0_11 = arith.constant 0 : index
    %22 = vector.load %arg2[%c1_10, %c0_11] : memref<8x256xi32, #tpu.memory_space<vmem>>, vector<1x256xi32>
    %23 = vector.broadcast %21 : vector<1x256xi32> to vector<128x256xi32>
    %24 = arith.cmpi eq, %2, %23 : vector<128x256xi32>
    %25 = arith.extui %24 : vector<128x256xi1> to vector<128x256xi32>
    %26 = arith.sitofp %25 : vector<128x256xi32> to vector<128x256xf32>
    %27 = arith.truncf %26 : vector<128x256xf32> to vector<128x256xbf16>
    %28 = vector.broadcast %22 : vector<1x256xi32> to vector<128x256xi32>
    %29 = arith.cmpi eq, %3, %28 : vector<128x256xi32>
    %30 = arith.extui %29 : vector<128x256xi1> to vector<128x256xi32>
    %31 = arith.sitofp %30 : vector<128x256xi32> to vector<128x256xf32>
    %32 = arith.truncf %31 : vector<128x256xf32> to vector<128x256xbf16>
    %cst_12 = arith.constant dense<0.000000e+00> : vector<128x256xf32>
    %33 = tpu.matmul %0, %27, %cst_12 {dimension_numbers = #tpu.dot_dimension_numbers<[1], [0], [0], [1], [0, 0, 1, 1], [], []>} : vector<128x128xbf16>, vector<128x256xbf16>, vector<128x256xf32> -> vector<128x256xf32>
    %cst_13 = arith.constant dense<0.000000e+00> : vector<128x256xf32>
    %34 = tpu.matmul %1, %32, %cst_13 {dimension_numbers = #tpu.dot_dimension_numbers<[1], [0], [0], [1], [0, 0, 1, 1], [], []>} : vector<128x128xbf16>, vector<128x256xbf16>, vector<128x256xf32> -> vector<128x256xf32>
    %35 = arith.mulf %33, %34 : vector<128x256xf32>
    %cst_14 = arith.constant dense<0.000000e+00> : vector<256xf32>
    %36 = vector.multi_reduction <add>, %35, %cst_14 [0] : vector<128x256xf32> to vector<256xf32>
    %37 = vector.shape_cast %36 : vector<256xf32> to vector<1x256xf32>
    %c2 = arith.constant 2 : index
    %c0_15 = arith.constant 0 : index
    %38 = vector.load %arg1[%c2, %c0_15] : memref<8x256xi32, #tpu.memory_space<vmem>>, vector<1x256xi32>
    %c2_16 = arith.constant 2 : index
    %c0_17 = arith.constant 0 : index
    %39 = vector.load %arg2[%c2_16, %c0_17] : memref<8x256xi32, #tpu.memory_space<vmem>>, vector<1x256xi32>
    %40 = vector.broadcast %38 : vector<1x256xi32> to vector<128x256xi32>
    %41 = arith.cmpi eq, %2, %40 : vector<128x256xi32>
    %42 = arith.extui %41 : vector<128x256xi1> to vector<128x256xi32>
    %43 = arith.sitofp %42 : vector<128x256xi32> to vector<128x256xf32>
    %44 = arith.truncf %43 : vector<128x256xf32> to vector<128x256xbf16>
    %45 = vector.broadcast %39 : vector<1x256xi32> to vector<128x256xi32>
    %46 = arith.cmpi eq, %3, %45 : vector<128x256xi32>
    %47 = arith.extui %46 : vector<128x256xi1> to vector<128x256xi32>
    %48 = arith.sitofp %47 : vector<128x256xi32> to vector<128x256xf32>
    %49 = arith.truncf %48 : vector<128x256xf32> to vector<128x256xbf16>
    %cst_18 = arith.constant dense<0.000000e+00> : vector<128x256xf32>
    %50 = tpu.matmul %0, %44, %cst_18 {dimension_numbers = #tpu.dot_dimension_numbers<[1], [0], [0], [1], [0, 0, 1, 1], [], []>} : vector<128x128xbf16>, vector<128x256xbf16>, vector<128x256xf32> -> vector<128x256xf32>
    %cst_19 = arith.constant dense<0.000000e+00> : vector<128x256xf32>
    %51 = tpu.matmul %1, %49, %cst_19 {dimension_numbers = #tpu.dot_dimension_numbers<[1], [0], [0], [1], [0, 0, 1, 1], [], []>} : vector<128x128xbf16>, vector<128x256xbf16>, vector<128x256xf32> -> vector<128x256xf32>
    %52 = arith.mulf %50, %51 : vector<128x256xf32>
    %cst_20 = arith.constant dense<0.000000e+00> : vector<256xf32>
    %53 = vector.multi_reduction <add>, %52, %cst_20 [0] : vector<128x256xf32> to vector<256xf32>
    %54 = vector.shape_cast %53 : vector<256xf32> to vector<1x256xf32>
    %c3 = arith.constant 3 : index
    %c0_21 = arith.constant 0 : index
    %55 = vector.load %arg1[%c3, %c0_21] : memref<8x256xi32, #tpu.memory_space<vmem>>, vector<1x256xi32>
    %c3_22 = arith.constant 3 : index
    %c0_23 = arith.constant 0 : index
    %56 = vector.load %arg2[%c3_22, %c0_23] : memref<8x256xi32, #tpu.memory_space<vmem>>, vector<1x256xi32>
    %57 = vector.broadcast %55 : vector<1x256xi32> to vector<128x256xi32>
    %58 = arith.cmpi eq, %2, %57 : vector<128x256xi32>
    %59 = arith.extui %58 : vector<128x256xi1> to vector<128x256xi32>
    %60 = arith.sitofp %59 : vector<128x256xi32> to vector<128x256xf32>
    %61 = arith.truncf %60 : vector<128x256xf32> to vector<128x256xbf16>
    %62 = vector.broadcast %56 : vector<1x256xi32> to vector<128x256xi32>
    %63 = arith.cmpi eq, %3, %62 : vector<128x256xi32>
    %64 = arith.extui %63 : vector<128x256xi1> to vector<128x256xi32>
    %65 = arith.sitofp %64 : vector<128x256xi32> to vector<128x256xf32>
    %66 = arith.truncf %65 : vector<128x256xf32> to vector<128x256xbf16>
    %cst_24 = arith.constant dense<0.000000e+00> : vector<128x256xf32>
    %67 = tpu.matmul %0, %61, %cst_24 {dimension_numbers = #tpu.dot_dimension_numbers<[1], [0], [0], [1], [0, 0, 1, 1], [], []>} : vector<128x128xbf16>, vector<128x256xbf16>, vector<128x256xf32> -> vector<128x256xf32>
    %cst_25 = arith.constant dense<0.000000e+00> : vector<128x256xf32>
    %68 = tpu.matmul %1, %66, %cst_25 {dimension_numbers = #tpu.dot_dimension_numbers<[1], [0], [0], [1], [0, 0, 1, 1], [], []>} : vector<128x128xbf16>, vector<128x256xbf16>, vector<128x256xf32> -> vector<128x256xf32>
    %69 = arith.mulf %67, %68 : vector<128x256xf32>
    %cst_26 = arith.constant dense<0.000000e+00> : vector<256xf32>
    %70 = vector.multi_reduction <add>, %69, %cst_26 [0] : vector<128x256xf32> to vector<256xf32>
    %71 = vector.shape_cast %70 : vector<256xf32> to vector<1x256xf32>
    %c4 = arith.constant 4 : index
    %c0_27 = arith.constant 0 : index
    %72 = vector.load %arg1[%c4, %c0_27] : memref<8x256xi32, #tpu.memory_space<vmem>>, vector<1x256xi32>
    %c4_28 = arith.constant 4 : index
    %c0_29 = arith.constant 0 : index
    %73 = vector.load %arg2[%c4_28, %c0_29] : memref<8x256xi32, #tpu.memory_space<vmem>>, vector<1x256xi32>
    %74 = vector.broadcast %72 : vector<1x256xi32> to vector<128x256xi32>
    %75 = arith.cmpi eq, %2, %74 : vector<128x256xi32>
    %76 = arith.extui %75 : vector<128x256xi1> to vector<128x256xi32>
    %77 = arith.sitofp %76 : vector<128x256xi32> to vector<128x256xf32>
    %78 = arith.truncf %77 : vector<128x256xf32> to vector<128x256xbf16>
    %79 = vector.broadcast %73 : vector<1x256xi32> to vector<128x256xi32>
    %80 = arith.cmpi eq, %3, %79 : vector<128x256xi32>
    %81 = arith.extui %80 : vector<128x256xi1> to vector<128x256xi32>
    %82 = arith.sitofp %81 : vector<128x256xi32> to vector<128x256xf32>
    %83 = arith.truncf %82 : vector<128x256xf32> to vector<128x256xbf16>
    %cst_30 = arith.constant dense<0.000000e+00> : vector<128x256xf32>
    %84 = tpu.matmul %0, %78, %cst_30 {dimension_numbers = #tpu.dot_dimension_numbers<[1], [0], [0], [1], [0, 0, 1, 1], [], []>} : vector<128x128xbf16>, vector<128x256xbf16>, vector<128x256xf32> -> vector<128x256xf32>
    %cst_31 = arith.constant dense<0.000000e+00> : vector<128x256xf32>
    %85 = tpu.matmul %1, %83, %cst_31 {dimension_numbers = #tpu.dot_dimension_numbers<[1], [0], [0], [1], [0, 0, 1, 1], [], []>} : vector<128x128xbf16>, vector<128x256xbf16>, vector<128x256xf32> -> vector<128x256xf32>
    %86 = arith.mulf %84, %85 : vector<128x256xf32>
    %cst_32 = arith.constant dense<0.000000e+00> : vector<256xf32>
    %87 = vector.multi_reduction <add>, %86, %cst_32 [0] : vector<128x256xf32> to vector<256xf32>
    %88 = vector.shape_cast %87 : vector<256xf32> to vector<1x256xf32>
    %c5 = arith.constant 5 : index
    %c0_33 = arith.constant 0 : index
    %89 = vector.load %arg1[%c5, %c0_33] : memref<8x256xi32, #tpu.memory_space<vmem>>, vector<1x256xi32>
    %c5_34 = arith.constant 5 : index
    %c0_35 = arith.constant 0 : index
    %90 = vector.load %arg2[%c5_34, %c0_35] : memref<8x256xi32, #tpu.memory_space<vmem>>, vector<1x256xi32>
    %91 = vector.broadcast %89 : vector<1x256xi32> to vector<128x256xi32>
    %92 = arith.cmpi eq, %2, %91 : vector<128x256xi32>
    %93 = arith.extui %92 : vector<128x256xi1> to vector<128x256xi32>
    %94 = arith.sitofp %93 : vector<128x256xi32> to vector<128x256xf32>
    %95 = arith.truncf %94 : vector<128x256xf32> to vector<128x256xbf16>
    %96 = vector.broadcast %90 : vector<1x256xi32> to vector<128x256xi32>
    %97 = arith.cmpi eq, %3, %96 : vector<128x256xi32>
    %98 = arith.extui %97 : vector<128x256xi1> to vector<128x256xi32>
    %99 = arith.sitofp %98 : vector<128x256xi32> to vector<128x256xf32>
    %100 = arith.truncf %99 : vector<128x256xf32> to vector<128x256xbf16>
    %cst_36 = arith.constant dense<0.000000e+00> : vector<128x256xf32>
    %101 = tpu.matmul %0, %95, %cst_36 {dimension_numbers = #tpu.dot_dimension_numbers<[1], [0], [0], [1], [0, 0, 1, 1], [], []>} : vector<128x128xbf16>, vector<128x256xbf16>, vector<128x256xf32> -> vector<128x256xf32>
    %cst_37 = arith.constant dense<0.000000e+00> : vector<128x256xf32>
    %102 = tpu.matmul %1, %100, %cst_37 {dimension_numbers = #tpu.dot_dimension_numbers<[1], [0], [0], [1], [0, 0, 1, 1], [], []>} : vector<128x128xbf16>, vector<128x256xbf16>, vector<128x256xf32> -> vector<128x256xf32>
    %103 = arith.mulf %101, %102 : vector<128x256xf32>
    %cst_38 = arith.constant dense<0.000000e+00> : vector<256xf32>
    %104 = vector.multi_reduction <add>, %103, %cst_38 [0] : vector<128x256xf32> to vector<256xf32>
    %105 = vector.shape_cast %104 : vector<256xf32> to vector<1x256xf32>
    %c6 = arith.constant 6 : index
    %c0_39 = arith.constant 0 : index
    %106 = vector.load %arg1[%c6, %c0_39] : memref<8x256xi32, #tpu.memory_space<vmem>>, vector<1x256xi32>
    %c6_40 = arith.constant 6 : index
    %c0_41 = arith.constant 0 : index
    %107 = vector.load %arg2[%c6_40, %c0_41] : memref<8x256xi32, #tpu.memory_space<vmem>>, vector<1x256xi32>
    %108 = vector.broadcast %106 : vector<1x256xi32> to vector<128x256xi32>
    %109 = arith.cmpi eq, %2, %108 : vector<128x256xi32>
    %110 = arith.extui %109 : vector<128x256xi1> to vector<128x256xi32>
    %111 = arith.sitofp %110 : vector<128x256xi32> to vector<128x256xf32>
    %112 = arith.truncf %111 : vector<128x256xf32> to vector<128x256xbf16>
    %113 = vector.broadcast %107 : vector<1x256xi32> to vector<128x256xi32>
    %114 = arith.cmpi eq, %3, %113 : vector<128x256xi32>
    %115 = arith.extui %114 : vector<128x256xi1> to vector<128x256xi32>
    %116 = arith.sitofp %115 : vector<128x256xi32> to vector<128x256xf32>
    %117 = arith.truncf %116 : vector<128x256xf32> to vector<128x256xbf16>
    %cst_42 = arith.constant dense<0.000000e+00> : vector<128x256xf32>
    %118 = tpu.matmul %0, %112, %cst_42 {dimension_numbers = #tpu.dot_dimension_numbers<[1], [0], [0], [1], [0, 0, 1, 1], [], []>} : vector<128x128xbf16>, vector<128x256xbf16>, vector<128x256xf32> -> vector<128x256xf32>
    %cst_43 = arith.constant dense<0.000000e+00> : vector<128x256xf32>
    %119 = tpu.matmul %1, %117, %cst_43 {dimension_numbers = #tpu.dot_dimension_numbers<[1], [0], [0], [1], [0, 0, 1, 1], [], []>} : vector<128x128xbf16>, vector<128x256xbf16>, vector<128x256xf32> -> vector<128x256xf32>
    %120 = arith.mulf %118, %119 : vector<128x256xf32>
    %cst_44 = arith.constant dense<0.000000e+00> : vector<256xf32>
    %121 = vector.multi_reduction <add>, %120, %cst_44 [0] : vector<128x256xf32> to vector<256xf32>
    %122 = vector.shape_cast %121 : vector<256xf32> to vector<1x256xf32>
    %c7 = arith.constant 7 : index
    %c0_45 = arith.constant 0 : index
    %123 = vector.load %arg1[%c7, %c0_45] : memref<8x256xi32, #tpu.memory_space<vmem>>, vector<1x256xi32>
    %c7_46 = arith.constant 7 : index
    %c0_47 = arith.constant 0 : index
    %124 = vector.load %arg2[%c7_46, %c0_47] : memref<8x256xi32, #tpu.memory_space<vmem>>, vector<1x256xi32>
    %125 = vector.broadcast %123 : vector<1x256xi32> to vector<128x256xi32>
    %126 = arith.cmpi eq, %2, %125 : vector<128x256xi32>
    %127 = arith.extui %126 : vector<128x256xi1> to vector<128x256xi32>
    %128 = arith.sitofp %127 : vector<128x256xi32> to vector<128x256xf32>
    %129 = arith.truncf %128 : vector<128x256xf32> to vector<128x256xbf16>
    %130 = vector.broadcast %124 : vector<1x256xi32> to vector<128x256xi32>
    %131 = arith.cmpi eq, %3, %130 : vector<128x256xi32>
    %132 = arith.extui %131 : vector<128x256xi1> to vector<128x256xi32>
    %133 = arith.sitofp %132 : vector<128x256xi32> to vector<128x256xf32>
    %134 = arith.truncf %133 : vector<128x256xf32> to vector<128x256xbf16>
    %cst_48 = arith.constant dense<0.000000e+00> : vector<128x256xf32>
    %135 = tpu.matmul %0, %129, %cst_48 {dimension_numbers = #tpu.dot_dimension_numbers<[1], [0], [0], [1], [0, 0, 1, 1], [], []>} : vector<128x128xbf16>, vector<128x256xbf16>, vector<128x256xf32> -> vector<128x256xf32>
    %cst_49 = arith.constant dense<0.000000e+00> : vector<128x256xf32>
    %136 = tpu.matmul %1, %134, %cst_49 {dimension_numbers = #tpu.dot_dimension_numbers<[1], [0], [0], [1], [0, 0, 1, 1], [], []>} : vector<128x128xbf16>, vector<128x256xbf16>, vector<128x256xf32> -> vector<128x256xf32>
    %137 = arith.mulf %135, %136 : vector<128x256xf32>
    %cst_50 = arith.constant dense<0.000000e+00> : vector<256xf32>
    %138 = vector.multi_reduction <add>, %137, %cst_50 [0] : vector<128x256xf32> to vector<256xf32>
    %139 = vector.shape_cast %138 : vector<256xf32> to vector<1x256xf32>
    %140 = tpu.concatenate %20, %37, %54, %71, %88, %105, %122, %139 in 0 : vector<1x256xf32>, vector<1x256xf32>, vector<1x256xf32>, vector<1x256xf32>, vector<1x256xf32>, vector<1x256xf32>, vector<1x256xf32>, vector<1x256xf32> -> vector<8x256xf32>
    %c0_51 = arith.constant 0 : index
    %c0_52 = arith.constant 0 : index
    %141 = vector.load %arg5[%c0_51, %c0_52] : memref<8x256xf32, #tpu.memory_space<vmem>>, vector<8x256xf32>
    tpu.vector_store %arg5[%c0_51, %c0_52], %140 {strides = array<i32>} : memref<8x256xf32, #tpu.memory_space<vmem>>, vector<8x256xf32>,
    return
  }
  func.func @transform_0(%arg0: i32) -> (i32, i32) {
    %c0_i32 = arith.constant 0 : i32
    %c0_i32_0 = arith.constant 0 : i32
    return %arg0, %c0_i32 : i32, i32
  }
  func.func @transform_1(%arg0: i32) -> (i32, i32) {
    %c0_i32 = arith.constant 0 : i32
    %c0_i32_0 = arith.constant 0 : i32
    return %arg0, %c0_i32 : i32, i32
  }
  func.func @transform_2(%arg0: i32) -> (i32, i32) {
    %c0_i32 = arith.constant 0 : i32
    %c0_i32_0 = arith.constant 0 : i32
    %c0_i32_1 = arith.constant 0 : i32
    return %c0_i32, %c0_i32_0 : i32, i32
  }
  func.func @transform_3(%arg0: i32) -> (i32, i32) {
    %c0_i32 = arith.constant 0 : i32
    %c0_i32_0 = arith.constant 0 : i32
    %c0_i32_1 = arith.constant 0 : i32
    return %c0_i32, %c0_i32_0 : i32, i32
  }
  func.func @transform_4(%arg0: i32) -> (i32, i32) {
    %c0_i32 = arith.constant 0 : i32
    %c0_i32_0 = arith.constant 0 : i32
    return %arg0, %c0_i32 : i32, i32
  }
}

</mosaic_0001>

<bundles_post_ra>
// kernel: tpu_custom_call.1
= control target key start
LH: loop header
LB: loop body
LE: loop exit
PB: predicated region body
PF: predicated region fallthrough
CT: control target
= control target key end

     0   :  { %9 = vsyncpa [#allocation3], 0  ;;  %s7443_s0 = inlined_call_operand.hbm [shape: s32[8,256], index: 0, kind: input, shape index: {}]   ;;  %s7444_s1 = inlined_call_operand.hbm [shape: s32[8,256], index: 1, kind: input, shape index: {}]   ;;  %s7445_s2 = inlined_call_operand.hbm [shape: bf16[128,128], index: 2, kind: input, shape index: {}]   ;;  %s7446_s3 = inlined_call_operand.hbm [shape: bf16[128,128], index: 3, kind: input, shape index: {}]   ;;  %s7447_s4 = inlined_call_operand.hbm [shape: f32[8,256], index: 4, kind: output, shape index: {}]  }
   0x1   :  { %10 = vsyncpa [#allocation6], 0 }
   0x2   :  { %11 = vsyncpa [#allocation9], 0  ;;  %s29_s17 = sshll.u32 %s7444_s1, 4  ;;  %s30_s17 = int_to_ptr.hbm [resolvable:$true] %s29_s17 }
   0x3   :  { %12 = vsyncpa [#allocation4], 0  ;;  %s5566_s18 = smov [#allocation5]   ;;  %s18_s22 = sshll.u32 %s7443_s0, 4  ;;  %s19_s22 = int_to_ptr.hbm [resolvable:$true] %s18_s22 }
   0x4   :  { %s31_s19 = sshll.u32 %s5566_s18, 4  ;;  %s5567_s23 = smov [#allocation2]   ;;  %s32_s19 = int_to_ptr.vmem [resolvable:$true] %s31_s19 }
   0x5   :  { %34 = dma.hbm_to_vmem [thread:$0]  %s30_s17, 256, %s32_s19, [#allocation6]  }
   0x6   :  { %s20_s24 = sshll.u32 %s5567_s23, 4  ;;  %s39_s27 = sshll.u32 %s7445_s2, 4  ;;  %s21_s24 = int_to_ptr.vmem [resolvable:$true] %s20_s24  ;;  %s40_s27 = int_to_ptr.hbm [resolvable:$true] %s39_s27 }
   0x7   :  { %23 = dma.hbm_to_vmem [thread:$0]  %s19_s22, 256, %s21_s24, [#allocation3]  }
   0x8   :  { %s5568_s1 = smov [#allocation7]   ;;  %s52_s5 = sshll.u32 %s7446_s3, 4  ;;  %s53_s5 = int_to_ptr.hbm [resolvable:$true] %s52_s5 }
   0x9   :  { %s41_s28 = sshll.u32 %s5568_s1, 4  ;;  %s5569_s6 = smov 64   ;;  %s42_s28 = int_to_ptr.vmem [resolvable:$true] %s41_s28 }
   0xa   :  { %s5570_s0 = smov 4   ;;  %s5571_s7 = smov [#allocation8]  }
   0xb   :  { %47 = dma.hbm_to_vmem [thread:$0]  %s40_s27, 1024, %s42_s28, [#allocation6], %s5569_s6, %s5569_s6, %s5570_s0  }
   0xc   :  { %s54_s8 = sshll.u32 %s5571_s7, 4  ;;  %s55_s8 = int_to_ptr.vmem [resolvable:$true] %s54_s8 }
   0xd   :  { %60 = dma.hbm_to_vmem [thread:$0]  %s53_s5, 1024, %s55_s8, [#allocation9], %s5569_s6, %s5569_s6, %s5570_s0  }
   0xe   :  { %5558 = dma.done.wait [#allocation3], 256  }
   0xf   :  { %5559 = vsyncadd [#allocation3], 4294967040 }
  0x10   :  { %5560 = dma.done.wait [#allocation6], 1280  }
  0x11   :  { %5561 = vsyncadd [#allocation6], 4294966016 }
  0x12   :  { %5562 = dma.done.wait [#allocation9], 1024  }
  0x13   :  { %5563 = vsyncadd [#allocation9], 4294966272  ;;  %v109_v0 = vlaneseq  ;;  %v126_v6 = vld [vmem:[#allocation2] ss:$8 sm:$0x3]  ;;  %v5933_v34 = vld [vmem:[#allocation7 + $0x10] sm:$0xff] }
  0x14   :  { %v127_v7 = vld [vmem:[#allocation5] ss:$8 sm:$0x3]  ;;  %v5625_v8 = vperm.slane %v126_v6, 0  ;;  %v5627_v9 = vperm.slane %v126_v6, 1  ;;  %v5828_v29 = vld [vmem:[#allocation7] sm:$0xff] }
  0x15   :  { %v5611_v1 = vshrl.u32 %v109_v0, 7  ;;  %v5629_v10 = vperm.slane %v127_v7, 0  ;;  %v5631_v11 = vperm.slane %v127_v7, 1  ;;  %v5572_v12 = vmov 1.0|1.0   ;;  %v5841_v31 = vld [vmem:[#allocation8] sm:$0xff] }
  0x16   :  { %v725_v24 = vld [vmem:[#allocation5 + $0x1] ss:$8 sm:$0x3]  ;;  %v723_v25 = vld [vmem:[#allocation2 + $0x1] ss:$8 sm:$0x3] }
  0x17   :  { %v5614_v2 = vadd.s32 112, %v5611_v1  ;;  %v5617_v3 = vadd.s32 120, %v5611_v1  ;;  %v5620_v4 = vadd.s32 96, %v5611_v1  ;;  %v5623_v5 = vadd.s32 104, %v5611_v1  ;;  %v5904_v32 = vld [vmem:[#allocation7 + $0x8] sm:$0xff]  ;;  %v5935_v35 = vld [vmem:[#allocation8 + $0x10] sm:$0xff] }
  0x18   :  { %v5655_v13 = vadd.s32 80, %v5611_v1  ;;  %v5658_v14 = vadd.s32 88, %v5611_v1  ;;  %v5681_v15 = vadd.s32 64, %v5611_v1  ;;  %v5684_v16 = vadd.s32 72, %v5611_v1  ;;  %v5907_v33 = vld [vmem:[#allocation8 + $0x8] sm:$0xff]  ;;  %v5961_v36 = vld [vmem:[#allocation7 + $0x18] sm:$0xff] }
  0x19   :  { %vm158_vm0 = vcmp.eq.s32.totalorder %v5614_v2, %v5625_v8  ;;  %vm160_vm1 = vcmp.eq.s32.totalorder %v5617_v3, %v5625_v8  ;;  %vm159_vm2 = vcmp.eq.s32.totalorder %v5614_v2, %v5627_v9  ;;  %vm161_vm3 = vcmp.eq.s32.totalorder %v5617_v3, %v5627_v9  ;;  %v5963_v37 = vld [vmem:[#allocation8 + $0x18] sm:$0xff]  ;;  %v5989_v38 = vld [vmem:[#allocation7 + $0x20] sm:$0xff]  ;;  %v6017_v40 = vld [vmem:[#allocation7 + $0x28] sm:$0xff]  ;;  %s5573_s2 = smov [#allocation10]   ;;  %s4266_s11 = sshll.u32 %s7447_s4, 4  ;;  %s4267_s11 = int_to_ptr.hbm [resolvable:$true] %s4266_s11 }
  0x1a   :  { %vm4374_vm4 = vmpackc.low %vm160_vm1, %vm158_vm0  ;;  %vm272_vm5 = vcmp.eq.s32.totalorder %v5614_v2, %v5629_v10  ;;  %vm274_vm6 = vcmp.eq.s32.totalorder %v5617_v3, %v5629_v10  ;;  %vm273_vm7 = vcmp.eq.s32.totalorder %v5614_v2, %v5631_v11  ;;  %vm275_vm8 = vcmp.eq.s32.totalorder %v5617_v3, %v5631_v11  ;;  %v5991_v39 = vld [vmem:[#allocation8 + $0x20] sm:$0xff]  ;;  %v6019_v41 = vld [vmem:[#allocation8 + $0x28] sm:$0xff]  ;;  %s4264_s3 = sshll.u32 %s5573_s2, 4  ;;  %s4265_s3 = int_to_ptr.vmem [resolvable:$true] %s4264_s3 }
  0x1b   :  { %4375 = vmatpush.bf16.msk.msra.mxu0 %vm4374_vm4, %v5572_v12  ;;  %vm4390_vm9 = vmpackc.low %vm161_vm3, %vm159_vm2  ;;  %vm154_vm10 = vcmp.eq.s32.totalorder %v5620_v4, %v5625_v8  ;;  %vm156_vm11 = vcmp.eq.s32.totalorder %v5623_v5, %v5625_v8  ;;  %vm155_vm13 = vcmp.eq.s32.totalorder %v5620_v4, %v5627_v9  ;;  %vm157_vm14 = vcmp.eq.s32.totalorder %v5623_v5, %v5627_v9  ;;  %v6045_v42 = vld [vmem:[#allocation7 + $0x30] sm:$0xff]  ;;  %v1225_v47 = vld [vmem:[#allocation2 + $0x2] ss:$8 sm:$0x3] }
  0x1c   :  { %4391 = vmatpush.bf16.msk.msra.mxu1 %vm4390_vm9, %v5572_v12  ;;  %vm4438_vm12 = vmpackc.low %vm274_vm6, %vm272_vm5  ;;  %vm268_vm0 = vcmp.eq.s32.totalorder %v5620_v4, %v5629_v10  ;;  %vm270_vm1 = vcmp.eq.s32.totalorder %v5623_v5, %v5629_v10  ;;  %vm269_vm3 = vcmp.eq.s32.totalorder %v5620_v4, %v5631_v11  ;;  %vm271_vm4 = vcmp.eq.s32.totalorder %v5623_v5, %v5631_v11  ;;  %v6047_v43 = vld [vmem:[#allocation8 + $0x30] sm:$0xff]  ;;  %v6079_v50 = vld [vmem:[#allocation7 + $0x38] sm:$0xff] }
  0x1d   :  { %4439 = vmatpush.bf16.msk.msra.mxu2 %vm4438_vm12, %v5572_v12  ;;  %vm4454_vm15 = vmpackc.low %vm275_vm8, %vm273_vm7  ;;  %vm150_vm6 = vcmp.eq.s32.totalorder %v5655_v13, %v5625_v8  ;;  %vm152_vm7 = vcmp.eq.s32.totalorder %v5658_v14, %v5625_v8  ;;  %vm151_vm9 = vcmp.eq.s32.totalorder %v5655_v13, %v5627_v9  ;;  %vm264_vm12 = vcmp.eq.s32.totalorder %v5655_v13, %v5629_v10  ;;  %v1227_v44 = vld [vmem:[#allocation5 + $0x2] ss:$8 sm:$0x3] }
  0x1e   :  { %4455 = vmatpush.bf16.msk.msra.mxu3 %vm4454_vm15, %v5572_v12  ;;  %vm4376_vm2 = vmpackc.low %vm156_vm11, %vm154_vm10  ;;  %vm153_vm10 = vcmp.eq.s32.totalorder %v5658_v14, %v5627_v9  ;;  %vm265_vm15 = vcmp.eq.s32.totalorder %v5655_v13, %v5631_v11  ;;  %v5707_v17 = vadd.s32 48, %v5611_v1  ;;  %v5710_v18 = vadd.s32 56, %v5611_v1  ;;  %v6083_v51 = vld [vmem:[#allocation8 + $0x38] sm:$0xff] }
  0x1f   :  { %4377 = vmatpush.bf16.msk.msra.mxu0 %vm4376_vm2, %v5572_v12  ;;  %vm4392_vm5 = vmpackc.low %vm157_vm14, %vm155_vm13  ;;  %vm266_vm13 = vcmp.eq.s32.totalorder %v5658_v14, %v5629_v10  ;;  %vm146_vm2 = vcmp.eq.s32.totalorder %v5681_v15, %v5625_v8  ;;  %v5733_v19 = vadd.s32 32, %v5611_v1  ;;  %v5736_v20 = vadd.s32 40, %v5611_v1 }
  0x20   :  { %4393 = vmatpush.bf16.msk.msra.mxu1 %vm4392_vm5, %v5572_v12  ;;  %vm4440_vm8 = vmpackc.low %vm270_vm1, %vm268_vm0  ;;  %vm267_vm0 = vcmp.eq.s32.totalorder %v5658_v14, %v5631_v11  ;;  %vm147_vm5 = vcmp.eq.s32.totalorder %v5681_v15, %v5627_v9  ;;  %v5759_v21 = vadd.s32 16, %v5611_v1  ;;  %v5762_v22 = vadd.s32 24, %v5611_v1 }
  0x21   :  { %4441 = vmatpush.bf16.msk.msra.mxu2 %vm4440_vm8, %v5572_v12  ;;  %vm4456_vm11 = vmpackc.low %vm271_vm4, %vm269_vm3  ;;  %vm148_vm3 = vcmp.eq.s32.totalorder %v5684_v16, %v5625_v8  ;;  %vm260_vm8 = vcmp.eq.s32.totalorder %v5681_v15, %v5629_v10  ;;  %v5785_v23 = vadd.s32 8, %v5611_v1  ;;  %v5807_v26 = vperm.slane %v725_v24, 0 }
  0x22   :  { %4457 = vmatpush.bf16.msk.msra.mxu3 %vm4456_vm11, %v5572_v12  ;;  %vm4378_vm14 = vmpackc.low %vm152_vm7, %vm150_vm6  ;;  %vm149_vm6 = vcmp.eq.s32.totalorder %v5684_v16, %v5627_v9  ;;  %vm261_vm11 = vcmp.eq.s32.totalorder %v5681_v15, %v5631_v11  ;;  %v5814_v27 = vperm.slane %v725_v24, 1  ;;  %v5821_v28 = vperm.slane %v723_v25, 0 }
  0x23   :  { %4379 = vmatpush.bf16.msk.msra.mxu0 %vm4378_vm14, %v5572_v12  ;;  %vm4394_vm1 = vmpackc.low %vm153_vm10, %vm151_vm9  ;;  %vm262_vm9 = vcmp.eq.s32.totalorder %v5684_v16, %v5629_v10  ;;  %vm142_vm14 = vcmp.eq.s32.totalorder %v5707_v17, %v5625_v8  ;;  %v5830_v30 = vperm.slane %v723_v25, 1  ;;  %v6053_v45 = vperm.slane %v1227_v44, 0 }
  0x24   :  { %4395 = vmatpush.bf16.msk.msra.mxu1 %vm4394_vm1, %v5572_v12  ;;  %vm4442_vm4 = vmpackc.low %vm266_vm13, %vm264_vm12  ;;  %vm263_vm12 = vcmp.eq.s32.totalorder %v5684_v16, %v5631_v11  ;;  %vm143_vm1 = vcmp.eq.s32.totalorder %v5707_v17, %v5627_v9  ;;  %v6055_v46 = vperm.slane %v1227_v44, 1  ;;  %v6066_v48 = vperm.slane %v1225_v47, 0 }
  0x25   :  { %4443 = vmatpush.bf16.msk.msra.mxu2 %vm4442_vm4, %v5572_v12  ;;  %vm4458_vm7 = vmpackc.low %vm267_vm0, %vm265_vm15  ;;  %vm144_vm15 = vcmp.eq.s32.totalorder %v5710_v18, %v5625_v8  ;;  %vm256_vm4 = vcmp.eq.s32.totalorder %v5707_v17, %v5629_v10  ;;  %v6068_v49 = vperm.slane %v1225_v47, 1 }
  0x26   :  { %4459 = vmatpush.bf16.msk.msra.mxu3 %vm4458_vm7, %v5572_v12  ;;  %vm4380_vm10 = vmpackc.low %vm148_vm3, %vm146_vm2  ;;  %vm145_vm2 = vcmp.eq.s32.totalorder %v5710_v18, %v5627_v9  ;;  %vm257_vm7 = vcmp.eq.s32.totalorder %v5707_v17, %v5631_v11 }
  0x27   :  { %4381 = vmatpush.bf16.msk.msra.mxu0 %vm4380_vm10, %v5572_v12  ;;  %vm4396_vm13 = vmpackc.low %vm149_vm6, %vm147_vm5  ;;  %vm258_vm5 = vcmp.eq.s32.totalorder %v5710_v18, %v5629_v10  ;;  %vm138_vm10 = vcmp.eq.s32.totalorder %v5733_v19, %v5625_v8 }
  0x28   :  { %4397 = vmatpush.bf16.msk.msra.mxu1 %vm4396_vm13, %v5572_v12  ;;  %vm4444_vm0 = vmpackc.low %vm262_vm9, %vm260_vm8  ;;  %vm259_vm8 = vcmp.eq.s32.totalorder %v5710_v18, %v5631_v11  ;;  %vm139_vm13 = vcmp.eq.s32.totalorder %v5733_v19, %v5627_v9 }
  0x29   :  { %4445 = vmatpush.bf16.msk.msra.mxu2 %vm4444_vm0, %v5572_v12  ;;  %vm4460_vm3 = vmpackc.low %vm263_vm12, %vm261_vm11  ;;  %vm140_vm11 = vcmp.eq.s32.totalorder %v5736_v20, %v5625_v8  ;;  %vm252_vm0 = vcmp.eq.s32.totalorder %v5733_v19, %v5629_v10 }
  0x2a   :  { %4461 = vmatpush.bf16.msk.msra.mxu3 %vm4460_vm3, %v5572_v12  ;;  %vm4382_vm6 = vmpackc.low %vm144_vm15, %vm142_vm14  ;;  %vm141_vm14 = vcmp.eq.s32.totalorder %v5736_v20, %v5627_v9  ;;  %vm253_vm3 = vcmp.eq.s32.totalorder %v5733_v19, %v5631_v11 }
  0x2b   :  { %4383 = vmatpush.bf16.msk.msra.mxu0 %vm4382_vm6, %v5572_v12  ;;  %vm4398_vm9 = vmpackc.low %vm145_vm2, %vm143_vm1  ;;  %vm254_vm1 = vcmp.eq.s32.totalorder %v5736_v20, %v5629_v10  ;;  %vm134_vm6 = vcmp.eq.s32.totalorder %v5759_v21, %v5625_v8 }
  0x2c   :  { %4399 = vmatpush.bf16.msk.msra.mxu1 %vm4398_vm9, %v5572_v12  ;;  %vm4446_vm12 = vmpackc.low %vm258_vm5, %vm256_vm4  ;;  %vm255_vm4 = vcmp.eq.s32.totalorder %v5736_v20, %v5631_v11  ;;  %vm135_vm9 = vcmp.eq.s32.totalorder %v5759_v21, %v5627_v9 }
  0x2d   :  { %4447 = vmatpush.bf16.msk.msra.mxu2 %vm4446_vm12, %v5572_v12  ;;  %vm4462_vm15 = vmpackc.low %vm259_vm8, %vm257_vm7  ;;  %vm136_vm7 = vcmp.eq.s32.totalorder %v5762_v22, %v5625_v8  ;;  %vm248_vm12 = vcmp.eq.s32.totalorder %v5759_v21, %v5629_v10 }
  0x2e   :  { %4463 = vmatpush.bf16.msk.msra.mxu3 %vm4462_vm15, %v5572_v12  ;;  %vm4384_vm2 = vmpackc.low %vm140_vm11, %vm138_vm10  ;;  %vm137_vm10 = vcmp.eq.s32.totalorder %v5762_v22, %v5627_v9  ;;  %vm249_vm15 = vcmp.eq.s32.totalorder %v5759_v21, %v5631_v11 }
  0x2f   :  { %4385 = vmatpush.bf16.msk.msra.mxu0 %vm4384_vm2, %v5572_v12  ;;  %vm4400_vm5 = vmpackc.low %vm141_vm14, %vm139_vm13  ;;  %vm250_vm13 = vcmp.eq.s32.totalorder %v5762_v22, %v5629_v10  ;;  %vm130_vm2 = vcmp.eq.s32.totalorder %v5611_v1, %v5625_v8 }
  0x30   :  { %4401 = vmatpush.bf16.msk.msra.mxu1 %vm4400_vm5, %v5572_v12  ;;  %vm4448_vm8 = vmpackc.low %vm254_vm1, %vm252_vm0  ;;  %vm251_vm0 = vcmp.eq.s32.totalorder %v5762_v22, %v5631_v11  ;;  %vm131_vm5 = vcmp.eq.s32.totalorder %v5611_v1, %v5627_v9 }
  0x31   :  { %4449 = vmatpush.bf16.msk.msra.mxu2 %vm4448_vm8, %v5572_v12  ;;  %vm4464_vm11 = vmpackc.low %vm255_vm4, %vm253_vm3  ;;  %vm132_vm3 = vcmp.eq.s32.totalorder %v5785_v23, %v5625_v8  ;;  %vm244_vm8 = vcmp.eq.s32.totalorder %v5611_v1, %v5629_v10 }
  0x32   :  { %4465 = vmatpush.bf16.msk.msra.mxu3 %vm4464_vm11, %v5572_v12  ;;  %vm4386_vm14 = vmpackc.low %vm136_vm7, %vm134_vm6  ;;  %vm133_vm6 = vcmp.eq.s32.totalorder %v5785_v23, %v5627_v9  ;;  %vm245_vm11 = vcmp.eq.s32.totalorder %v5611_v1, %v5631_v11 }
  0x33   :  { %4387 = vmatpush.bf16.msk.msra.mxu0 %vm4386_vm14, %v5572_v12  ;;  %vm4402_vm1 = vmpackc.low %vm137_vm10, %vm135_vm9  ;;  %vm246_vm9 = vcmp.eq.s32.totalorder %v5785_v23, %v5629_v10  ;;  %vm870_vm14 = vcmp.eq.s32.totalorder %v5614_v2, %v5807_v26 }
  0x34   :  { %4403 = vmatpush.bf16.msk.msra.mxu1 %vm4402_vm1, %v5572_v12  ;;  %vm4450_vm4 = vmpackc.low %vm250_vm13, %vm248_vm12  ;;  %vm247_vm12 = vcmp.eq.s32.totalorder %v5785_v23, %v5631_v11  ;;  %vm871_vm1 = vcmp.eq.s32.totalorder %v5614_v2, %v5814_v27 }
  0x35   :  { %4451 = vmatpush.bf16.msk.msra.mxu2 %vm4450_vm4, %v5572_v12  ;;  %vm4466_vm7 = vmpackc.low %vm251_vm0, %vm249_vm15  ;;  %vm872_vm15 = vcmp.eq.s32.totalorder %v5617_v3, %v5807_v26  ;;  %vm756_vm4 = vcmp.eq.s32.totalorder %v5614_v2, %v5821_v28 }
  0x36   :  { %4467 = vmatpush.bf16.msk.msra.mxu3 %vm4466_vm7, %v5572_v12  ;;  %vm4388_vm10 = vmpackc.low %vm132_vm3, %vm130_vm2  ;;  %vm873_vm2 = vcmp.eq.s32.totalorder %v5617_v3, %v5814_v27  ;;  %vm757_vm7 = vcmp.eq.s32.totalorder %v5614_v2, %v5830_v30 }
  0x37   :  { %4389 = vmatpush.bf16.msk.msra.mxu0 %vm4388_vm10, %v5572_v12  ;;  %vm4404_vm13 = vmpackc.low %vm133_vm6, %vm131_vm5  ;;  %vm758_vm5 = vcmp.eq.s32.totalorder %v5617_v3, %v5821_v28  ;;  %vm866_vm10 = vcmp.eq.s32.totalorder %v5620_v4, %v5807_v26 }
  0x38   :  { %4405 = vmatpush.bf16.msk.msra.mxu1 %vm4404_vm13, %v5572_v12  ;;  %vm4452_vm0 = vmpackc.low %vm246_vm9, %vm244_vm8  ;;  %vm759_vm8 = vcmp.eq.s32.totalorder %v5617_v3, %v5830_v30  ;;  %vm867_vm13 = vcmp.eq.s32.totalorder %v5620_v4, %v5814_v27 }
  0x39   :  { %4453 = vmatpush.bf16.msk.msra.mxu2 %vm4452_vm0, %v5572_v12  ;;  %vm4468_vm3 = vmpackc.low %vm247_vm12, %vm245_vm11  ;;  %vm868_vm11 = vcmp.eq.s32.totalorder %v5623_v5, %v5807_v26  ;;  %vm752_vm0 = vcmp.eq.s32.totalorder %v5620_v4, %v5821_v28 }
  0x3a   :  { %4469 = vmatpush.bf16.msk.msra.mxu3 %vm4468_vm3, %v5572_v12  ;;  %412 = vmatmul.bf16.vlgmr.msra.gmra.mxu0 %v5828_v29  ;;  %vm4566_vm6 = vmpackc.low %vm872_vm15, %vm870_vm14  ;;  %vm869_vm14 = vcmp.eq.s32.totalorder %v5623_v5, %v5814_v27  ;;  %vm753_vm3 = vcmp.eq.s32.totalorder %v5620_v4, %v5830_v30 }
  0x3b   :  { %461 = vmatmul.bf16.vlgmr.msra.gmra.mxu1 %v5828_v29  ;;  %vm4582_vm9 = vmpackc.low %vm873_vm2, %vm871_vm1  ;;  %vm754_vm1 = vcmp.eq.s32.totalorder %v5623_v5, %v5821_v28 }
  0x3c   :  { %558 = vmatmul.bf16.vlgmr.msra.gmra.mxu2 %v5841_v31  ;;  %vm4534_vm12 = vmpackc.low %vm758_vm5, %vm756_vm4  ;;  %vm755_vm4 = vcmp.eq.s32.totalorder %v5623_v5, %v5830_v30 }
  0x3d   :  { %4567 = vmatpush.bf16.msk.msrb.mxu2 %vm4566_vm6, %v5572_v12  ;;  %607 = vmatmul.bf16.vlgmr.msra.gmra.mxu3 %v5841_v31  ;;  %vm4550_vm15 = vmpackc.low %vm759_vm8, %vm757_vm7  ;;  %vm862_vm6 = vcmp.eq.s32.totalorder %v5655_v13, %v5807_v26  ;;  %vm864_vm7 = vcmp.eq.s32.totalorder %v5658_v14, %v5807_v26 }
  0x3e   :  { %4583 = vmatpush.bf16.msk.msrb.mxu3 %vm4582_vm9, %v5572_v12  ;;  %4535 = vmatpush.bf16.msk.msrb.mxu0 %vm4534_vm12, %v5572_v12  ;;  %vm4568_vm2 = vmpackc.low %vm868_vm11, %vm866_vm10  ;;  %vm863_vm9 = vcmp.eq.s32.totalorder %v5655_v13, %v5814_v27  ;;  %vm865_vm10 = vcmp.eq.s32.totalorder %v5658_v14, %v5814_v27  ;;  %vm748_vm12 = vcmp.eq.s32.totalorder %v5655_v13, %v5821_v28 }
  0x3f   :  { %4551 = vmatpush.bf16.msk.msrb.mxu1 %vm4550_vm15, %v5572_v12  ;;  %vm4584_vm5 = vmpackc.low %vm869_vm14, %vm867_vm13  ;;  %vm750_vm13 = vcmp.eq.s32.totalorder %v5658_v14, %v5821_v28  ;;  %vm749_vm15 = vcmp.eq.s32.totalorder %v5655_v13, %v5830_v30 }
  0x40   :  { %vm4536_vm8 = vmpackc.low %vm754_vm1, %vm752_vm0  ;;  %vm751_vm0 = vcmp.eq.s32.totalorder %v5658_v14, %v5830_v30 }
  0x41   :  { %4569 = vmatpush.bf16.msk.msrb.mxu2 %vm4568_vm2, %v5572_v12  ;;  %vm4552_vm11 = vmpackc.low %vm755_vm4, %vm753_vm3  ;;  %vm858_vm4 = vcmp.eq.s32.totalorder %v5681_v15, %v5807_v26 }
  0x42   :  { %4585 = vmatpush.bf16.msk.msrb.mxu3 %vm4584_vm5, %v5572_v12  ;;  %4537 = vmatpush.bf16.msk.msrb.mxu0 %vm4536_vm8, %v5572_v12  ;;  %vm4570_vm14 = vmpackc.low %vm864_vm7, %vm862_vm6  ;;  %vm860_vm5 = vcmp.eq.s32.totalorder %v5684_v16, %v5807_v26  ;;  %vm859_vm6 = vcmp.eq.s32.totalorder %v5681_v15, %v5814_v27  ;;  %vm861_vm7 = vcmp.eq.s32.totalorder %v5684_v16, %v5814_v27 }
  0x43   :  { %4553 = vmatpush.bf16.msk.msrb.mxu1 %vm4552_vm11, %v5572_v12  ;;  %vm4586_vm1 = vmpackc.low %vm865_vm10, %vm863_vm9  ;;  %vm744_vm9 = vcmp.eq.s32.totalorder %v5681_v15, %v5821_v28  ;;  %vm746_vm10 = vcmp.eq.s32.totalorder %v5684_v16, %v5821_v28  ;;  %vm745_vm11 = vcmp.eq.s32.totalorder %v5681_v15, %v5830_v30 }
  0x44   :  { %vm4538_vm2 = vmpackc.low %vm750_vm13, %vm748_vm12  ;;  %vm747_vm12 = vcmp.eq.s32.totalorder %v5684_v16, %v5830_v30 }
  0x45   :  { %4571 = vmatpush.bf16.msk.msrb.mxu2 %vm4570_vm14, %v5572_v12  ;;  %vm4554_vm3 = vmpackc.low %vm751_vm0, %vm749_vm15  ;;  %vm854_vm0 = vcmp.eq.s32.totalorder %v5707_v17, %v5807_v26 }
  0x46   :  { %4587 = vmatpush.bf16.msk.msrb.mxu3 %vm4586_vm1, %v5572_v12  ;;  %4539 = vmatpush.bf16.msk.msrb.mxu0 %vm4538_vm2, %v5572_v12  ;;  %vm4572_vm8 = vmpackc.low %vm860_vm5, %vm858_vm4  ;;  %vm856_vm1 = vcmp.eq.s32.totalorder %v5710_v18, %v5807_v26  ;;  %vm855_vm2 = vcmp.eq.s32.totalorder %v5707_v17, %v5814_v27  ;;  %vm740_vm5 = vcmp.eq.s32.totalorder %v5707_v17, %v5821_v28 }
  0x47   :  { %4555 = vmatpush.bf16.msk.msrb.mxu1 %vm4554_vm3, %v5572_v12  ;;  %vm4588_vm13 = vmpackc.low %vm861_vm7, %vm859_vm6  ;;  %vm857_vm3 = vcmp.eq.s32.totalorder %v5710_v18, %v5814_v27  ;;  %vm742_vm6 = vcmp.eq.s32.totalorder %v5710_v18, %v5821_v28  ;;  %vm741_vm7 = vcmp.eq.s32.totalorder %v5707_v17, %v5830_v30 }
  0x48   :  { %vm4540_vm14 = vmpackc.low %vm746_vm10, %vm744_vm9 }
  0x49   :  { %4573 = vmatpush.bf16.msk.msrb.mxu2 %vm4572_vm8, %v5572_v12  ;;  %vm4556_vm15 = vmpackc.low %vm747_vm12, %vm745_vm11  ;;  %vm743_vm8 = vcmp.eq.s32.totalorder %v5710_v18, %v5830_v30  ;;  %vm850_vm12 = vcmp.eq.s32.totalorder %v5733_v19, %v5807_v26 }
  0x4a   :  { %417 = vmatmul.bf16.gmra.mxu0 %v5904_v32  ;;  %4589 = vmatpush.bf16.msk.msrb.mxu3 %vm4588_vm13, %v5572_v12  ;;  %vm4574_vm4 = vmpackc.low %vm856_vm1, %vm854_vm0  ;;  %vm852_vm13 = vcmp.eq.s32.totalorder %v5736_v20, %v5807_v26  ;;  %vm736_vm1 = vcmp.eq.s32.totalorder %v5733_v19, %v5821_v28 }
  0x4b   :  { %466 = vmatmul.bf16.gmra.mxu1 %v5904_v32  ;;  %4541 = vmatpush.bf16.msk.msrb.mxu0 %vm4540_vm14, %v5572_v12  ;;  %vm4590_vm9 = vmpackc.low %vm857_vm3, %vm855_vm2  ;;  %vm851_vm14 = vcmp.eq.s32.totalorder %v5733_v19, %v5814_v27  ;;  %vm738_vm2 = vcmp.eq.s32.totalorder %v5736_v20, %v5821_v28  ;;  %vm737_vm3 = vcmp.eq.s32.totalorder %v5733_v19, %v5830_v30 }
  0x4c   :  { %563 = vmatmul.bf16.gmra.mxu2 %v5907_v33  ;;  %4557 = vmatpush.bf16.msk.msrb.mxu1 %vm4556_vm15, %v5572_v12  ;;  %vm4542_vm10 = vmpackc.low %vm742_vm6, %vm740_vm5  ;;  %vm853_vm15 = vcmp.eq.s32.totalorder %v5736_v20, %v5814_v27 }
  0x4d   :  { %612 = vmatmul.bf16.gmra.mxu3 %v5907_v33  ;;  %4575 = vmatpush.bf16.msk.msrb.mxu2 %vm4574_vm4, %v5572_v12  ;;  %vm4558_vm11 = vmpackc.low %vm743_vm8, %vm741_vm7  ;;  %vm739_vm4 = vcmp.eq.s32.totalorder %v5736_v20, %v5830_v30  ;;  %vm846_vm8 = vcmp.eq.s32.totalorder %v5759_v21, %v5807_v26 }
  0x4e   :  { %4591 = vmatpush.bf16.msk.msrb.mxu3 %vm4590_vm9, %v5572_v12  ;;  %vm4576_vm0 = vmpackc.low %vm852_vm13, %vm850_vm12  ;;  %vm848_vm9 = vcmp.eq.s32.totalorder %v5762_v22, %v5807_v26  ;;  %vm732_vm13 = vcmp.eq.s32.totalorder %v5759_v21, %v5821_v28 }
  0x4f   :  { %4543 = vmatpush.bf16.msk.msrb.mxu0 %vm4542_vm10, %v5572_v12  ;;  %vm4592_vm5 = vmpackc.low %vm853_vm15, %vm851_vm14  ;;  %vm847_vm10 = vcmp.eq.s32.totalorder %v5759_v21, %v5814_v27  ;;  %vm734_vm14 = vcmp.eq.s32.totalorder %v5762_v22, %v5821_v28  ;;  %vm733_vm15 = vcmp.eq.s32.totalorder %v5759_v21, %v5830_v30 }
  0x50   :  { %4559 = vmatpush.bf16.msk.msrb.mxu1 %vm4558_vm11, %v5572_v12  ;;  %vm4544_vm6 = vmpackc.low %vm738_vm2, %vm736_vm1  ;;  %vm849_vm11 = vcmp.eq.s32.totalorder %v5762_v22, %v5814_v27 }
  0x51   :  { %4577 = vmatpush.bf16.msk.msrb.mxu2 %vm4576_vm0, %v5572_v12  ;;  %vm4560_vm7 = vmpackc.low %vm739_vm4, %vm737_vm3  ;;  %vm735_vm0 = vcmp.eq.s32.totalorder %v5762_v22, %v5830_v30  ;;  %vm842_vm4 = vcmp.eq.s32.totalorder %v5611_v1, %v5807_v26 }
  0x52   :  { %4593 = vmatpush.bf16.msk.msrb.mxu3 %vm4592_vm5, %v5572_v12  ;;  %vm4578_vm12 = vmpackc.low %vm848_vm9, %vm846_vm8  ;;  %vm844_vm5 = vcmp.eq.s32.totalorder %v5785_v23, %v5807_v26  ;;  %vm728_vm9 = vcmp.eq.s32.totalorder %v5611_v1, %v5821_v28 }
  0x53   :  { %4545 = vmatpush.bf16.msk.msrb.mxu0 %vm4544_vm6, %v5572_v12  ;;  %vm4594_vm1 = vmpackc.low %vm849_vm11, %vm847_vm10  ;;  %vm843_vm6 = vcmp.eq.s32.totalorder %v5611_v1, %v5814_v27  ;;  %vm730_vm10 = vcmp.eq.s32.totalorder %v5785_v23, %v5821_v28  ;;  %vm729_vm11 = vcmp.eq.s32.totalorder %v5611_v1, %v5830_v30 }
  0x54   :  { %4561 = vmatpush.bf16.msk.msrb.mxu1 %vm4560_vm7, %v5572_v12  ;;  %vm4546_vm2 = vmpackc.low %vm734_vm14, %vm732_vm13  ;;  %vm845_vm7 = vcmp.eq.s32.totalorder %v5785_v23, %v5814_v27 }
  0x55   :  { %4579 = vmatpush.bf16.msk.msrb.mxu2 %vm4578_vm12, %v5572_v12  ;;  %vm4562_vm3 = vmpackc.low %vm735_vm0, %vm733_vm15  ;;  %vm731_vm12 = vcmp.eq.s32.totalorder %v5785_v23, %v5830_v30  ;;  %vm1372_vm0 = vcmp.eq.s32.totalorder %v5614_v2, %v6053_v45 }
  0x56   :  { %4595 = vmatpush.bf16.msk.msrb.mxu3 %vm4594_vm1, %v5572_v12  ;;  %vm4580_vm8 = vmpackc.low %vm844_vm5, %vm842_vm4  ;;  %vm1374_vm1 = vcmp.eq.s32.totalorder %v5617_v3, %v6053_v45 }
  0x57   :  { %4547 = vmatpush.bf16.msk.msrb.mxu0 %vm4546_vm2, %v5572_v12  ;;  %vm4596_vm13 = vmpackc.low %vm845_vm7, %vm843_vm6  ;;  %vm1373_vm2 = vcmp.eq.s32.totalorder %v5614_v2, %v6055_v46  ;;  %vm1258_vm6 = vcmp.eq.s32.totalorder %v5614_v2, %v6066_v48  ;;  %vm1260_vm7 = vcmp.eq.s32.totalorder %v5617_v3, %v6066_v48 }
  0x58   :  { %4563 = vmatpush.bf16.msk.msrb.mxu1 %vm4562_vm3, %v5572_v12  ;;  %vm4548_vm14 = vmpackc.low %vm730_vm10, %vm728_vm9  ;;  %vm1375_vm3 = vcmp.eq.s32.totalorder %v5617_v3, %v6055_v46  ;;  %vm1261_vm9 = vcmp.eq.s32.totalorder %v5617_v3, %v6068_v49 }
  0x59   :  { %4581 = vmatpush.bf16.msk.msrb.mxu2 %vm4580_vm8, %v5572_v12  ;;  %vm4564_vm15 = vmpackc.low %vm731_vm12, %vm729_vm11  ;;  %vm1259_vm8 = vcmp.eq.s32.totalorder %v5614_v2, %v6068_v49  ;;  %vm1368_vm12 = vcmp.eq.s32.totalorder %v5620_v4, %v6053_v45 }
  0x5a   :  { %422 = vmatmul.bf16.gmra.mxu0 %v5933_v34  ;;  %4597 = vmatpush.bf16.msk.msrb.mxu3 %vm4596_vm13, %v5572_v12  ;;  %vm4694_vm4 = vmpackc.low %vm1374_vm1, %vm1372_vm0  ;;  %vm1370_vm13 = vcmp.eq.s32.totalorder %v5623_v5, %v6053_v45 }
  0x5b   :  { %471 = vmatmul.bf16.gmra.mxu1 %v5933_v34  ;;  %4549 = vmatpush.bf16.msk.msrb.mxu0 %vm4548_vm14, %v5572_v12  ;;  %vm4710_vm5 = vmpackc.low %vm1375_vm3, %vm1373_vm2  ;;  %vm1369_vm14 = vcmp.eq.s32.totalorder %v5620_v4, %v6055_v46  ;;  %vm1254_vm2 = vcmp.eq.s32.totalorder %v5620_v4, %v6066_v48  ;;  %vm1256_vm3 = vcmp.eq.s32.totalorder %v5623_v5, %v6066_v48 }
  0x5c   :  { %568 = vmatmul.bf16.gmra.mxu2 %v5935_v35  ;;  %4565 = vmatpush.bf16.msk.msrb.mxu1 %vm4564_vm15, %v5572_v12  ;;  %vm4662_vm10 = vmpackc.low %vm1260_vm7, %vm1258_vm6  ;;  %vm1371_vm15 = vcmp.eq.s32.totalorder %v5623_v5, %v6055_v46 }
  0x5d   :  { %617 = vmatmul.bf16.gmra.mxu3 %v5935_v35  ;;  %4695 = vmatpush.bf16.msk.msra.mxu2 %vm4694_vm4, %v5572_v12  ;;  %vm4678_vm11 = vmpackc.low %vm1261_vm9, %vm1259_vm8  ;;  %vm1255_vm4 = vcmp.eq.s32.totalorder %v5620_v4, %v6068_v49  ;;  %vm1364_vm8 = vcmp.eq.s32.totalorder %v5655_v13, %v6053_v45  ;;  %vm1366_vm9 = vcmp.eq.s32.totalorder %v5658_v14, %v6053_v45 }
  0x5e   :  { %4711 = vmatpush.bf16.msk.msra.mxu3 %vm4710_vm5, %v5572_v12  ;;  %vm4696_vm0 = vmpackc.low %vm1370_vm13, %vm1368_vm12  ;;  %vm1257_vm5 = vcmp.eq.s32.totalorder %v5623_v5, %v6068_v49 }
  0x5f   :  { %4663 = vmatpush.bf16.msk.msra.mxu0 %vm4662_vm10, %v5572_v12  ;;  %vm4712_vm1 = vmpackc.low %vm1371_vm15, %vm1369_vm14  ;;  %vm1365_vm10 = vcmp.eq.s32.totalorder %v5655_v13, %v6055_v46  ;;  %vm1250_vm14 = vcmp.eq.s32.totalorder %v5655_v13, %v6066_v48  ;;  %vm1252_vm15 = vcmp.eq.s32.totalorder %v5658_v14, %v6066_v48 }
  0x60   :  { %4679 = vmatpush.bf16.msk.msra.mxu1 %vm4678_vm11, %v5572_v12  ;;  %vm4664_vm6 = vmpackc.low %vm1256_vm3, %vm1254_vm2  ;;  %vm1367_vm11 = vcmp.eq.s32.totalorder %v5658_v14, %v6055_v46 }
  0x61   :  { %4697 = vmatpush.bf16.msk.msra.mxu2 %vm4696_vm0, %v5572_v12  ;;  %vm4680_vm7 = vmpackc.low %vm1257_vm5, %vm1255_vm4  ;;  %vm1251_vm0 = vcmp.eq.s32.totalorder %v5655_v13, %v6068_v49  ;;  %vm1360_vm4 = vcmp.eq.s32.totalorder %v5681_v15, %v6053_v45  ;;  %vm1362_vm5 = vcmp.eq.s32.totalorder %v5684_v16, %v6053_v45 }
  0x62   :  { %4713 = vmatpush.bf16.msk.msra.mxu3 %vm4712_vm1, %v5572_v12  ;;  %vm4698_vm12 = vmpackc.low %vm1366_vm9, %vm1364_vm8  ;;  %vm1253_vm1 = vcmp.eq.s32.totalorder %v5658_v14, %v6068_v49 }
  0x63   :  { %4665 = vmatpush.bf16.msk.msra.mxu0 %vm4664_vm6, %v5572_v12  ;;  %vm4714_vm13 = vmpackc.low %vm1367_vm11, %vm1365_vm10  ;;  %vm1361_vm6 = vcmp.eq.s32.totalorder %v5681_v15, %v6055_v46  ;;  %vm1246_vm10 = vcmp.eq.s32.totalorder %v5681_v15, %v6066_v48  ;;  %vm1248_vm11 = vcmp.eq.s32.totalorder %v5684_v16, %v6066_v48 }
  0x64   :  { %4681 = vmatpush.bf16.msk.msra.mxu1 %vm4680_vm7, %v5572_v12  ;;  %vm4666_vm2 = vmpackc.low %vm1252_vm15, %vm1250_vm14  ;;  %vm1363_vm7 = vcmp.eq.s32.totalorder %v5684_v16, %v6055_v46  ;;  %vm1249_vm14 = vcmp.eq.s32.totalorder %v5684_v16, %v6068_v49 }
  0x65   :  { %4699 = vmatpush.bf16.msk.msra.mxu2 %vm4698_vm12, %v5572_v12  ;;  %vm4682_vm3 = vmpackc.low %vm1253_vm1, %vm1251_vm0  ;;  %vm1247_vm12 = vcmp.eq.s32.totalorder %v5681_v15, %v6068_v49  ;;  %vm1356_vm0 = vcmp.eq.s32.totalorder %v5707_v17, %v6053_v45  ;;  %vm1358_vm1 = vcmp.eq.s32.totalorder %v5710_v18, %v6053_v45 }
  0x66   :  { %4715 = vmatpush.bf16.msk.msra.mxu3 %vm4714_vm13, %v5572_v12  ;;  %vm4700_vm8 = vmpackc.low %vm1362_vm5, %vm1360_vm4 }
  0x67   :  { %4667 = vmatpush.bf16.msk.msra.mxu0 %vm4666_vm2, %v5572_v12  ;;  %vm4716_vm9 = vmpackc.low %vm1363_vm7, %vm1361_vm6  ;;  %vm1357_vm2 = vcmp.eq.s32.totalorder %v5707_v17, %v6055_v46  ;;  %vm1242_vm6 = vcmp.eq.s32.totalorder %v5707_v17, %v6066_v48  ;;  %vm1244_vm7 = vcmp.eq.s32.totalorder %v5710_v18, %v6066_v48 }
  0x68   :  { %4683 = vmatpush.bf16.msk.msra.mxu1 %vm4682_vm3, %v5572_v12  ;;  %vm4668_vm13 = vmpackc.low %vm1248_vm11, %vm1246_vm10  ;;  %vm1359_vm3 = vcmp.eq.s32.totalorder %v5710_v18, %v6055_v46  ;;  %vm1245_vm10 = vcmp.eq.s32.totalorder %v5710_v18, %v6068_v49 }
  0x69   :  { %4701 = vmatpush.bf16.msk.msra.mxu2 %vm4700_vm8, %v5572_v12  ;;  %vm4684_vm15 = vmpackc.low %vm1249_vm14, %vm1247_vm12  ;;  %vm1243_vm8 = vcmp.eq.s32.totalorder %v5707_v17, %v6068_v49  ;;  %vm1352_vm12 = vcmp.eq.s32.totalorder %v5733_v19, %v6053_v45  ;;  %vm1353_vm14 = vcmp.eq.s32.totalorder %v5733_v19, %v6055_v46 }
  0x6a   :  { %427 = vmatmul.bf16.gmra.mxu0 %v5961_v36  ;;  %4717 = vmatpush.bf16.msk.msra.mxu3 %vm4716_vm9, %v5572_v12  ;;  %vm4702_vm4 = vmpackc.low %vm1358_vm1, %vm1356_vm0 }
  0x6b   :  { %476 = vmatmul.bf16.gmra.mxu1 %v5961_v36  ;;  %4669 = vmatpush.bf16.msk.msra.mxu0 %vm4668_vm13, %v5572_v12  ;;  %vm4718_vm5 = vmpackc.low %vm1359_vm3, %vm1357_vm2  ;;  %vm1354_vm13 = vcmp.eq.s32.totalorder %v5736_v20, %v6053_v45  ;;  %vm1238_vm2 = vcmp.eq.s32.totalorder %v5733_v19, %v6066_v48  ;;  %vm1240_vm3 = vcmp.eq.s32.totalorder %v5736_v20, %v6066_v48 }
  0x6c   :  { %573 = vmatmul.bf16.gmra.mxu2 %v5963_v37  ;;  %4685 = vmatpush.bf16.msk.msra.mxu1 %vm4684_vm15, %v5572_v12  ;;  %vm4670_vm9 = vmpackc.low %vm1244_vm7, %vm1242_vm6  ;;  %vm1355_vm15 = vcmp.eq.s32.totalorder %v5736_v20, %v6055_v46  ;;  %vm1241_vm6 = vcmp.eq.s32.totalorder %v5736_v20, %v6068_v49 }
  0x6d   :  { %622 = vmatmul.bf16.gmra.mxu3 %v5963_v37  ;;  %4703 = vmatpush.bf16.msk.msra.mxu2 %vm4702_vm4, %v5572_v12  ;;  %vm4686_vm11 = vmpackc.low %vm1245_vm10, %vm1243_vm8  ;;  %vm1239_vm4 = vcmp.eq.s32.totalorder %v5733_v19, %v6068_v49  ;;  %vm1348_vm8 = vcmp.eq.s32.totalorder %v5759_v21, %v6053_v45  ;;  %vm1349_vm10 = vcmp.eq.s32.totalorder %v5759_v21, %v6055_v46 }
  0x6e   :  { %4719 = vmatpush.bf16.msk.msra.mxu3 %vm4718_vm5, %v5572_v12  ;;  %vm4704_vm0 = vmpackc.low %vm1354_vm13, %vm1352_vm12 }
  0x6f   :  { %4671 = vmatpush.bf16.msk.msra.mxu0 %vm4670_vm9, %v5572_v12  ;;  %vm4720_vm1 = vmpackc.low %vm1355_vm15, %vm1353_vm14  ;;  %vm1350_vm9 = vcmp.eq.s32.totalorder %v5762_v22, %v6053_v45  ;;  %vm1234_vm14 = vcmp.eq.s32.totalorder %v5759_v21, %v6066_v48  ;;  %vm1236_vm15 = vcmp.eq.s32.totalorder %v5762_v22, %v6066_v48 }
  0x70   :  { %4687 = vmatpush.bf16.msk.msra.mxu1 %vm4686_vm11, %v5572_v12  ;;  %vm4672_vm5 = vmpackc.low %vm1240_vm3, %vm1238_vm2  ;;  %vm1351_vm11 = vcmp.eq.s32.totalorder %v5762_v22, %v6055_v46  ;;  %vm1237_vm2 = vcmp.eq.s32.totalorder %v5762_v22, %v6068_v49 }
  0x71   :  { %4705 = vmatpush.bf16.msk.msra.mxu2 %vm4704_vm0, %v5572_v12  ;;  %vm4688_vm7 = vmpackc.low %vm1241_vm6, %vm1239_vm4  ;;  %vm1235_vm0 = vcmp.eq.s32.totalorder %v5759_v21, %v6068_v49  ;;  %vm1344_vm4 = vcmp.eq.s32.totalorder %v5611_v1, %v6053_v45  ;;  %vm1345_vm6 = vcmp.eq.s32.totalorder %v5611_v1, %v6055_v46 }
  0x72   :  { %4721 = vmatpush.bf16.msk.msra.mxu3 %vm4720_vm1, %v5572_v12  ;;  %vm4706_vm12 = vmpackc.low %vm1350_vm9, %vm1348_vm8 }
  0x73   :  { %4673 = vmatpush.bf16.msk.msra.mxu0 %vm4672_vm5, %v5572_v12  ;;  %vm4722_vm13 = vmpackc.low %vm1351_vm11, %vm1349_vm10  ;;  %vm1346_vm5 = vcmp.eq.s32.totalorder %v5785_v23, %v6053_v45  ;;  %vm1230_vm10 = vcmp.eq.s32.totalorder %v5611_v1, %v6066_v48  ;;  %vm1232_vm11 = vcmp.eq.s32.totalorder %v5785_v23, %v6066_v48 }
  0x74   :  { %4689 = vmatpush.bf16.msk.msra.mxu1 %vm4688_vm7, %v5572_v12  ;;  %vm4674_vm1 = vmpackc.low %vm1236_vm15, %vm1234_vm14  ;;  %vm1347_vm7 = vcmp.eq.s32.totalorder %v5785_v23, %v6055_v46  ;;  %vm1233_vm14 = vcmp.eq.s32.totalorder %v5785_v23, %v6068_v49 }
  0x75   :  { %4707 = vmatpush.bf16.msk.msra.mxu2 %vm4706_vm12, %v5572_v12  ;;  %vm4690_vm3 = vmpackc.low %vm1237_vm2, %vm1235_vm0  ;;  %vm1231_vm12 = vcmp.eq.s32.totalorder %v5611_v1, %v6068_v49 }
  0x76   :  { %4723 = vmatpush.bf16.msk.msra.mxu3 %vm4722_vm13, %v5572_v12  ;;  %vm4708_vm8 = vmpackc.low %vm1346_vm5, %vm1344_vm4 }
  0x77   :  { %4675 = vmatpush.bf16.msk.msra.mxu0 %vm4674_vm1, %v5572_v12  ;;  %vm4724_vm9 = vmpackc.low %vm1347_vm7, %vm1345_vm6 }
  0x78   :  { %4691 = vmatpush.bf16.msk.msra.mxu1 %vm4690_vm3, %v5572_v12  ;;  %vm4676_vm13 = vmpackc.low %vm1232_vm11, %vm1230_vm10 }
  0x79   :  { %4709 = vmatpush.bf16.msk.msra.mxu2 %vm4708_vm8, %v5572_v12  ;;  %vm4692_vm15 = vmpackc.low %vm1233_vm14, %vm1231_vm12 }
  0x7a   :  { %432 = vmatmul.bf16.gmra.mxu0 %v5989_v38  ;;  %4725 = vmatpush.bf16.msk.msra.mxu3 %vm4724_vm9, %v5572_v12 }
  0x7b   :  { %481 = vmatmul.bf16.gmra.mxu1 %v5989_v38  ;;  %4677 = vmatpush.bf16.msk.msra.mxu0 %vm4676_vm13, %v5572_v12 }
  0x7c   :  { %578 = vmatmul.bf16.gmra.mxu2 %v5991_v39  ;;  %4693 = vmatpush.bf16.msk.msra.mxu1 %vm4692_vm15, %v5572_v12 }
  0x7d   :  { %627 = vmatmul.bf16.gmra.mxu3 %v5991_v39 }
  0x8a   :  { %437 = vmatmul.bf16.gmra.mxu0 %v6017_v40 }
  0x8b   :  { %486 = vmatmul.bf16.gmra.mxu1 %v6017_v40 }
  0x8c   :  { %583 = vmatmul.bf16.gmra.mxu2 %v6019_v41 }
  0x8d   :  { %632 = vmatmul.bf16.gmra.mxu3 %v6019_v41 }
  0x9a   :  { %442 = vmatmul.bf16.gmra.mxu0 %v6045_v42 }
  0x9b   :  { %491 = vmatmul.bf16.gmra.mxu1 %v6045_v42 }
  0x9c   :  { %588 = vmatmul.bf16.gmra.mxu2 %v6047_v43 }
  0x9d   :  { %637 = vmatmul.bf16.gmra.mxu3 %v6047_v43 }
  0xaa   :  { %447 = vmatmul.bf16.gmra.mxu0 %v6079_v50 }
  0xab   :  { %496 = vmatmul.bf16.gmra.mxu1 %v6079_v50 }
  0xac   :  { %593 = vmatmul.bf16.gmra.mxu2 %v6083_v51 }
  0xad   :  { %642 = vmatmul.bf16.gmra.mxu3 %v6083_v51 }
  0xb7   :  { %v413_v52 = vpop.f32.mrf.mxu0 }
  0xb8   :  { %v462_v53 = vpop.f32.mrf.mxu1 }
  0xba   :  { %962 = vmatmul.bf16.vlgmr.msrb.gmra.mxu0 %v5828_v29 }
  0xbb   :  { %1011 = vmatmul.bf16.vlgmr.msrb.gmra.mxu1 %v5828_v29 }
  0xbc   :  { %1060 = vmatmul.bf16.vlgmr.msrb.gmra.mxu2 %v5841_v31 }
  0xbd   :  { %1109 = vmatmul.bf16.vlgmr.msrb.gmra.mxu3 %v5841_v31 }
  0xbf   :  { %v559_v54 = vpop.f32.mrf.mxu2  ;;  %v415_v55 = vpop.f32.mrf.mxu0 }
  0xc0   :  { %v648_v56 = vmul.f32 %v559_v54, %v413_v52  ;;  %v608_v57 = vpop.f32.mrf.mxu3  ;;  %v464_v58 = vpop.f32.mrf.mxu1 }
  0xc1   :  { %v649_v59 = vmul.f32 %v608_v57, %v462_v53 }
  0xc7   :  { %v561_v60 = vpop.f32.mrf.mxu2  ;;  %v418_v61 = vpop.f32.mrf.mxu0 }
  0xc8   :  { %v650_v62 = vmul.f32 %v561_v60, %v415_v55  ;;  %v610_v63 = vpop.f32.mrf.mxu3  ;;  %v467_v0 = vpop.f32.mrf.mxu1 }
  0xc9   :  { %v651_v6 = vmul.f32 %v610_v63, %v464_v58 }
  0xca   :  { %v680_v7 = vadd.f32 %v650_v62, %v648_v56  ;;  %967 = vmatmul.bf16.gmra.mxu0 %v5904_v32 }
  0xcb   :  { %v701_v8 = vadd.f32 %v651_v6, %v649_v59  ;;  %1016 = vmatmul.bf16.gmra.mxu1 %v5904_v32 }
  0xcc   :  { %1065 = vmatmul.bf16.gmra.mxu2 %v5907_v33 }
  0xcd   :  { %1114 = vmatmul.bf16.gmra.mxu3 %v5907_v33 }
  0xcf   :  { %v564_v9 = vpop.f32.mrf.mxu2  ;;  %v420_v10 = vpop.f32.mrf.mxu0 }
  0xd0   :  { %v652_v11 = vmul.f32 %v564_v9, %v418_v61  ;;  %v613_v24 = vpop.f32.mrf.mxu3  ;;  %v469_v25 = vpop.f32.mrf.mxu1 }
  0xd1   :  { %v653_v26 = vmul.f32 %v613_v24, %v467_v0 }
  0xd2   :  { %v681_v27 = vadd.f32 %v680_v7, %v652_v11 }
  0xd3   :  { %v702_v28 = vadd.f32 %v701_v8, %v653_v26 }
  0xd7   :  { %v566_v29 = vpop.f32.mrf.mxu2  ;;  %v423_v30 = vpop.f32.mrf.mxu0 }
  0xd8   :  { %v654_v44 = vmul.f32 %v566_v29, %v420_v10  ;;  %v615_v47 = vpop.f32.mrf.mxu3  ;;  %v472_v52 = vpop.f32.mrf.mxu1 }
  0xd9   :  { %v655_v53 = vmul.f32 %v615_v47, %v469_v25 }
  0xda   :  { %v682_v54 = vadd.f32 %v681_v27, %v654_v44  ;;  %972 = vmatmul.bf16.gmra.mxu0 %v5933_v34 }
  0xdb   :  { %v703_v55 = vadd.f32 %v702_v28, %v655_v53  ;;  %1021 = vmatmul.bf16.gmra.mxu1 %v5933_v34 }
  0xdc   :  { %1070 = vmatmul.bf16.gmra.mxu2 %v5935_v35 }
  0xdd   :  { %1119 = vmatmul.bf16.gmra.mxu3 %v5935_v35 }
  0xdf   :  { %v569_v56 = vpop.f32.mrf.mxu2  ;;  %v425_v57 = vpop.f32.mrf.mxu0 }
  0xe0   :  { %v656_v58 = vmul.f32 %v569_v56, %v423_v30  ;;  %v618_v59 = vpop.f32.mrf.mxu3  ;;  %v474_v60 = vpop.f32.mrf.mxu1 }
  0xe1   :  { %v657_v61 = vmul.f32 %v618_v59, %v472_v52 }
  0xe2   :  { %v683_v62 = vadd.f32 %v682_v54, %v656_v58 }
  0xe3   :  { %v704_v63 = vadd.f32 %v703_v55, %v657_v61 }
  0xe7   :  { %v571_v0 = vpop.f32.mrf.mxu2  ;;  %v428_v6 = vpop.f32.mrf.mxu0 }
  0xe8   :  { %v658_v7 = vmul.f32 %v571_v0, %v425_v57  ;;  %v620_v8 = vpop.f32.mrf.mxu3  ;;  %v477_v9 = vpop.f32.mrf.mxu1 }
  0xe9   :  { %v659_v10 = vmul.f32 %v620_v8, %v474_v60 }
  0xea   :  { %v684_v11 = vadd.f32 %v683_v62, %v658_v7  ;;  %977 = vmatmul.bf16.gmra.mxu0 %v5961_v36 }
  0xeb   :  { %v705_v24 = vadd.f32 %v704_v63, %v659_v10  ;;  %1026 = vmatmul.bf16.gmra.mxu1 %v5961_v36 }
  0xec   :  { %1075 = vmatmul.bf16.gmra.mxu2 %v5963_v37 }
  0xed   :  { %1124 = vmatmul.bf16.gmra.mxu3 %v5963_v37 }
  0xef   :  { %v574_v25 = vpop.f32.mrf.mxu2  ;;  %v430_v26 = vpop.f32.mrf.mxu0 }
  0xf0   :  { %v660_v36 = vmul.f32 %v574_v25, %v428_v6  ;;  %v623_v37 = vpop.f32.mrf.mxu3  ;;  %v479_v27 = vpop.f32.mrf.mxu1 }
  0xf1   :  { %v661_v28 = vmul.f32 %v623_v37, %v477_v9 }
  0xf2   :  { %v685_v29 = vadd.f32 %v684_v11, %v660_v36 }
  0xf3   :  { %v706_v30 = vadd.f32 %v705_v24, %v661_v28 }
  0xf7   :  { %v576_v44 = vpop.f32.mrf.mxu2  ;;  %v433_v47 = vpop.f32.mrf.mxu0 }
  0xf8   :  { %v662_v52 = vmul.f32 %v576_v44, %v430_v26  ;;  %v625_v53 = vpop.f32.mrf.mxu3  ;;  %v482_v54 = vpop.f32.mrf.mxu1 }
  0xf9   :  { %v663_v55 = vmul.f32 %v625_v53, %v479_v27 }
  0xfa   :  { %v686_v56 = vadd.f32 %v685_v29, %v662_v52  ;;  %982 = vmatmul.bf16.gmra.mxu0 %v5989_v38 }
  0xfb   :  { %v707_v57 = vadd.f32 %v706_v30, %v663_v55  ;;  %1031 = vmatmul.bf16.gmra.mxu1 %v5989_v38 }
  0xfc   :  { %1080 = vmatmul.bf16.gmra.mxu2 %v5991_v39 }
  0xfd   :  { %1129 = vmatmul.bf16.gmra.mxu3 %v5991_v39 }
  0xff   :  { %v579_v58 = vpop.f32.mrf.mxu2  ;;  %v435_v59 = vpop.f32.mrf.mxu0 }
 0x100   :  { %v664_v38 = vmul.f32 %v579_v58, %v433_v47  ;;  %v628_v39 = vpop.f32.mrf.mxu3  ;;  %v484_v60 = vpop.f32.mrf.mxu1 }
 0x101   :  { %v665_v61 = vmul.f32 %v628_v39, %v482_v54 }
 0x102   :  { %v687_v62 = vadd.f32 %v686_v56, %v664_v38 }
 0x103   :  { %v708_v63 = vadd.f32 %v707_v57, %v665_v61  ;;  %v1727_v61 = vld [vmem:[#allocation2 + $0x3] ss:$8 sm:$0x3] }
 0x107   :  { %v581_v0 = vpop.f32.mrf.mxu2  ;;  %v438_v6 = vpop.f32.mrf.mxu0 }
 0x108   :  { %v666_v7 = vmul.f32 %v581_v0, %v435_v59  ;;  %v630_v8 = vpop.f32.mrf.mxu3  ;;  %v487_v9 = vpop.f32.mrf.mxu1 }
 0x109   :  { %v667_v10 = vmul.f32 %v630_v8, %v484_v60  ;;  %v1729_v60 = vld [vmem:[#allocation5 + $0x3] ss:$8 sm:$0x3]  ;;  %v6263_v8 = vperm.slane %v1727_v61, 1 }
 0x10a   :  { %v688_v11 = vadd.f32 %v687_v62, %v666_v7  ;;  %987 = vmatmul.bf16.gmra.mxu0 %v6017_v40 }
 0x10b   :  { %v709_v24 = vadd.f32 %v708_v63, %v667_v10  ;;  %1036 = vmatmul.bf16.gmra.mxu1 %v6017_v40  ;;  %vm1761_vm8 = vcmp.eq.s32.totalorder %v5614_v2, %v6263_v8  ;;  %vm1763_vm9 = vcmp.eq.s32.totalorder %v5617_v3, %v6263_v8 }
 0x10c   :  { %1085 = vmatmul.bf16.gmra.mxu2 %v6019_v41  ;;  %vm4806_vm14 = vmpackc.low %vm1763_vm9, %vm1761_vm8 }
 0x10d   :  { %1134 = vmatmul.bf16.gmra.mxu3 %v6019_v41  ;;  %4807 = vmatpush.bf16.msk.msrb.mxu1 %vm4806_vm14, %v5572_v12 }
 0x10f   :  { %v584_v25 = vpop.f32.mrf.mxu2  ;;  %v440_v26 = vpop.f32.mrf.mxu0 }
 0x110   :  { %v668_v40 = vmul.f32 %v584_v25, %v438_v6  ;;  %v633_v41 = vpop.f32.mrf.mxu3  ;;  %v489_v36 = vpop.f32.mrf.mxu1  ;;  %v6259_v6 = vperm.slane %v1729_v60, 1 }
 0x111   :  { %v669_v37 = vmul.f32 %v633_v41, %v487_v9 }
 0x112   :  { %v689_v27 = vadd.f32 %v688_v11, %v668_v40  ;;  %vm1875_vm2 = vcmp.eq.s32.totalorder %v5614_v2, %v6259_v6  ;;  %vm1877_vm4 = vcmp.eq.s32.totalorder %v5617_v3, %v6259_v6  ;;  %vm1871_vm13 = vcmp.eq.s32.totalorder %v5620_v4, %v6259_v6 }
 0x113   :  { %v710_v45 = vadd.f32 %v709_v24, %v669_v37  ;;  %vm4838_vm7 = vmpackc.low %vm1877_vm4, %vm1875_vm2  ;;  %vm1873_vm15 = vcmp.eq.s32.totalorder %v5623_v5, %v6259_v6  ;;  %vm1757_vm4 = vcmp.eq.s32.totalorder %v5620_v4, %v6263_v8 }
 0x114   :  { %4839 = vmatpush.bf16.msk.msrb.mxu3 %vm4838_vm7, %v5572_v12 }
 0x117   :  { %v586_v46 = vpop.f32.mrf.mxu2  ;;  %v443_v28 = vpop.f32.mrf.mxu0 }
 0x118   :  { %v670_v29 = vmul.f32 %v586_v46, %v440_v26  ;;  %v635_v30 = vpop.f32.mrf.mxu3  ;;  %v492_v44 = vpop.f32.mrf.mxu1 }
 0x119   :  { %v671_v47 = vmul.f32 %v635_v30, %v489_v36  ;;  %v6311_v30 = vld [vmem:[#allocation7] sm:$0xff] }
 0x11a   :  { %v690_v52 = vadd.f32 %v689_v27, %v670_v29  ;;  %992 = vmatmul.bf16.gmra.mxu0 %v6045_v42 }
 0x11b   :  { %v711_v48 = vadd.f32 %v710_v45, %v671_v47  ;;  %1041 = vmatmul.bf16.gmra.mxu1 %v6045_v42  ;;  %v6257_v42 = vperm.slane %v1729_v60, 0 }
 0x11c   :  { %1090 = vmatmul.bf16.gmra.mxu2 %v6047_v43 }
 0x11d   :  { %1139 = vmatmul.bf16.gmra.mxu3 %v6047_v43  ;;  %v6261_v43 = vperm.slane %v1727_v61, 0  ;;  %vm1874_vm0 = vcmp.eq.s32.totalorder %v5614_v2, %v6257_v42  ;;  %vm1876_vm1 = vcmp.eq.s32.totalorder %v5617_v3, %v6257_v42  ;;  %vm1870_vm11 = vcmp.eq.s32.totalorder %v5620_v4, %v6257_v42 }
 0x11e   :  { %vm4822_vm3 = vmpackc.low %vm1876_vm1, %vm1874_vm0  ;;  %vm1872_vm12 = vcmp.eq.s32.totalorder %v5623_v5, %v6257_v42  ;;  %vm1866_vm8 = vcmp.eq.s32.totalorder %v5655_v13, %v6257_v42  ;;  %vm1868_vm9 = vcmp.eq.s32.totalorder %v5658_v14, %v6257_v42 }
 0x11f   :  { %v589_v49 = vpop.f32.mrf.mxu2  ;;  %v445_v53 = vpop.f32.mrf.mxu0  ;;  %vm1760_vm5 = vcmp.eq.s32.totalorder %v5614_v2, %v6261_v43  ;;  %vm1762_vm6 = vcmp.eq.s32.totalorder %v5617_v3, %v6261_v43  ;;  %4823 = vmatpush.bf16.msk.msrb.mxu2 %vm4822_vm3, %v5572_v12  ;;  %vm4824_vm0 = vmpackc.low %vm1872_vm12, %vm1870_vm11  ;;  %vm1756_vm2 = vcmp.eq.s32.totalorder %v5620_v4, %v6261_v43  ;;  %vm1758_vm3 = vcmp.eq.s32.totalorder %v5623_v5, %v6261_v43 }
 0x120   :  { %v672_v54 = vmul.f32 %v589_v49, %v443_v28  ;;  %v638_v55 = vpop.f32.mrf.mxu3  ;;  %v494_v56 = vpop.f32.mrf.mxu1  ;;  %vm4790_vm10 = vmpackc.low %vm1762_vm6, %vm1760_vm5  ;;  %vm1759_vm6 = vcmp.eq.s32.totalorder %v5623_v5, %v6263_v8  ;;  %vm1869_vm12 = vcmp.eq.s32.totalorder %v5658_v14, %v6259_v6  ;;  %vm1752_vm14 = vcmp.eq.s32.totalorder %v5655_v13, %v6261_v43 }
 0x121   :  { %v673_v57 = vmul.f32 %v638_v55, %v492_v44  ;;  %4791 = vmatpush.bf16.msk.msrb.mxu0 %vm4790_vm10, %v5572_v12  ;;  %vm4840_vm1 = vmpackc.low %vm1873_vm15, %vm1871_vm13  ;;  %vm1867_vm10 = vcmp.eq.s32.totalorder %v5655_v13, %v6259_v6  ;;  %vm1754_vm15 = vcmp.eq.s32.totalorder %v5658_v14, %v6261_v43 }
 0x122   :  { %v691_v58 = vadd.f32 %v690_v52, %v672_v54  ;;  %4841 = vmatpush.bf16.msk.msrb.mxu3 %vm4840_vm1, %v5572_v12  ;;  %vm4792_vm5 = vmpackc.low %vm1758_vm3, %vm1756_vm2  ;;  %vm1755_vm2 = vcmp.eq.s32.totalorder %v5658_v14, %v6263_v8 }
 0x123   :  { %v712_v59 = vadd.f32 %v711_v48, %v673_v57  ;;  %4825 = vmatpush.bf16.msk.msrb.mxu2 %vm4824_vm0, %v5572_v12  ;;  %vm4808_vm7 = vmpackc.low %vm1759_vm6, %vm1757_vm4  ;;  %vm1753_vm0 = vcmp.eq.s32.totalorder %v5655_v13, %v6263_v8  ;;  %vm1862_vm4 = vcmp.eq.s32.totalorder %v5681_v15, %v6257_v42  ;;  %vm1863_vm6 = vcmp.eq.s32.totalorder %v5681_v15, %v6259_v6 }
 0x124   :  { %4809 = vmatpush.bf16.msk.msrb.mxu1 %vm4808_vm7, %v5572_v12  ;;  %vm4826_vm11 = vmpackc.low %vm1868_vm9, %vm1866_vm8  ;;  %vm1865_vm7 = vcmp.eq.s32.totalorder %v5684_v16, %v6259_v6 }
 0x125   :  { %4793 = vmatpush.bf16.msk.msrb.mxu0 %vm4792_vm5, %v5572_v12  ;;  %vm4842_vm13 = vmpackc.low %vm1869_vm12, %vm1867_vm10  ;;  %vm1864_vm5 = vcmp.eq.s32.totalorder %v5684_v16, %v6257_v42  ;;  %vm1748_vm10 = vcmp.eq.s32.totalorder %v5681_v15, %v6261_v43  ;;  %vm1749_vm12 = vcmp.eq.s32.totalorder %v5681_v15, %v6263_v8 }
 0x126   :  { %4843 = vmatpush.bf16.msk.msrb.mxu3 %vm4842_vm13, %v5572_v12  ;;  %vm4794_vm1 = vmpackc.low %vm1754_vm15, %vm1752_vm14  ;;  %vm1751_vm14 = vcmp.eq.s32.totalorder %v5684_v16, %v6263_v8 }
 0x127   :  { %v591_v38 = vpop.f32.mrf.mxu2  ;;  %v448_v39 = vpop.f32.mrf.mxu0  ;;  %4827 = vmatpush.bf16.msk.msrb.mxu2 %vm4826_vm11, %v5572_v12  ;;  %vm4810_vm3 = vmpackc.low %vm1755_vm2, %vm1753_vm0  ;;  %vm1750_vm11 = vcmp.eq.s32.totalorder %v5684_v16, %v6261_v43  ;;  %vm1858_vm0 = vcmp.eq.s32.totalorder %v5707_v17, %v6257_v42  ;;  %vm1859_vm2 = vcmp.eq.s32.totalorder %v5707_v17, %v6259_v6 }
 0x128   :  { %v674_v62 = vmul.f32 %v591_v38, %v445_v53  ;;  %v640_v63 = vpop.f32.mrf.mxu3  ;;  %v497_v0 = vpop.f32.mrf.mxu1  ;;  %4811 = vmatpush.bf16.msk.msrb.mxu1 %vm4810_vm3, %v5572_v12  ;;  %vm4828_vm8 = vmpackc.low %vm1864_vm5, %vm1862_vm4  ;;  %vm1861_vm3 = vcmp.eq.s32.totalorder %v5710_v18, %v6259_v6 }
 0x129   :  { %v675_v7 = vmul.f32 %v640_v63, %v494_v56  ;;  %4795 = vmatpush.bf16.msk.msrb.mxu0 %vm4794_vm1, %v5572_v12  ;;  %vm4844_vm9 = vmpackc.low %vm1865_vm7, %vm1863_vm6  ;;  %vm1860_vm1 = vcmp.eq.s32.totalorder %v5710_v18, %v6257_v42  ;;  %vm1744_vm6 = vcmp.eq.s32.totalorder %v5707_v17, %v6261_v43  ;;  %vm1746_vm7 = vcmp.eq.s32.totalorder %v5710_v18, %v6261_v43 }
 0x12a   :  { %v692_v9 = vadd.f32 %v691_v58, %v674_v62  ;;  %997 = vmatmul.bf16.gmra.mxu0 %v6079_v50  ;;  %4845 = vmatpush.bf16.msk.msrb.mxu3 %vm4844_vm9, %v5572_v12  ;;  %vm4796_vm13 = vmpackc.low %vm1750_vm11, %vm1748_vm10  ;;  %vm1747_vm10 = vcmp.eq.s32.totalorder %v5710_v18, %v6263_v8 }
 0x12b   :  { %v713_v10 = vadd.f32 %v712_v59, %v675_v7  ;;  %1046 = vmatmul.bf16.gmra.mxu1 %v6079_v50  ;;  %4829 = vmatpush.bf16.msk.msrb.mxu2 %vm4828_vm8, %v5572_v12  ;;  %vm4812_vm15 = vmpackc.low %vm1751_vm14, %vm1749_vm12  ;;  %vm1745_vm8 = vcmp.eq.s32.totalorder %v5707_v17, %v6263_v8  ;;  %vm1854_vm12 = vcmp.eq.s32.totalorder %v5733_v19, %v6257_v42 }
 0x12c   :  { %1095 = vmatmul.bf16.gmra.mxu2 %v6083_v51  ;;  %4813 = vmatpush.bf16.msk.msrb.mxu1 %vm4812_vm15, %v5572_v12  ;;  %vm4830_vm4 = vmpackc.low %vm1860_vm1, %vm1858_vm0  ;;  %vm1855_vm14 = vcmp.eq.s32.totalorder %v5733_v19, %v6259_v6  ;;  %vm1857_vm15 = vcmp.eq.s32.totalorder %v5736_v20, %v6259_v6 }
 0x12d   :  { %1144 = vmatmul.bf16.gmra.mxu3 %v6083_v51  ;;  %4797 = vmatpush.bf16.msk.msrb.mxu0 %vm4796_vm13, %v5572_v12  ;;  %vm4846_vm5 = vmpackc.low %vm1861_vm3, %vm1859_vm2  ;;  %vm1856_vm13 = vcmp.eq.s32.totalorder %v5736_v20, %v6257_v42  ;;  %vm1740_vm2 = vcmp.eq.s32.totalorder %v5733_v19, %v6261_v43  ;;  %vm1742_vm3 = vcmp.eq.s32.totalorder %v5736_v20, %v6261_v43 }
 0x12e   :  { %4847 = vmatpush.bf16.msk.msrb.mxu3 %vm4846_vm5, %v5572_v12  ;;  %vm4798_vm9 = vmpackc.low %vm1746_vm7, %vm1744_vm6  ;;  %vm1743_vm6 = vcmp.eq.s32.totalorder %v5736_v20, %v6263_v8 }
 0x12f   :  { %v594_v50 = vpop.f32.mrf.mxu2  ;;  %v450_v51 = vpop.f32.mrf.mxu0  ;;  %4831 = vmatpush.bf16.msk.msrb.mxu2 %vm4830_vm4, %v5572_v12  ;;  %vm4814_vm11 = vmpackc.low %vm1747_vm10, %vm1745_vm8  ;;  %vm1741_vm4 = vcmp.eq.s32.totalorder %v5733_v19, %v6263_v8  ;;  %vm1850_vm8 = vcmp.eq.s32.totalorder %v5759_v21, %v6257_v42  ;;  %vm1851_vm10 = vcmp.eq.s32.totalorder %v5759_v21, %v6259_v6 }
 0x130   :  { %v676_v11 = vmul.f32 %v594_v50, %v448_v39  ;;  %v643_v24 = vpop.f32.mrf.mxu3  ;;  %v499_v25 = vpop.f32.mrf.mxu1  ;;  %4815 = vmatpush.bf16.msk.msrb.mxu1 %vm4814_vm11, %v5572_v12  ;;  %vm4832_vm0 = vmpackc.low %vm1856_vm13, %vm1854_vm12  ;;  %vm1853_vm11 = vcmp.eq.s32.totalorder %v5762_v22, %v6259_v6 }
 0x131   :  { %v677_v26 = vmul.f32 %v643_v24, %v497_v0  ;;  %4799 = vmatpush.bf16.msk.msrb.mxu0 %vm4798_vm9, %v5572_v12  ;;  %vm4848_vm1 = vmpackc.low %vm1857_vm15, %vm1855_vm14  ;;  %vm1852_vm9 = vcmp.eq.s32.totalorder %v5762_v22, %v6257_v42  ;;  %vm1736_vm14 = vcmp.eq.s32.totalorder %v5759_v21, %v6261_v43  ;;  %vm1738_vm15 = vcmp.eq.s32.totalorder %v5762_v22, %v6261_v43 }
 0x132   :  { %v693_v40 = vadd.f32 %v692_v9, %v676_v11  ;;  %4849 = vmatpush.bf16.msk.msrb.mxu3 %vm4848_vm1, %v5572_v12  ;;  %vm4800_vm5 = vmpackc.low %vm1742_vm3, %vm1740_vm2  ;;  %vm1739_vm2 = vcmp.eq.s32.totalorder %v5762_v22, %v6263_v8 }
 0x133   :  { %v714_v41 = vadd.f32 %v713_v10, %v677_v26  ;;  %4833 = vmatpush.bf16.msk.msrb.mxu2 %vm4832_vm0, %v5572_v12  ;;  %vm4816_vm7 = vmpackc.low %vm1743_vm6, %vm1741_vm4  ;;  %vm1737_vm0 = vcmp.eq.s32.totalorder %v5759_v21, %v6263_v8  ;;  %vm1846_vm4 = vcmp.eq.s32.totalorder %v5611_v1, %v6257_v42  ;;  %vm1847_vm6 = vcmp.eq.s32.totalorder %v5611_v1, %v6259_v6 }
 0x134   :  { %4817 = vmatpush.bf16.msk.msrb.mxu1 %vm4816_vm7, %v5572_v12  ;;  %vm4834_vm12 = vmpackc.low %vm1852_vm9, %vm1850_vm8  ;;  %vm1849_vm7 = vcmp.eq.s32.totalorder %v5785_v23, %v6259_v6 }
 0x135   :  { %4801 = vmatpush.bf16.msk.msrb.mxu0 %vm4800_vm5, %v5572_v12  ;;  %vm4850_vm13 = vmpackc.low %vm1853_vm11, %vm1851_vm10  ;;  %vm1848_vm5 = vcmp.eq.s32.totalorder %v5785_v23, %v6257_v42  ;;  %vm1732_vm10 = vcmp.eq.s32.totalorder %v5611_v1, %v6261_v43  ;;  %vm1734_vm11 = vcmp.eq.s32.totalorder %v5785_v23, %v6261_v43  ;;  %v6471_v43 = vld [vmem:[#allocation7 + $0x30] sm:$0xff] }
 0x136   :  { %4851 = vmatpush.bf16.msk.msrb.mxu3 %vm4850_vm13, %v5572_v12  ;;  %vm4802_vm1 = vmpackc.low %vm1738_vm15, %vm1736_vm14  ;;  %vm1735_vm14 = vcmp.eq.s32.totalorder %v5785_v23, %v6263_v8 }
 0x137   :  { %v596_v36 = vpop.f32.mrf.mxu2  ;;  %v963_v37 = vpop.f32.mrf.mxu0  ;;  %4835 = vmatpush.bf16.msk.msrb.mxu2 %vm4834_vm12, %v5572_v12  ;;  %vm4818_vm3 = vmpackc.low %vm1739_vm2, %vm1737_vm0  ;;  %vm1733_vm12 = vcmp.eq.s32.totalorder %v5611_v1, %v6263_v8  ;;  %v6475_v8 = vld [vmem:[#allocation8 + $0x30] sm:$0xff] }
 0x138   :  { %v678_v27 = vmul.f32 %v596_v36, %v450_v51  ;;  %v645_v45 = vpop.f32.mrf.mxu3  ;;  %v1012_v46 = vpop.f32.mrf.mxu1  ;;  %4819 = vmatpush.bf16.msk.msrb.mxu1 %vm4818_vm3, %v5572_v12  ;;  %vm4836_vm8 = vmpackc.low %vm1848_vm5, %vm1846_vm4 }
 0x139   :  { %v679_v28 = vmul.f32 %v645_v45, %v499_v25  ;;  %4803 = vmatpush.bf16.msk.msrb.mxu0 %vm4802_vm1, %v5572_v12  ;;  %vm4852_vm9 = vmpackc.low %vm1849_vm7, %vm1847_vm6 }
 0x13a   :  { %v6309_v29 = vadd.f32 %v693_v40, %v678_v27  ;;  %1464 = vmatmul.bf16.vlgmr.msra.gmra.mxu0 %v6311_v30  ;;  %4853 = vmatpush.bf16.msk.msrb.mxu3 %vm4852_vm9, %v5572_v12  ;;  %vm4804_vm13 = vmpackc.low %vm1734_vm11, %vm1732_vm10 }
 0x13b   :  { %v6314_v44 = vadd.f32 %v714_v41, %v679_v28  ;;  %1513 = vmatmul.bf16.vlgmr.msra.gmra.mxu1 %v6311_v30  ;;  %4837 = vmatpush.bf16.msk.msrb.mxu2 %vm4836_vm8, %v5572_v12  ;;  %vm4820_vm15 = vmpackc.low %vm1735_vm14, %vm1733_vm12 }
 0x13c   :  { %1562 = vmatmul.bf16.vlgmr.msra.gmra.mxu2 %v5841_v31  ;;  %4821 = vmatpush.bf16.msk.msrb.mxu1 %vm4820_vm15, %v5572_v12 }
 0x13d   :  { %1611 = vmatmul.bf16.vlgmr.msra.gmra.mxu3 %v5841_v31  ;;  %4805 = vmatpush.bf16.msk.msrb.mxu0 %vm4804_vm13, %v5572_v12 }
 0x13f   :  { %v1061_v47 = vpop.f32.mrf.mxu2  ;;  %v965_v52 = vpop.f32.mrf.mxu0 }
 0x140   :  { %v1150_v48 = vmul.f32 %v1061_v47, %v963_v37  ;;  %v1110_v31 = vpop.f32.mrf.mxu3  ;;  %v1014_v49 = vpop.f32.mrf.mxu1 }
 0x141   :  { %v1151_v53 = vmul.f32 %v1110_v31, %v1012_v46 }
 0x147   :  { %v1063_v54 = vpop.f32.mrf.mxu2  ;;  %v968_v55 = vpop.f32.mrf.mxu0 }
 0x148   :  { %v1152_v56 = vmul.f32 %v1063_v54, %v965_v52  ;;  %v1112_v57 = vpop.f32.mrf.mxu3  ;;  %v1017_v58 = vpop.f32.mrf.mxu1 }
 0x149   :  { %v1153_v59 = vmul.f32 %v1112_v57, %v1014_v49 }
 0x14a   :  { %v1182_v38 = vadd.f32 %v1152_v56, %v1150_v48  ;;  %1469 = vmatmul.bf16.gmra.mxu0 %v5904_v32 }
 0x14b   :  { %v1203_v39 = vadd.f32 %v1153_v59, %v1151_v53  ;;  %1518 = vmatmul.bf16.gmra.mxu1 %v5904_v32  ;;  %v6387_v53 = vld [vmem:[#allocation7 + $0x18] sm:$0xff] }
 0x14c   :  { %1567 = vmatmul.bf16.gmra.mxu2 %v5907_v33 }
 0x14d   :  { %1616 = vmatmul.bf16.gmra.mxu3 %v5907_v33 }
 0x14f   :  { %v1066_v60 = vpop.f32.mrf.mxu2  ;;  %v970_v61 = vpop.f32.mrf.mxu0 }
 0x150   :  { %v1154_v32 = vmul.f32 %v1066_v60, %v968_v55  ;;  %v1115_v33 = vpop.f32.mrf.mxu3  ;;  %v1019_v62 = vpop.f32.mrf.mxu1  ;;  %v6391_v55 = vld [vmem:[#allocation8 + $0x18] sm:$0xff] }
 0x151   :  { %v1155_v63 = vmul.f32 %v1115_v33, %v1017_v58 }
 0x152   :  { %v1183_v0 = vadd.f32 %v1182_v38, %v1154_v32 }
 0x153   :  { %v1204_v7 = vadd.f32 %v1203_v39, %v1155_v63 }
 0x157   :  { %v1068_v9 = vpop.f32.mrf.mxu2  ;;  %v973_v10 = vpop.f32.mrf.mxu0 }
 0x158   :  { %v1156_v50 = vmul.f32 %v1068_v9, %v970_v61  ;;  %v1117_v51 = vpop.f32.mrf.mxu3  ;;  %v1022_v11 = vpop.f32.mrf.mxu1 }
 0x159   :  { %v1157_v24 = vmul.f32 %v1117_v51, %v1019_v62  ;;  %v6419_v51 = vld [vmem:[#allocation8 + $0x20] sm:$0xff] }
 0x15a   :  { %v1184_v25 = vadd.f32 %v1183_v0, %v1156_v50  ;;  %1474 = vmatmul.bf16.gmra.mxu0 %v5933_v34 }
 0x15b   :  { %v1205_v26 = vadd.f32 %v1204_v7, %v1157_v24  ;;  %1523 = vmatmul.bf16.gmra.mxu1 %v5933_v34 }
 0x15c   :  { %1572 = vmatmul.bf16.gmra.mxu2 %v5935_v35 }
 0x15d   :  { %1621 = vmatmul.bf16.gmra.mxu3 %v5935_v35 }
 0x15f   :  { %v1071_v40 = vpop.f32.mrf.mxu2  ;;  %v975_v41 = vpop.f32.mrf.mxu0 }
 0x160   :  { %v1158_v34 = vmul.f32 %v1071_v40, %v973_v10  ;;  %v1120_v35 = vpop.f32.mrf.mxu3  ;;  %v1024_v36 = vpop.f32.mrf.mxu1  ;;  %v6415_v10 = vld [vmem:[#allocation7 + $0x20] sm:$0xff] }
 0x161   :  { %v1159_v37 = vmul.f32 %v1120_v35, %v1022_v11 }
 0x162   :  { %v1185_v27 = vadd.f32 %v1184_v25, %v1158_v34 }
 0x163   :  { %v1206_v45 = vadd.f32 %v1205_v26, %v1159_v37 }
 0x167   :  { %v1073_v46 = vpop.f32.mrf.mxu2  ;;  %v978_v28 = vpop.f32.mrf.mxu0 }
 0x168   :  { %v1160_v47 = vmul.f32 %v1073_v46, %v975_v41  ;;  %v1122_v52 = vpop.f32.mrf.mxu3  ;;  %v1027_v48 = vpop.f32.mrf.mxu1 }
 0x169   :  { %v1161_v31 = vmul.f32 %v1122_v52, %v1024_v36  ;;  %v6443_v52 = vld [vmem:[#allocation7 + $0x28] sm:$0xff] }
 0x16a   :  { %v1186_v49 = vadd.f32 %v1185_v27, %v1160_v47  ;;  %1479 = vmatmul.bf16.gmra.mxu0 %v6387_v53 }
 0x16b   :  { %v1207_v54 = vadd.f32 %v1206_v45, %v1161_v31  ;;  %1528 = vmatmul.bf16.gmra.mxu1 %v6387_v53  ;;  %v6447_v31 = vld [vmem:[#allocation8 + $0x28] sm:$0xff] }
 0x16c   :  { %1577 = vmatmul.bf16.gmra.mxu2 %v6391_v55 }
 0x16d   :  { %1626 = vmatmul.bf16.gmra.mxu3 %v6391_v55 }
 0x16f   :  { %v1076_v56 = vpop.f32.mrf.mxu2  ;;  %v980_v57 = vpop.f32.mrf.mxu0 }
 0x170   :  { %v1162_v58 = vmul.f32 %v1076_v56, %v978_v28  ;;  %v1125_v59 = vpop.f32.mrf.mxu3  ;;  %v1029_v38 = vpop.f32.mrf.mxu1 }
 0x171   :  { %v1163_v39 = vmul.f32 %v1125_v59, %v1027_v48 }
 0x172   :  { %v1187_v60 = vadd.f32 %v1186_v49, %v1162_v58 }
 0x173   :  { %v1208_v61 = vadd.f32 %v1207_v54, %v1163_v39 }
 0x177   :  { %v1078_v32 = vpop.f32.mrf.mxu2  ;;  %v983_v33 = vpop.f32.mrf.mxu0 }
 0x178   :  { %v1164_v62 = vmul.f32 %v1078_v32, %v980_v57  ;;  %v1127_v63 = vpop.f32.mrf.mxu3  ;;  %v1032_v0 = vpop.f32.mrf.mxu1 }
 0x179   :  { %v1165_v7 = vmul.f32 %v1127_v63, %v1029_v38 }
 0x17a   :  { %v1188_v9 = vadd.f32 %v1187_v60, %v1164_v62  ;;  %1484 = vmatmul.bf16.gmra.mxu0 %v6415_v10 }
 0x17b   :  { %v1209_v50 = vadd.f32 %v1208_v61, %v1165_v7  ;;  %1533 = vmatmul.bf16.gmra.mxu1 %v6415_v10 }
 0x17c   :  { %1582 = vmatmul.bf16.gmra.mxu2 %v6419_v51 }
 0x17d   :  { %1631 = vmatmul.bf16.gmra.mxu3 %v6419_v51 }
 0x17f   :  { %v1081_v11 = vpop.f32.mrf.mxu2  ;;  %v985_v24 = vpop.f32.mrf.mxu0 }
 0x180   :  { %v1166_v25 = vmul.f32 %v1081_v11, %v983_v33  ;;  %v1130_v26 = vpop.f32.mrf.mxu3  ;;  %v1034_v40 = vpop.f32.mrf.mxu1 }
 0x181   :  { %v1167_v41 = vmul.f32 %v1130_v26, %v1032_v0 }
 0x182   :  { %v1189_v34 = vadd.f32 %v1188_v9, %v1166_v25 }
 0x183   :  { %v1210_v35 = vadd.f32 %v1209_v50, %v1167_v41 }
 0x187   :  { %v1083_v36 = vpop.f32.mrf.mxu2  ;;  %v988_v37 = vpop.f32.mrf.mxu0 }
 0x188   :  { %v1168_v27 = vmul.f32 %v1083_v36, %v985_v24  ;;  %v1132_v45 = vpop.f32.mrf.mxu3  ;;  %v1037_v46 = vpop.f32.mrf.mxu1 }
 0x189   :  { %v1169_v28 = vmul.f32 %v1132_v45, %v1034_v40  ;;  %v2229_v45 = vld [vmem:[#allocation2 + $0x4] ss:$8 sm:$0x3] }
 0x18a   :  { %v1190_v47 = vadd.f32 %v1189_v34, %v1168_v27  ;;  %1489 = vmatmul.bf16.gmra.mxu0 %v6443_v52  ;;  %v2231_v27 = vld [vmem:[#allocation5 + $0x4] ss:$8 sm:$0x3] }
 0x18b   :  { %v1211_v48 = vadd.f32 %v1210_v35, %v1169_v28  ;;  %1538 = vmatmul.bf16.gmra.mxu1 %v6443_v52  ;;  %v6479_v28 = vld [vmem:[#allocation7 + $0x38] sm:$0xff] }
 0x18c   :  { %1587 = vmatmul.bf16.gmra.mxu2 %v6447_v31 }
 0x18d   :  { %1636 = vmatmul.bf16.gmra.mxu3 %v6447_v31 }
 0x18f   :  { %v1086_v49 = vpop.f32.mrf.mxu2  ;;  %v990_v54 = vpop.f32.mrf.mxu0 }
 0x190   :  { %v1170_v56 = vmul.f32 %v1086_v49, %v988_v37  ;;  %v1135_v57 = vpop.f32.mrf.mxu3  ;;  %v1039_v58 = vpop.f32.mrf.mxu1  ;;  %v6486_v49 = vperm.slane %v2229_v45, 0 }
 0x191   :  { %v1171_v59 = vmul.f32 %v1135_v57, %v1037_v46  ;;  %v6491_v57 = vld [vmem:[#allocation8 + $0x38] sm:$0xff] }
 0x192   :  { %v1191_v38 = vadd.f32 %v1190_v47, %v1170_v56  ;;  %v6482_v47 = vperm.slane %v2231_v27, 0  ;;  %v6489_v56 = vperm.slane %v2229_v45, 1  ;;  %vm2262_vm5 = vcmp.eq.s32.totalorder %v5614_v2, %v6486_v49 }
 0x193   :  { %v1212_v42 = vadd.f32 %v1211_v48, %v1171_v59  ;;  %v6484_v48 = vperm.slane %v2231_v27, 1  ;;  %vm2264_vm6 = vcmp.eq.s32.totalorder %v5617_v3, %v6486_v49 }
 0x194   :  { %vm2376_vm0 = vcmp.eq.s32.totalorder %v5614_v2, %v6482_v47  ;;  %vm2378_vm1 = vcmp.eq.s32.totalorder %v5617_v3, %v6482_v47  ;;  %vm2263_vm7 = vcmp.eq.s32.totalorder %v5614_v2, %v6489_v56  ;;  %vm2265_vm8 = vcmp.eq.s32.totalorder %v5617_v3, %v6489_v56  ;;  %vm4918_vm12 = vmpackc.low %vm2264_vm6, %vm2262_vm5 }
 0x195   :  { %vm2377_vm2 = vcmp.eq.s32.totalorder %v5614_v2, %v6484_v48  ;;  %vm2379_vm3 = vcmp.eq.s32.totalorder %v5617_v3, %v6484_v48  ;;  %vm4950_vm4 = vmpackc.low %vm2378_vm1, %vm2376_vm0  ;;  %vm2372_vm10 = vcmp.eq.s32.totalorder %v5620_v4, %v6482_v47  ;;  %vm2374_vm11 = vcmp.eq.s32.totalorder %v5623_v5, %v6482_v47  ;;  %4919 = vmatpush.bf16.msk.msra.mxu0 %vm4918_vm12, %v5572_v12 }
 0x196   :  { %4951 = vmatpush.bf16.msk.msra.mxu2 %vm4950_vm4, %v5572_v12  ;;  %vm4966_vm9 = vmpackc.low %vm2379_vm3, %vm2377_vm2  ;;  %vm2373_vm13 = vcmp.eq.s32.totalorder %v5620_v4, %v6484_v48  ;;  %vm2375_vm14 = vcmp.eq.s32.totalorder %v5623_v5, %v6484_v48  ;;  %vm2258_vm2 = vcmp.eq.s32.totalorder %v5620_v4, %v6486_v49  ;;  %vm2260_vm3 = vcmp.eq.s32.totalorder %v5623_v5, %v6486_v49 }
 0x197   :  { %v1088_v6 = vpop.f32.mrf.mxu2  ;;  %v993_v39 = vpop.f32.mrf.mxu0  ;;  %4967 = vmatpush.bf16.msk.msra.mxu3 %vm4966_vm9, %v5572_v12  ;;  %vm4934_vm15 = vmpackc.low %vm2265_vm8, %vm2263_vm7  ;;  %vm2259_vm4 = vcmp.eq.s32.totalorder %v5620_v4, %v6489_v56  ;;  %vm2261_vm6 = vcmp.eq.s32.totalorder %v5623_v5, %v6489_v56  ;;  %vm2368_vm8 = vcmp.eq.s32.totalorder %v5655_v13, %v6482_v47  ;;  %vm2370_vm9 = vcmp.eq.s32.totalorder %v5658_v14, %v6482_v47 }
 0x198   :  { %v1172_v60 = vmul.f32 %v1088_v6, %v990_v54  ;;  %v1137_v61 = vpop.f32.mrf.mxu3  ;;  %v1042_v32 = vpop.f32.mrf.mxu1  ;;  %4935 = vmatpush.bf16.msk.msra.mxu1 %vm4934_vm15, %v5572_v12  ;;  %vm4952_vm0 = vmpackc.low %vm2374_vm11, %vm2372_vm10  ;;  %vm2369_vm10 = vcmp.eq.s32.totalorder %v5655_v13, %v6484_v48  ;;  %vm2371_vm12 = vcmp.eq.s32.totalorder %v5658_v14, %v6484_v48  ;;  %vm2256_vm15 = vcmp.eq.s32.totalorder %v5658_v14, %v6486_v49 }
 0x199   :  { %v1173_v33 = vmul.f32 %v1137_v61, %v1039_v58  ;;  %v716_v61 = vrot.slane %v6314_v44, 4  ;;  %vm4968_vm1 = vmpackc.low %vm2375_vm14, %vm2373_vm13  ;;  %vm2254_vm14 = vcmp.eq.s32.totalorder %v5655_v13, %v6486_v49 }
 0x19a   :  { %v1192_v62 = vadd.f32 %v1191_v38, %v1172_v60  ;;  %1494 = vmatmul.bf16.gmra.mxu0 %v6471_v43  ;;  %v695_v60 = vrot.slane %v6309_v29, 4  ;;  %4953 = vmatpush.bf16.msk.msra.mxu2 %vm4952_vm0, %v5572_v12  ;;  %vm4920_vm5 = vmpackc.low %vm2260_vm3, %vm2258_vm2  ;;  %vm2255_vm0 = vcmp.eq.s32.totalorder %v5655_v13, %v6489_v56  ;;  %vm2257_vm2 = vcmp.eq.s32.totalorder %v5658_v14, %v6489_v56 }
 0x19b   :  { %v1213_v63 = vadd.f32 %v1212_v42, %v1173_v33  ;;  %1543 = vmatmul.bf16.gmra.mxu1 %v6471_v43  ;;  %4969 = vmatpush.bf16.msk.msra.mxu3 %vm4968_vm1, %v5572_v12  ;;  %vm4936_vm7 = vmpackc.low %vm2261_vm6, %vm2259_vm4  ;;  %vm4236_vm3 = vcmask 1040384   ;;  %vm2366_vm6 = vcmp.eq.s32.totalorder %v5684_v16, %v6482_v47 }
 0x19c   :  { %1592 = vmatmul.bf16.gmra.mxu2 %v6475_v8  ;;  %4921 = vmatpush.bf16.msk.msra.mxu0 %vm4920_vm5, %v5572_v12  ;;  %vm4954_vm11 = vmpackc.low %vm2370_vm9, %vm2368_vm8  ;;  %vm2364_vm5 = vcmp.eq.s32.totalorder %v5681_v15, %v6482_v47  ;;  %vm2367_vm8 = vcmp.eq.s32.totalorder %v5684_v16, %v6484_v48 }
 0x19d   :  { %1641 = vmatmul.bf16.gmra.mxu3 %v6475_v8  ;;  %4937 = vmatpush.bf16.msk.msra.mxu1 %vm4936_vm7, %v5572_v12  ;;  %vm4970_vm13 = vmpackc.low %vm2371_vm12, %vm2369_vm10  ;;  %vm2365_vm7 = vcmp.eq.s32.totalorder %v5681_v15, %v6484_v48  ;;  %vm2252_vm12 = vcmp.eq.s32.totalorder %v5684_v16, %v6486_v49 }
 0x19e   :  { %4955 = vmatpush.bf16.msk.msra.mxu2 %vm4954_vm11, %v5572_v12  ;;  %vm4922_vm1 = vmpackc.low %vm2256_vm15, %vm2254_vm14  ;;  %vm2250_vm11 = vcmp.eq.s32.totalorder %v5681_v15, %v6486_v49  ;;  %vm2253_vm15 = vcmp.eq.s32.totalorder %v5684_v16, %v6489_v56 }
 0x19f   :  { %v1091_v0 = vpop.f32.mrf.mxu2  ;;  %v995_v7 = vpop.f32.mrf.mxu0  ;;  %4971 = vmatpush.bf16.msk.msra.mxu3 %vm4970_vm13, %v5572_v12  ;;  %vm4938_vm4 = vmpackc.low %vm2257_vm2, %vm2255_vm0  ;;  %vm2251_vm13 = vcmp.eq.s32.totalorder %v5681_v15, %v6489_v56  ;;  %vm2362_vm2 = vcmp.eq.s32.totalorder %v5710_v18, %v6482_v47 }
 0x1a0   :  { %v1174_v9 = vmul.f32 %v1091_v0, %v993_v39  ;;  %v1140_v50 = vpop.f32.mrf.mxu3  ;;  %v1044_v11 = vpop.f32.mrf.mxu1  ;;  %4923 = vmatpush.bf16.msk.msra.mxu0 %vm4922_vm1, %v5572_v12  ;;  %vm4956_vm9 = vmpackc.low %vm2366_vm6, %vm2364_vm5  ;;  %vm2360_vm1 = vcmp.eq.s32.totalorder %v5707_v17, %v6482_v47 }
 0x1a1   :  { %v1175_v24 = vmul.f32 %v1140_v50, %v1042_v32  ;;  %4939 = vmatpush.bf16.msk.msra.mxu1 %vm4938_vm4, %v5572_v12  ;;  %vm4972_vm10 = vmpackc.low %vm2367_vm8, %vm2365_vm7  ;;  %vm2363_vm4 = vcmp.eq.s32.totalorder %v5710_v18, %v6484_v48  ;;  %vm2246_vm7 = vcmp.eq.s32.totalorder %v5707_v17, %v6486_v49  ;;  %vm2248_vm8 = vcmp.eq.s32.totalorder %v5710_v18, %v6486_v49 }
 0x1a2   :  { %v1193_v25 = vadd.f32 %v1192_v62, %v1174_v9  ;;  %v696_v62 = vadd.f32 %v695_v60, %v6309_v29  ;;  %v6550_v29 = vld [vmem:[#allocation8] sm:$0xff]  ;;  %4957 = vmatpush.bf16.msk.msra.mxu2 %vm4956_vm9, %v5572_v12  ;;  %vm4924_vm14 = vmpackc.low %vm2252_vm12, %vm2250_vm11  ;;  %vm2247_vm9 = vcmp.eq.s32.totalorder %v5707_v17, %v6489_v56  ;;  %vm2249_vm11 = vcmp.eq.s32.totalorder %v5710_v18, %v6489_v56 }
 0x1a3   :  { %v1214_v26 = vadd.f32 %v1213_v63, %v1175_v24  ;;  %v717_v63 = vadd.f32 %v716_v61, %v6314_v44  ;;  %4973 = vmatpush.bf16.msk.msra.mxu3 %vm4972_vm10, %v5572_v12  ;;  %vm4940_vm0 = vmpackc.low %vm2253_vm15, %vm2251_vm13  ;;  %vm2356_vm13 = vcmp.eq.s32.totalorder %v5733_v19, %v6482_v47  ;;  %vm2357_vm15 = vcmp.eq.s32.totalorder %v5733_v19, %v6484_v48 }
 0x1a4   :  { %4925 = vmatpush.bf16.msk.msra.mxu0 %vm4924_vm14, %v5572_v12  ;;  %vm4958_vm5 = vmpackc.low %vm2362_vm2, %vm2360_vm1  ;;  %vm2358_vm14 = vcmp.eq.s32.totalorder %v5736_v20, %v6482_v47 }
 0x1a5   :  { %4941 = vmatpush.bf16.msk.msra.mxu1 %vm4940_vm0, %v5572_v12  ;;  %vm4926_vm10 = vmpackc.low %vm2248_vm8, %vm2246_vm7  ;;  %vm2359_vm0 = vcmp.eq.s32.totalorder %v5736_v20, %v6484_v48  ;;  %vm2245_vm7 = vcmp.eq.s32.totalorder %v5736_v20, %v6489_v56 }
 0x1a6   :  { %4959 = vmatpush.bf16.msk.msra.mxu2 %vm4958_vm5, %v5572_v12  ;;  %vm4942_vm12 = vmpackc.low %vm2249_vm11, %vm2247_vm9  ;;  %vm2243_vm5 = vcmp.eq.s32.totalorder %v5733_v19, %v6489_v56  ;;  %vm2352_vm9 = vcmp.eq.s32.totalorder %v5759_v21, %v6482_v47  ;;  %vm2353_vm11 = vcmp.eq.s32.totalorder %v5759_v21, %v6484_v48 }
 0x1a7   :  { %v1093_v40 = vpop.f32.mrf.mxu2  ;;  %v998_v41 = vpop.f32.mrf.mxu0  ;;  %vm4960_vm1 = vmpackc.low %vm2358_vm14, %vm2356_vm13 }
 0x1a8   :  { %v1176_v34 = vmul.f32 %v1093_v40, %v995_v7  ;;  %v1142_v35 = vpop.f32.mrf.mxu3  ;;  %v1047_v36 = vpop.f32.mrf.mxu1  ;;  %4927 = vmatpush.bf16.msk.msra.mxu0 %vm4926_vm10, %v5572_v12  ;;  %vm4976_vm2 = vmpackc.low %vm2359_vm0, %vm2357_vm15  ;;  %vm2354_vm10 = vcmp.eq.s32.totalorder %v5762_v22, %v6482_v47  ;;  %vm2238_vm15 = vcmp.eq.s32.totalorder %v5759_v21, %v6486_v49  ;;  %vm2240_vm0 = vcmp.eq.s32.totalorder %v5762_v22, %v6486_v49 }
 0x1a9   :  { %v1177_v37 = vmul.f32 %v1142_v35, %v1044_v11  ;;  %4943 = vmatpush.bf16.msk.msra.mxu1 %vm4942_vm12, %v5572_v12  ;;  %vm4944_vm8 = vmpackc.low %vm2245_vm7, %vm2243_vm5  ;;  %vm2355_vm12 = vcmp.eq.s32.totalorder %v5762_v22, %v6484_v48  ;;  %vm2348_vm5 = vcmp.eq.s32.totalorder %v5611_v1, %v6482_v47  ;;  %vm2349_vm7 = vcmp.eq.s32.totalorder %v5611_v1, %v6484_v48 }
 0x1aa   :  { %v1194_v46 = vadd.f32 %v1193_v25, %v1176_v34  ;;  %1499 = vmatmul.bf16.gmra.mxu0 %v6479_v28  ;;  %v697_v25 = vrot.slane %v696_v62, 2  ;;  %4961 = vmatpush.bf16.msk.msra.mxu2 %vm4960_vm1, %v5572_v12  ;;  %vm4962_vm13 = vmpackc.low %vm2354_vm10, %vm2352_vm9  ;;  %vm2239_vm1 = vcmp.eq.s32.totalorder %v5759_v21, %v6489_v56 }
 0x1ab   :  { %v1215_v54 = vadd.f32 %v1214_v26, %v1177_v37  ;;  %1548 = vmatmul.bf16.gmra.mxu1 %v6479_v28  ;;  %v718_v26 = vrot.slane %v717_v63, 2  ;;  %vm4978_vm14 = vmpackc.low %vm2355_vm12, %vm2353_vm11  ;;  %vm2234_vm11 = vcmp.eq.s32.totalorder %v5611_v1, %v6486_v49  ;;  %vm2236_vm12 = vcmp.eq.s32.totalorder %v5785_v23, %v6486_v49 }
 0x1ac   :  { %1597 = vmatmul.bf16.gmra.mxu2 %v6491_v57  ;;  %v698_v35 = vadd.f32 %v697_v25, %v696_v62 }
 0x1ad   :  { %1646 = vmatmul.bf16.gmra.mxu3 %v6491_v57  ;;  %4945 = vmatpush.bf16.msk.msra.mxu1 %vm4944_vm8, %v5572_v12  ;;  %vm2351_vm8 = vcmp.eq.s32.totalorder %v5785_v23, %v6484_v48 }
 0x1ae   :  { %4963 = vmatpush.bf16.msk.msra.mxu2 %vm4962_vm13, %v5572_v12  ;;  %vm4980_vm10 = vmpackc.low %vm2351_vm8, %vm2349_vm7  ;;  %vm2235_vm13 = vcmp.eq.s32.totalorder %v5611_v1, %v6489_v56 }
 0x1af   :  { %v1096_v58 = vpop.f32.mrf.mxu2  ;;  %v1000_v59 = vpop.f32.mrf.mxu0 }
 0x1b0   :  { %v1178_v38 = vmul.f32 %v1096_v58, %v998_v41  ;;  %v1145_v42 = vpop.f32.mrf.mxu3  ;;  %v1049_v6 = vpop.f32.mrf.mxu1 }
 0x1b1   :  { %v1179_v39 = vmul.f32 %v1145_v42, %v1047_v36  ;;  %v719_v36 = vadd.f32 %v718_v26, %v717_v63 }
 0x1b2   :  { %v1195_v32 = vadd.f32 %v1194_v46, %v1178_v38 }
 0x1b3   :  { %v1216_v33 = vadd.f32 %v1215_v54, %v1179_v39  ;;  %v720_v39 = vrot.slane %v719_v36, 1 }
 0x1b7   :  { %v1098_v0 = vpop.f32.mrf.mxu2  ;;  %v1465_v7 = vpop.f32.mrf.mxu0 }
 0x1b8   :  { %v1180_v9 = vmul.f32 %v1098_v0, %v1000_v59  ;;  %v1147_v50 = vpop.f32.mrf.mxu3  ;;  %v1514_v11 = vpop.f32.mrf.mxu1  ;;  %v721_v0 = vadd.f32 %v720_v39, %v719_v36  ;;  %v6582_v36 = vld [vmem:[#allocation8 + $0x8] sm:$0xff] }
 0x1b9   :  { %v1181_v24 = vmul.f32 %v1147_v50, %v1049_v6  ;;  %v699_v6 = vrot.slane %v698_v35, 1 }
 0x1ba   :  { %v1196_v40 = vadd.f32 %v1195_v32, %v1180_v9  ;;  %1966 = vmatmul.bf16.vlgmr.msrb.gmra.mxu0 %v6311_v30 }
 0x1bb   :  { %v1217_v41 = vadd.f32 %v1216_v33, %v1181_v24  ;;  %2015 = vmatmul.bf16.vlgmr.msrb.gmra.mxu1 %v6311_v30  ;;  %v700_v62 = vadd.f32 %v699_v6, %v698_v35 }
 0x1bc   :  { %v1197_v34 = vrot.slane %v1196_v40, 4  ;;  %2064 = vmatmul.bf16.vlgmr.msrb.gmra.mxu2 %v6550_v29 }
 0x1bd   :  { %v1218_v44 = vrot.slane %v1217_v41, 4  ;;  %2113 = vmatmul.bf16.vlgmr.msrb.gmra.mxu3 %v6550_v29 }
 0x1be   :  { %v1198_v30 = vadd.f32 %v1197_v34, %v1196_v40 }
 0x1bf   :  { %v1219_v37 = vadd.f32 %v1218_v44, %v1217_v41  ;;  %v1563_v27 = vpop.f32.mrf.mxu2  ;;  %v1467_v45 = vpop.f32.mrf.mxu0  ;;  %v6578_v44 = vld [vmem:[#allocation7 + $0x8] sm:$0xff] }
 0x1c0   :  { %v1199_v46 = vrot.slane %v1198_v30, 2  ;;  %v1652_v54 = vmul.f32 %v1563_v27, %v1465_v7  ;;  %v1612_v58 = vpop.f32.mrf.mxu3  ;;  %v1516_v59 = vpop.f32.mrf.mxu1 }
 0x1c1   :  { %v1220_v38 = vrot.slane %v1219_v37, 2  ;;  %v1653_v42 = vmul.f32 %v1612_v58, %v1514_v11 }
 0x1c2   :  { %v1200_v60 = vadd.f32 %v1199_v46, %v1198_v30 }
 0x1c3   :  { %v1221_v61 = vadd.f32 %v1220_v38, %v1219_v37 }
 0x1c4   :  { %v1201_v32 = vrot.slane %v1200_v60, 1 }
 0x1c5   :  { %v1222_v33 = vrot.slane %v1221_v61, 1 }
 0x1c6   :  { %v1202_v63 = vadd.f32 %v1201_v32, %v1200_v60 }
 0x1c7   :  { %v1223_v7 = vadd.f32 %v1222_v33, %v1221_v61  ;;  %v1565_v9 = vpop.f32.mrf.mxu2  ;;  %v1470_v50 = vpop.f32.mrf.mxu0  ;;  %v6606_v33 = vld [vmem:[#allocation7 + $0x10] sm:$0xff] }
 0x1c8   :  { %v6574_v11 = vsel %vm4236_vm3, %v700_v62, %v1202_v63  ;;  %v1654_v24 = vmul.f32 %v1565_v9, %v1467_v45  ;;  %v1614_v25 = vpop.f32.mrf.mxu3  ;;  %v1519_v26 = vpop.f32.mrf.mxu1  ;;  %v6610_v63 = vld [vmem:[#allocation8 + $0x10] sm:$0xff] }
 0x1c9   :  { %v6576_v40 = vsel %vm4236_vm3, %v721_v0, %v1223_v7  ;;  %v1655_v41 = vmul.f32 %v1614_v25, %v1516_v59  ;;  %vm2361_vm3 = vcmp.eq.s32.totalorder %v5707_v17, %v6484_v48 }
 0x1ca   :  { %v1684_v34 = vadd.f32 %v1654_v24, %v1652_v54  ;;  %1971 = vmatmul.bf16.gmra.mxu0 %v6578_v44  ;;  %vm4974_vm6 = vmpackc.low %vm2363_vm4, %vm2361_vm3  ;;  %vm2242_vm3 = vcmp.eq.s32.totalorder %v5733_v19, %v6486_v49  ;;  %vm2244_vm4 = vcmp.eq.s32.totalorder %v5736_v20, %v6486_v49 }
 0x1cb   :  { %v1705_v35 = vadd.f32 %v1655_v41, %v1653_v42  ;;  %2020 = vmatmul.bf16.gmra.mxu1 %v6578_v44  ;;  %4975 = vmatpush.bf16.msk.msra.mxu3 %vm4974_vm6, %v5572_v12  ;;  %vm4928_vm6 = vmpackc.low %vm2244_vm4, %vm2242_vm3  ;;  %vm2241_vm3 = vcmp.eq.s32.totalorder %v5762_v22, %v6489_v56 }
 0x1cc   :  { %2069 = vmatmul.bf16.gmra.mxu2 %v6582_v36  ;;  %4929 = vmatpush.bf16.msk.msra.mxu0 %vm4928_vm6, %v5572_v12  ;;  %vm4946_vm4 = vmpackc.low %vm2241_vm3, %vm2239_vm1  ;;  %vm2350_vm6 = vcmp.eq.s32.totalorder %v5785_v23, %v6482_v47 }
 0x1cd   :  { %2118 = vmatmul.bf16.gmra.mxu3 %v6582_v36  ;;  %4947 = vmatpush.bf16.msk.msra.mxu1 %vm4946_vm4, %v5572_v12  ;;  %vm4964_vm9 = vmpackc.low %vm2350_vm6, %vm2348_vm5 }
 0x1ce   :  { %4965 = vmatpush.bf16.msk.msra.mxu2 %vm4964_vm9, %v5572_v12 }
 0x1cf   :  { %v1568_v30 = vpop.f32.mrf.mxu2  ;;  %v1472_v37 = vpop.f32.mrf.mxu0  ;;  %4977 = vmatpush.bf16.msk.msra.mxu3 %vm4976_vm2, %v5572_v12  ;;  %vm4930_vm2 = vmpackc.low %vm2240_vm0, %vm2238_vm15  ;;  %vm2237_vm15 = vcmp.eq.s32.totalorder %v5785_v23, %v6489_v56 }
 0x1d0   :  { %v1656_v27 = vmul.f32 %v1568_v30, %v1470_v50  ;;  %v1617_v45 = vpop.f32.mrf.mxu3  ;;  %v1521_v46 = vpop.f32.mrf.mxu1  ;;  %4931 = vmatpush.bf16.msk.msra.mxu0 %vm4930_vm2, %v5572_v12  ;;  %vm4948_vm0 = vmpackc.low %vm2237_vm15, %vm2235_vm13 }
 0x1d1   :  { %v1657_v54 = vmul.f32 %v1617_v45, %v1519_v26  ;;  %4949 = vmatpush.bf16.msk.msra.mxu1 %vm4948_vm0, %v5572_v12 }
 0x1d2   :  { %v1685_v58 = vadd.f32 %v1684_v34, %v1656_v27 }
 0x1d3   :  { %v1706_v59 = vadd.f32 %v1705_v35, %v1657_v54  ;;  %4979 = vmatpush.bf16.msk.msra.mxu3 %vm4978_vm14, %v5572_v12  ;;  %vm4932_vm14 = vmpackc.low %vm2236_vm12, %vm2234_vm11 }
 0x1d4   :  { %4933 = vmatpush.bf16.msk.msra.mxu0 %vm4932_vm14, %v5572_v12 }
 0x1d7   :  { %v1570_v38 = vpop.f32.mrf.mxu2  ;;  %v1475_v42 = vpop.f32.mrf.mxu0  ;;  %4981 = vmatpush.bf16.msk.msra.mxu3 %vm4980_vm10, %v5572_v12 }
 0x1d8   :  { %v1658_v6 = vmul.f32 %v1570_v38, %v1472_v37  ;;  %v1619_v39 = vpop.f32.mrf.mxu3  ;;  %v1524_v60 = vpop.f32.mrf.mxu1 }
 0x1d9   :  { %v1659_v61 = vmul.f32 %v1619_v39, %v1521_v46 }
 0x1da   :  { %v1686_v32 = vadd.f32 %v1685_v58, %v1658_v6  ;;  %1976 = vmatmul.bf16.gmra.mxu0 %v6606_v33 }
 0x1db   :  { %v1707_v62 = vadd.f32 %v1706_v59, %v1659_v61  ;;  %2025 = vmatmul.bf16.gmra.mxu1 %v6606_v33 }
 0x1dc   :  { %2074 = vmatmul.bf16.gmra.mxu2 %v6610_v63 }
 0x1dd   :  { %2123 = vmatmul.bf16.gmra.mxu3 %v6610_v63 }
 0x1df   :  { %v1573_v0 = vpop.f32.mrf.mxu2  ;;  %v1477_v7 = vpop.f32.mrf.mxu0 }
 0x1e0   :  { %v1660_v9 = vmul.f32 %v1573_v0, %v1475_v42  ;;  %v1622_v50 = vpop.f32.mrf.mxu3  ;;  %v1526_v24 = vpop.f32.mrf.mxu1 }
 0x1e1   :  { %v1661_v25 = vmul.f32 %v1622_v50, %v1524_v60 }
 0x1e2   :  { %v1687_v26 = vadd.f32 %v1686_v32, %v1660_v9 }
 0x1e3   :  { %v1708_v41 = vadd.f32 %v1707_v62, %v1661_v25 }
 0x1e7   :  { %v1575_v34 = vpop.f32.mrf.mxu2  ;;  %v1480_v35 = vpop.f32.mrf.mxu0 }
 0x1e8   :  { %v1662_v30 = vmul.f32 %v1575_v34, %v1477_v7  ;;  %v1624_v37 = vpop.f32.mrf.mxu3  ;;  %v1529_v27 = vpop.f32.mrf.mxu1 }
 0x1e9   :  { %v1663_v45 = vmul.f32 %v1624_v37, %v1526_v24 }
 0x1ea   :  { %v1688_v46 = vadd.f32 %v1687_v26, %v1662_v30  ;;  %1981 = vmatmul.bf16.gmra.mxu0 %v6387_v53 }
 0x1eb   :  { %v1709_v54 = vadd.f32 %v1708_v41, %v1663_v45  ;;  %2030 = vmatmul.bf16.gmra.mxu1 %v6387_v53 }
 0x1ec   :  { %2079 = vmatmul.bf16.gmra.mxu2 %v6391_v55 }
 0x1ed   :  { %2128 = vmatmul.bf16.gmra.mxu3 %v6391_v55 }
 0x1ef   :  { %v1578_v58 = vpop.f32.mrf.mxu2  ;;  %v1482_v59 = vpop.f32.mrf.mxu0 }
 0x1f0   :  { %v1664_v53 = vmul.f32 %v1578_v58, %v1480_v35  ;;  %v1627_v55 = vpop.f32.mrf.mxu3  ;;  %v1531_v38 = vpop.f32.mrf.mxu1 }
 0x1f1   :  { %v1665_v42 = vmul.f32 %v1627_v55, %v1529_v27 }
 0x1f2   :  { %v1689_v6 = vadd.f32 %v1688_v46, %v1664_v53 }
 0x1f3   :  { %v1710_v39 = vadd.f32 %v1709_v54, %v1665_v42 }
 0x1f7   :  { %v1580_v60 = vpop.f32.mrf.mxu2  ;;  %v1485_v61 = vpop.f32.mrf.mxu0 }
 0x1f8   :  { %v1666_v32 = vmul.f32 %v1580_v60, %v1482_v59  ;;  %v1629_v62 = vpop.f32.mrf.mxu3  ;;  %v1534_v0 = vpop.f32.mrf.mxu1 }
 0x1f9   :  { %v1667_v7 = vmul.f32 %v1629_v62, %v1531_v38 }
 0x1fa   :  { %v1690_v9 = vadd.f32 %v1689_v6, %v1666_v32  ;;  %1986 = vmatmul.bf16.gmra.mxu0 %v6415_v10 }
 0x1fb   :  { %v1711_v50 = vadd.f32 %v1710_v39, %v1667_v7  ;;  %2035 = vmatmul.bf16.gmra.mxu1 %v6415_v10 }
 0x1fc   :  { %2084 = vmatmul.bf16.gmra.mxu2 %v6419_v51 }
 0x1fd   :  { %2133 = vmatmul.bf16.gmra.mxu3 %v6419_v51 }
 0x1ff   :  { %v1583_v24 = vpop.f32.mrf.mxu2  ;;  %v1487_v25 = vpop.f32.mrf.mxu0 }
 0x200   :  { %v1668_v10 = vmul.f32 %v1583_v24, %v1485_v61  ;;  %v1632_v51 = vpop.f32.mrf.mxu3  ;;  %v1536_v26 = vpop.f32.mrf.mxu1 }
 0x201   :  { %v1669_v41 = vmul.f32 %v1632_v51, %v1534_v0 }
 0x202   :  { %v1691_v34 = vadd.f32 %v1690_v9, %v1668_v10 }
 0x203   :  { %v1712_v35 = vadd.f32 %v1711_v50, %v1669_v41 }
 0x207   :  { %v1585_v30 = vpop.f32.mrf.mxu2  ;;  %v1490_v37 = vpop.f32.mrf.mxu0 }
 0x208   :  { %v1670_v27 = vmul.f32 %v1585_v30, %v1487_v25  ;;  %v1634_v45 = vpop.f32.mrf.mxu3  ;;  %v1539_v46 = vpop.f32.mrf.mxu1 }
 0x209   :  { %v1671_v54 = vmul.f32 %v1634_v45, %v1536_v26 }
 0x20a   :  { %v1692_v58 = vadd.f32 %v1691_v34, %v1670_v27  ;;  %1991 = vmatmul.bf16.gmra.mxu0 %v6443_v52  ;;  %v2733_v27 = vld [vmem:[#allocation5 + $0x5] ss:$8 sm:$0x3] }
 0x20b   :  { %v1713_v59 = vadd.f32 %v1712_v35, %v1671_v54  ;;  %2040 = vmatmul.bf16.gmra.mxu1 %v6443_v52 }
 0x20c   :  { %2089 = vmatmul.bf16.gmra.mxu2 %v6447_v31 }
 0x20d   :  { %2138 = vmatmul.bf16.gmra.mxu3 %v6447_v31 }
 0x20f   :  { %v1588_v53 = vpop.f32.mrf.mxu2  ;;  %v1492_v55 = vpop.f32.mrf.mxu0 }
 0x210   :  { %v1672_v52 = vmul.f32 %v1588_v53, %v1490_v37  ;;  %v1637_v31 = vpop.f32.mrf.mxu3  ;;  %v1541_v38 = vpop.f32.mrf.mxu1 }
 0x211   :  { %v1673_v42 = vmul.f32 %v1637_v31, %v1539_v46  ;;  %v6713_v46 = vperm.slane %v2733_v27, 1 }
 0x212   :  { %v1693_v6 = vadd.f32 %v1692_v58, %v1672_v52 }
 0x213   :  { %v1714_v47 = vadd.f32 %v1713_v59, %v1673_v42  ;;  %vm2879_vm3 = vcmp.eq.s32.totalorder %v5614_v2, %v6713_v46  ;;  %vm2881_vm4 = vcmp.eq.s32.totalorder %v5617_v3, %v6713_v46  ;;  %vm2875_vm14 = vcmp.eq.s32.totalorder %v5620_v4, %v6713_v46 }
 0x214   :  { %vm5094_vm10 = vmpackc.low %vm2881_vm4, %vm2879_vm3  ;;  %vm2877_vm15 = vcmp.eq.s32.totalorder %v5623_v5, %v6713_v46 }
 0x215   :  { %5095 = vmatpush.bf16.msk.msrb.mxu3 %vm5094_vm10, %v5572_v12 }
 0x217   :  { %v1590_v48 = vpop.f32.mrf.mxu2  ;;  %v1495_v39 = vpop.f32.mrf.mxu0 }
 0x218   :  { %v1674_v60 = vmul.f32 %v1590_v48, %v1492_v55  ;;  %v1639_v61 = vpop.f32.mrf.mxu3  ;;  %v1544_v32 = vpop.f32.mrf.mxu1 }
 0x219   :  { %v1675_v62 = vmul.f32 %v1639_v61, %v1541_v38 }
 0x21a   :  { %v1694_v0 = vadd.f32 %v1693_v6, %v1674_v60  ;;  %1996 = vmatmul.bf16.gmra.mxu0 %v6471_v43 }
 0x21b   :  { %v1715_v49 = vadd.f32 %v1714_v47, %v1675_v62  ;;  %2045 = vmatmul.bf16.gmra.mxu1 %v6471_v43  ;;  %v2731_v43 = vld [vmem:[#allocation2 + $0x5] ss:$8 sm:$0x3] }
 0x21c   :  { %2094 = vmatmul.bf16.gmra.mxu2 %v6475_v8  ;;  %v6715_v54 = vperm.slane %v2731_v43, 0  ;;  %v6718_v59 = vperm.slane %v2731_v43, 1  ;;  %v6771_v62 = vld [vmem:[#allocation7] sm:$0xff] }
 0x21d   :  { %2143 = vmatmul.bf16.gmra.mxu3 %v6475_v8  ;;  %v6711_v8 = vperm.slane %v2733_v27, 0 }
 0x21e   :  { %vm2764_vm6 = vcmp.eq.s32.totalorder %v5614_v2, %v6715_v54  ;;  %vm2766_vm7 = vcmp.eq.s32.totalorder %v5617_v3, %v6715_v54  ;;  %vm2765_vm8 = vcmp.eq.s32.totalorder %v5614_v2, %v6718_v59  ;;  %vm2767_vm9 = vcmp.eq.s32.totalorder %v5617_v3, %v6718_v59 }
 0x21f   :  { %v1593_v56 = vpop.f32.mrf.mxu2  ;;  %v1497_v7 = vpop.f32.mrf.mxu0  ;;  %vm2878_vm1 = vcmp.eq.s32.totalorder %v5614_v2, %v6711_v8  ;;  %vm2880_vm2 = vcmp.eq.s32.totalorder %v5617_v3, %v6711_v8  ;;  %vm2874_vm11 = vcmp.eq.s32.totalorder %v5620_v4, %v6711_v8  ;;  %vm2876_vm12 = vcmp.eq.s32.totalorder %v5623_v5, %v6711_v8  ;;  %vm5046_vm13 = vmpackc.low %vm2766_vm7, %vm2764_vm6 }
 0x220   :  { %v1676_v9 = vmul.f32 %v1593_v56, %v1495_v39  ;;  %v1642_v50 = vpop.f32.mrf.mxu3  ;;  %v1546_v24 = vpop.f32.mrf.mxu1  ;;  %vm5078_vm5 = vmpackc.low %vm2880_vm2, %vm2878_vm1  ;;  %5047 = vmatpush.bf16.msk.msrb.mxu0 %vm5046_vm13, %v5572_v12  ;;  %vm2760_vm3 = vcmp.eq.s32.totalorder %v5620_v4, %v6715_v54  ;;  %vm2762_vm4 = vcmp.eq.s32.totalorder %v5623_v5, %v6715_v54  ;;  %vm2763_vm7 = vcmp.eq.s32.totalorder %v5623_v5, %v6718_v59 }
 0x221   :  { %v1677_v25 = vmul.f32 %v1642_v50, %v1544_v32  ;;  %5079 = vmatpush.bf16.msk.msrb.mxu2 %vm5078_vm5, %v5572_v12  ;;  %vm5062_vm0 = vmpackc.low %vm2767_vm9, %vm2765_vm8  ;;  %vm2761_vm5 = vcmp.eq.s32.totalorder %v5620_v4, %v6718_v59  ;;  %vm2870_vm9 = vcmp.eq.s32.totalorder %v5655_v13, %v6711_v8  ;;  %vm2872_vm10 = vcmp.eq.s32.totalorder %v5658_v14, %v6711_v8 }
 0x222   :  { %v1695_v10 = vadd.f32 %v1694_v0, %v1676_v9  ;;  %5063 = vmatpush.bf16.msk.msrb.mxu1 %vm5062_vm0, %v5572_v12  ;;  %vm5080_vm1 = vmpackc.low %vm2876_vm12, %vm2874_vm11  ;;  %vm2871_vm11 = vcmp.eq.s32.totalorder %v5655_v13, %v6713_v46  ;;  %vm2873_vm13 = vcmp.eq.s32.totalorder %v5658_v14, %v6713_v46  ;;  %vm2758_vm0 = vcmp.eq.s32.totalorder %v5658_v14, %v6715_v54 }
 0x223   :  { %v1716_v51 = vadd.f32 %v1715_v49, %v1677_v25  ;;  %vm5096_vm2 = vmpackc.low %vm2877_vm15, %vm2875_vm14  ;;  %vm2756_vm15 = vcmp.eq.s32.totalorder %v5655_v13, %v6715_v54 }
 0x224   :  { %5097 = vmatpush.bf16.msk.msrb.mxu3 %vm5096_vm2, %v5572_v12  ;;  %vm5048_vm6 = vmpackc.low %vm2762_vm4, %vm2760_vm3  ;;  %vm2759_vm3 = vcmp.eq.s32.totalorder %v5658_v14, %v6718_v59  ;;  %vm4239_vm4 = vcmask 1041408  }
 0x225   :  { %5081 = vmatpush.bf16.msk.msrb.mxu2 %vm5080_vm1, %v5572_v12  ;;  %5049 = vmatpush.bf16.msk.msrb.mxu0 %vm5048_vm6, %v5572_v12  ;;  %vm5064_vm8 = vmpackc.low %vm2763_vm7, %vm2761_vm5  ;;  %vm2757_vm1 = vcmp.eq.s32.totalorder %v5655_v13, %v6718_v59  ;;  %vm2866_vm6 = vcmp.eq.s32.totalorder %v5681_v15, %v6711_v8  ;;  %vm2868_vm7 = vcmp.eq.s32.totalorder %v5684_v16, %v6711_v8 }
 0x226   :  { %5065 = vmatpush.bf16.msk.msrb.mxu1 %vm5064_vm8, %v5572_v12  ;;  %vm5082_vm12 = vmpackc.low %vm2872_vm10, %vm2870_vm9  ;;  %vm2867_vm8 = vcmp.eq.s32.totalorder %v5681_v15, %v6713_v46  ;;  %vm2869_vm9 = vcmp.eq.s32.totalorder %v5684_v16, %v6713_v46 }
 0x227   :  { %v1595_v26 = vpop.f32.mrf.mxu2  ;;  %v1500_v41 = vpop.f32.mrf.mxu0  ;;  %vm5098_vm14 = vmpackc.low %vm2873_vm13, %vm2871_vm11  ;;  %vm2754_vm13 = vcmp.eq.s32.totalorder %v5684_v16, %v6715_v54 }
 0x228   :  { %v1678_v34 = vmul.f32 %v1595_v26, %v1497_v7  ;;  %v1644_v35 = vpop.f32.mrf.mxu3  ;;  %v1549_v30 = vpop.f32.mrf.mxu1  ;;  %5099 = vmatpush.bf16.msk.msrb.mxu3 %vm5098_vm14, %v5572_v12  ;;  %vm5050_vm2 = vmpackc.low %vm2758_vm0, %vm2756_vm15  ;;  %vm2753_vm14 = vcmp.eq.s32.totalorder %v5681_v15, %v6718_v59  ;;  %vm2755_vm0 = vcmp.eq.s32.totalorder %v5684_v16, %v6718_v59 }
 0x229   :  { %v1679_v37 = vmul.f32 %v1644_v35, %v1546_v24  ;;  %5083 = vmatpush.bf16.msk.msrb.mxu2 %vm5082_vm12, %v5572_v12  ;;  %5051 = vmatpush.bf16.msk.msrb.mxu0 %vm5050_vm2, %v5572_v12  ;;  %vm5066_vm5 = vmpackc.low %vm2759_vm3, %vm2757_vm1  ;;  %vm2752_vm12 = vcmp.eq.s32.totalorder %v5681_v15, %v6715_v54  ;;  %vm2862_vm2 = vcmp.eq.s32.totalorder %v5707_v17, %v6711_v8 }
 0x22a   :  { %v1696_v45 = vadd.f32 %v1695_v10, %v1678_v34  ;;  %2001 = vmatmul.bf16.gmra.mxu0 %v6479_v28  ;;  %5067 = vmatpush.bf16.msk.msrb.mxu1 %vm5066_vm5, %v5572_v12  ;;  %vm5084_vm10 = vmpackc.low %vm2868_vm7, %vm2866_vm6  ;;  %vm2864_vm3 = vcmp.eq.s32.totalorder %v5710_v18, %v6711_v8  ;;  %vm2865_vm5 = vcmp.eq.s32.totalorder %v5710_v18, %v6713_v46 }
 0x22b   :  { %v1717_v58 = vadd.f32 %v1716_v51, %v1679_v37  ;;  %2050 = vmatmul.bf16.gmra.mxu1 %v6479_v28  ;;  %vm5100_vm11 = vmpackc.low %vm2869_vm9, %vm2867_vm8  ;;  %vm2748_vm8 = vcmp.eq.s32.totalorder %v5707_v17, %v6715_v54  ;;  %vm2750_vm9 = vcmp.eq.s32.totalorder %v5710_v18, %v6715_v54 }
 0x22c   :  { %2099 = vmatmul.bf16.gmra.mxu2 %v6491_v57  ;;  %5101 = vmatpush.bf16.msk.msrb.mxu3 %vm5100_vm11, %v5572_v12  ;;  %vm5052_vm15 = vmpackc.low %vm2754_vm13, %vm2752_vm12  ;;  %vm2751_vm12 = vcmp.eq.s32.totalorder %v5710_v18, %v6718_v59 }
 0x22d   :  { %2148 = vmatmul.bf16.gmra.mxu3 %v6491_v57  ;;  %5085 = vmatpush.bf16.msk.msrb.mxu2 %vm5084_vm10, %v5572_v12  ;;  %vm5068_vm1 = vmpackc.low %vm2755_vm0, %vm2753_vm14  ;;  %vm2749_vm10 = vcmp.eq.s32.totalorder %v5707_v17, %v6718_v59  ;;  %vm2858_vm14 = vcmp.eq.s32.totalorder %v5733_v19, %v6711_v8  ;;  %vm2859_vm0 = vcmp.eq.s32.totalorder %v5733_v19, %v6713_v46 }
 0x22e   :  { %5053 = vmatpush.bf16.msk.msrb.mxu0 %vm5052_vm15, %v5572_v12  ;;  %5069 = vmatpush.bf16.msk.msrb.mxu1 %vm5068_vm1, %v5572_v12  ;;  %vm5086_vm6 = vmpackc.low %vm2864_vm3, %vm2862_vm2  ;;  %vm2860_vm15 = vcmp.eq.s32.totalorder %v5736_v20, %v6711_v8  ;;  %vm2861_vm1 = vcmp.eq.s32.totalorder %v5736_v20, %v6713_v46 }
 0x22f   :  { %v1598_v28 = vpop.f32.mrf.mxu2  ;;  %v1502_v57 = vpop.f32.mrf.mxu0  ;;  %vm5054_vm11 = vmpackc.low %vm2750_vm9, %vm2748_vm8  ;;  %vm2747_vm8 = vcmp.eq.s32.totalorder %v5736_v20, %v6718_v59 }
 0x230   :  { %v1680_v53 = vmul.f32 %v1598_v28, %v1500_v41  ;;  %v1647_v55 = vpop.f32.mrf.mxu3  ;;  %v1551_v52 = vpop.f32.mrf.mxu1  ;;  %vm5070_vm13 = vmpackc.low %vm2751_vm12, %vm2749_vm10  ;;  %vm2854_vm10 = vcmp.eq.s32.totalorder %v5759_v21, %v6711_v8  ;;  %vm2855_vm12 = vcmp.eq.s32.totalorder %v5759_v21, %v6713_v46 }
 0x231   :  { %v1681_v31 = vmul.f32 %v1647_v55, %v1549_v30  ;;  %5087 = vmatpush.bf16.msk.msrb.mxu2 %vm5086_vm6, %v5572_v12  ;;  %vm5088_vm2 = vmpackc.low %vm2860_vm15, %vm2858_vm14  ;;  %vm2745_vm6 = vcmp.eq.s32.totalorder %v5733_v19, %v6718_v59 }
 0x232   :  { %v1697_v38 = vadd.f32 %v1696_v45, %v1680_v53  ;;  %5055 = vmatpush.bf16.msk.msrb.mxu0 %vm5054_vm11, %v5572_v12  ;;  %5071 = vmatpush.bf16.msk.msrb.mxu1 %vm5070_vm13, %v5572_v12  ;;  %vm5104_vm3 = vmpackc.low %vm2861_vm1, %vm2859_vm0  ;;  %vm2856_vm11 = vcmp.eq.s32.totalorder %v5762_v22, %v6711_v8  ;;  %vm2857_vm13 = vcmp.eq.s32.totalorder %v5762_v22, %v6713_v46 }
 0x233   :  { %v1718_v42 = vadd.f32 %v1717_v58, %v1681_v31  ;;  %vm5072_vm9 = vmpackc.low %vm2747_vm8, %vm2745_vm6  ;;  %vm2740_vm0 = vcmp.eq.s32.totalorder %v5759_v21, %v6715_v54  ;;  %vm2742_vm1 = vcmp.eq.s32.totalorder %v5762_v22, %v6715_v54  ;;  %vm2850_vm6 = vcmp.eq.s32.totalorder %v5611_v1, %v6711_v8 }
 0x234   :  { %vm5090_vm14 = vmpackc.low %vm2856_vm11, %vm2854_vm10  ;;  %vm2851_vm8 = vcmp.eq.s32.totalorder %v5611_v1, %v6713_v46 }
 0x235   :  { %5089 = vmatpush.bf16.msk.msrb.mxu2 %vm5088_vm2, %v5572_v12  ;;  %vm5106_vm15 = vmpackc.low %vm2857_vm13, %vm2855_vm12  ;;  %vm2741_vm2 = vcmp.eq.s32.totalorder %v5759_v21, %v6718_v59  ;;  %vm2736_vm12 = vcmp.eq.s32.totalorder %v5611_v1, %v6715_v54  ;;  %vm2738_vm13 = vcmp.eq.s32.totalorder %v5785_v23, %v6715_v54 }
 0x236   :  { %5073 = vmatpush.bf16.msk.msrb.mxu1 %vm5072_vm9, %v5572_v12  ;;  %vm2853_vm9 = vcmp.eq.s32.totalorder %v5785_v23, %v6713_v46 }
 0x237   :  { %v1600_v6 = vpop.f32.mrf.mxu2  ;;  %v1967_v47 = vpop.f32.mrf.mxu0  ;;  %vm5108_vm11 = vmpackc.low %vm2853_vm9, %vm2851_vm8 }
 0x238   :  { %v1682_v48 = vmul.f32 %v1600_v6, %v1502_v57  ;;  %v1649_v39 = vpop.f32.mrf.mxu3  ;;  %v2016_v60 = vpop.f32.mrf.mxu1 }
 0x239   :  { %v1683_v61 = vmul.f32 %v1649_v39, %v1551_v52  ;;  %5091 = vmatpush.bf16.msk.msrb.mxu2 %vm5090_vm14, %v5572_v12  ;;  %vm2737_vm14 = vcmp.eq.s32.totalorder %v5611_v1, %v6718_v59 }
 0x23a   :  { %v1698_v32 = vadd.f32 %v1697_v38, %v1682_v48  ;;  %2468 = vmatmul.bf16.vlgmr.msra.gmra.mxu0 %v6771_v62 }
 0x23b   :  { %v1719_v0 = vadd.f32 %v1718_v42, %v1683_v61  ;;  %2517 = vmatmul.bf16.vlgmr.msra.gmra.mxu1 %v6771_v62 }
 0x23c   :  { %v1699_v49 = vrot.slane %v1698_v32, 4  ;;  %2566 = vmatmul.bf16.vlgmr.msra.gmra.mxu2 %v6550_v29 }
 0x23d   :  { %v1720_v56 = vrot.slane %v1719_v0, 4  ;;  %2615 = vmatmul.bf16.vlgmr.msra.gmra.mxu3 %v6550_v29 }
 0x23e   :  { %v1700_v7 = vadd.f32 %v1699_v49, %v1698_v32 }
 0x23f   :  { %v1721_v9 = vadd.f32 %v1720_v56, %v1719_v0  ;;  %v2065_v50 = vpop.f32.mrf.mxu2  ;;  %v1969_v24 = vpop.f32.mrf.mxu0 }
 0x240   :  { %v1701_v29 = vrot.slane %v1700_v7, 2  ;;  %v2154_v25 = vmul.f32 %v2065_v50, %v1967_v47  ;;  %v2114_v10 = vpop.f32.mrf.mxu3  ;;  %v2018_v51 = vpop.f32.mrf.mxu1 }
 0x241   :  { %v1722_v26 = vrot.slane %v1721_v9, 2  ;;  %v2155_v41 = vmul.f32 %v2114_v10, %v2016_v60 }
 0x242   :  { %v1702_v34 = vadd.f32 %v1701_v29, %v1700_v7 }
 0x243   :  { %v1723_v35 = vadd.f32 %v1722_v26, %v1721_v9 }
 0x244   :  { %v1703_v30 = vrot.slane %v1702_v34, 1 }
 0x245   :  { %v1724_v37 = vrot.slane %v1723_v35, 1 }
 0x246   :  { %v1704_v27 = vadd.f32 %v1703_v30, %v1702_v34 }
 0x247   :  { %v1725_v43 = vadd.f32 %v1724_v37, %v1723_v35  ;;  %v2067_v45 = vpop.f32.mrf.mxu2  ;;  %v1972_v58 = vpop.f32.mrf.mxu0 }
 0x248   :  { %v6798_v28 = vsel %vm4239_vm4, %v6574_v11, %v1704_v27  ;;  %v2156_v57 = vmul.f32 %v2067_v45, %v1969_v24  ;;  %v2116_v53 = vpop.f32.mrf.mxu3  ;;  %v2021_v55 = vpop.f32.mrf.mxu1 }
 0x249   :  { %v6801_v52 = vsel %vm4239_vm4, %v6576_v40, %v1725_v43  ;;  %v2157_v31 = vmul.f32 %v2116_v53, %v2018_v51  ;;  %vm2863_vm4 = vcmp.eq.s32.totalorder %v5707_v17, %v6713_v46  ;;  %v6851_v43 = vld [vmem:[#allocation7 + $0x18] sm:$0xff] }
 0x24a   :  { %v2186_v38 = vadd.f32 %v2156_v57, %v2154_v25  ;;  %2473 = vmatmul.bf16.gmra.mxu0 %v6578_v44  ;;  %vm5102_vm7 = vmpackc.low %vm2865_vm5, %vm2863_vm4  ;;  %vm2744_vm4 = vcmp.eq.s32.totalorder %v5733_v19, %v6715_v54  ;;  %vm2746_vm5 = vcmp.eq.s32.totalorder %v5736_v20, %v6715_v54  ;;  %v6935_v54 = vld [vmem:[#allocation7 + $0x30] sm:$0xff] }
 0x24b   :  { %v2207_v42 = vadd.f32 %v2157_v31, %v2155_v41  ;;  %2522 = vmatmul.bf16.gmra.mxu1 %v6578_v44  ;;  %5103 = vmatpush.bf16.msk.msrb.mxu3 %vm5102_vm7, %v5572_v12  ;;  %vm5056_vm7 = vmpackc.low %vm2746_vm5, %vm2744_vm4  ;;  %vm2743_vm4 = vcmp.eq.s32.totalorder %v5762_v22, %v6718_v59 }
 0x24c   :  { %2571 = vmatmul.bf16.gmra.mxu2 %v6582_v36  ;;  %5057 = vmatpush.bf16.msk.msrb.mxu0 %vm5056_vm7, %v5572_v12  ;;  %vm5074_vm5 = vmpackc.low %vm2743_vm4, %vm2741_vm2  ;;  %vm2852_vm7 = vcmp.eq.s32.totalorder %v5785_v23, %v6711_v8 }
 0x24d   :  { %2620 = vmatmul.bf16.gmra.mxu3 %v6582_v36  ;;  %5075 = vmatpush.bf16.msk.msrb.mxu1 %vm5074_vm5, %v5572_v12  ;;  %vm5092_vm10 = vmpackc.low %vm2852_vm7, %vm2850_vm6 }
 0x24e   :  { %5093 = vmatpush.bf16.msk.msrb.mxu2 %vm5092_vm10, %v5572_v12 }
 0x24f   :  { %v2070_v11 = vpop.f32.mrf.mxu2  ;;  %v1974_v40 = vpop.f32.mrf.mxu0  ;;  %5105 = vmatpush.bf16.msk.msrb.mxu3 %vm5104_vm3, %v5572_v12  ;;  %vm5058_vm3 = vmpackc.low %vm2742_vm1, %vm2740_vm0  ;;  %vm2739_vm0 = vcmp.eq.s32.totalorder %v5785_v23, %v6718_v59  ;;  %v6939_v59 = vld [vmem:[#allocation8 + $0x30] sm:$0xff] }
 0x250   :  { %v2158_v44 = vmul.f32 %v2070_v11, %v1972_v58  ;;  %v2119_v36 = vpop.f32.mrf.mxu3  ;;  %v2023_v6 = vpop.f32.mrf.mxu1  ;;  %v6855_v58 = vld [vmem:[#allocation8 + $0x18] sm:$0xff]  ;;  %5059 = vmatpush.bf16.msk.msrb.mxu0 %vm5058_vm3, %v5572_v12  ;;  %vm5076_vm1 = vmpackc.low %vm2739_vm0, %vm2737_vm14 }
 0x251   :  { %v2159_v47 = vmul.f32 %v2119_v36, %v2021_v55  ;;  %5077 = vmatpush.bf16.msk.msrb.mxu1 %vm5076_vm1, %v5572_v12 }
 0x252   :  { %v2187_v48 = vadd.f32 %v2186_v38, %v2158_v44 }
 0x253   :  { %v2208_v39 = vadd.f32 %v2207_v42, %v2159_v47  ;;  %5107 = vmatpush.bf16.msk.msrb.mxu3 %vm5106_vm15, %v5572_v12  ;;  %vm5060_vm15 = vmpackc.low %vm2738_vm13, %vm2736_vm12 }
 0x254   :  { %5061 = vmatpush.bf16.msk.msrb.mxu0 %vm5060_vm15, %v5572_v12 }
 0x257   :  { %v2072_v60 = vpop.f32.mrf.mxu2  ;;  %v1977_v61 = vpop.f32.mrf.mxu0  ;;  %5109 = vmatpush.bf16.msk.msrb.mxu3 %vm5108_vm11, %v5572_v12 }
 0x258   :  { %v2160_v32 = vmul.f32 %v2072_v60, %v1974_v40  ;;  %v2121_v0 = vpop.f32.mrf.mxu3  ;;  %v2026_v49 = vpop.f32.mrf.mxu1 }
 0x259   :  { %v2161_v56 = vmul.f32 %v2121_v0, %v2023_v6  ;;  %v6883_v0 = vld [vmem:[#allocation8 + $0x20] sm:$0xff] }
 0x25a   :  { %v2188_v7 = vadd.f32 %v2187_v48, %v2160_v32  ;;  %2478 = vmatmul.bf16.gmra.mxu0 %v6606_v33 }
 0x25b   :  { %v2209_v9 = vadd.f32 %v2208_v39, %v2161_v56  ;;  %2527 = vmatmul.bf16.gmra.mxu1 %v6606_v33 }
 0x25c   :  { %2576 = vmatmul.bf16.gmra.mxu2 %v6610_v63 }
 0x25d   :  { %2625 = vmatmul.bf16.gmra.mxu3 %v6610_v63 }
 0x25f   :  { %v2075_v50 = vpop.f32.mrf.mxu2  ;;  %v1979_v24 = vpop.f32.mrf.mxu0 }
 0x260   :  { %v2162_v33 = vmul.f32 %v2075_v50, %v1977_v61  ;;  %v2124_v63 = vpop.f32.mrf.mxu3  ;;  %v2028_v29 = vpop.f32.mrf.mxu1  ;;  %v6879_v61 = vld [vmem:[#allocation7 + $0x20] sm:$0xff] }
 0x261   :  { %v2163_v25 = vmul.f32 %v2124_v63, %v2026_v49 }
 0x262   :  { %v2189_v10 = vadd.f32 %v2188_v7, %v2162_v33 }
 0x263   :  { %v2210_v51 = vadd.f32 %v2209_v9, %v2163_v25 }
 0x267   :  { %v2077_v26 = vpop.f32.mrf.mxu2  ;;  %v1982_v41 = vpop.f32.mrf.mxu0 }
 0x268   :  { %v2164_v34 = vmul.f32 %v2077_v26, %v1979_v24  ;;  %v2126_v35 = vpop.f32.mrf.mxu3  ;;  %v2031_v30 = vpop.f32.mrf.mxu1 }
 0x269   :  { %v2165_v37 = vmul.f32 %v2126_v35, %v2028_v29  ;;  %v6907_v35 = vld [vmem:[#allocation7 + $0x28] sm:$0xff] }
 0x26a   :  { %v2190_v27 = vadd.f32 %v2189_v10, %v2164_v34  ;;  %2483 = vmatmul.bf16.gmra.mxu0 %v6851_v43 }
 0x26b   :  { %v2211_v45 = vadd.f32 %v2210_v51, %v2165_v37  ;;  %2532 = vmatmul.bf16.gmra.mxu1 %v6851_v43  ;;  %v6911_v37 = vld [vmem:[#allocation8 + $0x28] sm:$0xff] }
 0x26c   :  { %2581 = vmatmul.bf16.gmra.mxu2 %v6855_v58 }
 0x26d   :  { %2630 = vmatmul.bf16.gmra.mxu3 %v6855_v58 }
 0x26f   :  { %v2080_v57 = vpop.f32.mrf.mxu2  ;;  %v1984_v53 = vpop.f32.mrf.mxu0 }
 0x270   :  { %v2166_v55 = vmul.f32 %v2080_v57, %v1982_v41  ;;  %v2129_v31 = vpop.f32.mrf.mxu3  ;;  %v2033_v38 = vpop.f32.mrf.mxu1 }
 0x271   :  { %v2167_v42 = vmul.f32 %v2129_v31, %v2031_v30 }
 0x272   :  { %v2191_v11 = vadd.f32 %v2190_v27, %v2166_v55 }
 0x273   :  { %v2212_v40 = vadd.f32 %v2211_v45, %v2167_v42 }
 0x277   :  { %v2082_v44 = vpop.f32.mrf.mxu2  ;;  %v1987_v36 = vpop.f32.mrf.mxu0 }
 0x278   :  { %v2168_v6 = vmul.f32 %v2082_v44, %v1984_v53  ;;  %v2131_v47 = vpop.f32.mrf.mxu3  ;;  %v2036_v48 = vpop.f32.mrf.mxu1 }
 0x279   :  { %v2169_v39 = vmul.f32 %v2131_v47, %v2033_v38 }
 0x27a   :  { %v2192_v60 = vadd.f32 %v2191_v11, %v2168_v6  ;;  %2488 = vmatmul.bf16.gmra.mxu0 %v6879_v61 }
 0x27b   :  { %v2213_v32 = vadd.f32 %v2212_v40, %v2169_v39  ;;  %2537 = vmatmul.bf16.gmra.mxu1 %v6879_v61 }
 0x27c   :  { %2586 = vmatmul.bf16.gmra.mxu2 %v6883_v0 }
 0x27d   :  { %2635 = vmatmul.bf16.gmra.mxu3 %v6883_v0 }
 0x27f   :  { %v2085_v49 = vpop.f32.mrf.mxu2  ;;  %v1989_v56 = vpop.f32.mrf.mxu0 }
 0x280   :  { %v2170_v7 = vmul.f32 %v2085_v49, %v1987_v36  ;;  %v2134_v9 = vpop.f32.mrf.mxu3  ;;  %v2038_v50 = vpop.f32.mrf.mxu1 }
 0x281   :  { %v2171_v24 = vmul.f32 %v2134_v9, %v2036_v48 }
 0x282   :  { %v2193_v33 = vadd.f32 %v2192_v60, %v2170_v7 }
 0x283   :  { %v2214_v63 = vadd.f32 %v2213_v32, %v2171_v24 }
 0x287   :  { %v2087_v29 = vpop.f32.mrf.mxu2  ;;  %v1992_v25 = vpop.f32.mrf.mxu0 }
 0x288   :  { %v2172_v10 = vmul.f32 %v2087_v29, %v1989_v56  ;;  %v2136_v51 = vpop.f32.mrf.mxu3  ;;  %v2041_v26 = vpop.f32.mrf.mxu1 }
 0x289   :  { %v2173_v41 = vmul.f32 %v2136_v51, %v2038_v50  ;;  %v3233_v51 = vld [vmem:[#allocation2 + $0x6] ss:$8 sm:$0x3] }
 0x28a   :  { %v2194_v34 = vadd.f32 %v2193_v33, %v2172_v10  ;;  %2493 = vmatmul.bf16.gmra.mxu0 %v6907_v35  ;;  %v3235_v10 = vld [vmem:[#allocation5 + $0x6] ss:$8 sm:$0x3] }
 0x28b   :  { %v2215_v30 = vadd.f32 %v2214_v63, %v2173_v41  ;;  %2542 = vmatmul.bf16.gmra.mxu1 %v6907_v35  ;;  %v6943_v41 = vld [vmem:[#allocation7 + $0x38] sm:$0xff] }
 0x28c   :  { %2591 = vmatmul.bf16.gmra.mxu2 %v6911_v37 }
 0x28d   :  { %2640 = vmatmul.bf16.gmra.mxu3 %v6911_v37 }
 0x28f   :  { %v2090_v27 = vpop.f32.mrf.mxu2  ;;  %v1994_v45 = vpop.f32.mrf.mxu0 }
 0x290   :  { %v2174_v57 = vmul.f32 %v2090_v27, %v1992_v25  ;;  %v2139_v53 = vpop.f32.mrf.mxu3  ;;  %v2043_v55 = vpop.f32.mrf.mxu1  ;;  %v6950_v27 = vperm.slane %v3233_v51, 0 }
 0x291   :  { %v2175_v31 = vmul.f32 %v2139_v53, %v2041_v26  ;;  %v6955_v53 = vld [vmem:[#allocation8 + $0x38] sm:$0xff] }
 0x292   :  { %v2195_v38 = vadd.f32 %v2194_v34, %v2174_v57  ;;  %v6946_v34 = vperm.slane %v3235_v10, 0  ;;  %v6953_v57 = vperm.slane %v3233_v51, 1  ;;  %vm3266_vm7 = vcmp.eq.s32.totalorder %v5614_v2, %v6950_v27 }
 0x293   :  { %v2216_v8 = vadd.f32 %v2215_v30, %v2175_v31  ;;  %v6948_v30 = vperm.slane %v3235_v10, 1  ;;  %vm3268_vm8 = vcmp.eq.s32.totalorder %v5617_v3, %v6950_v27 }
 0x294   :  { %vm3380_vm2 = vcmp.eq.s32.totalorder %v5614_v2, %v6946_v34  ;;  %vm3382_vm3 = vcmp.eq.s32.totalorder %v5617_v3, %v6946_v34  ;;  %vm3267_vm9 = vcmp.eq.s32.totalorder %v5614_v2, %v6953_v57  ;;  %vm3269_vm10 = vcmp.eq.s32.totalorder %v5617_v3, %v6953_v57  ;;  %vm5174_vm14 = vmpackc.low %vm3268_vm8, %vm3266_vm7 }
 0x295   :  { %vm3381_vm4 = vcmp.eq.s32.totalorder %v5614_v2, %v6948_v30  ;;  %vm3383_vm5 = vcmp.eq.s32.totalorder %v5617_v3, %v6948_v30  ;;  %vm5206_vm6 = vmpackc.low %vm3382_vm3, %vm3380_vm2  ;;  %vm3376_vm12 = vcmp.eq.s32.totalorder %v5620_v4, %v6946_v34  ;;  %vm3378_vm13 = vcmp.eq.s32.totalorder %v5623_v5, %v6946_v34  ;;  %5175 = vmatpush.bf16.msk.msra.mxu0 %vm5174_vm14, %v5572_v12 }
 0x296   :  { %5207 = vmatpush.bf16.msk.msra.mxu2 %vm5206_vm6, %v5572_v12  ;;  %vm5222_vm11 = vmpackc.low %vm3383_vm5, %vm3381_vm4  ;;  %vm3377_vm15 = vcmp.eq.s32.totalorder %v5620_v4, %v6948_v30  ;;  %vm3379_vm0 = vcmp.eq.s32.totalorder %v5623_v5, %v6948_v30  ;;  %vm3262_vm4 = vcmp.eq.s32.totalorder %v5620_v4, %v6950_v27  ;;  %vm3264_vm5 = vcmp.eq.s32.totalorder %v5623_v5, %v6950_v27 }
 0x297   :  { %v2092_v46 = vpop.f32.mrf.mxu2  ;;  %v1997_v42 = vpop.f32.mrf.mxu0  ;;  %5223 = vmatpush.bf16.msk.msra.mxu3 %vm5222_vm11, %v5572_v12  ;;  %vm5190_vm1 = vmpackc.low %vm3269_vm10, %vm3267_vm9  ;;  %vm3263_vm6 = vcmp.eq.s32.totalorder %v5620_v4, %v6953_v57  ;;  %vm3265_vm8 = vcmp.eq.s32.totalorder %v5623_v5, %v6953_v57  ;;  %vm3372_vm10 = vcmp.eq.s32.totalorder %v5655_v13, %v6946_v34  ;;  %vm3374_vm11 = vcmp.eq.s32.totalorder %v5658_v14, %v6946_v34 }
 0x298   :  { %v2176_v11 = vmul.f32 %v2092_v46, %v1994_v45  ;;  %v2141_v40 = vpop.f32.mrf.mxu3  ;;  %v2046_v44 = vpop.f32.mrf.mxu1  ;;  %5191 = vmatpush.bf16.msk.msra.mxu1 %vm5190_vm1, %v5572_v12  ;;  %vm5208_vm2 = vmpackc.low %vm3378_vm13, %vm3376_vm12  ;;  %vm3373_vm12 = vcmp.eq.s32.totalorder %v5655_v13, %v6948_v30  ;;  %vm3375_vm14 = vcmp.eq.s32.totalorder %v5658_v14, %v6948_v30  ;;  %vm3260_vm1 = vcmp.eq.s32.totalorder %v5658_v14, %v6950_v27 }
 0x299   :  { %v2177_v36 = vmul.f32 %v2141_v40, %v2043_v55  ;;  %vm5224_vm3 = vmpackc.low %vm3379_vm0, %vm3377_vm15  ;;  %vm3258_vm0 = vcmp.eq.s32.totalorder %v5655_v13, %v6950_v27 }
 0x29a   :  { %v2196_v6 = vadd.f32 %v2195_v38, %v2176_v11  ;;  %2498 = vmatmul.bf16.gmra.mxu0 %v6935_v54  ;;  %5209 = vmatpush.bf16.msk.msra.mxu2 %vm5208_vm2, %v5572_v12  ;;  %vm5176_vm7 = vmpackc.low %vm3264_vm5, %vm3262_vm4  ;;  %vm3259_vm2 = vcmp.eq.s32.totalorder %v5655_v13, %v6953_v57  ;;  %vm3261_vm4 = vcmp.eq.s32.totalorder %v5658_v14, %v6953_v57  ;;  %vm4242_vm5 = vcmask 1042432  }
 0x29b   :  { %v2217_v47 = vadd.f32 %v2216_v8, %v2177_v36  ;;  %2547 = vmatmul.bf16.gmra.mxu1 %v6935_v54  ;;  %5225 = vmatpush.bf16.msk.msra.mxu3 %vm5224_vm3, %v5572_v12  ;;  %vm5192_vm9 = vmpackc.low %vm3265_vm8, %vm3263_vm6  ;;  %vm3370_vm8 = vcmp.eq.s32.totalorder %v5684_v16, %v6946_v34 }
 0x29c   :  { %2596 = vmatmul.bf16.gmra.mxu2 %v6939_v59  ;;  %5177 = vmatpush.bf16.msk.msra.mxu0 %vm5176_vm7, %v5572_v12  ;;  %vm5210_vm13 = vmpackc.low %vm3374_vm11, %vm3372_vm10  ;;  %vm3368_vm7 = vcmp.eq.s32.totalorder %v5681_v15, %v6946_v34  ;;  %vm3371_vm10 = vcmp.eq.s32.totalorder %v5684_v16, %v6948_v30 }
 0x29d   :  { %2645 = vmatmul.bf16.gmra.mxu3 %v6939_v59  ;;  %5193 = vmatpush.bf16.msk.msra.mxu1 %vm5192_vm9, %v5572_v12  ;;  %vm5226_vm15 = vmpackc.low %vm3375_vm14, %vm3373_vm12  ;;  %vm3369_vm9 = vcmp.eq.s32.totalorder %v5681_v15, %v6948_v30  ;;  %vm3256_vm14 = vcmp.eq.s32.totalorder %v5684_v16, %v6950_v27 }
 0x29e   :  { %5211 = vmatpush.bf16.msk.msra.mxu2 %vm5210_vm13, %v5572_v12  ;;  %vm5178_vm3 = vmpackc.low %vm3260_vm1, %vm3258_vm0  ;;  %vm3254_vm13 = vcmp.eq.s32.totalorder %v5681_v15, %v6950_v27  ;;  %vm3257_vm1 = vcmp.eq.s32.totalorder %v5684_v16, %v6953_v57 }
 0x29f   :  { %v2095_v48 = vpop.f32.mrf.mxu2  ;;  %v1999_v39 = vpop.f32.mrf.mxu0  ;;  %5227 = vmatpush.bf16.msk.msra.mxu3 %vm5226_vm15, %v5572_v12  ;;  %vm5194_vm6 = vmpackc.low %vm3261_vm4, %vm3259_vm2  ;;  %vm3255_vm15 = vcmp.eq.s32.totalorder %v5681_v15, %v6953_v57  ;;  %vm3366_vm4 = vcmp.eq.s32.totalorder %v5710_v18, %v6946_v34 }
 0x2a0   :  { %v2178_v60 = vmul.f32 %v2095_v48, %v1997_v42  ;;  %v2144_v32 = vpop.f32.mrf.mxu3  ;;  %v2048_v49 = vpop.f32.mrf.mxu1  ;;  %5179 = vmatpush.bf16.msk.msra.mxu0 %vm5178_vm3, %v5572_v12  ;;  %vm5212_vm11 = vmpackc.low %vm3370_vm8, %vm3368_vm7  ;;  %vm3364_vm3 = vcmp.eq.s32.totalorder %v5707_v17, %v6946_v34 }
 0x2a1   :  { %v2179_v56 = vmul.f32 %v2144_v32, %v2046_v44  ;;  %5195 = vmatpush.bf16.msk.msra.mxu1 %vm5194_vm6, %v5572_v12  ;;  %vm5228_vm12 = vmpackc.low %vm3371_vm10, %vm3369_vm9  ;;  %vm3367_vm6 = vcmp.eq.s32.totalorder %v5710_v18, %v6948_v30  ;;  %vm3250_vm9 = vcmp.eq.s32.totalorder %v5707_v17, %v6950_v27  ;;  %vm3252_vm10 = vcmp.eq.s32.totalorder %v5710_v18, %v6950_v27 }
 0x2a2   :  { %v2197_v7 = vadd.f32 %v2196_v6, %v2178_v60  ;;  %5213 = vmatpush.bf16.msk.msra.mxu2 %vm5212_vm11, %v5572_v12  ;;  %vm5180_vm0 = vmpackc.low %vm3256_vm14, %vm3254_vm13  ;;  %vm3251_vm11 = vcmp.eq.s32.totalorder %v5707_v17, %v6953_v57  ;;  %vm3253_vm13 = vcmp.eq.s32.totalorder %v5710_v18, %v6953_v57 }
 0x2a3   :  { %v2218_v9 = vadd.f32 %v2217_v47, %v2179_v56  ;;  %v7010_v56 = vld [vmem:[#allocation8] sm:$0xff]  ;;  %5229 = vmatpush.bf16.msk.msra.mxu3 %vm5228_vm12, %v5572_v12  ;;  %vm5196_vm2 = vmpackc.low %vm3257_vm1, %vm3255_vm15  ;;  %vm3360_vm15 = vcmp.eq.s32.totalorder %v5733_v19, %v6946_v34  ;;  %vm3361_vm1 = vcmp.eq.s32.totalorder %v5733_v19, %v6948_v30 }
 0x2a4   :  { %5181 = vmatpush.bf16.msk.msra.mxu0 %vm5180_vm0, %v5572_v12  ;;  %vm5214_vm7 = vmpackc.low %vm3366_vm4, %vm3364_vm3  ;;  %vm3362_vm0 = vcmp.eq.s32.totalorder %v5736_v20, %v6946_v34 }
 0x2a5   :  { %5197 = vmatpush.bf16.msk.msra.mxu1 %vm5196_vm2, %v5572_v12  ;;  %vm5182_vm12 = vmpackc.low %vm3252_vm10, %vm3250_vm9  ;;  %vm3363_vm2 = vcmp.eq.s32.totalorder %v5736_v20, %v6948_v30  ;;  %vm3249_vm9 = vcmp.eq.s32.totalorder %v5736_v20, %v6953_v57 }
 0x2a6   :  { %5215 = vmatpush.bf16.msk.msra.mxu2 %vm5214_vm7, %v5572_v12  ;;  %vm5198_vm14 = vmpackc.low %vm3253_vm13, %vm3251_vm11  ;;  %vm3247_vm7 = vcmp.eq.s32.totalorder %v5733_v19, %v6953_v57  ;;  %vm3356_vm11 = vcmp.eq.s32.totalorder %v5759_v21, %v6946_v34  ;;  %vm3357_vm13 = vcmp.eq.s32.totalorder %v5759_v21, %v6948_v30 }
 0x2a7   :  { %v2097_v50 = vpop.f32.mrf.mxu2  ;;  %v2002_v24 = vpop.f32.mrf.mxu0  ;;  %vm5216_vm3 = vmpackc.low %vm3362_vm0, %vm3360_vm15 }
 0x2a8   :  { %v2180_v33 = vmul.f32 %v2097_v50, %v1999_v39  ;;  %v2146_v63 = vpop.f32.mrf.mxu3  ;;  %v2051_v29 = vpop.f32.mrf.mxu1  ;;  %5183 = vmatpush.bf16.msk.msra.mxu0 %vm5182_vm12, %v5572_v12  ;;  %vm5232_vm4 = vmpackc.low %vm3363_vm2, %vm3361_vm1  ;;  %vm3358_vm12 = vcmp.eq.s32.totalorder %v5762_v22, %v6946_v34  ;;  %vm3242_vm1 = vcmp.eq.s32.totalorder %v5759_v21, %v6950_v27  ;;  %vm3244_vm2 = vcmp.eq.s32.totalorder %v5762_v22, %v6950_v27 }
 0x2a9   :  { %v2181_v25 = vmul.f32 %v2146_v63, %v2048_v49  ;;  %5199 = vmatpush.bf16.msk.msra.mxu1 %vm5198_vm14, %v5572_v12  ;;  %vm5200_vm10 = vmpackc.low %vm3249_vm9, %vm3247_vm7  ;;  %vm3359_vm14 = vcmp.eq.s32.totalorder %v5762_v22, %v6948_v30  ;;  %vm3352_vm7 = vcmp.eq.s32.totalorder %v5611_v1, %v6946_v34  ;;  %vm3353_vm9 = vcmp.eq.s32.totalorder %v5611_v1, %v6948_v30 }
 0x2aa   :  { %v2198_v26 = vadd.f32 %v2197_v7, %v2180_v33  ;;  %2503 = vmatmul.bf16.gmra.mxu0 %v6943_v41  ;;  %5217 = vmatpush.bf16.msk.msra.mxu2 %vm5216_vm3, %v5572_v12  ;;  %vm5218_vm15 = vmpackc.low %vm3358_vm12, %vm3356_vm11  ;;  %vm3243_vm3 = vcmp.eq.s32.totalorder %v5759_v21, %v6953_v57 }
 0x2ab   :  { %v2219_v45 = vadd.f32 %v2218_v9, %v2181_v25  ;;  %2552 = vmatmul.bf16.gmra.mxu1 %v6943_v41  ;;  %vm5234_vm0 = vmpackc.low %vm3359_vm14, %vm3357_vm13  ;;  %vm3238_vm13 = vcmp.eq.s32.totalorder %v5611_v1, %v6950_v27  ;;  %vm3240_vm14 = vcmp.eq.s32.totalorder %v5785_v23, %v6950_v27 }
 0x2ac   :  { %2601 = vmatmul.bf16.gmra.mxu2 %v6955_v53 }
 0x2ad   :  { %2650 = vmatmul.bf16.gmra.mxu3 %v6955_v53  ;;  %5201 = vmatpush.bf16.msk.msra.mxu1 %vm5200_vm10, %v5572_v12  ;;  %vm3355_vm10 = vcmp.eq.s32.totalorder %v5785_v23, %v6948_v30 }
 0x2ae   :  { %5219 = vmatpush.bf16.msk.msra.mxu2 %vm5218_vm15, %v5572_v12  ;;  %vm5236_vm12 = vmpackc.low %vm3355_vm10, %vm3353_vm9  ;;  %vm3239_vm15 = vcmp.eq.s32.totalorder %v5611_v1, %v6953_v57 }
 0x2af   :  { %v2100_v55 = vpop.f32.mrf.mxu2  ;;  %v2004_v31 = vpop.f32.mrf.mxu0 }
 0x2b0   :  { %v2182_v38 = vmul.f32 %v2100_v55, %v2002_v24  ;;  %v2149_v8 = vpop.f32.mrf.mxu3  ;;  %v2053_v46 = vpop.f32.mrf.mxu1 }
 0x2b1   :  { %v2183_v42 = vmul.f32 %v2149_v8, %v2051_v29 }
 0x2b2   :  { %v2199_v11 = vadd.f32 %v2198_v26, %v2182_v38 }
 0x2b3   :  { %v2220_v40 = vadd.f32 %v2219_v45, %v2183_v42 }
 0x2b7   :  { %v2102_v44 = vpop.f32.mrf.mxu2  ;;  %v2469_v36 = vpop.f32.mrf.mxu0 }
 0x2b8   :  { %v2184_v6 = vmul.f32 %v2102_v44, %v2004_v31  ;;  %v2151_v47 = vpop.f32.mrf.mxu3  ;;  %v2518_v48 = vpop.f32.mrf.mxu1 }
 0x2b9   :  { %v2185_v39 = vmul.f32 %v2151_v47, %v2053_v46 }
 0x2ba   :  { %v2200_v60 = vadd.f32 %v2199_v11, %v2184_v6  ;;  %2970 = vmatmul.bf16.vlgmr.msrb.gmra.mxu0 %v6771_v62 }
 0x2bb   :  { %v2221_v32 = vadd.f32 %v2220_v40, %v2185_v39  ;;  %3019 = vmatmul.bf16.vlgmr.msrb.gmra.mxu1 %v6771_v62  ;;  %v7040_v39 = vld [vmem:[#allocation7 + $0x8] sm:$0xff] }
 0x2bc   :  { %v2201_v49 = vrot.slane %v2200_v60, 4  ;;  %3068 = vmatmul.bf16.vlgmr.msrb.gmra.mxu2 %v7010_v56 }
 0x2bd   :  { %v2222_v7 = vrot.slane %v2221_v32, 4  ;;  %3117 = vmatmul.bf16.vlgmr.msrb.gmra.mxu3 %v7010_v56 }
 0x2be   :  { %v2202_v9 = vadd.f32 %v2201_v49, %v2200_v60 }
 0x2bf   :  { %v2223_v62 = vadd.f32 %v2222_v7, %v2221_v32  ;;  %v2567_v50 = vpop.f32.mrf.mxu2  ;;  %v2471_v24 = vpop.f32.mrf.mxu0  ;;  %v7044_v32 = vld [vmem:[#allocation8 + $0x8] sm:$0xff] }
 0x2c0   :  { %v2203_v33 = vrot.slane %v2202_v9, 2  ;;  %v2656_v63 = vmul.f32 %v2567_v50, %v2469_v36  ;;  %v2616_v29 = vpop.f32.mrf.mxu3  ;;  %v2520_v25 = vpop.f32.mrf.mxu1 }
 0x2c1   :  { %v2224_v10 = vrot.slane %v2223_v62, 2  ;;  %v2657_v51 = vmul.f32 %v2616_v29, %v2518_v48 }
 0x2c2   :  { %v2204_v26 = vadd.f32 %v2203_v33, %v2202_v9 }
 0x2c3   :  { %v2225_v45 = vadd.f32 %v2224_v10, %v2223_v62 }
 0x2c4   :  { %v2205_v55 = vrot.slane %v2204_v26, 1 }
 0x2c5   :  { %v2226_v31 = vrot.slane %v2225_v45, 1 }
 0x2c6   :  { %v2206_v38 = vadd.f32 %v2205_v55, %v2204_v26 }
 0x2c7   :  { %v2227_v8 = vadd.f32 %v2226_v31, %v2225_v45  ;;  %v2569_v46 = vpop.f32.mrf.mxu2  ;;  %v2474_v42 = vpop.f32.mrf.mxu0  ;;  %v7068_v45 = vld [vmem:[#allocation7 + $0x10] sm:$0xff] }
 0x2c8   :  { %v7035_v11 = vsel %vm4242_vm5, %v6798_v28, %v2206_v38  ;;  %v2658_v40 = vmul.f32 %v2569_v46, %v2471_v24  ;;  %v2618_v44 = vpop.f32.mrf.mxu3  ;;  %v2523_v36 = vpop.f32.mrf.mxu1  ;;  %v7072_v31 = vld [vmem:[#allocation8 + $0x10] sm:$0xff] }
 0x2c9   :  { %v7038_v6 = vsel %vm4242_vm5, %v6801_v52, %v2227_v8  ;;  %v2659_v47 = vmul.f32 %v2618_v44, %v2520_v25  ;;  %vm3365_vm5 = vcmp.eq.s32.totalorder %v5707_v17, %v6948_v30 }
 0x2ca   :  { %v2688_v48 = vadd.f32 %v2658_v40, %v2656_v63  ;;  %2975 = vmatmul.bf16.gmra.mxu0 %v7040_v39  ;;  %vm5230_vm8 = vmpackc.low %vm3367_vm6, %vm3365_vm5  ;;  %vm3246_vm5 = vcmp.eq.s32.totalorder %v5733_v19, %v6950_v27  ;;  %vm3248_vm6 = vcmp.eq.s32.totalorder %v5736_v20, %v6950_v27 }
 0x2cb   :  { %v2709_v60 = vadd.f32 %v2659_v47, %v2657_v51  ;;  %3024 = vmatmul.bf16.gmra.mxu1 %v7040_v39  ;;  %5231 = vmatpush.bf16.msk.msra.mxu3 %vm5230_vm8, %v5572_v12  ;;  %vm5184_vm8 = vmpackc.low %vm3248_vm6, %vm3246_vm5  ;;  %vm3245_vm5 = vcmp.eq.s32.totalorder %v5762_v22, %v6953_v57 }
 0x2cc   :  { %3073 = vmatmul.bf16.gmra.mxu2 %v7044_v32  ;;  %5185 = vmatpush.bf16.msk.msra.mxu0 %vm5184_vm8, %v5572_v12  ;;  %vm5202_vm6 = vmpackc.low %vm3245_vm5, %vm3243_vm3  ;;  %vm3354_vm8 = vcmp.eq.s32.totalorder %v5785_v23, %v6946_v34 }
 0x2cd   :  { %3122 = vmatmul.bf16.gmra.mxu3 %v7044_v32  ;;  %5203 = vmatpush.bf16.msk.msra.mxu1 %vm5202_vm6, %v5572_v12  ;;  %vm5220_vm11 = vmpackc.low %vm3354_vm8, %vm3352_vm7 }
 0x2ce   :  { %5221 = vmatpush.bf16.msk.msra.mxu2 %vm5220_vm11, %v5572_v12 }
 0x2cf   :  { %v2572_v28 = vpop.f32.mrf.mxu2  ;;  %v2476_v52 = vpop.f32.mrf.mxu0  ;;  %5233 = vmatpush.bf16.msk.msra.mxu3 %vm5232_vm4, %v5572_v12  ;;  %vm5186_vm4 = vmpackc.low %vm3244_vm2, %vm3242_vm1  ;;  %vm3241_vm1 = vcmp.eq.s32.totalorder %v5785_v23, %v6953_v57 }
 0x2d0   :  { %v2660_v49 = vmul.f32 %v2572_v28, %v2474_v42  ;;  %v2621_v7 = vpop.f32.mrf.mxu3  ;;  %v2525_v9 = vpop.f32.mrf.mxu1  ;;  %5187 = vmatpush.bf16.msk.msra.mxu0 %vm5186_vm4, %v5572_v12  ;;  %vm5204_vm2 = vmpackc.low %vm3241_vm1, %vm3239_vm15 }
 0x2d1   :  { %v2661_v62 = vmul.f32 %v2621_v7, %v2523_v36  ;;  %5205 = vmatpush.bf16.msk.msra.mxu1 %vm5204_vm2, %v5572_v12 }
 0x2d2   :  { %v2689_v50 = vadd.f32 %v2688_v48, %v2660_v49 }
 0x2d3   :  { %v2710_v24 = vadd.f32 %v2709_v60, %v2661_v62  ;;  %5235 = vmatpush.bf16.msk.msra.mxu3 %vm5234_vm0, %v5572_v12  ;;  %vm5188_vm0 = vmpackc.low %vm3240_vm14, %vm3238_vm13 }
 0x2d4   :  { %5189 = vmatpush.bf16.msk.msra.mxu0 %vm5188_vm0, %v5572_v12 }
 0x2d7   :  { %v2574_v33 = vpop.f32.mrf.mxu2  ;;  %v2479_v63 = vpop.f32.mrf.mxu0  ;;  %5237 = vmatpush.bf16.msk.msra.mxu3 %vm5236_vm12, %v5572_v12 }
 0x2d8   :  { %v2662_v29 = vmul.f32 %v2574_v33, %v2476_v52  ;;  %v2623_v25 = vpop.f32.mrf.mxu3  ;;  %v2528_v10 = vpop.f32.mrf.mxu1 }
 0x2d9   :  { %v2663_v51 = vmul.f32 %v2623_v25, %v2525_v9 }
 0x2da   :  { %v2690_v26 = vadd.f32 %v2689_v50, %v2662_v29  ;;  %2980 = vmatmul.bf16.gmra.mxu0 %v7068_v45 }
 0x2db   :  { %v2711_v55 = vadd.f32 %v2710_v24, %v2663_v51  ;;  %3029 = vmatmul.bf16.gmra.mxu1 %v7068_v45 }
 0x2dc   :  { %3078 = vmatmul.bf16.gmra.mxu2 %v7072_v31 }
 0x2dd   :  { %3127 = vmatmul.bf16.gmra.mxu3 %v7072_v31 }
 0x2df   :  { %v2577_v38 = vpop.f32.mrf.mxu2  ;;  %v2481_v8 = vpop.f32.mrf.mxu0 }
 0x2e0   :  { %v2664_v46 = vmul.f32 %v2577_v38, %v2479_v63  ;;  %v2626_v42 = vpop.f32.mrf.mxu3  ;;  %v2530_v40 = vpop.f32.mrf.mxu1 }
 0x2e1   :  { %v2665_v44 = vmul.f32 %v2626_v42, %v2528_v10 }
 0x2e2   :  { %v2691_v36 = vadd.f32 %v2690_v26, %v2664_v46 }
 0x2e3   :  { %v2712_v47 = vadd.f32 %v2711_v55, %v2665_v44 }
 0x2e7   :  { %v2579_v48 = vpop.f32.mrf.mxu2  ;;  %v2484_v60 = vpop.f32.mrf.mxu0 }
 0x2e8   :  { %v2666_v28 = vmul.f32 %v2579_v48, %v2481_v8  ;;  %v2628_v52 = vpop.f32.mrf.mxu3  ;;  %v2533_v49 = vpop.f32.mrf.mxu1 }
 0x2e9   :  { %v2667_v7 = vmul.f32 %v2628_v52, %v2530_v40 }
 0x2ea   :  { %v2692_v9 = vadd.f32 %v2691_v36, %v2666_v28  ;;  %2985 = vmatmul.bf16.gmra.mxu0 %v6851_v43 }
 0x2eb   :  { %v2713_v62 = vadd.f32 %v2712_v47, %v2667_v7  ;;  %3034 = vmatmul.bf16.gmra.mxu1 %v6851_v43 }
 0x2ec   :  { %3083 = vmatmul.bf16.gmra.mxu2 %v6855_v58 }
 0x2ed   :  { %3132 = vmatmul.bf16.gmra.mxu3 %v6855_v58 }
 0x2ef   :  { %v2582_v50 = vpop.f32.mrf.mxu2  ;;  %v2486_v24 = vpop.f32.mrf.mxu0 }
 0x2f0   :  { %v2668_v43 = vmul.f32 %v2582_v50, %v2484_v60  ;;  %v2631_v58 = vpop.f32.mrf.mxu3  ;;  %v2535_v33 = vpop.f32.mrf.mxu1 }
 0x2f1   :  { %v2669_v63 = vmul.f32 %v2631_v58, %v2533_v49 }
 0x2f2   :  { %v2693_v29 = vadd.f32 %v2692_v9, %v2668_v43 }
 0x2f3   :  { %v2714_v25 = vadd.f32 %v2713_v62, %v2669_v63 }
 0x2f7   :  { %v2584_v10 = vpop.f32.mrf.mxu2  ;;  %v2489_v51 = vpop.f32.mrf.mxu0 }
 0x2f8   :  { %v2670_v26 = vmul.f32 %v2584_v10, %v2486_v24  ;;  %v2633_v55 = vpop.f32.mrf.mxu3  ;;  %v2538_v38 = vpop.f32.mrf.mxu1 }
 0x2f9   :  { %v2671_v8 = vmul.f32 %v2633_v55, %v2535_v33 }
 0x2fa   :  { %v2694_v46 = vadd.f32 %v2693_v29, %v2670_v26  ;;  %2990 = vmatmul.bf16.gmra.mxu0 %v6879_v61 }
 0x2fb   :  { %v2715_v42 = vadd.f32 %v2714_v25, %v2671_v8  ;;  %3039 = vmatmul.bf16.gmra.mxu1 %v6879_v61 }
 0x2fc   :  { %3088 = vmatmul.bf16.gmra.mxu2 %v6883_v0 }
 0x2fd   :  { %3137 = vmatmul.bf16.gmra.mxu3 %v6883_v0 }
 0x2ff   :  { %v2587_v40 = vpop.f32.mrf.mxu2  ;;  %v2491_v44 = vpop.f32.mrf.mxu0 }
 0x300   :  { %v2672_v61 = vmul.f32 %v2587_v40, %v2489_v51  ;;  %v2636_v0 = vpop.f32.mrf.mxu3  ;;  %v2540_v36 = vpop.f32.mrf.mxu1 }
 0x301   :  { %v2673_v47 = vmul.f32 %v2636_v0, %v2538_v38 }
 0x302   :  { %v2695_v48 = vadd.f32 %v2694_v46, %v2672_v61 }
 0x303   :  { %v2716_v60 = vadd.f32 %v2715_v42, %v2673_v47 }
 0x307   :  { %v2589_v28 = vpop.f32.mrf.mxu2  ;;  %v2494_v52 = vpop.f32.mrf.mxu0 }
 0x308   :  { %v2674_v49 = vmul.f32 %v2589_v28, %v2491_v44  ;;  %v2638_v7 = vpop.f32.mrf.mxu3  ;;  %v2543_v9 = vpop.f32.mrf.mxu1 }
 0x309   :  { %v2675_v62 = vmul.f32 %v2638_v7, %v2540_v36 }
 0x30a   :  { %v2696_v50 = vadd.f32 %v2695_v48, %v2674_v49  ;;  %2995 = vmatmul.bf16.gmra.mxu0 %v6907_v35  ;;  %v3737_v48 = vld [vmem:[#allocation5 + $0x7] ss:$8 sm:$0x3] }
 0x30b   :  { %v2717_v24 = vadd.f32 %v2716_v60, %v2675_v62  ;;  %3044 = vmatmul.bf16.gmra.mxu1 %v6907_v35  ;;  %v3735_v60 = vld [vmem:[#allocation2 + $0x7] ss:$8 sm:$0x3]  ;;  %v7174_v7 = vperm.slane %v3737_v48, 1 }
 0x30c   :  { %3093 = vmatmul.bf16.gmra.mxu2 %v6911_v37  ;;  %v7178_v62 = vperm.slane %v3735_v60, 1 }
 0x30d   :  { %3142 = vmatmul.bf16.gmra.mxu3 %v6911_v37  ;;  %vm3883_vm5 = vcmp.eq.s32.totalorder %v5614_v2, %v7174_v7  ;;  %vm3885_vm7 = vcmp.eq.s32.totalorder %v5617_v3, %v7174_v7  ;;  %vm3879_vm0 = vcmp.eq.s32.totalorder %v5620_v4, %v7174_v7  ;;  %vm3881_vm2 = vcmp.eq.s32.totalorder %v5623_v5, %v7174_v7 }
 0x30e   :  { %vm5350_vm10 = vmpackc.low %vm3885_vm7, %vm3883_vm5  ;;  %vm3769_vm11 = vcmp.eq.s32.totalorder %v5614_v2, %v7178_v62  ;;  %vm3771_vm12 = vcmp.eq.s32.totalorder %v5617_v3, %v7178_v62  ;;  %vm3765_vm7 = vcmp.eq.s32.totalorder %v5620_v4, %v7178_v62 }
 0x30f   :  { %v2592_v43 = vpop.f32.mrf.mxu2  ;;  %v2496_v58 = vpop.f32.mrf.mxu0  ;;  %5351 = vmatpush.bf16.msk.msrb.mxu3 %vm5350_vm10, %v5572_v12  ;;  %vm5318_vm1 = vmpackc.low %vm3771_vm12, %vm3769_vm11 }
 0x310   :  { %v2676_v35 = vmul.f32 %v2592_v43, %v2494_v52  ;;  %v2641_v37 = vpop.f32.mrf.mxu3  ;;  %v2545_v33 = vpop.f32.mrf.mxu1  ;;  %5319 = vmatpush.bf16.msk.msrb.mxu1 %vm5318_vm1, %v5572_v12 }
 0x311   :  { %v2677_v63 = vmul.f32 %v2641_v37, %v2543_v9 }
 0x312   :  { %v2697_v29 = vadd.f32 %v2696_v50, %v2676_v35 }
 0x313   :  { %v2718_v34 = vadd.f32 %v2717_v24, %v2677_v63 }
 0x317   :  { %v2594_v30 = vpop.f32.mrf.mxu2  ;;  %v2499_v25 = vpop.f32.mrf.mxu0 }
 0x318   :  { %v2678_v10 = vmul.f32 %v2594_v30, %v2496_v58  ;;  %v2643_v51 = vpop.f32.mrf.mxu3  ;;  %v2548_v26 = vpop.f32.mrf.mxu1 }
 0x319   :  { %v2679_v55 = vmul.f32 %v2643_v51, %v2545_v33  ;;  %v7224_v51 = vld [vmem:[#allocation7] sm:$0xff] }
 0x31a   :  { %v2698_v38 = vadd.f32 %v2697_v29, %v2678_v10  ;;  %3000 = vmatmul.bf16.gmra.mxu0 %v6935_v54 }
 0x31b   :  { %v2719_v27 = vadd.f32 %v2718_v34, %v2679_v55  ;;  %3049 = vmatmul.bf16.gmra.mxu1 %v6935_v54  ;;  %v7172_v54 = vperm.slane %v3737_v48, 0 }
 0x31c   :  { %3098 = vmatmul.bf16.gmra.mxu2 %v6939_v59 }
 0x31d   :  { %3147 = vmatmul.bf16.gmra.mxu3 %v6939_v59  ;;  %v7176_v59 = vperm.slane %v3735_v60, 0  ;;  %vm3882_vm3 = vcmp.eq.s32.totalorder %v5614_v2, %v7172_v54  ;;  %vm3884_vm4 = vcmp.eq.s32.totalorder %v5617_v3, %v7172_v54  ;;  %vm3878_vm14 = vcmp.eq.s32.totalorder %v5620_v4, %v7172_v54 }
 0x31e   :  { %vm5334_vm6 = vmpackc.low %vm3884_vm4, %vm3882_vm3  ;;  %vm3880_vm15 = vcmp.eq.s32.totalorder %v5623_v5, %v7172_v54  ;;  %vm3874_vm11 = vcmp.eq.s32.totalorder %v5655_v13, %v7172_v54  ;;  %vm3876_vm12 = vcmp.eq.s32.totalorder %v5658_v14, %v7172_v54 }
 0x31f   :  { %v2597_v57 = vpop.f32.mrf.mxu2  ;;  %v2501_v8 = vpop.f32.mrf.mxu0  ;;  %vm3768_vm8 = vcmp.eq.s32.totalorder %v5614_v2, %v7176_v59  ;;  %vm3770_vm9 = vcmp.eq.s32.totalorder %v5617_v3, %v7176_v59  ;;  %5335 = vmatpush.bf16.msk.msrb.mxu2 %vm5334_vm6, %v5572_v12  ;;  %vm5336_vm3 = vmpackc.low %vm3880_vm15, %vm3878_vm14  ;;  %vm3764_vm5 = vcmp.eq.s32.totalorder %v5620_v4, %v7176_v59  ;;  %vm3766_vm6 = vcmp.eq.s32.totalorder %v5623_v5, %v7176_v59 }
 0x320   :  { %v2680_v46 = vmul.f32 %v2597_v57, %v2499_v25  ;;  %v2646_v42 = vpop.f32.mrf.mxu3  ;;  %v2550_v40 = vpop.f32.mrf.mxu1  ;;  %vm5302_vm13 = vmpackc.low %vm3770_vm9, %vm3768_vm8  ;;  %vm3767_vm9 = vcmp.eq.s32.totalorder %v5623_v5, %v7178_v62  ;;  %vm3877_vm15 = vcmp.eq.s32.totalorder %v5658_v14, %v7174_v7  ;;  %vm3760_vm1 = vcmp.eq.s32.totalorder %v5655_v13, %v7176_v59 }
 0x321   :  { %v2681_v44 = vmul.f32 %v2646_v42, %v2548_v26  ;;  %5303 = vmatpush.bf16.msk.msrb.mxu0 %vm5302_vm13, %v5572_v12  ;;  %vm5352_vm4 = vmpackc.low %vm3881_vm2, %vm3879_vm0  ;;  %vm3875_vm13 = vcmp.eq.s32.totalorder %v5655_v13, %v7174_v7  ;;  %vm3762_vm2 = vcmp.eq.s32.totalorder %v5658_v14, %v7176_v59 }
 0x322   :  { %v2699_v61 = vadd.f32 %v2698_v38, %v2680_v46  ;;  %5353 = vmatpush.bf16.msk.msrb.mxu3 %vm5352_vm4, %v5572_v12  ;;  %vm5304_vm8 = vmpackc.low %vm3766_vm6, %vm3764_vm5  ;;  %vm3763_vm5 = vcmp.eq.s32.totalorder %v5658_v14, %v7178_v62 }
 0x323   :  { %v2720_v0 = vadd.f32 %v2719_v27, %v2681_v44  ;;  %5337 = vmatpush.bf16.msk.msrb.mxu2 %vm5336_vm3, %v5572_v12  ;;  %vm5320_vm10 = vmpackc.low %vm3767_vm9, %vm3765_vm7  ;;  %vm3761_vm3 = vcmp.eq.s32.totalorder %v5655_v13, %v7178_v62  ;;  %vm4245_vm7 = vcmask 1043456   ;;  %vm3872_vm9 = vcmp.eq.s32.totalorder %v5684_v16, %v7172_v54 }
 0x324   :  { %5321 = vmatpush.bf16.msk.msrb.mxu1 %vm5320_vm10, %v5572_v12  ;;  %vm5338_vm14 = vmpackc.low %vm3876_vm12, %vm3874_vm11  ;;  %vm3871_vm10 = vcmp.eq.s32.totalorder %v5681_v15, %v7174_v7  ;;  %vm3873_vm11 = vcmp.eq.s32.totalorder %v5684_v16, %v7174_v7 }
 0x325   :  { %5305 = vmatpush.bf16.msk.msrb.mxu0 %vm5304_vm8, %v5572_v12  ;;  %vm5354_vm0 = vmpackc.low %vm3877_vm15, %vm3875_vm13  ;;  %vm3870_vm8 = vcmp.eq.s32.totalorder %v5681_v15, %v7172_v54  ;;  %vm3758_vm15 = vcmp.eq.s32.totalorder %v5684_v16, %v7176_v59 }
 0x326   :  { %5355 = vmatpush.bf16.msk.msrb.mxu3 %vm5354_vm0, %v5572_v12  ;;  %vm5306_vm4 = vmpackc.low %vm3762_vm2, %vm3760_vm1  ;;  %vm3757_vm0 = vcmp.eq.s32.totalorder %v5681_v15, %v7178_v62  ;;  %vm3759_vm2 = vcmp.eq.s32.totalorder %v5684_v16, %v7178_v62 }
 0x327   :  { %v2599_v36 = vpop.f32.mrf.mxu2  ;;  %v2504_v47 = vpop.f32.mrf.mxu0  ;;  %5339 = vmatpush.bf16.msk.msrb.mxu2 %vm5338_vm14, %v5572_v12  ;;  %vm5322_vm6 = vmpackc.low %vm3763_vm5, %vm3761_vm3  ;;  %vm3756_vm14 = vcmp.eq.s32.totalorder %v5681_v15, %v7176_v59  ;;  %vm3868_vm5 = vcmp.eq.s32.totalorder %v5710_v18, %v7172_v54 }
 0x328   :  { %v2682_v28 = vmul.f32 %v2599_v36, %v2501_v8  ;;  %v2648_v52 = vpop.f32.mrf.mxu3  ;;  %v2553_v49 = vpop.f32.mrf.mxu1  ;;  %5323 = vmatpush.bf16.msk.msrb.mxu1 %vm5322_vm6, %v5572_v12  ;;  %vm5340_vm12 = vmpackc.low %vm3872_vm9, %vm3870_vm8  ;;  %vm3867_vm6 = vcmp.eq.s32.totalorder %v5707_v17, %v7174_v7 }
 0x329   :  { %v2683_v9 = vmul.f32 %v2648_v52, %v2550_v40  ;;  %5307 = vmatpush.bf16.msk.msrb.mxu0 %vm5306_vm4, %v5572_v12  ;;  %vm5356_vm13 = vmpackc.low %vm3873_vm11, %vm3871_vm10  ;;  %vm3866_vm4 = vcmp.eq.s32.totalorder %v5707_v17, %v7172_v54  ;;  %vm3752_vm10 = vcmp.eq.s32.totalorder %v5707_v17, %v7176_v59  ;;  %vm3754_vm11 = vcmp.eq.s32.totalorder %v5710_v18, %v7176_v59 }
 0x32a   :  { %v2700_v50 = vadd.f32 %v2699_v61, %v2682_v28  ;;  %3005 = vmatmul.bf16.gmra.mxu0 %v6943_v41  ;;  %5357 = vmatpush.bf16.msk.msrb.mxu3 %vm5356_vm13, %v5572_v12  ;;  %vm5308_vm1 = vmpackc.low %vm3758_vm15, %vm3756_vm14  ;;  %vm3755_vm14 = vcmp.eq.s32.totalorder %v5710_v18, %v7178_v62 }
 0x32b   :  { %v2721_v24 = vadd.f32 %v2720_v0, %v2683_v9  ;;  %3054 = vmatmul.bf16.gmra.mxu1 %v6943_v41  ;;  %5341 = vmatpush.bf16.msk.msrb.mxu2 %vm5340_vm12, %v5572_v12  ;;  %vm5324_vm3 = vmpackc.low %vm3759_vm2, %vm3757_vm0  ;;  %vm3753_vm12 = vcmp.eq.s32.totalorder %v5707_v17, %v7178_v62  ;;  %vm3862_vm0 = vcmp.eq.s32.totalorder %v5733_v19, %v7172_v54 }
 0x32c   :  { %3103 = vmatmul.bf16.gmra.mxu2 %v6955_v53  ;;  %5325 = vmatpush.bf16.msk.msrb.mxu1 %vm5324_vm3, %v5572_v12  ;;  %vm5342_vm8 = vmpackc.low %vm3868_vm5, %vm3866_vm4  ;;  %vm3863_vm2 = vcmp.eq.s32.totalorder %v5733_v19, %v7174_v7  ;;  %vm3865_vm3 = vcmp.eq.s32.totalorder %v5736_v20, %v7174_v7 }
 0x32d   :  { %3152 = vmatmul.bf16.gmra.mxu3 %v6955_v53  ;;  %5309 = vmatpush.bf16.msk.msrb.mxu0 %vm5308_vm1, %v5572_v12  ;;  %vm5310_vm13 = vmpackc.low %vm3754_vm11, %vm3752_vm10  ;;  %vm3864_vm1 = vcmp.eq.s32.totalorder %v5736_v20, %v7172_v54  ;;  %vm3751_vm10 = vcmp.eq.s32.totalorder %v5736_v20, %v7178_v62 }
 0x32e   :  { %vm5326_vm15 = vmpackc.low %vm3755_vm14, %vm3753_vm12  ;;  %vm3858_vm12 = vcmp.eq.s32.totalorder %v5759_v21, %v7172_v54  ;;  %vm3859_vm14 = vcmp.eq.s32.totalorder %v5759_v21, %v7174_v7 }
 0x32f   :  { %v2602_v2 = vpop.f32.mrf.mxu2  ;;  %v2506_v3 = vpop.f32.mrf.mxu0  ;;  %5343 = vmatpush.bf16.msk.msrb.mxu2 %vm5342_vm8, %v5572_v12  ;;  %vm5344_vm4 = vmpackc.low %vm3864_vm1, %vm3862_vm0  ;;  %vm3749_vm8 = vcmp.eq.s32.totalorder %v5733_v19, %v7178_v62 }
 0x330   :  { %v2684_v41 = vmul.f32 %v2602_v2, %v2504_v47  ;;  %v2651_v53 = vpop.f32.mrf.mxu3  ;;  %v2555_v43 = vpop.f32.mrf.mxu1  ;;  %5327 = vmatpush.bf16.msk.msrb.mxu1 %vm5326_vm15, %v5572_v12  ;;  %vm5360_vm5 = vmpackc.low %vm3865_vm3, %vm3863_vm2  ;;  %vm3861_vm15 = vcmp.eq.s32.totalorder %v5762_v22, %v7174_v7  ;;  %vm3744_vm2 = vcmp.eq.s32.totalorder %v5759_v21, %v7176_v59  ;;  %vm3746_vm3 = vcmp.eq.s32.totalorder %v5762_v22, %v7176_v59 }
 0x331   :  { %v2685_v58 = vmul.f32 %v2651_v53, %v2553_v49  ;;  %5311 = vmatpush.bf16.msk.msrb.mxu0 %vm5310_vm13, %v5572_v12  ;;  %vm5328_vm11 = vmpackc.low %vm3751_vm10, %vm3749_vm8  ;;  %vm3860_vm13 = vcmp.eq.s32.totalorder %v5762_v22, %v7172_v54  ;;  %vm3854_vm8 = vcmp.eq.s32.totalorder %v5611_v1, %v7172_v54  ;;  %vm3855_vm10 = vcmp.eq.s32.totalorder %v5611_v1, %v7174_v7 }
 0x332   :  { %v2701_v35 = vadd.f32 %v2700_v50, %v2684_v41  ;;  %vm5346_vm0 = vmpackc.low %vm3860_vm13, %vm3858_vm12 }
 0x333   :  { %v2722_v37 = vadd.f32 %v2721_v24, %v2685_v58  ;;  %5345 = vmatpush.bf16.msk.msrb.mxu2 %vm5344_vm4, %v5572_v12  ;;  %vm5362_vm1 = vmpackc.low %vm3861_vm15, %vm3859_vm14  ;;  %vm3745_vm4 = vcmp.eq.s32.totalorder %v5759_v21, %v7178_v62  ;;  %vm3740_vm14 = vcmp.eq.s32.totalorder %v5611_v1, %v7176_v59  ;;  %vm3742_vm15 = vcmp.eq.s32.totalorder %v5785_v23, %v7176_v59 }
 0x334   :  { %5329 = vmatpush.bf16.msk.msrb.mxu1 %vm5328_vm11, %v5572_v12  ;;  %vm3857_vm11 = vcmp.eq.s32.totalorder %v5785_v23, %v7174_v7 }
 0x335   :  { %vm5364_vm13 = vmpackc.low %vm3857_vm11, %vm3855_vm10 }
 0x337   :  { %v2604_v33 = vpop.f32.mrf.mxu2  ;;  %v2971_v63 = vpop.f32.mrf.mxu0  ;;  %5347 = vmatpush.bf16.msk.msrb.mxu2 %vm5346_vm0, %v5572_v12  ;;  %vm3741_vm0 = vcmp.eq.s32.totalorder %v5611_v1, %v7178_v62 }
 0x338   :  { %v2686_v29 = vmul.f32 %v2604_v33, %v2506_v3  ;;  %v2653_v34 = vpop.f32.mrf.mxu3  ;;  %v3020_v30 = vpop.f32.mrf.mxu1 }
 0x339   :  { %v2687_v25 = vmul.f32 %v2653_v34, %v2555_v43 }
 0x33a   :  { %v2702_v10 = vadd.f32 %v2701_v35, %v2686_v29  ;;  %3472 = vmatmul.bf16.vlgmr.msra.gmra.mxu0 %v7224_v51 }
 0x33b   :  { %v2723_v4 = vadd.f32 %v2722_v37, %v2687_v25  ;;  %3521 = vmatmul.bf16.vlgmr.msra.gmra.mxu1 %v7224_v51 }
 0x33c   :  { %v2703_v5 = vrot.slane %v2702_v10, 4  ;;  %3570 = vmatmul.bf16.vlgmr.msra.gmra.mxu2 %v7010_v56 }
 0x33d   :  { %v2724_v26 = vrot.slane %v2723_v4, 4  ;;  %3619 = vmatmul.bf16.vlgmr.msra.gmra.mxu3 %v7010_v56 }
 0x33e   :  { %v2704_v55 = vadd.f32 %v2703_v5, %v2702_v10 }
 0x33f   :  { %v2725_v38 = vadd.f32 %v2724_v26, %v2723_v4  ;;  %v3069_v27 = vpop.f32.mrf.mxu2  ;;  %v2973_v57 = vpop.f32.mrf.mxu0 }
 0x340   :  { %v2705_v56 = vrot.slane %v2704_v55, 2  ;;  %v3158_v8 = vmul.f32 %v3069_v27, %v2971_v63  ;;  %v3118_v46 = vpop.f32.mrf.mxu3  ;;  %v3022_v42 = vpop.f32.mrf.mxu1 }
 0x341   :  { %v2726_v40 = vrot.slane %v2725_v38, 2  ;;  %v3159_v44 = vmul.f32 %v3118_v46, %v3020_v30 }
 0x342   :  { %v2706_v61 = vadd.f32 %v2705_v56, %v2704_v55 }
 0x343   :  { %v2727_v0 = vadd.f32 %v2726_v40, %v2725_v38 }
 0x344   :  { %v2707_v36 = vrot.slane %v2706_v61, 1 }
 0x345   :  { %v2728_v47 = vrot.slane %v2727_v0, 1 }
 0x346   :  { %v2708_v48 = vadd.f32 %v2707_v36, %v2706_v61 }
 0x347   :  { %v2729_v60 = vadd.f32 %v2728_v47, %v2727_v0  ;;  %v3071_v28 = vpop.f32.mrf.mxu2  ;;  %v2976_v52 = vpop.f32.mrf.mxu0 }
 0x348   :  { %v3160_v49 = vmul.f32 %v3071_v28, %v2973_v57  ;;  %v3120_v9 = vpop.f32.mrf.mxu3  ;;  %v3025_v50 = vpop.f32.mrf.mxu1  ;;  %v7251_v13 = vsel %vm4245_vm7, %v7035_v11, %v2708_v48 }
 0x349   :  { %v3161_v24 = vmul.f32 %v3120_v9, %v3022_v42  ;;  %v7254_v14 = vsel %vm4245_vm7, %v7038_v6, %v2729_v60  ;;  %vm3869_vm7 = vcmp.eq.s32.totalorder %v5710_v18, %v7174_v7  ;;  %v7304_v42 = vld [vmem:[#allocation7 + $0x18] sm:$0xff] }
 0x34a   :  { %v3190_v2 = vadd.f32 %v3160_v49, %v3158_v8  ;;  %3477 = vmatmul.bf16.gmra.mxu0 %v7040_v39  ;;  %vm5358_vm9 = vmpackc.low %vm3869_vm7, %vm3867_vm6  ;;  %v7308_v18 = vld [vmem:[#allocation8 + $0x18] sm:$0xff]  ;;  %vm3748_vm6 = vcmp.eq.s32.totalorder %v5733_v19, %v7176_v59  ;;  %vm3750_vm7 = vcmp.eq.s32.totalorder %v5736_v20, %v7176_v59  ;;  %v7336_v20 = vld [vmem:[#allocation8 + $0x20] sm:$0xff] }
 0x34b   :  { %v3211_v3 = vadd.f32 %v3161_v24, %v3159_v44  ;;  %3526 = vmatmul.bf16.gmra.mxu1 %v7040_v39  ;;  %5359 = vmatpush.bf16.msk.msrb.mxu3 %vm5358_vm9, %v5572_v12  ;;  %vm5312_vm9 = vmpackc.low %vm3750_vm7, %vm3748_vm6  ;;  %vm3747_vm6 = vcmp.eq.s32.totalorder %v5762_v22, %v7178_v62  ;;  %v7364_v22 = vld [vmem:[#allocation8 + $0x28] sm:$0xff]  ;;  %v7388_v59 = vld [vmem:[#allocation7 + $0x30] sm:$0xff] }
 0x34c   :  { %3575 = vmatmul.bf16.gmra.mxu2 %v7044_v32  ;;  %5313 = vmatpush.bf16.msk.msrb.mxu0 %vm5312_vm9, %v5572_v12  ;;  %vm5330_vm7 = vmpackc.low %vm3747_vm6, %vm3745_vm4  ;;  %vm3856_vm9 = vcmp.eq.s32.totalorder %v5785_v23, %v7172_v54  ;;  %vm4248_vm4 = vcmask 1044480   ;;  %vm4254_vm6 = vcmask 1046528  }
 0x34d   :  { %3624 = vmatmul.bf16.gmra.mxu3 %v7044_v32  ;;  %5331 = vmatpush.bf16.msk.msrb.mxu1 %vm5330_vm7, %v5572_v12  ;;  %vm5348_vm12 = vmpackc.low %vm3856_vm9, %vm3854_vm8 }
 0x34e   :  { %5349 = vmatpush.bf16.msk.msrb.mxu2 %vm5348_vm12, %v5572_v12 }
 0x34f   :  { %v3074_v11 = vpop.f32.mrf.mxu2  ;;  %v2978_v6 = vpop.f32.mrf.mxu0  ;;  %5361 = vmatpush.bf16.msk.msrb.mxu3 %vm5360_vm5, %v5572_v12  ;;  %vm5314_vm5 = vmpackc.low %vm3746_vm3, %vm3744_vm2  ;;  %vm3743_vm2 = vcmp.eq.s32.totalorder %v5785_v23, %v7178_v62  ;;  %v7392_v23 = vld [vmem:[#allocation8 + $0x30] sm:$0xff] }
 0x350   :  { %v3162_v39 = vmul.f32 %v3074_v11, %v2976_v52  ;;  %v3123_v32 = vpop.f32.mrf.mxu3  ;;  %v3027_v41 = vpop.f32.mrf.mxu1  ;;  %5315 = vmatpush.bf16.msk.msrb.mxu0 %vm5314_vm5, %v5572_v12  ;;  %vm5332_vm3 = vmpackc.low %vm3743_vm2, %vm3741_vm0  ;;  %vm4251_vm5 = vcmask 1045504  }
 0x351   :  { %v3163_v53 = vmul.f32 %v3123_v32, %v3025_v50  ;;  %5333 = vmatpush.bf16.msk.msrb.mxu1 %vm5332_vm3, %v5572_v12 }
 0x352   :  { %v3191_v43 = vadd.f32 %v3190_v2, %v3162_v39 }
 0x353   :  { %v3212_v58 = vadd.f32 %v3211_v3, %v3163_v53  ;;  %v7332_v3 = vld [vmem:[#allocation7 + $0x20] sm:$0xff]  ;;  %5363 = vmatpush.bf16.msk.msrb.mxu3 %vm5362_vm1, %v5572_v12  ;;  %vm5316_vm1 = vmpackc.low %vm3742_vm15, %vm3740_vm14 }
 0x354   :  { %5317 = vmatpush.bf16.msk.msrb.mxu0 %vm5316_vm1, %v5572_v12 }
 0x357   :  { %v3076_v35 = vpop.f32.mrf.mxu2  ;;  %v2981_v37 = vpop.f32.mrf.mxu0  ;;  %5365 = vmatpush.bf16.msk.msrb.mxu3 %vm5364_vm13, %v5572_v12 }
 0x358   :  { %v3164_v33 = vmul.f32 %v3076_v35, %v2978_v6  ;;  %v3125_v63 = vpop.f32.mrf.mxu3  ;;  %v3030_v29 = vpop.f32.mrf.mxu1 }
 0x359   :  { %v3165_v34 = vmul.f32 %v3125_v63, %v3027_v41 }
 0x35a   :  { %v3192_v30 = vadd.f32 %v3191_v43, %v3164_v33  ;;  %3482 = vmatmul.bf16.gmra.mxu0 %v7068_v45 }
 0x35b   :  { %v3213_v25 = vadd.f32 %v3212_v58, %v3165_v34  ;;  %3531 = vmatmul.bf16.gmra.mxu1 %v7068_v45 }
 0x35c   :  { %3580 = vmatmul.bf16.gmra.mxu2 %v7072_v31 }
 0x35d   :  { %3629 = vmatmul.bf16.gmra.mxu3 %v7072_v31 }
 0x35f   :  { %v3079_v15 = vpop.f32.mrf.mxu2  ;;  %v2983_v16 = vpop.f32.mrf.mxu0 }
 0x360   :  { %v3166_v45 = vmul.f32 %v3079_v15, %v2981_v37  ;;  %v3128_v31 = vpop.f32.mrf.mxu3  ;;  %v3032_v10 = vpop.f32.mrf.mxu1 }
 0x361   :  { %v3167_v4 = vmul.f32 %v3128_v31, %v3030_v29 }
 0x362   :  { %v3193_v5 = vadd.f32 %v3192_v30, %v3166_v45 }
 0x363   :  { %v3214_v26 = vadd.f32 %v3213_v25, %v3167_v4  ;;  %v7360_v25 = vld [vmem:[#allocation7 + $0x28] sm:$0xff] }
 0x367   :  { %v3081_v55 = vpop.f32.mrf.mxu2  ;;  %v2986_v38 = vpop.f32.mrf.mxu0 }
 0x368   :  { %v3168_v27 = vmul.f32 %v3081_v55, %v2983_v16  ;;  %v3130_v57 = vpop.f32.mrf.mxu3  ;;  %v3035_v56 = vpop.f32.mrf.mxu1 }
 0x369   :  { %v3169_v8 = vmul.f32 %v3130_v57, %v3032_v10 }
 0x36a   :  { %v3194_v46 = vadd.f32 %v3193_v5, %v3168_v27  ;;  %3487 = vmatmul.bf16.gmra.mxu0 %v7304_v42 }
 0x36b   :  { %v3215_v17 = vadd.f32 %v3214_v26, %v3169_v8  ;;  %3536 = vmatmul.bf16.gmra.mxu1 %v7304_v42 }
 0x36c   :  { %3585 = vmatmul.bf16.gmra.mxu2 %v7308_v18 }
 0x36d   :  { %3634 = vmatmul.bf16.gmra.mxu3 %v7308_v18 }
 0x36f   :  { %v3084_v40 = vpop.f32.mrf.mxu2  ;;  %v2988_v44 = vpop.f32.mrf.mxu0 }
 0x370   :  { %v3170_v61 = vmul.f32 %v3084_v40, %v2986_v38  ;;  %v3133_v0 = vpop.f32.mrf.mxu3  ;;  %v3037_v36 = vpop.f32.mrf.mxu1 }
 0x371   :  { %v3171_v47 = vmul.f32 %v3133_v0, %v3035_v56 }
 0x372   :  { %v3195_v48 = vadd.f32 %v3194_v46, %v3170_v61 }
 0x373   :  { %v3216_v60 = vadd.f32 %v3215_v17, %v3171_v47 }
 0x377   :  { %v3086_v28 = vpop.f32.mrf.mxu2  ;;  %v2991_v52 = vpop.f32.mrf.mxu0 }
 0x378   :  { %v3172_v49 = vmul.f32 %v3086_v28, %v2988_v44  ;;  %v3135_v9 = vpop.f32.mrf.mxu3  ;;  %v3040_v50 = vpop.f32.mrf.mxu1 }
 0x379   :  { %v3173_v24 = vmul.f32 %v3135_v9, %v3037_v36 }
 0x37a   :  { %v3196_v2 = vadd.f32 %v3195_v48, %v3172_v49  ;;  %3492 = vmatmul.bf16.gmra.mxu0 %v7332_v3  ;;  %v7396_v49 = vld [vmem:[#allocation7 + $0x38] sm:$0xff] }
 0x37b   :  { %v3217_v19 = vadd.f32 %v3216_v60, %v3173_v24  ;;  %3541 = vmatmul.bf16.gmra.mxu1 %v7332_v3 }
 0x37c   :  { %3590 = vmatmul.bf16.gmra.mxu2 %v7336_v20 }
 0x37d   :  { %3639 = vmatmul.bf16.gmra.mxu3 %v7336_v20 }
 0x37f   :  { %v3089_v11 = vpop.f32.mrf.mxu2  ;;  %v2993_v6 = vpop.f32.mrf.mxu0 }
 0x380   :  { %v3174_v39 = vmul.f32 %v3089_v11, %v2991_v52  ;;  %v3138_v32 = vpop.f32.mrf.mxu3  ;;  %v3042_v41 = vpop.f32.mrf.mxu1 }
 0x381   :  { %v3175_v53 = vmul.f32 %v3138_v32, %v3040_v50  ;;  %v7400_v50 = vld [vmem:[#allocation8 + $0x38] sm:$0xff] }
 0x382   :  { %v3197_v43 = vadd.f32 %v3196_v2, %v3174_v39 }
 0x383   :  { %v3218_v58 = vadd.f32 %v3217_v19, %v3175_v53 }
 0x387   :  { %v3091_v35 = vpop.f32.mrf.mxu2  ;;  %v2996_v37 = vpop.f32.mrf.mxu0 }
 0x388   :  { %v3176_v33 = vmul.f32 %v3091_v35, %v2993_v6  ;;  %v3140_v63 = vpop.f32.mrf.mxu3  ;;  %v3045_v29 = vpop.f32.mrf.mxu1 }
 0x389   :  { %v3177_v34 = vmul.f32 %v3140_v63, %v3042_v41 }
 0x38a   :  { %v3198_v30 = vadd.f32 %v3197_v43, %v3176_v33  ;;  %3497 = vmatmul.bf16.gmra.mxu0 %v7360_v25 }
 0x38b   :  { %v3219_v21 = vadd.f32 %v3218_v58, %v3177_v34  ;;  %3546 = vmatmul.bf16.gmra.mxu1 %v7360_v25 }
 0x38c   :  { %3595 = vmatmul.bf16.gmra.mxu2 %v7364_v22 }
 0x38d   :  { %3644 = vmatmul.bf16.gmra.mxu3 %v7364_v22 }
 0x38f   :  { %v3094_v15 = vpop.f32.mrf.mxu2  ;;  %v2998_v16 = vpop.f32.mrf.mxu0 }
 0x390   :  { %v3178_v45 = vmul.f32 %v3094_v15, %v2996_v37  ;;  %v3143_v31 = vpop.f32.mrf.mxu3  ;;  %v3047_v10 = vpop.f32.mrf.mxu1 }
 0x391   :  { %v3179_v4 = vmul.f32 %v3143_v31, %v3045_v29 }
 0x392   :  { %v3199_v5 = vadd.f32 %v3198_v30, %v3178_v45  ;;  %v5433_v30 = vld [vmem:[#allocation8] sm:$0xff] }
 0x393   :  { %v3220_v54 = vadd.f32 %v3219_v21, %v3179_v4 }
 0x397   :  { %v3096_v7 = vpop.f32.mrf.mxu2  ;;  %v3001_v26 = vpop.f32.mrf.mxu0 }
 0x398   :  { %v3180_v55 = vmul.f32 %v3096_v7, %v2998_v16  ;;  %v3145_v38 = vpop.f32.mrf.mxu3  ;;  %v3050_v27 = vpop.f32.mrf.mxu1 }
 0x399   :  { %v3181_v57 = vmul.f32 %v3145_v38, %v3047_v10 }
 0x39a   :  { %v3200_v56 = vadd.f32 %v3199_v5, %v3180_v55  ;;  %3502 = vmatmul.bf16.gmra.mxu0 %v7388_v59 }
 0x39b   :  { %v3221_v1 = vadd.f32 %v3220_v54, %v3181_v57  ;;  %3551 = vmatmul.bf16.gmra.mxu1 %v7388_v59 }
 0x39c   :  { %3600 = vmatmul.bf16.gmra.mxu2 %v7392_v23 }
 0x39d   :  { %3649 = vmatmul.bf16.gmra.mxu3 %v7392_v23 }
 0x39f   :  { %v3099_v12 = vpop.f32.mrf.mxu2  ;;  %v3003_v62 = vpop.f32.mrf.mxu0 }
 0x3a0   :  { %v3182_v8 = vmul.f32 %v3099_v12, %v3001_v26  ;;  %v3148_v46 = vpop.f32.mrf.mxu3  ;;  %v3052_v17 = vpop.f32.mrf.mxu1 }
 0x3a1   :  { %v3183_v40 = vmul.f32 %v3148_v46, %v3050_v27 }
 0x3a2   :  { %v3201_v44 = vadd.f32 %v3200_v56, %v3182_v8 }
 0x3a3   :  { %v3222_v61 = vadd.f32 %v3221_v1, %v3183_v40 }
 0x3a7   :  { %v3101_v0 = vpop.f32.mrf.mxu2  ;;  %v3006_v36 = vpop.f32.mrf.mxu0 }
 0x3a8   :  { %v3184_v47 = vmul.f32 %v3101_v0, %v3003_v62  ;;  %v3150_v48 = vpop.f32.mrf.mxu3  ;;  %v3055_v60 = vpop.f32.mrf.mxu1  ;;  %v5434_v0 = vld [vmem:[#allocation7 + $0x8] sm:$0xff] }
 0x3a9   :  { %v3185_v28 = vmul.f32 %v3150_v48, %v3052_v17 }
 0x3aa   :  { %v3202_v52 = vadd.f32 %v3201_v44, %v3184_v47  ;;  %3507 = vmatmul.bf16.gmra.mxu0 %v7396_v49  ;;  %v5435_v47 = vld [vmem:[#allocation8 + $0x8] sm:$0xff] }
 0x3ab   :  { %v3223_v9 = vadd.f32 %v3222_v61, %v3185_v28  ;;  %3556 = vmatmul.bf16.gmra.mxu1 %v7396_v49 }
 0x3ac   :  { %3605 = vmatmul.bf16.gmra.mxu2 %v7400_v50 }
 0x3ad   :  { %3654 = vmatmul.bf16.gmra.mxu3 %v7400_v50 }
 0x3af   :  { %v3104_v24 = vpop.f32.mrf.mxu2  ;;  %v3008_v2 = vpop.f32.mrf.mxu0 }
 0x3b0   :  { %v3186_v19 = vmul.f32 %v3104_v24, %v3006_v36  ;;  %v3153_v11 = vpop.f32.mrf.mxu3  ;;  %v3057_v6 = vpop.f32.mrf.mxu1 }
 0x3b1   :  { %v3187_v39 = vmul.f32 %v3153_v11, %v3055_v60 }
 0x3b2   :  { %v3203_v32 = vadd.f32 %v3202_v52, %v3186_v19 }
 0x3b3   :  { %v3224_v41 = vadd.f32 %v3223_v9, %v3187_v39 }
 0x3b7   :  { %v3106_v53 = vpop.f32.mrf.mxu2  ;;  %v3473_v43 = vpop.f32.mrf.mxu0 }
 0x3b8   :  { %v3188_v58 = vmul.f32 %v3106_v53, %v3008_v2  ;;  %v3155_v35 = vpop.f32.mrf.mxu3  ;;  %v3522_v37 = vpop.f32.mrf.mxu1  ;;  %v5436_v53 = vld [vmem:[#allocation7 + $0x10] sm:$0xff] }
 0x3b9   :  { %v3189_v33 = vmul.f32 %v3155_v35, %v3057_v6 }
 0x3ba   :  { %v3204_v63 = vadd.f32 %v3203_v32, %v3188_v58  ;;  %3974 = vmatmul.bf16.vlgmr.msrb.gmra.mxu0 %v7224_v51  ;;  %v5437_v58 = vld [vmem:[#allocation8 + $0x10] sm:$0xff] }
 0x3bb   :  { %v3225_v29 = vadd.f32 %v3224_v41, %v3189_v33  ;;  %4023 = vmatmul.bf16.vlgmr.msrb.gmra.mxu1 %v7224_v51 }
 0x3bc   :  { %v3205_v34 = vrot.slane %v3204_v63, 4  ;;  %4072 = vmatmul.bf16.vlgmr.msrb.gmra.mxu2 %v5433_v30 }
 0x3bd   :  { %v3226_v21 = vrot.slane %v3225_v29, 4  ;;  %4121 = vmatmul.bf16.vlgmr.msrb.gmra.mxu3 %v5433_v30 }
 0x3be   :  { %v3206_v15 = vadd.f32 %v3205_v34, %v3204_v63 }
 0x3bf   :  { %v3227_v16 = vadd.f32 %v3226_v21, %v3225_v29  ;;  %v3571_v45 = vpop.f32.mrf.mxu2  ;;  %v3475_v31 = vpop.f32.mrf.mxu0 }
 0x3c0   :  { %v3207_v10 = vrot.slane %v3206_v15, 2  ;;  %v3660_v4 = vmul.f32 %v3571_v45, %v3473_v43  ;;  %v3620_v5 = vpop.f32.mrf.mxu3  ;;  %v3524_v54 = vpop.f32.mrf.mxu1 }
 0x3c1   :  { %v3228_v7 = vrot.slane %v3227_v16, 2  ;;  %v3661_v26 = vmul.f32 %v3620_v5, %v3522_v37 }
 0x3c2   :  { %v3208_v55 = vadd.f32 %v3207_v10, %v3206_v15 }
 0x3c3   :  { %v3229_v38 = vadd.f32 %v3228_v7, %v3227_v16 }
 0x3c4   :  { %v3209_v27 = vrot.slane %v3208_v55, 1 }
 0x3c5   :  { %v3230_v57 = vrot.slane %v3229_v38, 1 }
 0x3c6   :  { %v3210_v51 = vadd.f32 %v3209_v27, %v3208_v55 }
 0x3c7   :  { %v3231_v56 = vadd.f32 %v3230_v57, %v3229_v38  ;;  %v3573_v1 = vpop.f32.mrf.mxu2  ;;  %v3478_v12 = vpop.f32.mrf.mxu0 }
 0x3c8   :  { %v3662_v62 = vmul.f32 %v3573_v1, %v3475_v31  ;;  %v3622_v8 = vpop.f32.mrf.mxu3  ;;  %v3527_v46 = vpop.f32.mrf.mxu1  ;;  %v7407_v17 = vsel %vm4248_vm4, %v7251_v13, %v3210_v51 }
 0x3c9   :  { %v3663_v40 = vmul.f32 %v3622_v8, %v3524_v54  ;;  %v7410_v44 = vsel %vm4248_vm4, %v7254_v14, %v3231_v56 }
 0x3ca   :  { %v3692_v61 = vadd.f32 %v3662_v62, %v3660_v4  ;;  %3979 = vmatmul.bf16.gmra.mxu0 %v5434_v0 }
 0x3cb   :  { %v3713_v36 = vadd.f32 %v3663_v40, %v3661_v26  ;;  %4028 = vmatmul.bf16.gmra.mxu1 %v5434_v0 }
 0x3cc   :  { %4077 = vmatmul.bf16.gmra.mxu2 %v5435_v47 }
 0x3cd   :  { %4126 = vmatmul.bf16.gmra.mxu3 %v5435_v47 }
 0x3cf   :  { %v3576_v48 = vpop.f32.mrf.mxu2  ;;  %v3480_v60 = vpop.f32.mrf.mxu0 }
 0x3d0   :  { %v3664_v28 = vmul.f32 %v3576_v48, %v3478_v12  ;;  %v3625_v52 = vpop.f32.mrf.mxu3  ;;  %v3529_v9 = vpop.f32.mrf.mxu1 }
 0x3d1   :  { %v3665_v24 = vmul.f32 %v3625_v52, %v3527_v46 }
 0x3d2   :  { %v3693_v13 = vadd.f32 %v3692_v61, %v3664_v28 }
 0x3d3   :  { %v3714_v2 = vadd.f32 %v3713_v36, %v3665_v24 }
 0x3d7   :  { %v3578_v19 = vpop.f32.mrf.mxu2  ;;  %v3483_v11 = vpop.f32.mrf.mxu0 }
 0x3d8   :  { %v3666_v14 = vmul.f32 %v3578_v19, %v3480_v60  ;;  %v3627_v6 = vpop.f32.mrf.mxu3  ;;  %v3532_v39 = vpop.f32.mrf.mxu1 }
 0x3d9   :  { %v3667_v32 = vmul.f32 %v3627_v6, %v3529_v9 }
 0x3da   :  { %v3694_v41 = vadd.f32 %v3693_v13, %v3666_v14  ;;  %3984 = vmatmul.bf16.gmra.mxu0 %v5436_v53 }
 0x3db   :  { %v3715_v43 = vadd.f32 %v3714_v2, %v3667_v32  ;;  %4033 = vmatmul.bf16.gmra.mxu1 %v5436_v53 }
 0x3dc   :  { %4082 = vmatmul.bf16.gmra.mxu2 %v5437_v58 }
 0x3dd   :  { %4131 = vmatmul.bf16.gmra.mxu3 %v5437_v58 }
 0x3df   :  { %v3581_v35 = vpop.f32.mrf.mxu2  ;;  %v3485_v37 = vpop.f32.mrf.mxu0 }
 0x3e0   :  { %v3668_v33 = vmul.f32 %v3581_v35, %v3483_v11  ;;  %v3630_v63 = vpop.f32.mrf.mxu3  ;;  %v3534_v29 = vpop.f32.mrf.mxu1 }
 0x3e1   :  { %v3669_v34 = vmul.f32 %v3630_v63, %v3532_v39 }
 0x3e2   :  { %v3695_v30 = vadd.f32 %v3694_v41, %v3668_v33 }
 0x3e3   :  { %v3716_v21 = vadd.f32 %v3715_v43, %v3669_v34 }
 0x3e7   :  { %v3583_v15 = vpop.f32.mrf.mxu2  ;;  %v3488_v16 = vpop.f32.mrf.mxu0 }
 0x3e8   :  { %v3670_v45 = vmul.f32 %v3583_v15, %v3485_v37  ;;  %v3632_v31 = vpop.f32.mrf.mxu3  ;;  %v3537_v10 = vpop.f32.mrf.mxu1 }
 0x3e9   :  { %v3671_v4 = vmul.f32 %v3632_v31, %v3534_v29 }
 0x3ea   :  { %v3696_v5 = vadd.f32 %v3695_v30, %v3670_v45  ;;  %3989 = vmatmul.bf16.gmra.mxu0 %v7304_v42 }
 0x3eb   :  { %v3717_v54 = vadd.f32 %v3716_v21, %v3671_v4  ;;  %4038 = vmatmul.bf16.gmra.mxu1 %v7304_v42 }
 0x3ec   :  { %4087 = vmatmul.bf16.gmra.mxu2 %v7308_v18 }
 0x3ed   :  { %4136 = vmatmul.bf16.gmra.mxu3 %v7308_v18 }
 0x3ef   :  { %v3586_v7 = vpop.f32.mrf.mxu2  ;;  %v3490_v26 = vpop.f32.mrf.mxu0 }
 0x3f0   :  { %v3672_v55 = vmul.f32 %v3586_v7, %v3488_v16  ;;  %v3635_v38 = vpop.f32.mrf.mxu3  ;;  %v3539_v27 = vpop.f32.mrf.mxu1 }
 0x3f1   :  { %v3673_v57 = vmul.f32 %v3635_v38, %v3537_v10 }
 0x3f2   :  { %v3697_v51 = vadd.f32 %v3696_v5, %v3672_v55 }
 0x3f3   :  { %v3718_v56 = vadd.f32 %v3717_v54, %v3673_v57 }
 0x3f7   :  { %v3588_v1 = vpop.f32.mrf.mxu2  ;;  %v3493_v12 = vpop.f32.mrf.mxu0 }
 0x3f8   :  { %v3674_v62 = vmul.f32 %v3588_v1, %v3490_v26  ;;  %v3637_v8 = vpop.f32.mrf.mxu3  ;;  %v3542_v46 = vpop.f32.mrf.mxu1 }
 0x3f9   :  { %v3675_v40 = vmul.f32 %v3637_v8, %v3539_v27 }
 0x3fa   :  { %v3698_v61 = vadd.f32 %v3697_v51, %v3674_v62  ;;  %3994 = vmatmul.bf16.gmra.mxu0 %v7332_v3 }
 0x3fb   :  { %v3719_v42 = vadd.f32 %v3718_v56, %v3675_v40  ;;  %4043 = vmatmul.bf16.gmra.mxu1 %v7332_v3 }
 0x3fc   :  { %4092 = vmatmul.bf16.gmra.mxu2 %v7336_v20 }
 0x3fd   :  { %4141 = vmatmul.bf16.gmra.mxu3 %v7336_v20 }
 0x3ff   :  { %v3591_v18 = vpop.f32.mrf.mxu2  ;;  %v3495_v0 = vpop.f32.mrf.mxu0 }
 0x400   :  { %v3676_v36 = vmul.f32 %v3591_v18, %v3493_v12  ;;  %v3640_v47 = vpop.f32.mrf.mxu3  ;;  %v3544_v48 = vpop.f32.mrf.mxu1 }
 0x401   :  { %v3677_v60 = vmul.f32 %v3640_v47, %v3542_v46 }
 0x402   :  { %v3699_v28 = vadd.f32 %v3698_v61, %v3676_v36 }
 0x403   :  { %v3720_v52 = vadd.f32 %v3719_v42, %v3677_v60 }
 0x407   :  { %v3593_v9 = vpop.f32.mrf.mxu2  ;;  %v3498_v24 = vpop.f32.mrf.mxu0 }
 0x408   :  { %v3678_v13 = vmul.f32 %v3593_v9, %v3495_v0  ;;  %v3642_v2 = vpop.f32.mrf.mxu3  ;;  %v3547_v19 = vpop.f32.mrf.mxu1 }
 0x409   :  { %v3679_v11 = vmul.f32 %v3642_v2, %v3544_v48 }
 0x40a   :  { %v3700_v14 = vadd.f32 %v3699_v28, %v3678_v13  ;;  %3999 = vmatmul.bf16.gmra.mxu0 %v7360_v25 }
 0x40b   :  { %v3721_v3 = vadd.f32 %v3720_v52, %v3679_v11  ;;  %4048 = vmatmul.bf16.gmra.mxu1 %v7360_v25 }
 0x40c   :  { %4097 = vmatmul.bf16.gmra.mxu2 %v7364_v22 }
 0x40d   :  { %4146 = vmatmul.bf16.gmra.mxu3 %v7364_v22 }
 0x40f   :  { %v3596_v20 = vpop.f32.mrf.mxu2  ;;  %v3500_v6 = vpop.f32.mrf.mxu0 }
 0x410   :  { %v3680_v39 = vmul.f32 %v3596_v20, %v3498_v24  ;;  %v3645_v32 = vpop.f32.mrf.mxu3  ;;  %v3549_v41 = vpop.f32.mrf.mxu1 }
 0x411   :  { %v3681_v53 = vmul.f32 %v3645_v32, %v3547_v19 }
 0x412   :  { %v3701_v43 = vadd.f32 %v3700_v14, %v3680_v39 }
 0x413   :  { %v3722_v58 = vadd.f32 %v3721_v3, %v3681_v53 }
 0x417   :  { %v3598_v35 = vpop.f32.mrf.mxu2  ;;  %v3503_v37 = vpop.f32.mrf.mxu0 }
 0x418   :  { %v3682_v33 = vmul.f32 %v3598_v35, %v3500_v6  ;;  %v3647_v63 = vpop.f32.mrf.mxu3  ;;  %v3552_v29 = vpop.f32.mrf.mxu1 }
 0x419   :  { %v3683_v34 = vmul.f32 %v3647_v63, %v3549_v41 }
 0x41a   :  { %v3702_v30 = vadd.f32 %v3701_v43, %v3682_v33  ;;  %4004 = vmatmul.bf16.gmra.mxu0 %v7388_v59 }
 0x41b   :  { %v3723_v25 = vadd.f32 %v3722_v58, %v3683_v34  ;;  %4053 = vmatmul.bf16.gmra.mxu1 %v7388_v59 }
 0x41c   :  { %4102 = vmatmul.bf16.gmra.mxu2 %v7392_v23 }
 0x41d   :  { %4151 = vmatmul.bf16.gmra.mxu3 %v7392_v23 }
 0x41f   :  { %v3601_v22 = vpop.f32.mrf.mxu2  ;;  %v3505_v21 = vpop.f32.mrf.mxu0 }
 0x420   :  { %v3684_v15 = vmul.f32 %v3601_v22, %v3503_v37  ;;  %v3650_v16 = vpop.f32.mrf.mxu3  ;;  %v3554_v45 = vpop.f32.mrf.mxu1 }
 0x421   :  { %v3685_v31 = vmul.f32 %v3650_v16, %v3552_v29 }
 0x422   :  { %v3703_v10 = vadd.f32 %v3702_v30, %v3684_v15 }
 0x423   :  { %v3724_v4 = vadd.f32 %v3723_v25, %v3685_v31 }
 0x427   :  { %v3603_v5 = vpop.f32.mrf.mxu2  ;;  %v3508_v54 = vpop.f32.mrf.mxu0 }
 0x428   :  { %v3686_v7 = vmul.f32 %v3603_v5, %v3505_v21  ;;  %v3652_v26 = vpop.f32.mrf.mxu3  ;;  %v3557_v55 = vpop.f32.mrf.mxu1 }
 0x429   :  { %v3687_v38 = vmul.f32 %v3652_v26, %v3554_v45 }
 0x42a   :  { %v3704_v27 = vadd.f32 %v3703_v10, %v3686_v7  ;;  %4009 = vmatmul.bf16.gmra.mxu0 %v7396_v49 }
 0x42b   :  { %v3725_v59 = vadd.f32 %v3724_v4, %v3687_v38  ;;  %4058 = vmatmul.bf16.gmra.mxu1 %v7396_v49 }
 0x42c   :  { %4107 = vmatmul.bf16.gmra.mxu2 %v7400_v50 }
 0x42d   :  { %4156 = vmatmul.bf16.gmra.mxu3 %v7400_v50 }
 0x42f   :  { %v3606_v23 = vpop.f32.mrf.mxu2  ;;  %v3510_v57 = vpop.f32.mrf.mxu0 }
 0x430   :  { %v3688_v51 = vmul.f32 %v3606_v23, %v3508_v54  ;;  %v3655_v56 = vpop.f32.mrf.mxu3  ;;  %v3559_v1 = vpop.f32.mrf.mxu1 }
 0x431   :  { %v3689_v12 = vmul.f32 %v3655_v56, %v3557_v55 }
 0x432   :  { %v3705_v62 = vadd.f32 %v3704_v27, %v3688_v51 }
 0x433   :  { %v3726_v8 = vadd.f32 %v3725_v59, %v3689_v12 }
 0x437   :  { %v3608_v46 = vpop.f32.mrf.mxu2  ;;  %v3975_v40 = vpop.f32.mrf.mxu0 }
 0x438   :  { %v3690_v61 = vmul.f32 %v3608_v46, %v3510_v57  ;;  %v3657_v42 = vpop.f32.mrf.mxu3  ;;  %v4024_v18 = vpop.f32.mrf.mxu1 }
 0x439   :  { %v3691_v0 = vmul.f32 %v3657_v42, %v3559_v1 }
 0x43a   :  { %v3706_v36 = vadd.f32 %v3705_v62, %v3690_v61 }
 0x43b   :  { %v3727_v49 = vadd.f32 %v3726_v8, %v3691_v0 }
 0x43c   :  { %v3707_v47 = vrot.slane %v3706_v36, 4 }
 0x43d   :  { %v3728_v48 = vrot.slane %v3727_v49, 4 }
 0x43e   :  { %v3708_v60 = vadd.f32 %v3707_v47, %v3706_v36 }
 0x43f   :  { %v3729_v50 = vadd.f32 %v3728_v48, %v3727_v49  ;;  %v4073_v28 = vpop.f32.mrf.mxu2  ;;  %v3977_v52 = vpop.f32.mrf.mxu0 }
 0x440   :  { %v3709_v9 = vrot.slane %v3708_v60, 2  ;;  %v4162_v24 = vmul.f32 %v4073_v28, %v3975_v40  ;;  %v4122_v13 = vpop.f32.mrf.mxu3  ;;  %v4026_v2 = vpop.f32.mrf.mxu1 }
 0x441   :  { %v3730_v19 = vrot.slane %v3729_v50, 2  ;;  %v4163_v11 = vmul.f32 %v4122_v13, %v4024_v18 }
 0x442   :  { %v3710_v14 = vadd.f32 %v3709_v9, %v3708_v60 }
 0x443   :  { %v3731_v3 = vadd.f32 %v3730_v19, %v3729_v50 }
 0x444   :  { %v3711_v20 = vrot.slane %v3710_v14, 1 }
 0x445   :  { %v3732_v6 = vrot.slane %v3731_v3, 1 }
 0x446   :  { %v3712_v39 = vadd.f32 %v3711_v20, %v3710_v14 }
 0x447   :  { %v3733_v32 = vadd.f32 %v3732_v6, %v3731_v3  ;;  %v4075_v41 = vpop.f32.mrf.mxu2  ;;  %v3980_v53 = vpop.f32.mrf.mxu0 }
 0x448   :  { %v4164_v43 = vmul.f32 %v4075_v41, %v3977_v52  ;;  %v4124_v58 = vpop.f32.mrf.mxu3  ;;  %v4029_v35 = vpop.f32.mrf.mxu1  ;;  %v7433_v37 = vsel %vm4251_vm5, %v7407_v17, %v3712_v39 }
 0x449   :  { %v4165_v33 = vmul.f32 %v4124_v58, %v4026_v2  ;;  %v7436_v63 = vsel %vm4251_vm5, %v7410_v44, %v3733_v32 }
 0x44a   :  { %v4194_v29 = vadd.f32 %v4164_v43, %v4162_v24 }
 0x44b   :  { %v4215_v34 = vadd.f32 %v4165_v33, %v4163_v11 }
 0x44f   :  { %v4078_v30 = vpop.f32.mrf.mxu2  ;;  %v3982_v25 = vpop.f32.mrf.mxu0 }
 0x450   :  { %v4166_v22 = vmul.f32 %v4078_v30, %v3980_v53  ;;  %v4127_v21 = vpop.f32.mrf.mxu3  ;;  %v4031_v15 = vpop.f32.mrf.mxu1 }
 0x451   :  { %v4167_v16 = vmul.f32 %v4127_v21, %v4029_v35 }
 0x452   :  { %v4195_v45 = vadd.f32 %v4194_v29, %v4166_v22 }
 0x453   :  { %v4216_v31 = vadd.f32 %v4215_v34, %v4167_v16 }
 0x457   :  { %v4080_v10 = vpop.f32.mrf.mxu2  ;;  %v3985_v4 = vpop.f32.mrf.mxu0 }
 0x458   :  { %v4168_v5 = vmul.f32 %v4080_v10, %v3982_v25  ;;  %v4129_v54 = vpop.f32.mrf.mxu3  ;;  %v4034_v17 = vpop.f32.mrf.mxu1 }
 0x459   :  { %v4169_v7 = vmul.f32 %v4129_v54, %v4031_v15 }
 0x45a   :  { %v4196_v26 = vadd.f32 %v4195_v45, %v4168_v5 }
 0x45b   :  { %v4217_v55 = vadd.f32 %v4216_v31, %v4169_v7 }
 0x45f   :  { %v4083_v44 = vpop.f32.mrf.mxu2  ;;  %v3987_v38 = vpop.f32.mrf.mxu0 }
 0x460   :  { %v4170_v27 = vmul.f32 %v4083_v44, %v3985_v4  ;;  %v4132_v59 = vpop.f32.mrf.mxu3  ;;  %v4036_v23 = vpop.f32.mrf.mxu1 }
 0x461   :  { %v4171_v57 = vmul.f32 %v4132_v59, %v4034_v17 }
 0x462   :  { %v4197_v51 = vadd.f32 %v4196_v26, %v4170_v27 }
 0x463   :  { %v4218_v56 = vadd.f32 %v4217_v55, %v4171_v57 }
 0x467   :  { %v4085_v1 = vpop.f32.mrf.mxu2  ;;  %v3990_v12 = vpop.f32.mrf.mxu0 }
 0x468   :  { %v4134_v62 = vpop.f32.mrf.mxu3  ;;  %v4039_v8 = vpop.f32.mrf.mxu1  ;;  %v4172_v41 = vmul.f32 %v4085_v1, %v3987_v38 }
 0x469   :  { %v4173_v53 = vmul.f32 %v4134_v62, %v4036_v23 }
 0x46a   :  { %v4198_v29 = vadd.f32 %v4197_v51, %v4172_v41 }
 0x46b   :  { %v4219_v30 = vadd.f32 %v4218_v56, %v4173_v53 }
 0x46f   :  { %v4088_v46 = vpop.f32.mrf.mxu2  ;;  %v3992_v40 = vpop.f32.mrf.mxu0 }
 0x470   :  { %v4137_v61 = vpop.f32.mrf.mxu3  ;;  %v4041_v42 = vpop.f32.mrf.mxu1  ;;  %v4174_v58 = vmul.f32 %v4088_v46, %v3990_v12 }
 0x471   :  { %v4175_v33 = vmul.f32 %v4137_v61, %v4039_v8 }
 0x472   :  { %v4199_v21 = vadd.f32 %v4198_v29, %v4174_v58 }
 0x473   :  { %v4220_v45 = vadd.f32 %v4219_v30, %v4175_v33 }
 0x477   :  { %v4090_v18 = vpop.f32.mrf.mxu2  ;;  %v3995_v0 = vpop.f32.mrf.mxu0 }
 0x478   :  { %v4139_v36 = vpop.f32.mrf.mxu3  ;;  %v4044_v49 = vpop.f32.mrf.mxu1  ;;  %v4176_v34 = vmul.f32 %v4090_v18, %v3992_v40 }
 0x479   :  { %v4177_v25 = vmul.f32 %v4139_v36, %v4041_v42 }
 0x47a   :  { %v4200_v10 = vadd.f32 %v4199_v21, %v4176_v34 }
 0x47b   :  { %v4221_v5 = vadd.f32 %v4220_v45, %v4177_v25 }
 0x47f   :  { %v4093_v47 = vpop.f32.mrf.mxu2  ;;  %v3997_v48 = vpop.f32.mrf.mxu0 }
 0x480   :  { %v4142_v60 = vpop.f32.mrf.mxu3  ;;  %v4046_v50 = vpop.f32.mrf.mxu1  ;;  %v4178_v15 = vmul.f32 %v4093_v47, %v3995_v0 }
 0x481   :  { %v4179_v31 = vmul.f32 %v4142_v60, %v4044_v49 }
 0x482   :  { %v4201_v17 = vadd.f32 %v4200_v10, %v4178_v15 }
 0x483   :  { %v4222_v26 = vadd.f32 %v4221_v5, %v4179_v31 }
 0x487   :  { %v4095_v28 = vpop.f32.mrf.mxu2  ;;  %v4000_v52 = vpop.f32.mrf.mxu0 }
 0x488   :  { %v4144_v9 = vpop.f32.mrf.mxu3  ;;  %v4049_v24 = vpop.f32.mrf.mxu1  ;;  %v4180_v4 = vmul.f32 %v4095_v28, %v3997_v48 }
 0x489   :  { %v4181_v54 = vmul.f32 %v4144_v9, %v4046_v50 }
 0x48a   :  { %v4202_v38 = vadd.f32 %v4201_v17, %v4180_v4 }
 0x48b   :  { %v4223_v23 = vadd.f32 %v4222_v26, %v4181_v54 }
 0x48f   :  { %v4098_v13 = vpop.f32.mrf.mxu2  ;;  %v4002_v2 = vpop.f32.mrf.mxu0 }
 0x490   :  { %v4147_v19 = vpop.f32.mrf.mxu3  ;;  %v4051_v11 = vpop.f32.mrf.mxu1  ;;  %v4182_v7 = vmul.f32 %v4098_v13, %v4000_v52 }
 0x491   :  { %v4183_v55 = vmul.f32 %v4147_v19, %v4049_v24 }
 0x492   :  { %v4203_v56 = vadd.f32 %v4202_v38, %v4182_v7 }
 0x493   :  { %v4224_v62 = vadd.f32 %v4223_v23, %v4183_v55 }
 0x497   :  { %v4100_v14 = vpop.f32.mrf.mxu2  ;;  %v4005_v20 = vpop.f32.mrf.mxu0 }
 0x498   :  { %v4149_v3 = vpop.f32.mrf.mxu3  ;;  %v4054_v6 = vpop.f32.mrf.mxu1  ;;  %v4184_v27 = vmul.f32 %v4100_v14, %v4002_v2 }
 0x499   :  { %v4185_v57 = vmul.f32 %v4149_v3, %v4051_v11 }
 0x49a   :  { %v4204_v46 = vadd.f32 %v4203_v56, %v4184_v27 }
 0x49b   :  { %v4225_v61 = vadd.f32 %v4224_v62, %v4185_v57 }
 0x49f   :  { %v4103_v39 = vpop.f32.mrf.mxu2  ;;  %v4007_v43 = vpop.f32.mrf.mxu0 }
 0x4a0   :  { %v4152_v32 = vpop.f32.mrf.mxu3  ;;  %v4056_v35 = vpop.f32.mrf.mxu1  ;;  %v4186_v1 = vmul.f32 %v4103_v39, %v4005_v20 }
 0x4a1   :  { %v4187_v8 = vmul.f32 %v4152_v32, %v4054_v6 }
 0x4a2   :  { %v4205_v18 = vadd.f32 %v4204_v46, %v4186_v1 }
 0x4a3   :  { %v4226_v36 = vadd.f32 %v4225_v61, %v4187_v8 }
 0x4a7   :  { %v4105_v22 = vpop.f32.mrf.mxu2  ;;  %v4010_v44 = vpop.f32.mrf.mxu0 }
 0x4a8   :  { %v4154_v16 = vpop.f32.mrf.mxu3  ;;  %v4059_v59 = vpop.f32.mrf.mxu1  ;;  %v4188_v40 = vmul.f32 %v4105_v22, %v4007_v43 }
 0x4a9   :  { %v4189_v42 = vmul.f32 %v4154_v16, %v4056_v35 }
 0x4aa   :  { %v4206_v47 = vadd.f32 %v4205_v18, %v4188_v40 }
 0x4ab   :  { %v4227_v48 = vadd.f32 %v4226_v36, %v4189_v42 }
 0x4af   :  { %v4108_v51 = vpop.f32.mrf.mxu2  ;;  %v4012_v60 = vpop.f32.mrf.mxu0 }
 0x4b0   :  { %v4157_v12 = vpop.f32.mrf.mxu3  ;;  %v4190_v0 = vmul.f32 %v4108_v51, %v4010_v44  ;;  %v4061_v52 = vpop.f32.mrf.mxu1 }
 0x4b1   :  { %v4191_v49 = vmul.f32 %v4157_v12, %v4059_v59 }
 0x4b2   :  { %v4207_v28 = vadd.f32 %v4206_v47, %v4190_v0 }
 0x4b3   :  { %v4228_v13 = vadd.f32 %v4227_v48, %v4191_v49 }
 0x4b7   :  { %v4110_v50 = vpop.f32.mrf.mxu2 }
 0x4b8   :  { %v4192_v9 = vmul.f32 %v4110_v50, %v4012_v60  ;;  %v4159_v24 = vpop.f32.mrf.mxu3 }
 0x4b9   :  { %v4193_v2 = vmul.f32 %v4159_v24, %v4061_v52 }
 0x4ba   :  { %v4208_v19 = vadd.f32 %v4207_v28, %v4192_v9 }
 0x4bb   :  { %v4229_v11 = vadd.f32 %v4228_v13, %v4193_v2 }
 0x4bc   :  { %v4209_v14 = vrot.slane %v4208_v19, 4 }
 0x4bd   :  { %v4230_v3 = vrot.slane %v4229_v11, 4 }
 0x4be   :  { %v4210_v20 = vadd.f32 %v4209_v14, %v4208_v19 }
 0x4bf   :  { %v4231_v6 = vadd.f32 %v4230_v3, %v4229_v11 }
 0x4c0   :  { %v4211_v39 = vrot.slane %v4210_v20, 2 }
 0x4c1   :  { %v4232_v32 = vrot.slane %v4231_v6, 2 }
 0x4c2   :  { %v4212_v41 = vadd.f32 %v4211_v39, %v4210_v20 }
 0x4c3   :  { %v4233_v53 = vadd.f32 %v4232_v32, %v4231_v6 }
 0x4c4   :  { %v4213_v43 = vrot.slane %v4212_v41, 1 }
 0x4c5   :  { %v4234_v58 = vrot.slane %v4233_v53, 1 }
 0x4c6   :  { %v4214_v35 = vadd.f32 %v4213_v43, %v4212_v41 }
 0x4c7   :  { %v4235_v33 = vadd.f32 %v4234_v58, %v4233_v53 }
 0x4c8   :  { %v4255_v29 = vsel %vm4254_vm6, %v7433_v37, %v4214_v35 }
 0x4c9   :  { %v4256_v34 = vsel %vm4254_vm6, %v7436_v63, %v4235_v33  ;;  %4257 = vst [vmem:[#allocation10] sm:$0xff] %v4255_v29 }
 0x4ca   :  { %4258 = vst [vmem:[#allocation10 + $0x8] sm:$0xff] %v4256_v34 }
 0x4cb   :  { %4269 = dma.vmem_to_hbm [thread:$0]  %s4265_s3, 256, %s4267_s11, [#allocation4]  }
 0x4cc   :  { %5564 = dma.done.wait [#allocation4], 256  }
 0x4cd   :  { %5565 = vsyncadd [#allocation4], 4294967040 }
 0x4ce   :  { %4274 = vsyncpa [#allocation3], 1 }
 0x4cf   :  { %4275 = vsyncpa [#allocation6], 1 }
 0x4d0   :  { %4276 = vsyncpa [#allocation9], 1 }
 0x4d1   :  { %4277 = vsyncpa [#allocation4], 1 }

// kernel: tpu_custom_call.1
= control target key start
LH: loop header
LB: loop body
LE: loop exit
PB: predicated region body
PF: predicated region fallthrough
CT: control target
= control target key end

     0   :  { %9 = vsyncpa [#allocation3], 0  ;;  %s7443_s0 = inlined_call_operand.hbm [shape: s32[8,256], index: 0, kind: input, shape index: {}]   ;;  %s7444_s1 = inlined_call_operand.hbm [shape: s32[8,256], index: 1, kind: input, shape index: {}]   ;;  %s7445_s2 = inlined_call_operand.hbm [shape: bf16[128,128], index: 2, kind: input, shape index: {}]   ;;  %s7446_s3 = inlined_call_operand.hbm [shape: bf16[128,128], index: 3, kind: input, shape index: {}]   ;;  %s7447_s4 = inlined_call_operand.hbm [shape: f32[8,256], index: 4, kind: output, shape index: {}]  }
   0x1   :  { %10 = vsyncpa [#allocation6], 0 }
   0x2   :  { %11 = vsyncpa [#allocation9], 0  ;;  %s29_s17 = sshll.u32 %s7444_s1, 4  ;;  %s30_s17 = int_to_ptr.hbm [resolvable:$true] %s29_s17 }
   0x3   :  { %12 = vsyncpa [#allocation4], 0  ;;  %s5566_s18 = smov [#allocation5]   ;;  %s18_s22 = sshll.u32 %s7443_s0, 4  ;;  %s19_s22 = int_to_ptr.hbm [resolvable:$true] %s18_s22 }
   0x4   :  { %s31_s19 = sshll.u32 %s5566_s18, 4  ;;  %s5567_s23 = smov [#allocation2]   ;;  %s32_s19 = int_to_ptr.vmem [resolvable:$true] %s31_s19 }
   0x5   :  { %34 = dma.hbm_to_vmem [thread:$0]  %s30_s17, 256, %s32_s19, [#allocation6]  }
   0x6   :  { %s20_s24 = sshll.u32 %s5567_s23, 4  ;;  %s39_s27 = sshll.u32 %s7445_s2, 4  ;;  %s21_s24 = int_to_ptr.vmem [resolvable:$true] %s20_s24  ;;  %s40_s27 = int_to_ptr.hbm [resolvable:$true] %s39_s27 }
   0x7   :  { %23 = dma.hbm_to_vmem [thread:$0]  %s19_s22, 256, %s21_s24, [#allocation3]  }
   0x8   :  { %s5568_s1 = smov [#allocation7]   ;;  %s52_s5 = sshll.u32 %s7446_s3, 4  ;;  %s53_s5 = int_to_ptr.hbm [resolvable:$true] %s52_s5 }
   0x9   :  { %s41_s28 = sshll.u32 %s5568_s1, 4  ;;  %s5569_s6 = smov 64   ;;  %s42_s28 = int_to_ptr.vmem [resolvable:$true] %s41_s28 }
   0xa   :  { %s5570_s0 = smov 4   ;;  %s5571_s7 = smov [#allocation8]  }
   0xb   :  { %47 = dma.hbm_to_vmem [thread:$0]  %s40_s27, 1024, %s42_s28, [#allocation6], %s5569_s6, %s5569_s6, %s5570_s0  }
   0xc   :  { %s54_s8 = sshll.u32 %s5571_s7, 4  ;;  %s55_s8 = int_to_ptr.vmem [resolvable:$true] %s54_s8 }
   0xd   :  { %60 = dma.hbm_to_vmem [thread:$0]  %s53_s5, 1024, %s55_s8, [#allocation9], %s5569_s6, %s5569_s6, %s5570_s0  }
   0xe   :  { %5558 = dma.done.wait [#allocation3], 256  }
   0xf   :  { %5559 = vsyncadd [#allocation3], 4294967040 }
  0x10   :  { %5560 = dma.done.wait [#allocation6], 1280  }
  0x11   :  { %5561 = vsyncadd [#allocation6], 4294966016 }
  0x12   :  { %5562 = dma.done.wait [#allocation9], 1024  }
  0x13   :  { %5563 = vsyncadd [#allocation9], 4294966272  ;;  %v109_v0 = vlaneseq  ;;  %v126_v6 = vld [vmem:[#allocation2] ss:$8 sm:$0x3]  ;;  %v5933_v34 = vld [vmem:[#allocation7 + $0x10] sm:$0xff] }
  0x14   :  { %v127_v7 = vld [vmem:[#allocation5] ss:$8 sm:$0x3]  ;;  %v5625_v8 = vperm.slane %v126_v6, 0  ;;  %v5627_v9 = vperm.slane %v126_v6, 1  ;;  %v5828_v29 = vld [vmem:[#allocation7] sm:$0xff] }
  0x15   :  { %v5611_v1 = vshrl.u32 %v109_v0, 7  ;;  %v5629_v10 = vperm.slane %v127_v7, 0  ;;  %v5631_v11 = vperm.slane %v127_v7, 1  ;;  %v5572_v12 = vmov 1.0|1.0   ;;  %v5841_v31 = vld [vmem:[#allocation8] sm:$0xff] }
  0x16   :  { %v725_v24 = vld [vmem:[#allocation5 + $0x1] ss:$8 sm:$0x3]  ;;  %v723_v25 = vld [vmem:[#allocation2 + $0x1] ss:$8 sm:$0x3] }
  0x17   :  { %v5614_v2 = vadd.s32 112, %v5611_v1  ;;  %v5617_v3 = vadd.s32 120, %v5611_v1  ;;  %v5620_v4 = vadd.s32 96, %v5611_v1  ;;  %v5623_v5 = vadd.s32 104, %v5611_v1  ;;  %v5904_v32 = vld [vmem:[#allocation7 + $0x8] sm:$0xff]  ;;  %v5935_v35 = vld [vmem:[#allocation8 + $0x10] sm:$0xff] }
  0x18   :  { %v5655_v13 = vadd.s32 80, %v5611_v1  ;;  %v5658_v14 = vadd.s32 88, %v5611_v1  ;;  %v5681_v15 = vadd.s32 64, %v5611_v1  ;;  %v5684_v16 = vadd.s32 72, %v5611_v1  ;;  %v5907_v33 = vld [vmem:[#allocation8 + $0x8] sm:$0xff]  ;;  %v5961_v36 = vld [vmem:[#allocation7 + $0x18] sm:$0xff] }
  0x19   :  { %vm158_vm0 = vcmp.eq.s32.totalorder %v5614_v2, %v5625_v8  ;;  %vm160_vm1 = vcmp.eq.s32.totalorder %v5617_v3, %v5625_v8  ;;  %vm159_vm2 = vcmp.eq.s32.totalorder %v5614_v2, %v5627_v9  ;;  %vm161_vm3 = vcmp.eq.s32.totalorder %v5617_v3, %v5627_v9  ;;  %v5963_v37 = vld [vmem:[#allocation8 + $0x18] sm:$0xff]  ;;  %v5989_v38 = vld [vmem:[#allocation7 + $0x20] sm:$0xff]  ;;  %v6017_v40 = vld [vmem:[#allocation7 + $0x28] sm:$0xff]  ;;  %s5573_s2 = smov [#allocation10]   ;;  %s4266_s11 = sshll.u32 %s7447_s4, 4  ;;  %s4267_s11 = int_to_ptr.hbm [resolvable:$true] %s4266_s11 }
  0x1a   :  { %vm4374_vm4 = vmpackc.low %vm160_vm1, %vm158_vm0  ;;  %vm272_vm5 = vcmp.eq.s32.totalorder %v5614_v2, %v5629_v10  ;;  %vm274_vm6 = vcmp.eq.s32.totalorder %v5617_v3, %v5629_v10  ;;  %vm273_vm7 = vcmp.eq.s32.totalorder %v5614_v2, %v5631_v11  ;;  %vm275_vm8 = vcmp.eq.s32.totalorder %v5617_v3, %v5631_v11  ;;  %v5991_v39 = vld [vmem:[#allocation8 + $0x20] sm:$0xff]  ;;  %v6019_v41 = vld [vmem:[#allocation8 + $0x28] sm:$0xff]  ;;  %s4264_s3 = sshll.u32 %s5573_s2, 4  ;;  %s4265_s3 = int_to_ptr.vmem [resolvable:$true] %s4264_s3 }
  0x1b   :  { %4375 = vmatpush.bf16.msk.msra.mxu0 %vm4374_vm4, %v5572_v12  ;;  %vm4390_vm9 = vmpackc.low %vm161_vm3, %vm159_vm2  ;;  %vm154_vm10 = vcmp.eq.s32.totalorder %v5620_v4, %v5625_v8  ;;  %vm156_vm11 = vcmp.eq.s32.totalorder %v5623_v5, %v5625_v8  ;;  %vm155_vm13 = vcmp.eq.s32.totalorder %v5620_v4, %v5627_v9  ;;  %vm157_vm14 = vcmp.eq.s32.totalorder %v5623_v5, %v5627_v9  ;;  %v6045_v42 = vld [vmem:[#allocation7 + $0x30] sm:$0xff]  ;;  %v1225_v47 = vld [vmem:[#allocation2 + $0x2] ss:$8 sm:$0x3] }
  0x1c   :  { %4391 = vmatpush.bf16.msk.msra.mxu1 %vm4390_vm9, %v5572_v12  ;;  %vm4438_vm12 = vmpackc.low %vm274_vm6, %vm272_vm5  ;;  %vm268_vm0 = vcmp.eq.s32.totalorder %v5620_v4, %v5629_v10  ;;  %vm270_vm1 = vcmp.eq.s32.totalorder %v5623_v5, %v5629_v10  ;;  %vm269_vm3 = vcmp.eq.s32.totalorder %v5620_v4, %v5631_v11  ;;  %vm271_vm4 = vcmp.eq.s32.totalorder %v5623_v5, %v5631_v11  ;;  %v6047_v43 = vld [vmem:[#allocation8 + $0x30] sm:$0xff]  ;;  %v6079_v50 = vld [vmem:[#allocation7 + $0x38] sm:$0xff] }
  0x1d   :  { %4439 = vmatpush.bf16.msk.msra.mxu2 %vm4438_vm12, %v5572_v12  ;;  %vm4454_vm15 = vmpackc.low %vm275_vm8, %vm273_vm7  ;;  %vm150_vm6 = vcmp.eq.s32.totalorder %v5655_v13, %v5625_v8  ;;  %vm152_vm7 = vcmp.eq.s32.totalorder %v5658_v14, %v5625_v8  ;;  %vm151_vm9 = vcmp.eq.s32.totalorder %v5655_v13, %v5627_v9  ;;  %vm264_vm12 = vcmp.eq.s32.totalorder %v5655_v13, %v5629_v10  ;;  %v1227_v44 = vld [vmem:[#allocation5 + $0x2] ss:$8 sm:$0x3] }
  0x1e   :  { %4455 = vmatpush.bf16.msk.msra.mxu3 %vm4454_vm15, %v5572_v12  ;;  %vm4376_vm2 = vmpackc.low %vm156_vm11, %vm154_vm10  ;;  %vm153_vm10 = vcmp.eq.s32.totalorder %v5658_v14, %v5627_v9  ;;  %vm265_vm15 = vcmp.eq.s32.totalorder %v5655_v13, %v5631_v11  ;;  %v5707_v17 = vadd.s32 48, %v5611_v1  ;;  %v5710_v18 = vadd.s32 56, %v5611_v1  ;;  %v6083_v51 = vld [vmem:[#allocation8 + $0x38] sm:$0xff] }
  0x1f   :  { %4377 = vmatpush.bf16.msk.msra.mxu0 %vm4376_vm2, %v5572_v12  ;;  %vm4392_vm5 = vmpackc.low %vm157_vm14, %vm155_vm13  ;;  %vm266_vm13 = vcmp.eq.s32.totalorder %v5658_v14, %v5629_v10  ;;  %vm146_vm2 = vcmp.eq.s32.totalorder %v5681_v15, %v5625_v8  ;;  %v5733_v19 = vadd.s32 32, %v5611_v1  ;;  %v5736_v20 = vadd.s32 40, %v5611_v1 }
  0x20   :  { %4393 = vmatpush.bf16.msk.msra.mxu1 %vm4392_vm5, %v5572_v12  ;;  %vm4440_vm8 = vmpackc.low %vm270_vm1, %vm268_vm0  ;;  %vm267_vm0 = vcmp.eq.s32.totalorder %v5658_v14, %v5631_v11  ;;  %vm147_vm5 = vcmp.eq.s32.totalorder %v5681_v15, %v5627_v9  ;;  %v5759_v21 = vadd.s32 16, %v5611_v1  ;;  %v5762_v22 = vadd.s32 24, %v5611_v1 }
  0x21   :  { %4441 = vmatpush.bf16.msk.msra.mxu2 %vm4440_vm8, %v5572_v12  ;;  %vm4456_vm11 = vmpackc.low %vm271_vm4, %vm269_vm3  ;;  %vm148_vm3 = vcmp.eq.s32.totalorder %v5684_v16, %v5625_v8  ;;  %vm260_vm8 = vcmp.eq.s32.totalorder %v5681_v15, %v5629_v10  ;;  %v5785_v23 = vadd.s32 8, %v5611_v1  ;;  %v5807_v26 = vperm.slane %v725_v24, 0 }
  0x22   :  { %4457 = vmatpush.bf16.msk.msra.mxu3 %vm4456_vm11, %v5572_v12  ;;  %vm4378_vm14 = vmpackc.low %vm152_vm7, %vm150_vm6  ;;  %vm149_vm6 = vcmp.eq.s32.totalorder %v5684_v16, %v5627_v9  ;;  %vm261_vm11 = vcmp.eq.s32.totalorder %v5681_v15, %v5631_v11  ;;  %v5814_v27 = vperm.slane %v725_v24, 1  ;;  %v5821_v28 = vperm.slane %v723_v25, 0 }
  0x23   :  { %4379 = vmatpush.bf16.msk.msra.mxu0 %vm4378_vm14, %v5572_v12  ;;  %vm4394_vm1 = vmpackc.low %vm153_vm10, %vm151_vm9  ;;  %vm262_vm9 = vcmp.eq.s32.totalorder %v5684_v16, %v5629_v10  ;;  %vm142_vm14 = vcmp.eq.s32.totalorder %v5707_v17, %v5625_v8  ;;  %v5830_v30 = vperm.slane %v723_v25, 1  ;;  %v6053_v45 = vperm.slane %v1227_v44, 0 }
  0x24   :  { %4395 = vmatpush.bf16.msk.msra.mxu1 %vm4394_vm1, %v5572_v12  ;;  %vm4442_vm4 = vmpackc.low %vm266_vm13, %vm264_vm12  ;;  %vm263_vm12 = vcmp.eq.s32.totalorder %v5684_v16, %v5631_v11  ;;  %vm143_vm1 = vcmp.eq.s32.totalorder %v5707_v17, %v5627_v9  ;;  %v6055_v46 = vperm.slane %v1227_v44, 1  ;;  %v6066_v48 = vperm.slane %v1225_v47, 0 }
  0x25   :  { %4443 = vmatpush.bf16.msk.msra.mxu2 %vm4442_vm4, %v5572_v12  ;;  %vm4458_vm7 = vmpackc.low %vm267_vm0, %vm265_vm15  ;;  %vm144_vm15 = vcmp.eq.s32.totalorder %v5710_v18, %v5625_v8  ;;  %vm256_vm4 = vcmp.eq.s32.totalorder %v5707_v17, %v5629_v10  ;;  %v6068_v49 = vperm.slane %v1225_v47, 1 }
  0x26   :  { %4459 = vmatpush.bf16.msk.msra.mxu3 %vm4458_vm7, %v5572_v12  ;;  %vm4380_vm10 = vmpackc.low %vm148_vm3, %vm146_vm2  ;;  %vm145_vm2 = vcmp.eq.s32.totalorder %v5710_v18, %v5627_v9  ;;  %vm257_vm7 = vcmp.eq.s32.totalorder %v5707_v17, %v5631_v11 }
  0x27   :  { %4381 = vmatpush.bf16.msk.msra.mxu0 %vm4380_vm10, %v5572_v12  ;;  %vm4396_vm13 = vmpackc.low %vm149_vm6, %vm147_vm5  ;;  %vm258_vm5 = vcmp.eq.s32.totalorder %v5710_v18, %v5629_v10  ;;  %vm138_vm10 = vcmp.eq.s32.totalorder %v5733_v19, %v5625_v8 }
  0x28   :  { %4397 = vmatpush.bf16.msk.msra.mxu1 %vm4396_vm13, %v5572_v12  ;;  %vm4444_vm0 = vmpackc.low %vm262_vm9, %vm260_vm8  ;;  %vm259_vm8 = vcmp.eq.s32.totalorder %v5710_v18, %v5631_v11  ;;  %vm139_vm13 = vcmp.eq.s32.totalorder %v5733_v19, %v5627_v9 }
  0x29   :  { %4445 = vmatpush.bf16.msk.msra.mxu2 %vm4444_vm0, %v5572_v12  ;;  %vm4460_vm3 = vmpackc.low %vm263_vm12, %vm261_vm11  ;;  %vm140_vm11 = vcmp.eq.s32.totalorder %v5736_v20, %v5625_v8  ;;  %vm252_vm0 = vcmp.eq.s32.totalorder %v5733_v19, %v5629_v10 }
  0x2a   :  { %4461 = vmatpush.bf16.msk.msra.mxu3 %vm4460_vm3, %v5572_v12  ;;  %vm4382_vm6 = vmpackc.low %vm144_vm15, %vm142_vm14  ;;  %vm141_vm14 = vcmp.eq.s32.totalorder %v5736_v20, %v5627_v9  ;;  %vm253_vm3 = vcmp.eq.s32.totalorder %v5733_v19, %v5631_v11 }
  0x2b   :  { %4383 = vmatpush.bf16.msk.msra.mxu0 %vm4382_vm6, %v5572_v12  ;;  %vm4398_vm9 = vmpackc.low %vm145_vm2, %vm143_vm1  ;;  %vm254_vm1 = vcmp.eq.s32.totalorder %v5736_v20, %v5629_v10  ;;  %vm134_vm6 = vcmp.eq.s32.totalorder %v5759_v21, %v5625_v8 }
  0x2c   :  { %4399 = vmatpush.bf16.msk.msra.mxu1 %vm4398_vm9, %v5572_v12  ;;  %vm4446_vm12 = vmpackc.low %vm258_vm5, %vm256_vm4  ;;  %vm255_vm4 = vcmp.eq.s32.totalorder %v5736_v20, %v5631_v11  ;;  %vm135_vm9 = vcmp.eq.s32.totalorder %v5759_v21, %v5627_v9 }
  0x2d   :  { %4447 = vmatpush.bf16.msk.msra.mxu2 %vm4446_vm12, %v5572_v12  ;;  %vm4462_vm15 = vmpackc.low %vm259_vm8, %vm257_vm7  ;;  %vm136_vm7 = vcmp.eq.s32.totalorder %v5762_v22, %v5625_v8  ;;  %vm248_vm12 = vcmp.eq.s32.totalorder %v5759_v21, %v5629_v10 }
  0x2e   :  { %4463 = vmatpush.bf16.msk.msra.mxu3 %vm4462_vm15, %v5572_v12  ;;  %vm4384_vm2 = vmpackc.low %vm140_vm11, %vm138_vm10  ;;  %vm137_vm10 = vcmp.eq.s32.totalorder %v5762_v22, %v5627_v9  ;;  %vm249_vm15 = vcmp.eq.s32.totalorder %v5759_v21, %v5631_v11 }
  0x2f   :  { %4385 = vmatpush.bf16.msk.msra.mxu0 %vm4384_vm2, %v5572_v12  ;;  %vm4400_vm5 = vmpackc.low %vm141_vm14, %vm139_vm13  ;;  %vm250_vm13 = vcmp.eq.s32.totalorder %v5762_v22, %v5629_v10  ;;  %vm130_vm2 = vcmp.eq.s32.totalorder %v5611_v1, %v5625_v8 }
  0x30   :  { %4401 = vmatpush.bf16.msk.msra.mxu1 %vm4400_vm5, %v5572_v12  ;;  %vm4448_vm8 = vmpackc.low %vm254_vm1, %vm252_vm0  ;;  %vm251_vm0 = vcmp.eq.s32.totalorder %v5762_v22, %v5631_v11  ;;  %vm131_vm5 = vcmp.eq.s32.totalorder %v5611_v1, %v5627_v9 }
  0x31   :  { %4449 = vmatpush.bf16.msk.msra.mxu2 %vm4448_vm8, %v5572_v12  ;;  %vm4464_vm11 = vmpackc.low %vm255_vm4, %vm253_vm3  ;;  %vm132_vm3 = vcmp.eq.s32.totalorder %v5785_v23, %v5625_v8  ;;  %vm244_vm8 = vcmp.eq.s32.totalorder %v5611_v1, %v5629_v10 }
  0x32   :  { %4465 = vmatpush.bf16.msk.msra.mxu3 %vm4464_vm11, %v5572_v12  ;;  %vm4386_vm14 = vmpackc.low %vm136_vm7, %vm134_vm6  ;;  %vm133_vm6 = vcmp.eq.s32.totalorder %v5785_v23, %v5627_v9  ;;  %vm245_vm11 = vcmp.eq.s32.totalorder %v5611_v1, %v5631_v11 }
  0x33   :  { %4387 = vmatpush.bf16.msk.msra.mxu0 %vm4386_vm14, %v5572_v12  ;;  %vm4402_vm1 = vmpackc.low %vm137_vm10, %vm135_vm9  ;;  %vm246_vm9 = vcmp.eq.s32.totalorder %v5785_v23, %v5629_v10  ;;  %vm870_vm14 = vcmp.eq.s32.totalorder %v5614_v2, %v5807_v26 }
  0x34   :  { %4403 = vmatpush.bf16.msk.msra.mxu1 %vm4402_vm1, %v5572_v12  ;;  %vm4450_vm4 = vmpackc.low %vm250_vm13, %vm248_vm12  ;;  %vm247_vm12 = vcmp.eq.s32.totalorder %v5785_v23, %v5631_v11  ;;  %vm871_vm1 = vcmp.eq.s32.totalorder %v5614_v2, %v5814_v27 }
  0x35   :  { %4451 = vmatpush.bf16.msk.msra.mxu2 %vm4450_vm4, %v5572_v12  ;;  %vm4466_vm7 = vmpackc.low %vm251_vm0, %vm249_vm15  ;;  %vm872_vm15 = vcmp.eq.s32.totalorder %v5617_v3, %v5807_v26  ;;  %vm756_vm4 = vcmp.eq.s32.totalorder %v5614_v2, %v5821_v28 }
  0x36   :  { %4467 = vmatpush.bf16.msk.msra.mxu3 %vm4466_vm7, %v5572_v12  ;;  %vm4388_vm10 = vmpackc.low %vm132_vm3, %vm130_vm2  ;;  %vm873_vm2 = vcmp.eq.s32.totalorder %v5617_v3, %v5814_v27  ;;  %vm757_vm7 = vcmp.eq.s32.totalorder %v5614_v2, %v5830_v30 }
  0x37   :  { %4389 = vmatpush.bf16.msk.msra.mxu0 %vm4388_vm10, %v5572_v12  ;;  %vm4404_vm13 = vmpackc.low %vm133_vm6, %vm131_vm5  ;;  %vm758_vm5 = vcmp.eq.s32.totalorder %v5617_v3, %v5821_v28  ;;  %vm866_vm10 = vcmp.eq.s32.totalorder %v5620_v4, %v5807_v26 }
  0x38   :  { %4405 = vmatpush.bf16.msk.msra.mxu1 %vm4404_vm13, %v5572_v12  ;;  %vm4452_vm0 = vmpackc.low %vm246_vm9, %vm244_vm8  ;;  %vm759_vm8 = vcmp.eq.s32.totalorder %v5617_v3, %v5830_v30  ;;  %vm867_vm13 = vcmp.eq.s32.totalorder %v5620_v4, %v5814_v27 }
  0x39   :  { %4453 = vmatpush.bf16.msk.msra.mxu2 %vm4452_vm0, %v5572_v12  ;;  %vm4468_vm3 = vmpackc.low %vm247_vm12, %vm245_vm11  ;;  %vm868_vm11 = vcmp.eq.s32.totalorder %v5623_v5, %v5807_v26  ;;  %vm752_vm0 = vcmp.eq.s32.totalorder %v5620_v4, %v5821_v28 }
  0x3a   :  { %4469 = vmatpush.bf16.msk.msra.mxu3 %vm4468_vm3, %v5572_v12  ;;  %412 = vmatmul.bf16.vlgmr.msra.gmra.mxu0 %v5828_v29  ;;  %vm4566_vm6 = vmpackc.low %vm872_vm15, %vm870_vm14  ;;  %vm869_vm14 = vcmp.eq.s32.totalorder %v5623_v5, %v5814_v27  ;;  %vm753_vm3 = vcmp.eq.s32.totalorder %v5620_v4, %v5830_v30 }
  0x3b   :  { %461 = vmatmul.bf16.vlgmr.msra.gmra.mxu1 %v5828_v29  ;;  %vm4582_vm9 = vmpackc.low %vm873_vm2, %vm871_vm1  ;;  %vm754_vm1 = vcmp.eq.s32.totalorder %v5623_v5, %v5821_v28 }
  0x3c   :  { %558 = vmatmul.bf16.vlgmr.msra.gmra.mxu2 %v5841_v31  ;;  %vm4534_vm12 = vmpackc.low %vm758_vm5, %vm756_vm4  ;;  %vm755_vm4 = vcmp.eq.s32.totalorder %v5623_v5, %v5830_v30 }
  0x3d   :  { %4567 = vmatpush.bf16.msk.msrb.mxu2 %vm4566_vm6, %v5572_v12  ;;  %607 = vmatmul.bf16.vlgmr.msra.gmra.mxu3 %v5841_v31  ;;  %vm4550_vm15 = vmpackc.low %vm759_vm8, %vm757_vm7  ;;  %vm862_vm6 = vcmp.eq.s32.totalorder %v5655_v13, %v5807_v26  ;;  %vm864_vm7 = vcmp.eq.s32.totalorder %v5658_v14, %v5807_v26 }
  0x3e   :  { %4583 = vmatpush.bf16.msk.msrb.mxu3 %vm4582_vm9, %v5572_v12  ;;  %4535 = vmatpush.bf16.msk.msrb.mxu0 %vm4534_vm12, %v5572_v12  ;;  %vm4568_vm2 = vmpackc.low %vm868_vm11, %vm866_vm10  ;;  %vm863_vm9 = vcmp.eq.s32.totalorder %v5655_v13, %v5814_v27  ;;  %vm865_vm10 = vcmp.eq.s32.totalorder %v5658_v14, %v5814_v27  ;;  %vm748_vm12 = vcmp.eq.s32.totalorder %v5655_v13, %v5821_v28 }
  0x3f   :  { %4551 = vmatpush.bf16.msk.msrb.mxu1 %vm4550_vm15, %v5572_v12  ;;  %vm4584_vm5 = vmpackc.low %vm869_vm14, %vm867_vm13  ;;  %vm750_vm13 = vcmp.eq.s32.totalorder %v5658_v14, %v5821_v28  ;;  %vm749_vm15 = vcmp.eq.s32.totalorder %v5655_v13, %v5830_v30 }
  0x40   :  { %vm4536_vm8 = vmpackc.low %vm754_vm1, %vm752_vm0  ;;  %vm751_vm0 = vcmp.eq.s32.totalorder %v5658_v14, %v5830_v30 }
  0x41   :  { %4569 = vmatpush.bf16.msk.msrb.mxu2 %vm4568_vm2, %v5572_v12  ;;  %vm4552_vm11 = vmpackc.low %vm755_vm4, %vm753_vm3  ;;  %vm858_vm4 = vcmp.eq.s32.totalorder %v5681_v15, %v5807_v26 }
  0x42   :  { %4585 = vmatpush.bf16.msk.msrb.mxu3 %vm4584_vm5, %v5572_v12  ;;  %4537 = vmatpush.bf16.msk.msrb.mxu0 %vm4536_vm8, %v5572_v12  ;;  %vm4570_vm14 = vmpackc.low %vm864_vm7, %vm862_vm6  ;;  %vm860_vm5 = vcmp.eq.s32.totalorder %v5684_v16, %v5807_v26  ;;  %vm859_vm6 = vcmp.eq.s32.totalorder %v5681_v15, %v5814_v27  ;;  %vm861_vm7 = vcmp.eq.s32.totalorder %v5684_v16, %v5814_v27 }
  0x43   :  { %4553 = vmatpush.bf16.msk.msrb.mxu1 %vm4552_vm11, %v5572_v12  ;;  %vm4586_vm1 = vmpackc.low %vm865_vm10, %vm863_vm9  ;;  %vm744_vm9 = vcmp.eq.s32.totalorder %v5681_v15, %v5821_v28  ;;  %vm746_vm10 = vcmp.eq.s32.totalorder %v5684_v16, %v5821_v28  ;;  %vm745_vm11 = vcmp.eq.s32.totalorder %v5681_v15, %v5830_v30 }
  0x44   :  { %vm4538_vm2 = vmpackc.low %vm750_vm13, %vm748_vm12  ;;  %vm747_vm12 = vcmp.eq.s32.totalorder %v5684_v16, %v5830_v30 }
  0x45   :  { %4571 = vmatpush.bf16.msk.msrb.mxu2 %vm4570_vm14, %v5572_v12  ;;  %vm4554_vm3 = vmpackc.low %vm751_vm0, %vm749_vm15  ;;  %vm854_vm0 = vcmp.eq.s32.totalorder %v5707_v17, %v5807_v26 }
  0x46   :  { %4587 = vmatpush.bf16.msk.msrb.mxu3 %vm4586_vm1, %v5572_v12  ;;  %4539 = vmatpush.bf16.msk.msrb.mxu0 %vm4538_vm2, %v5572_v12  ;;  %vm4572_vm8 = vmpackc.low %vm860_vm5, %vm858_vm4  ;;  %vm856_vm1 = vcmp.eq.s32.totalorder %v5710_v18, %v5807_v26  ;;  %vm855_vm2 = vcmp.eq.s32.totalorder %v5707_v17, %v5814_v27  ;;  %vm740_vm5 = vcmp.eq.s32.totalorder %v5707_v17, %v5821_v28 }
  0x47   :  { %4555 = vmatpush.bf16.msk.msrb.mxu1 %vm4554_vm3, %v5572_v12  ;;  %vm4588_vm13 = vmpackc.low %vm861_vm7, %vm859_vm6  ;;  %vm857_vm3 = vcmp.eq.s32.totalorder %v5710_v18, %v5814_v27  ;;  %vm742_vm6 = vcmp.eq.s32.totalorder %v5710_v18, %v5821_v28  ;;  %vm741_vm7 = vcmp.eq.s32.totalorder %v5707_v17, %v5830_v30 }
  0x48   :  { %vm4540_vm14 = vmpackc.low %vm746_vm10, %vm744_vm9 }
  0x49   :  { %4573 = vmatpush.bf16.msk.msrb.mxu2 %vm4572_vm8, %v5572_v12  ;;  %vm4556_vm15 = vmpackc.low %vm747_vm12, %vm745_vm11  ;;  %vm743_vm8 = vcmp.eq.s32.totalorder %v5710_v18, %v5830_v30  ;;  %vm850_vm12 = vcmp.eq.s32.totalorder %v5733_v19, %v5807_v26 }
  0x4a   :  { %417 = vmatmul.bf16.gmra.mxu0 %v5904_v32  ;;  %4589 = vmatpush.bf16.msk.msrb.mxu3 %vm4588_vm13, %v5572_v12  ;;  %vm4574_vm4 = vmpackc.low %vm856_vm1, %vm854_vm0  ;;  %vm852_vm13 = vcmp.eq.s32.totalorder %v5736_v20, %v5807_v26  ;;  %vm736_vm1 = vcmp.eq.s32.totalorder %v5733_v19, %v5821_v28 }
  0x4b   :  { %466 = vmatmul.bf16.gmra.mxu1 %v5904_v32  ;;  %4541 = vmatpush.bf16.msk.msrb.mxu0 %vm4540_vm14, %v5572_v12  ;;  %vm4590_vm9 = vmpackc.low %vm857_vm3, %vm855_vm2  ;;  %vm851_vm14 = vcmp.eq.s32.totalorder %v5733_v19, %v5814_v27  ;;  %vm738_vm2 = vcmp.eq.s32.totalorder %v5736_v20, %v5821_v28  ;;  %vm737_vm3 = vcmp.eq.s32.totalorder %v5733_v19, %v5830_v30 }
  0x4c   :  { %563 = vmatmul.bf16.gmra.mxu2 %v5907_v33  ;;  %4557 = vmatpush.bf16.msk.msrb.mxu1 %vm4556_vm15, %v5572_v12  ;;  %vm4542_vm10 = vmpackc.low %vm742_vm6, %vm740_vm5  ;;  %vm853_vm15 = vcmp.eq.s32.totalorder %v5736_v20, %v5814_v27 }
  0x4d   :  { %612 = vmatmul.bf16.gmra.mxu3 %v5907_v33  ;;  %4575 = vmatpush.bf16.msk.msrb.mxu2 %vm4574_vm4, %v5572_v12  ;;  %vm4558_vm11 = vmpackc.low %vm743_vm8, %vm741_vm7  ;;  %vm739_vm4 = vcmp.eq.s32.totalorder %v5736_v20, %v5830_v30  ;;  %vm846_vm8 = vcmp.eq.s32.totalorder %v5759_v21, %v5807_v26 }
  0x4e   :  { %4591 = vmatpush.bf16.msk.msrb.mxu3 %vm4590_vm9, %v5572_v12  ;;  %vm4576_vm0 = vmpackc.low %vm852_vm13, %vm850_vm12  ;;  %vm848_vm9 = vcmp.eq.s32.totalorder %v5762_v22, %v5807_v26  ;;  %vm732_vm13 = vcmp.eq.s32.totalorder %v5759_v21, %v5821_v28 }
  0x4f   :  { %4543 = vmatpush.bf16.msk.msrb.mxu0 %vm4542_vm10, %v5572_v12  ;;  %vm4592_vm5 = vmpackc.low %vm853_vm15, %vm851_vm14  ;;  %vm847_vm10 = vcmp.eq.s32.totalorder %v5759_v21, %v5814_v27  ;;  %vm734_vm14 = vcmp.eq.s32.totalorder %v5762_v22, %v5821_v28  ;;  %vm733_vm15 = vcmp.eq.s32.totalorder %v5759_v21, %v5830_v30 }
  0x50   :  { %4559 = vmatpush.bf16.msk.msrb.mxu1 %vm4558_vm11, %v5572_v12  ;;  %vm4544_vm6 = vmpackc.low %vm738_vm2, %vm736_vm1  ;;  %vm849_vm11 = vcmp.eq.s32.totalorder %v5762_v22, %v5814_v27 }
  0x51   :  { %4577 = vmatpush.bf16.msk.msrb.mxu2 %vm4576_vm0, %v5572_v12  ;;  %vm4560_vm7 = vmpackc.low %vm739_vm4, %vm737_vm3  ;;  %vm735_vm0 = vcmp.eq.s32.totalorder %v5762_v22, %v5830_v30  ;;  %vm842_vm4 = vcmp.eq.s32.totalorder %v5611_v1, %v5807_v26 }
  0x52   :  { %4593 = vmatpush.bf16.msk.msrb.mxu3 %vm4592_vm5, %v5572_v12  ;;  %vm4578_vm12 = vmpackc.low %vm848_vm9, %vm846_vm8  ;;  %vm844_vm5 = vcmp.eq.s32.totalorder %v5785_v23, %v5807_v26  ;;  %vm728_vm9 = vcmp.eq.s32.totalorder %v5611_v1, %v5821_v28 }
  0x53   :  { %4545 = vmatpush.bf16.msk.msrb.mxu0 %vm4544_vm6, %v5572_v12  ;;  %vm4594_vm1 = vmpackc.low %vm849_vm11, %vm847_vm10  ;;  %vm843_vm6 = vcmp.eq.s32.totalorder %v5611_v1, %v5814_v27  ;;  %vm730_vm10 = vcmp.eq.s32.totalorder %v5785_v23, %v5821_v28  ;;  %vm729_vm11 = vcmp.eq.s32.totalorder %v5611_v1, %v5830_v30 }
  0x54   :  { %4561 = vmatpush.bf16.msk.msrb.mxu1 %vm4560_vm7, %v5572_v12  ;;  %vm4546_vm2 = vmpackc.low %vm734_vm14, %vm732_vm13  ;;  %vm845_vm7 = vcmp.eq.s32.totalorder %v5785_v23, %v5814_v27 }
  0x55   :  { %4579 = vmatpush.bf16.msk.msrb.mxu2 %vm4578_vm12, %v5572_v12  ;;  %vm4562_vm3 = vmpackc.low %vm735_vm0, %vm733_vm15  ;;  %vm731_vm12 = vcmp.eq.s32.totalorder %v5785_v23, %v5830_v30  ;;  %vm1372_vm0 = vcmp.eq.s32.totalorder %v5614_v2, %v6053_v45 }
  0x56   :  { %4595 = vmatpush.bf16.msk.msrb.mxu3 %vm4594_vm1, %v5572_v12  ;;  %vm4580_vm8 = vmpackc.low %vm844_vm5, %vm842_vm4  ;;  %vm1374_vm1 = vcmp.eq.s32.totalorder %v5617_v3, %v6053_v45 }
  0x57   :  { %4547 = vmatpush.bf16.msk.msrb.mxu0 %vm4546_vm2, %v5572_v12  ;;  %vm4596_vm13 = vmpackc.low %vm845_vm7, %vm843_vm6  ;;  %vm1373_vm2 = vcmp.eq.s32.totalorder %v5614_v2, %v6055_v46  ;;  %vm1258_vm6 = vcmp.eq.s32.totalorder %v5614_v2, %v6066_v48  ;;  %vm1260_vm7 = vcmp.eq.s32.totalorder %v5617_v3, %v6066_v48 }
  0x58   :  { %4563 = vmatpush.bf16.msk.msrb.mxu1 %vm4562_vm3, %v5572_v12  ;;  %vm4548_vm14 = vmpackc.low %vm730_vm10, %vm728_vm9  ;;  %vm1375_vm3 = vcmp.eq.s32.totalorder %v5617_v3, %v6055_v46  ;;  %vm1261_vm9 = vcmp.eq.s32.totalorder %v5617_v3, %v6068_v49 }
  0x59   :  { %4581 = vmatpush.bf16.msk.msrb.mxu2 %vm4580_vm8, %v5572_v12  ;;  %vm4564_vm15 = vmpackc.low %vm731_vm12, %vm729_vm11  ;;  %vm1259_vm8 = vcmp.eq.s32.totalorder %v5614_v2, %v6068_v49  ;;  %vm1368_vm12 = vcmp.eq.s32.totalorder %v5620_v4, %v6053_v45 }
  0x5a   :  { %422 = vmatmul.bf16.gmra.mxu0 %v5933_v34  ;;  %4597 = vmatpush.bf16.msk.msrb.mxu3 %vm4596_vm13, %v5572_v12  ;;  %vm4694_vm4 = vmpackc.low %vm1374_vm1, %vm1372_vm0  ;;  %vm1370_vm13 = vcmp.eq.s32.totalorder %v5623_v5, %v6053_v45 }
  0x5b   :  { %471 = vmatmul.bf16.gmra.mxu1 %v5933_v34  ;;  %4549 = vmatpush.bf16.msk.msrb.mxu0 %vm4548_vm14, %v5572_v12  ;;  %vm4710_vm5 = vmpackc.low %vm1375_vm3, %vm1373_vm2  ;;  %vm1369_vm14 = vcmp.eq.s32.totalorder %v5620_v4, %v6055_v46  ;;  %vm1254_vm2 = vcmp.eq.s32.totalorder %v5620_v4, %v6066_v48  ;;  %vm1256_vm3 = vcmp.eq.s32.totalorder %v5623_v5, %v6066_v48 }
  0x5c   :  { %568 = vmatmul.bf16.gmra.mxu2 %v5935_v35  ;;  %4565 = vmatpush.bf16.msk.msrb.mxu1 %vm4564_vm15, %v5572_v12  ;;  %vm4662_vm10 = vmpackc.low %vm1260_vm7, %vm1258_vm6  ;;  %vm1371_vm15 = vcmp.eq.s32.totalorder %v5623_v5, %v6055_v46 }
  0x5d   :  { %617 = vmatmul.bf16.gmra.mxu3 %v5935_v35  ;;  %4695 = vmatpush.bf16.msk.msra.mxu2 %vm4694_vm4, %v5572_v12  ;;  %vm4678_vm11 = vmpackc.low %vm1261_vm9, %vm1259_vm8  ;;  %vm1255_vm4 = vcmp.eq.s32.totalorder %v5620_v4, %v6068_v49  ;;  %vm1364_vm8 = vcmp.eq.s32.totalorder %v5655_v13, %v6053_v45  ;;  %vm1366_vm9 = vcmp.eq.s32.totalorder %v5658_v14, %v6053_v45 }
  0x5e   :  { %4711 = vmatpush.bf16.msk.msra.mxu3 %vm4710_vm5, %v5572_v12  ;;  %vm4696_vm0 = vmpackc.low %vm1370_vm13, %vm1368_vm12  ;;  %vm1257_vm5 = vcmp.eq.s32.totalorder %v5623_v5, %v6068_v49 }
  0x5f   :  { %4663 = vmatpush.bf16.msk.msra.mxu0 %vm4662_vm10, %v5572_v12  ;;  %vm4712_vm1 = vmpackc.low %vm1371_vm15, %vm1369_vm14  ;;  %vm1365_vm10 = vcmp.eq.s32.totalorder %v5655_v13, %v6055_v46  ;;  %vm1250_vm14 = vcmp.eq.s32.totalorder %v5655_v13, %v6066_v48  ;;  %vm1252_vm15 = vcmp.eq.s32.totalorder %v5658_v14, %v6066_v48 }
  0x60   :  { %4679 = vmatpush.bf16.msk.msra.mxu1 %vm4678_vm11, %v5572_v12  ;;  %vm4664_vm6 = vmpackc.low %vm1256_vm3, %vm1254_vm2  ;;  %vm1367_vm11 = vcmp.eq.s32.totalorder %v5658_v14, %v6055_v46 }
  0x61   :  { %4697 = vmatpush.bf16.msk.msra.mxu2 %vm4696_vm0, %v5572_v12  ;;  %vm4680_vm7 = vmpackc.low %vm1257_vm5, %vm1255_vm4  ;;  %vm1251_vm0 = vcmp.eq.s32.totalorder %v5655_v13, %v6068_v49  ;;  %vm1360_vm4 = vcmp.eq.s32.totalorder %v5681_v15, %v6053_v45  ;;  %vm1362_vm5 = vcmp.eq.s32.totalorder %v5684_v16, %v6053_v45 }
  0x62   :  { %4713 = vmatpush.bf16.msk.msra.mxu3 %vm4712_vm1, %v5572_v12  ;;  %vm4698_vm12 = vmpackc.low %vm1366_vm9, %vm1364_vm8  ;;  %vm1253_vm1 = vcmp.eq.s32.totalorder %v5658_v14, %v6068_v49 }
  0x63   :  { %4665 = vmatpush.bf16.msk.msra.mxu0 %vm4664_vm6, %v5572_v12  ;;  %vm4714_vm13 = vmpackc.low %vm1367_vm11, %vm1365_vm10  ;;  %vm1361_vm6 = vcmp.eq.s32.totalorder %v5681_v15, %v6055_v46  ;;  %vm1246_vm10 = vcmp.eq.s32.totalorder %v5681_v15, %v6066_v48  ;;  %vm1248_vm11 = vcmp.eq.s32.totalorder %v5684_v16, %v6066_v48 }
  0x64   :  { %4681 = vmatpush.bf16.msk.msra.mxu1 %vm4680_vm7, %v5572_v12  ;;  %vm4666_vm2 = vmpackc.low %vm1252_vm15, %vm1250_vm14  ;;  %vm1363_vm7 = vcmp.eq.s32.totalorder %v5684_v16, %v6055_v46  ;;  %vm1249_vm14 = vcmp.eq.s32.totalorder %v5684_v16, %v6068_v49 }
  0x65   :  { %4699 = vmatpush.bf16.msk.msra.mxu2 %vm4698_vm12, %v5572_v12  ;;  %vm4682_vm3 = vmpackc.low %vm1253_vm1, %vm1251_vm0  ;;  %vm1247_vm12 = vcmp.eq.s32.totalorder %v5681_v15, %v6068_v49  ;;  %vm1356_vm0 = vcmp.eq.s32.totalorder %v5707_v17, %v6053_v45  ;;  %vm1358_vm1 = vcmp.eq.s32.totalorder %v5710_v18, %v6053_v45 }
  0x66   :  { %4715 = vmatpush.bf16.msk.msra.mxu3 %vm4714_vm13, %v5572_v12  ;;  %vm4700_vm8 = vmpackc.low %vm1362_vm5, %vm1360_vm4 }
  0x67   :  { %4667 = vmatpush.bf16.msk.msra.mxu0 %vm4666_vm2, %v5572_v12  ;;  %vm4716_vm9 = vmpackc.low %vm1363_vm7, %vm1361_vm6  ;;  %vm1357_vm2 = vcmp.eq.s32.totalorder %v5707_v17, %v6055_v46  ;;  %vm1242_vm6 = vcmp.eq.s32.totalorder %v5707_v17, %v6066_v48  ;;  %vm1244_vm7 = vcmp.eq.s32.totalorder %v5710_v18, %v6066_v48 }
  0x68   :  { %4683 = vmatpush.bf16.msk.msra.mxu1 %vm4682_vm3, %v5572_v12  ;;  %vm4668_vm13 = vmpackc.low %vm1248_vm11, %vm1246_vm10  ;;  %vm1359_vm3 = vcmp.eq.s32.totalorder %v5710_v18, %v6055_v46  ;;  %vm1245_vm10 = vcmp.eq.s32.totalorder %v5710_v18, %v6068_v49 }
  0x69   :  { %4701 = vmatpush.bf16.msk.msra.mxu2 %vm4700_vm8, %v5572_v12  ;;  %vm4684_vm15 = vmpackc.low %vm1249_vm14, %vm1247_vm12  ;;  %vm1243_vm8 = vcmp.eq.s32.totalorder %v5707_v17, %v6068_v49  ;;  %vm1352_vm12 = vcmp.eq.s32.totalorder %v5733_v19, %v6053_v45  ;;  %vm1353_vm14 = vcmp.eq.s32.totalorder %v5733_v19, %v6055_v46 }
  0x6a   :  { %427 = vmatmul.bf16.gmra.mxu0 %v5961_v36  ;;  %4717 = vmatpush.bf16.msk.msra.mxu3 %vm4716_vm9, %v5572_v12  ;;  %vm4702_vm4 = vmpackc.low %vm1358_vm1, %vm1356_vm0 }
  0x6b   :  { %476 = vmatmul.bf16.gmra.mxu1 %v5961_v36  ;;  %4669 = vmatpush.bf16.msk.msra.mxu0 %vm4668_vm13, %v5572_v12  ;;  %vm4718_vm5 = vmpackc.low %vm1359_vm3, %vm1357_vm2  ;;  %vm1354_vm13 = vcmp.eq.s32.totalorder %v5736_v20, %v6053_v45  ;;  %vm1238_vm2 = vcmp.eq.s32.totalorder %v5733_v19, %v6066_v48  ;;  %vm1240_vm3 = vcmp.eq.s32.totalorder %v5736_v20, %v6066_v48 }
  0x6c   :  { %573 = vmatmul.bf16.gmra.mxu2 %v5963_v37  ;;  %4685 = vmatpush.bf16.msk.msra.mxu1 %vm4684_vm15, %v5572_v12  ;;  %vm4670_vm9 = vmpackc.low %vm1244_vm7, %vm1242_vm6  ;;  %vm1355_vm15 = vcmp.eq.s32.totalorder %v5736_v20, %v6055_v46  ;;  %vm1241_vm6 = vcmp.eq.s32.totalorder %v5736_v20, %v6068_v49 }
  0x6d   :  { %622 = vmatmul.bf16.gmra.mxu3 %v5963_v37  ;;  %4703 = vmatpush.bf16.msk.msra.mxu2 %vm4702_vm4, %v5572_v12  ;;  %vm4686_vm11 = vmpackc.low %vm1245_vm10, %vm1243_vm8  ;;  %vm1239_vm4 = vcmp.eq.s32.totalorder %v5733_v19, %v6068_v49  ;;  %vm1348_vm8 = vcmp.eq.s32.totalorder %v5759_v21, %v6053_v45  ;;  %vm1349_vm10 = vcmp.eq.s32.totalorder %v5759_v21, %v6055_v46 }
  0x6e   :  { %4719 = vmatpush.bf16.msk.msra.mxu3 %vm4718_vm5, %v5572_v12  ;;  %vm4704_vm0 = vmpackc.low %vm1354_vm13, %vm1352_vm12 }
  0x6f   :  { %4671 = vmatpush.bf16.msk.msra.mxu0 %vm4670_vm9, %v5572_v12  ;;  %vm4720_vm1 = vmpackc.low %vm1355_vm15, %vm1353_vm14  ;;  %vm1350_vm9 = vcmp.eq.s32.totalorder %v5762_v22, %v6053_v45  ;;  %vm1234_vm14 = vcmp.eq.s32.totalorder %v5759_v21, %v6066_v48  ;;  %vm1236_vm15 = vcmp.eq.s32.totalorder %v5762_v22, %v6066_v48 }
  0x70   :  { %4687 = vmatpush.bf16.msk.msra.mxu1 %vm4686_vm11, %v5572_v12  ;;  %vm4672_vm5 = vmpackc.low %vm1240_vm3, %vm1238_vm2  ;;  %vm1351_vm11 = vcmp.eq.s32.totalorder %v5762_v22, %v6055_v46  ;;  %vm1237_vm2 = vcmp.eq.s32.totalorder %v5762_v22, %v6068_v49 }
  0x71   :  { %4705 = vmatpush.bf16.msk.msra.mxu2 %vm4704_vm0, %v5572_v12  ;;  %vm4688_vm7 = vmpackc.low %vm1241_vm6, %vm1239_vm4  ;;  %vm1235_vm0 = vcmp.eq.s32.totalorder %v5759_v21, %v6068_v49  ;;  %vm1344_vm4 = vcmp.eq.s32.totalorder %v5611_v1, %v6053_v45  ;;  %vm1345_vm6 = vcmp.eq.s32.totalorder %v5611_v1, %v6055_v46 }
  0x72   :  { %4721 = vmatpush.bf16.msk.msra.mxu3 %vm4720_vm1, %v5572_v12  ;;  %vm4706_vm12 = vmpackc.low %vm1350_vm9, %vm1348_vm8 }
  0x73   :  { %4673 = vmatpush.bf16.msk.msra.mxu0 %vm4672_vm5, %v5572_v12  ;;  %vm4722_vm13 = vmpackc.low %vm1351_vm11, %vm1349_vm10  ;;  %vm1346_vm5 = vcmp.eq.s32.totalorder %v5785_v23, %v6053_v45  ;;  %vm1230_vm10 = vcmp.eq.s32.totalorder %v5611_v1, %v6066_v48  ;;  %vm1232_vm11 = vcmp.eq.s32.totalorder %v5785_v23, %v6066_v48 }
  0x74   :  { %4689 = vmatpush.bf16.msk.msra.mxu1 %vm4688_vm7, %v5572_v12  ;;  %vm4674_vm1 = vmpackc.low %vm1236_vm15, %vm1234_vm14  ;;  %vm1347_vm7 = vcmp.eq.s32.totalorder %v5785_v23, %v6055_v46  ;;  %vm1233_vm14 = vcmp.eq.s32.totalorder %v5785_v23, %v6068_v49 }
  0x75   :  { %4707 = vmatpush.bf16.msk.msra.mxu2 %vm4706_vm12, %v5572_v12  ;;  %vm4690_vm3 = vmpackc.low %vm1237_vm2, %vm1235_vm0  ;;  %vm1231_vm12 = vcmp.eq.s32.totalorder %v5611_v1, %v6068_v49 }
  0x76   :  { %4723 = vmatpush.bf16.msk.msra.mxu3 %vm4722_vm13, %v5572_v12  ;;  %vm4708_vm8 = vmpackc.low %vm1346_vm5, %vm1344_vm4 }
  0x77   :  { %4675 = vmatpush.bf16.msk.msra.mxu0 %vm4674_vm1, %v5572_v12  ;;  %vm4724_vm9 = vmpackc.low %vm1347_vm7, %vm1345_vm6 }
  0x78   :  { %4691 = vmatpush.bf16.msk.msra.mxu1 %vm4690_vm3, %v5572_v12  ;;  %vm4676_vm13 = vmpackc.low %vm1232_vm11, %vm1230_vm10 }
  0x79   :  { %4709 = vmatpush.bf16.msk.msra.mxu2 %vm4708_vm8, %v5572_v12  ;;  %vm4692_vm15 = vmpackc.low %vm1233_vm14, %vm1231_vm12 }
  0x7a   :  { %432 = vmatmul.bf16.gmra.mxu0 %v5989_v38  ;;  %4725 = vmatpush.bf16.msk.msra.mxu3 %vm4724_vm9, %v5572_v12 }
  0x7b   :  { %481 = vmatmul.bf16.gmra.mxu1 %v5989_v38  ;;  %4677 = vmatpush.bf16.msk.msra.mxu0 %vm4676_vm13, %v5572_v12 }
  0x7c   :  { %578 = vmatmul.bf16.gmra.mxu2 %v5991_v39  ;;  %4693 = vmatpush.bf16.msk.msra.mxu1 %vm4692_vm15, %v5572_v12 }
  0x7d   :  { %627 = vmatmul.bf16.gmra.mxu3 %v5991_v39 }
  0x8a   :  { %437 = vmatmul.bf16.gmra.mxu0 %v6017_v40 }
  0x8b   :  { %486 = vmatmul.bf16.gmra.mxu1 %v6017_v40 }
  0x8c   :  { %583 = vmatmul.bf16.gmra.mxu2 %v6019_v41 }
  0x8d   :  { %632 = vmatmul.bf16.gmra.mxu3 %v6019_v41 }
  0x9a   :  { %442 = vmatmul.bf16.gmra.mxu0 %v6045_v42 }
  0x9b   :  { %491 = vmatmul.bf16.gmra.mxu1 %v6045_v42 }
  0x9c   :  { %588 = vmatmul.bf16.gmra.mxu2 %v6047_v43 }
  0x9d   :  { %637 = vmatmul.bf16.gmra.mxu3 %v6047_v43 }
  0xaa   :  { %447 = vmatmul.bf16.gmra.mxu0 %v6079_v50 }
  0xab   :  { %496 = vmatmul.bf16.gmra.mxu1 %v6079_v50 }
  0xac   :  { %593 = vmatmul.bf16.gmra.mxu2 %v6083_v51 }
  0xad   :  { %642 = vmatmul.bf16.gmra.mxu3 %v6083_v51 }
  0xb7   :  { %v413_v52 = vpop.f32.mrf.mxu0 }
  0xb8   :  { %v462_v53 = vpop.f32.mrf.mxu1 }
  0xba   :  { %962 = vmatmul.bf16.vlgmr.msrb.gmra.mxu0 %v5828_v29 }
  0xbb   :  { %1011 = vmatmul.bf16.vlgmr.msrb.gmra.mxu1 %v5828_v29 }
  0xbc   :  { %1060 = vmatmul.bf16.vlgmr.msrb.gmra.mxu2 %v5841_v31 }
  0xbd   :  { %1109 = vmatmul.bf16.vlgmr.msrb.gmra.mxu3 %v5841_v31 }
  0xbf   :  { %v559_v54 = vpop.f32.mrf.mxu2  ;;  %v415_v55 = vpop.f32.mrf.mxu0 }
  0xc0   :  { %v648_v56 = vmul.f32 %v559_v54, %v413_v52  ;;  %v608_v57 = vpop.f32.mrf.mxu3  ;;  %v464_v58 = vpop.f32.mrf.mxu1 }
  0xc1   :  { %v649_v59 = vmul.f32 %v608_v57, %v462_v53 }
  0xc7   :  { %v561_v60 = vpop.f32.mrf.mxu2  ;;  %v418_v61 = vpop.f32.mrf.mxu0 }
  0xc8   :  { %v650_v62 = vmul.f32 %v561_v60, %v415_v55  ;;  %v610_v63 = vpop.f32.mrf.mxu3  ;;  %v467_v0 = vpop.f32.mrf.mxu1 }
  0xc9   :  { %v651_v6 = vmul.f32 %v610_v63, %v464_v58 }
  0xca   :  { %v680_v7 = vadd.f32 %v650_v62, %v648_v56  ;;  %967 = vmatmul.bf16.gmra.mxu0 %v5904_v32 }
  0xcb   :  { %v701_v8 = vadd.f32 %v651_v6, %v649_v59  ;;  %1016 = vmatmul.bf16.gmra.mxu1 %v5904_v32 }
  0xcc   :  { %1065 = vmatmul.bf16.gmra.mxu2 %v5907_v33 }
  0xcd   :  { %1114 = vmatmul.bf16.gmra.mxu3 %v5907_v33 }
  0xcf   :  { %v564_v9 = vpop.f32.mrf.mxu2  ;;  %v420_v10 = vpop.f32.mrf.mxu0 }
  0xd0   :  { %v652_v11 = vmul.f32 %v564_v9, %v418_v61  ;;  %v613_v24 = vpop.f32.mrf.mxu3  ;;  %v469_v25 = vpop.f32.mrf.mxu1 }
  0xd1   :  { %v653_v26 = vmul.f32 %v613_v24, %v467_v0 }
  0xd2   :  { %v681_v27 = vadd.f32 %v680_v7, %v652_v11 }
  0xd3   :  { %v702_v28 = vadd.f32 %v701_v8, %v653_v26 }
  0xd7   :  { %v566_v29 = vpop.f32.mrf.mxu2  ;;  %v423_v30 = vpop.f32.mrf.mxu0 }
  0xd8   :  { %v654_v44 = vmul.f32 %v566_v29, %v420_v10  ;;  %v615_v47 = vpop.f32.mrf.mxu3  ;;  %v472_v52 = vpop.f32.mrf.mxu1 }
  0xd9   :  { %v655_v53 = vmul.f32 %v615_v47, %v469_v25 }
  0xda   :  { %v682_v54 = vadd.f32 %v681_v27, %v654_v44  ;;  %972 = vmatmul.bf16.gmra.mxu0 %v5933_v34 }
  0xdb   :  { %v703_v55 = vadd.f32 %v702_v28, %v655_v53  ;;  %1021 = vmatmul.bf16.gmra.mxu1 %v5933_v34 }
  0xdc   :  { %1070 = vmatmul.bf16.gmra.mxu2 %v5935_v35 }
  0xdd   :  { %1119 = vmatmul.bf16.gmra.mxu3 %v5935_v35 }
  0xdf   :  { %v569_v56 = vpop.f32.mrf.mxu2  ;;  %v425_v57 = vpop.f32.mrf.mxu0 }
  0xe0   :  { %v656_v58 = vmul.f32 %v569_v56, %v423_v30  ;;  %v618_v59 = vpop.f32.mrf.mxu3  ;;  %v474_v60 = vpop.f32.mrf.mxu1 }
  0xe1   :  { %v657_v61 = vmul.f32 %v618_v59, %v472_v52 }
  0xe2   :  { %v683_v62 = vadd.f32 %v682_v54, %v656_v58 }
  0xe3   :  { %v704_v63 = vadd.f32 %v703_v55, %v657_v61 }
  0xe7   :  { %v571_v0 = vpop.f32.mrf.mxu2  ;;  %v428_v6 = vpop.f32.mrf.mxu0 }
  0xe8   :  { %v658_v7 = vmul.f32 %v571_v0, %v425_v57  ;;  %v620_v8 = vpop.f32.mrf.mxu3  ;;  %v477_v9 = vpop.f32.mrf.mxu1 }
  0xe9   :  { %v659_v10 = vmul.f32 %v620_v8, %v474_v60 }
  0xea   :  { %v684_v11 = vadd.f32 %v683_v62, %v658_v7  ;;  %977 = vmatmul.bf16.gmra.mxu0 %v5961_v36 }
  0xeb   :  { %v705_v24 = vadd.f32 %v704_v63, %v659_v10  ;;  %1026 = vmatmul.bf16.gmra.mxu1 %v5961_v36 }
  0xec   :  { %1075 = vmatmul.bf16.gmra.mxu2 %v5963_v37 }
  0xed   :  { %1124 = vmatmul.bf16.gmra.mxu3 %v5963_v37 }
  0xef   :  { %v574_v25 = vpop.f32.mrf.mxu2  ;;  %v430_v26 = vpop.f32.mrf.mxu0 }
  0xf0   :  { %v660_v36 = vmul.f32 %v574_v25, %v428_v6  ;;  %v623_v37 = vpop.f32.mrf.mxu3  ;;  %v479_v27 = vpop.f32.mrf.mxu1 }
  0xf1   :  { %v661_v28 = vmul.f32 %v623_v37, %v477_v9 }
  0xf2   :  { %v685_v29 = vadd.f32 %v684_v11, %v660_v36 }
  0xf3   :  { %v706_v30 = vadd.f32 %v705_v24, %v661_v28 }
  0xf7   :  { %v576_v44 = vpop.f32.mrf.mxu2  ;;  %v433_v47 = vpop.f32.mrf.mxu0 }
  0xf8   :  { %v662_v52 = vmul.f32 %v576_v44, %v430_v26  ;;  %v625_v53 = vpop.f32.mrf.mxu3  ;;  %v482_v54 = vpop.f32.mrf.mxu1 }
  0xf9   :  { %v663_v55 = vmul.f32 %v625_v53, %v479_v27 }
  0xfa   :  { %v686_v56 = vadd.f32 %v685_v29, %v662_v52  ;;  %982 = vmatmul.bf16.gmra.mxu0 %v5989_v38 }
  0xfb   :  { %v707_v57 = vadd.f32 %v706_v30, %v663_v55  ;;  %1031 = vmatmul.bf16.gmra.mxu1 %v5989_v38 }
  0xfc   :  { %1080 = vmatmul.bf16.gmra.mxu2 %v5991_v39 }
  0xfd   :  { %1129 = vmatmul.bf16.gmra.mxu3 %v5991_v39 }
  0xff   :  { %v579_v58 = vpop.f32.mrf.mxu2  ;;  %v435_v59 = vpop.f32.mrf.mxu0 }
 0x100   :  { %v664_v38 = vmul.f32 %v579_v58, %v433_v47  ;;  %v628_v39 = vpop.f32.mrf.mxu3  ;;  %v484_v60 = vpop.f32.mrf.mxu1 }
 0x101   :  { %v665_v61 = vmul.f32 %v628_v39, %v482_v54 }
 0x102   :  { %v687_v62 = vadd.f32 %v686_v56, %v664_v38 }
 0x103   :  { %v708_v63 = vadd.f32 %v707_v57, %v665_v61  ;;  %v1727_v61 = vld [vmem:[#allocation2 + $0x3] ss:$8 sm:$0x3] }
 0x107   :  { %v581_v0 = vpop.f32.mrf.mxu2  ;;  %v438_v6 = vpop.f32.mrf.mxu0 }
 0x108   :  { %v666_v7 = vmul.f32 %v581_v0, %v435_v59  ;;  %v630_v8 = vpop.f32.mrf.mxu3  ;;  %v487_v9 = vpop.f32.mrf.mxu1 }
 0x109   :  { %v667_v10 = vmul.f32 %v630_v8, %v484_v60  ;;  %v1729_v60 = vld [vmem:[#allocation5 + $0x3] ss:$8 sm:$0x3]  ;;  %v6263_v8 = vperm.slane %v1727_v61, 1 }
 0x10a   :  { %v688_v11 = vadd.f32 %v687_v62, %v666_v7  ;;  %987 = vmatmul.bf16.gmra.mxu0 %v6017_v40 }
 0x10b   :  { %v709_v24 = vadd.f32 %v708_v63, %v667_v10  ;;  %1036 = vmatmul.bf16.gmra.mxu1 %v6017_v40  ;;  %vm1761_vm8 = vcmp.eq.s32.totalorder %v5614_v2, %v6263_v8  ;;  %vm1763_vm9 = vcmp.eq.s32.totalorder %v5617_v3, %v6263_v8 }
 0x10c   :  { %1085 = vmatmul.bf16.gmra.mxu2 %v6019_v41  ;;  %vm4806_vm14 = vmpackc.low %vm1763_vm9, %vm1761_vm8 }
 0x10d   :  { %1134 = vmatmul.bf16.gmra.mxu3 %v6019_v41  ;;  %4807 = vmatpush.bf16.msk.msrb.mxu1 %vm4806_vm14, %v5572_v12 }
 0x10f   :  { %v584_v25 = vpop.f32.mrf.mxu2  ;;  %v440_v26 = vpop.f32.mrf.mxu0 }
 0x110   :  { %v668_v40 = vmul.f32 %v584_v25, %v438_v6  ;;  %v633_v41 = vpop.f32.mrf.mxu3  ;;  %v489_v36 = vpop.f32.mrf.mxu1  ;;  %v6259_v6 = vperm.slane %v1729_v60, 1 }
 0x111   :  { %v669_v37 = vmul.f32 %v633_v41, %v487_v9 }
 0x112   :  { %v689_v27 = vadd.f32 %v688_v11, %v668_v40  ;;  %vm1875_vm2 = vcmp.eq.s32.totalorder %v5614_v2, %v6259_v6  ;;  %vm1877_vm4 = vcmp.eq.s32.totalorder %v5617_v3, %v6259_v6  ;;  %vm1871_vm13 = vcmp.eq.s32.totalorder %v5620_v4, %v6259_v6 }
 0x113   :  { %v710_v45 = vadd.f32 %v709_v24, %v669_v37  ;;  %vm4838_vm7 = vmpackc.low %vm1877_vm4, %vm1875_vm2  ;;  %vm1873_vm15 = vcmp.eq.s32.totalorder %v5623_v5, %v6259_v6  ;;  %vm1757_vm4 = vcmp.eq.s32.totalorder %v5620_v4, %v6263_v8 }
 0x114   :  { %4839 = vmatpush.bf16.msk.msrb.mxu3 %vm4838_vm7, %v5572_v12 }
 0x117   :  { %v586_v46 = vpop.f32.mrf.mxu2  ;;  %v443_v28 = vpop.f32.mrf.mxu0 }
 0x118   :  { %v670_v29 = vmul.f32 %v586_v46, %v440_v26  ;;  %v635_v30 = vpop.f32.mrf.mxu3  ;;  %v492_v44 = vpop.f32.mrf.mxu1 }
 0x119   :  { %v671_v47 = vmul.f32 %v635_v30, %v489_v36  ;;  %v6311_v30 = vld [vmem:[#allocation7] sm:$0xff] }
 0x11a   :  { %v690_v52 = vadd.f32 %v689_v27, %v670_v29  ;;  %992 = vmatmul.bf16.gmra.mxu0 %v6045_v42 }
 0x11b   :  { %v711_v48 = vadd.f32 %v710_v45, %v671_v47  ;;  %1041 = vmatmul.bf16.gmra.mxu1 %v6045_v42  ;;  %v6257_v42 = vperm.slane %v1729_v60, 0 }
 0x11c   :  { %1090 = vmatmul.bf16.gmra.mxu2 %v6047_v43 }
 0x11d   :  { %1139 = vmatmul.bf16.gmra.mxu3 %v6047_v43  ;;  %v6261_v43 = vperm.slane %v1727_v61, 0  ;;  %vm1874_vm0 = vcmp.eq.s32.totalorder %v5614_v2, %v6257_v42  ;;  %vm1876_vm1 = vcmp.eq.s32.totalorder %v5617_v3, %v6257_v42  ;;  %vm1870_vm11 = vcmp.eq.s32.totalorder %v5620_v4, %v6257_v42 }
 0x11e   :  { %vm4822_vm3 = vmpackc.low %vm1876_vm1, %vm1874_vm0  ;;  %vm1872_vm12 = vcmp.eq.s32.totalorder %v5623_v5, %v6257_v42  ;;  %vm1866_vm8 = vcmp.eq.s32.totalorder %v5655_v13, %v6257_v42  ;;  %vm1868_vm9 = vcmp.eq.s32.totalorder %v5658_v14, %v6257_v42 }
 0x11f   :  { %v589_v49 = vpop.f32.mrf.mxu2  ;;  %v445_v53 = vpop.f32.mrf.mxu0  ;;  %vm1760_vm5 = vcmp.eq.s32.totalorder %v5614_v2, %v6261_v43  ;;  %vm1762_vm6 = vcmp.eq.s32.totalorder %v5617_v3, %v6261_v43  ;;  %4823 = vmatpush.bf16.msk.msrb.mxu2 %vm4822_vm3, %v5572_v12  ;;  %vm4824_vm0 = vmpackc.low %vm1872_vm12, %vm1870_vm11  ;;  %vm1756_vm2 = vcmp.eq.s32.totalorder %v5620_v4, %v6261_v43  ;;  %vm1758_vm3 = vcmp.eq.s32.totalorder %v5623_v5, %v6261_v43 }
 0x120   :  { %v672_v54 = vmul.f32 %v589_v49, %v443_v28  ;;  %v638_v55 = vpop.f32.mrf.mxu3  ;;  %v494_v56 = vpop.f32.mrf.mxu1  ;;  %vm4790_vm10 = vmpackc.low %vm1762_vm6, %vm1760_vm5  ;;  %vm1759_vm6 = vcmp.eq.s32.totalorder %v5623_v5, %v6263_v8  ;;  %vm1869_vm12 = vcmp.eq.s32.totalorder %v5658_v14, %v6259_v6  ;;  %vm1752_vm14 = vcmp.eq.s32.totalorder %v5655_v13, %v6261_v43 }
 0x121   :  { %v673_v57 = vmul.f32 %v638_v55, %v492_v44  ;;  %4791 = vmatpush.bf16.msk.msrb.mxu0 %vm4790_vm10, %v5572_v12  ;;  %vm4840_vm1 = vmpackc.low %vm1873_vm15, %vm1871_vm13  ;;  %vm1867_vm10 = vcmp.eq.s32.totalorder %v5655_v13, %v6259_v6  ;;  %vm1754_vm15 = vcmp.eq.s32.totalorder %v5658_v14, %v6261_v43 }
 0x122   :  { %v691_v58 = vadd.f32 %v690_v52, %v672_v54  ;;  %4841 = vmatpush.bf16.msk.msrb.mxu3 %vm4840_vm1, %v5572_v12  ;;  %vm4792_vm5 = vmpackc.low %vm1758_vm3, %vm1756_vm2  ;;  %vm1755_vm2 = vcmp.eq.s32.totalorder %v5658_v14, %v6263_v8 }
 0x123   :  { %v712_v59 = vadd.f32 %v711_v48, %v673_v57  ;;  %4825 = vmatpush.bf16.msk.msrb.mxu2 %vm4824_vm0, %v5572_v12  ;;  %vm4808_vm7 = vmpackc.low %vm1759_vm6, %vm1757_vm4  ;;  %vm1753_vm0 = vcmp.eq.s32.totalorder %v5655_v13, %v6263_v8  ;;  %vm1862_vm4 = vcmp.eq.s32.totalorder %v5681_v15, %v6257_v42  ;;  %vm1863_vm6 = vcmp.eq.s32.totalorder %v5681_v15, %v6259_v6 }
 0x124   :  { %4809 = vmatpush.bf16.msk.msrb.mxu1 %vm4808_vm7, %v5572_v12  ;;  %vm4826_vm11 = vmpackc.low %vm1868_vm9, %vm1866_vm8  ;;  %vm1865_vm7 = vcmp.eq.s32.totalorder %v5684_v16, %v6259_v6 }
 0x125   :  { %4793 = vmatpush.bf16.msk.msrb.mxu0 %vm4792_vm5, %v5572_v12  ;;  %vm4842_vm13 = vmpackc.low %vm1869_vm12, %vm1867_vm10  ;;  %vm1864_vm5 = vcmp.eq.s32.totalorder %v5684_v16, %v6257_v42  ;;  %vm1748_vm10 = vcmp.eq.s32.totalorder %v5681_v15, %v6261_v43  ;;  %vm1749_vm12 = vcmp.eq.s32.totalorder %v5681_v15, %v6263_v8 }
 0x126   :  { %4843 = vmatpush.bf16.msk.msrb.mxu3 %vm4842_vm13, %v5572_v12  ;;  %vm4794_vm1 = vmpackc.low %vm1754_vm15, %vm1752_vm14  ;;  %vm1751_vm14 = vcmp.eq.s32.totalorder %v5684_v16, %v6263_v8 }
 0x127   :  { %v591_v38 = vpop.f32.mrf.mxu2  ;;  %v448_v39 = vpop.f32.mrf.mxu0  ;;  %4827 = vmatpush.bf16.msk.msrb.mxu2 %vm4826_vm11, %v5572_v12  ;;  %vm4810_vm3 = vmpackc.low %vm1755_vm2, %vm1753_vm0  ;;  %vm1750_vm11 = vcmp.eq.s32.totalorder %v5684_v16, %v6261_v43  ;;  %vm1858_vm0 = vcmp.eq.s32.totalorder %v5707_v17, %v6257_v42  ;;  %vm1859_vm2 = vcmp.eq.s32.totalorder %v5707_v17, %v6259_v6 }
 0x128   :  { %v674_v62 = vmul.f32 %v591_v38, %v445_v53  ;;  %v640_v63 = vpop.f32.mrf.mxu3  ;;  %v497_v0 = vpop.f32.mrf.mxu1  ;;  %4811 = vmatpush.bf16.msk.msrb.mxu1 %vm4810_vm3, %v5572_v12  ;;  %vm4828_vm8 = vmpackc.low %vm1864_vm5, %vm1862_vm4  ;;  %vm1861_vm3 = vcmp.eq.s32.totalorder %v5710_v18, %v6259_v6 }
 0x129   :  { %v675_v7 = vmul.f32 %v640_v63, %v494_v56  ;;  %4795 = vmatpush.bf16.msk.msrb.mxu0 %vm4794_vm1, %v5572_v12  ;;  %vm4844_vm9 = vmpackc.low %vm1865_vm7, %vm1863_vm6  ;;  %vm1860_vm1 = vcmp.eq.s32.totalorder %v5710_v18, %v6257_v42  ;;  %vm1744_vm6 = vcmp.eq.s32.totalorder %v5707_v17, %v6261_v43  ;;  %vm1746_vm7 = vcmp.eq.s32.totalorder %v5710_v18, %v6261_v43 }
 0x12a   :  { %v692_v9 = vadd.f32 %v691_v58, %v674_v62  ;;  %997 = vmatmul.bf16.gmra.mxu0 %v6079_v50  ;;  %4845 = vmatpush.bf16.msk.msrb.mxu3 %vm4844_vm9, %v5572_v12  ;;  %vm4796_vm13 = vmpackc.low %vm1750_vm11, %vm1748_vm10  ;;  %vm1747_vm10 = vcmp.eq.s32.totalorder %v5710_v18, %v6263_v8 }
 0x12b   :  { %v713_v10 = vadd.f32 %v712_v59, %v675_v7  ;;  %1046 = vmatmul.bf16.gmra.mxu1 %v6079_v50  ;;  %4829 = vmatpush.bf16.msk.msrb.mxu2 %vm4828_vm8, %v5572_v12  ;;  %vm4812_vm15 = vmpackc.low %vm1751_vm14, %vm1749_vm12  ;;  %vm1745_vm8 = vcmp.eq.s32.totalorder %v5707_v17, %v6263_v8  ;;  %vm1854_vm12 = vcmp.eq.s32.totalorder %v5733_v19, %v6257_v42 }
 0x12c   :  { %1095 = vmatmul.bf16.gmra.mxu2 %v6083_v51  ;;  %4813 = vmatpush.bf16.msk.msrb.mxu1 %vm4812_vm15, %v5572_v12  ;;  %vm4830_vm4 = vmpackc.low %vm1860_vm1, %vm1858_vm0  ;;  %vm1855_vm14 = vcmp.eq.s32.totalorder %v5733_v19, %v6259_v6  ;;  %vm1857_vm15 = vcmp.eq.s32.totalorder %v5736_v20, %v6259_v6 }
 0x12d   :  { %1144 = vmatmul.bf16.gmra.mxu3 %v6083_v51  ;;  %4797 = vmatpush.bf16.msk.msrb.mxu0 %vm4796_vm13, %v5572_v12  ;;  %vm4846_vm5 = vmpackc.low %vm1861_vm3, %vm1859_vm2  ;;  %vm1856_vm13 = vcmp.eq.s32.totalorder %v5736_v20, %v6257_v42  ;;  %vm1740_vm2 = vcmp.eq.s32.totalorder %v5733_v19, %v6261_v43  ;;  %vm1742_vm3 = vcmp.eq.s32.totalorder %v5736_v20, %v6261_v43 }
 0x12e   :  { %4847 = vmatpush.bf16.msk.msrb.mxu3 %vm4846_vm5, %v5572_v12  ;;  %vm4798_vm9 = vmpackc.low %vm1746_vm7, %vm1744_vm6  ;;  %vm1743_vm6 = vcmp.eq.s32.totalorder %v5736_v20, %v6263_v8 }
 0x12f   :  { %v594_v50 = vpop.f32.mrf.mxu2  ;;  %v450_v51 = vpop.f32.mrf.mxu0  ;;  %4831 = vmatpush.bf16.msk.msrb.mxu2 %vm4830_vm4, %v5572_v12  ;;  %vm4814_vm11 = vmpackc.low %vm1747_vm10, %vm1745_vm8  ;;  %vm1741_vm4 = vcmp.eq.s32.totalorder %v5733_v19, %v6263_v8  ;;  %vm1850_vm8 = vcmp.eq.s32.totalorder %v5759_v21, %v6257_v42  ;;  %vm1851_vm10 = vcmp.eq.s32.totalorder %v5759_v21, %v6259_v6 }
 0x130   :  { %v676_v11 = vmul.f32 %v594_v50, %v448_v39  ;;  %v643_v24 = vpop.f32.mrf.mxu3  ;;  %v499_v25 = vpop.f32.mrf.mxu1  ;;  %4815 = vmatpush.bf16.msk.msrb.mxu1 %vm4814_vm11, %v5572_v12  ;;  %vm4832_vm0 = vmpackc.low %vm1856_vm13, %vm1854_vm12  ;;  %vm1853_vm11 = vcmp.eq.s32.totalorder %v5762_v22, %v6259_v6 }
 0x131   :  { %v677_v26 = vmul.f32 %v643_v24, %v497_v0  ;;  %4799 = vmatpush.bf16.msk.msrb.mxu0 %vm4798_vm9, %v5572_v12  ;;  %vm4848_vm1 = vmpackc.low %vm1857_vm15, %vm1855_vm14  ;;  %vm1852_vm9 = vcmp.eq.s32.totalorder %v5762_v22, %v6257_v42  ;;  %vm1736_vm14 = vcmp.eq.s32.totalorder %v5759_v21, %v6261_v43  ;;  %vm1738_vm15 = vcmp.eq.s32.totalorder %v5762_v22, %v6261_v43 }
 0x132   :  { %v693_v40 = vadd.f32 %v692_v9, %v676_v11  ;;  %4849 = vmatpush.bf16.msk.msrb.mxu3 %vm4848_vm1, %v5572_v12  ;;  %vm4800_vm5 = vmpackc.low %vm1742_vm3, %vm1740_vm2  ;;  %vm1739_vm2 = vcmp.eq.s32.totalorder %v5762_v22, %v6263_v8 }
 0x133   :  { %v714_v41 = vadd.f32 %v713_v10, %v677_v26  ;;  %4833 = vmatpush.bf16.msk.msrb.mxu2 %vm4832_vm0, %v5572_v12  ;;  %vm4816_vm7 = vmpackc.low %vm1743_vm6, %vm1741_vm4  ;;  %vm1737_vm0 = vcmp.eq.s32.totalorder %v5759_v21, %v6263_v8  ;;  %vm1846_vm4 = vcmp.eq.s32.totalorder %v5611_v1, %v6257_v42  ;;  %vm1847_vm6 = vcmp.eq.s32.totalorder %v5611_v1, %v6259_v6 }
 0x134   :  { %4817 = vmatpush.bf16.msk.msrb.mxu1 %vm4816_vm7, %v5572_v12  ;;  %vm4834_vm12 = vmpackc.low %vm1852_vm9, %vm1850_vm8  ;;  %vm1849_vm7 = vcmp.eq.s32.totalorder %v5785_v23, %v6259_v6 }
 0x135   :  { %4801 = vmatpush.bf16.msk.msrb.mxu0 %vm4800_vm5, %v5572_v12  ;;  %vm4850_vm13 = vmpackc.low %vm1853_vm11, %vm1851_vm10  ;;  %vm1848_vm5 = vcmp.eq.s32.totalorder %v5785_v23, %v6257_v42  ;;  %vm1732_vm10 = vcmp.eq.s32.totalorder %v5611_v1, %v6261_v43  ;;  %vm1734_vm11 = vcmp.eq.s32.totalorder %v5785_v23, %v6261_v43  ;;  %v6471_v43 = vld [vmem:[#allocation7 + $0x30] sm:$0xff] }
 0x136   :  { %4851 = vmatpush.bf16.msk.msrb.mxu3 %vm4850_vm13, %v5572_v12  ;;  %vm4802_vm1 = vmpackc.low %vm1738_vm15, %vm1736_vm14  ;;  %vm1735_vm14 = vcmp.eq.s32.totalorder %v5785_v23, %v6263_v8 }
 0x137   :  { %v596_v36 = vpop.f32.mrf.mxu2  ;;  %v963_v37 = vpop.f32.mrf.mxu0  ;;  %4835 = vmatpush.bf16.msk.msrb.mxu2 %vm4834_vm12, %v5572_v12  ;;  %vm4818_vm3 = vmpackc.low %vm1739_vm2, %vm1737_vm0  ;;  %vm1733_vm12 = vcmp.eq.s32.totalorder %v5611_v1, %v6263_v8  ;;  %v6475_v8 = vld [vmem:[#allocation8 + $0x30] sm:$0xff] }
 0x138   :  { %v678_v27 = vmul.f32 %v596_v36, %v450_v51  ;;  %v645_v45 = vpop.f32.mrf.mxu3  ;;  %v1012_v46 = vpop.f32.mrf.mxu1  ;;  %4819 = vmatpush.bf16.msk.msrb.mxu1 %vm4818_vm3, %v5572_v12  ;;  %vm4836_vm8 = vmpackc.low %vm1848_vm5, %vm1846_vm4 }
 0x139   :  { %v679_v28 = vmul.f32 %v645_v45, %v499_v25  ;;  %4803 = vmatpush.bf16.msk.msrb.mxu0 %vm4802_vm1, %v5572_v12  ;;  %vm4852_vm9 = vmpackc.low %vm1849_vm7, %vm1847_vm6 }
 0x13a   :  { %v6309_v29 = vadd.f32 %v693_v40, %v678_v27  ;;  %1464 = vmatmul.bf16.vlgmr.msra.gmra.mxu0 %v6311_v30  ;;  %4853 = vmatpush.bf16.msk.msrb.mxu3 %vm4852_vm9, %v5572_v12  ;;  %vm4804_vm13 = vmpackc.low %vm1734_vm11, %vm1732_vm10 }
 0x13b   :  { %v6314_v44 = vadd.f32 %v714_v41, %v679_v28  ;;  %1513 = vmatmul.bf16.vlgmr.msra.gmra.mxu1 %v6311_v30  ;;  %4837 = vmatpush.bf16.msk.msrb.mxu2 %vm4836_vm8, %v5572_v12  ;;  %vm4820_vm15 = vmpackc.low %vm1735_vm14, %vm1733_vm12 }
 0x13c   :  { %1562 = vmatmul.bf16.vlgmr.msra.gmra.mxu2 %v5841_v31  ;;  %4821 = vmatpush.bf16.msk.msrb.mxu1 %vm4820_vm15, %v5572_v12 }
 0x13d   :  { %1611 = vmatmul.bf16.vlgmr.msra.gmra.mxu3 %v5841_v31  ;;  %4805 = vmatpush.bf16.msk.msrb.mxu0 %vm4804_vm13, %v5572_v12 }
 0x13f   :  { %v1061_v47 = vpop.f32.mrf.mxu2  ;;  %v965_v52 = vpop.f32.mrf.mxu0 }
 0x140   :  { %v1150_v48 = vmul.f32 %v1061_v47, %v963_v37  ;;  %v1110_v31 = vpop.f32.mrf.mxu3  ;;  %v1014_v49 = vpop.f32.mrf.mxu1 }
 0x141   :  { %v1151_v53 = vmul.f32 %v1110_v31, %v1012_v46 }
 0x147   :  { %v1063_v54 = vpop.f32.mrf.mxu2  ;;  %v968_v55 = vpop.f32.mrf.mxu0 }
 0x148   :  { %v1152_v56 = vmul.f32 %v1063_v54, %v965_v52  ;;  %v1112_v57 = vpop.f32.mrf.mxu3  ;;  %v1017_v58 = vpop.f32.mrf.mxu1 }
 0x149   :  { %v1153_v59 = vmul.f32 %v1112_v57, %v1014_v49 }
 0x14a   :  { %v1182_v38 = vadd.f32 %v1152_v56, %v1150_v48  ;;  %1469 = vmatmul.bf16.gmra.mxu0 %v5904_v32 }
 0x14b   :  { %v1203_v39 = vadd.f32 %v1153_v59, %v1151_v53  ;;  %1518 = vmatmul.bf16.gmra.mxu1 %v5904_v32  ;;  %v6387_v53 = vld [vmem:[#allocation7 + $0x18] sm:$0xff] }
 0x14c   :  { %1567 = vmatmul.bf16.gmra.mxu2 %v5907_v33 }
 0x14d   :  { %1616 = vmatmul.bf16.gmra.mxu3 %v5907_v33 }
 0x14f   :  { %v1066_v60 = vpop.f32.mrf.mxu2  ;;  %v970_v61 = vpop.f32.mrf.mxu0 }
 0x150   :  { %v1154_v32 = vmul.f32 %v1066_v60, %v968_v55  ;;  %v1115_v33 = vpop.f32.mrf.mxu3  ;;  %v1019_v62 = vpop.f32.mrf.mxu1  ;;  %v6391_v55 = vld [vmem:[#allocation8 + $0x18] sm:$0xff] }
 0x151   :  { %v1155_v63 = vmul.f32 %v1115_v33, %v1017_v58 }
 0x152   :  { %v1183_v0 = vadd.f32 %v1182_v38, %v1154_v32 }
 0x153   :  { %v1204_v7 = vadd.f32 %v1203_v39, %v1155_v63 }
 0x157   :  { %v1068_v9 = vpop.f32.mrf.mxu2  ;;  %v973_v10 = vpop.f32.mrf.mxu0 }
 0x158   :  { %v1156_v50 = vmul.f32 %v1068_v9, %v970_v61  ;;  %v1117_v51 = vpop.f32.mrf.mxu3  ;;  %v1022_v11 = vpop.f32.mrf.mxu1 }
 0x159   :  { %v1157_v24 = vmul.f32 %v1117_v51, %v1019_v62  ;;  %v6419_v51 = vld [vmem:[#allocation8 + $0x20] sm:$0xff] }
 0x15a   :  { %v1184_v25 = vadd.f32 %v1183_v0, %v1156_v50  ;;  %1474 = vmatmul.bf16.gmra.mxu0 %v5933_v34 }
 0x15b   :  { %v1205_v26 = vadd.f32 %v1204_v7, %v1157_v24  ;;  %1523 = vmatmul.bf16.gmra.mxu1 %v5933_v34 }
 0x15c   :  { %1572 = vmatmul.bf16.gmra.mxu2 %v5935_v35 }
 0x15d   :  { %1621 = vmatmul.bf16.gmra.mxu3 %v5935_v35 }
 0x15f   :  { %v1071_v40 = vpop.f32.mrf.mxu2  ;;  %v975_v41 = vpop.f32.mrf.mxu0 }
 0x160   :  { %v1158_v34 = vmul.f32 %v1071_v40, %v973_v10  ;;  %v1120_v35 = vpop.f32.mrf.mxu3  ;;  %v1024_v36 = vpop.f32.mrf.mxu1  ;;  %v6415_v10 = vld [vmem:[#allocation7 + $0x20] sm:$0xff] }
 0x161   :  { %v1159_v37 = vmul.f32 %v1120_v35, %v1022_v11 }
 0x162   :  { %v1185_v27 = vadd.f32 %v1184_v25, %v1158_v34 }
 0x163   :  { %v1206_v45 = vadd.f32 %v1205_v26, %v1159_v37 }
 0x167   :  { %v1073_v46 = vpop.f32.mrf.mxu2  ;;  %v978_v28 = vpop.f32.mrf.mxu0 }
 0x168   :  { %v1160_v47 = vmul.f32 %v1073_v46, %v975_v41  ;;  %v1122_v52 = vpop.f32.mrf.mxu3  ;;  %v1027_v48 = vpop.f32.mrf.mxu1 }
 0x169   :  { %v1161_v31 = vmul.f32 %v1122_v52, %v1024_v36  ;;  %v6443_v52 = vld [vmem:[#allocation7 + $0x28] sm:$0xff] }
 0x16a   :  { %v1186_v49 = vadd.f32 %v1185_v27, %v1160_v47  ;;  %1479 = vmatmul.bf16.gmra.mxu0 %v6387_v53 }
 0x16b   :  { %v1207_v54 = vadd.f32 %v1206_v45, %v1161_v31  ;;  %1528 = vmatmul.bf16.gmra.mxu1 %v6387_v53  ;;  %v6447_v31 = vld [vmem:[#allocation8 + $0x28] sm:$0xff] }
 0x16c   :  { %1577 = vmatmul.bf16.gmra.mxu2 %v6391_v55 }
 0x16d   :  { %1626 = vmatmul.bf16.gmra.mxu3 %v6391_v55 }
 0x16f   :  { %v1076_v56 = vpop.f32.mrf.mxu2  ;;  %v980_v57 = vpop.f32.mrf.mxu0 }
 0x170   :  { %v1162_v58 = vmul.f32 %v1076_v56, %v978_v28  ;;  %v1125_v59 = vpop.f32.mrf.mxu3  ;;  %v1029_v38 = vpop.f32.mrf.mxu1 }
 0x171   :  { %v1163_v39 = vmul.f32 %v1125_v59, %v1027_v48 }
 0x172   :  { %v1187_v60 = vadd.f32 %v1186_v49, %v1162_v58 }
 0x173   :  { %v1208_v61 = vadd.f32 %v1207_v54, %v1163_v39 }
 0x177   :  { %v1078_v32 = vpop.f32.mrf.mxu2  ;;  %v983_v33 = vpop.f32.mrf.mxu0 }
 0x178   :  { %v1164_v62 = vmul.f32 %v1078_v32, %v980_v57  ;;  %v1127_v63 = vpop.f32.mrf.mxu3  ;;  %v1032_v0 = vpop.f32.mrf.mxu1 }
 0x179   :  { %v1165_v7 = vmul.f32 %v1127_v63, %v1029_v38 }
 0x17a   :  { %v1188_v9 = vadd.f32 %v1187_v60, %v1164_v62  ;;  %1484 = vmatmul.bf16.gmra.mxu0 %v6415_v10 }
 0x17b   :  { %v1209_v50 = vadd.f32 %v1208_v61, %v1165_v7  ;;  %1533 = vmatmul.bf16.gmra.mxu1 %v6415_v10 }
 0x17c   :  { %1582 = vmatmul.bf16.gmra.mxu2 %v6419_v51 }
 0x17d   :  { %1631 = vmatmul.bf16.gmra.mxu3 %v6419_v51 }
 0x17f   :  { %v1081_v11 = vpop.f32.mrf.mxu2  ;;  %v985_v24 = vpop.f32.mrf.mxu0 }
 0x180   :  { %v1166_v25 = vmul.f32 %v1081_v11, %v983_v33  ;;  %v1130_v26 = vpop.f32.mrf.mxu3  ;;  %v1034_v40 = vpop.f32.mrf.mxu1 }
 0x181   :  { %v1167_v41 = vmul.f32 %v1130_v26, %v1032_v0 }
 0x182   :  { %v1189_v34 = vadd.f32 %v1188_v9, %v1166_v25 }
 0x183   :  { %v1210_v35 = vadd.f32 %v1209_v50, %v1167_v41 }
 0x187   :  { %v1083_v36 = vpop.f32.mrf.mxu2  ;;  %v988_v37 = vpop.f32.mrf.mxu0 }
 0x188   :  { %v1168_v27 = vmul.f32 %v1083_v36, %v985_v24  ;;  %v1132_v45 = vpop.f32.mrf.mxu3  ;;  %v1037_v46 = vpop.f32.mrf.mxu1 }
 0x189   :  { %v1169_v28 = vmul.f32 %v1132_v45, %v1034_v40  ;;  %v2229_v45 = vld [vmem:[#allocation2 + $0x4] ss:$8 sm:$0x3] }
 0x18a   :  { %v1190_v47 = vadd.f32 %v1189_v34, %v1168_v27  ;;  %1489 = vmatmul.bf16.gmra.mxu0 %v6443_v52  ;;  %v2231_v27 = vld [vmem:[#allocation5 + $0x4] ss:$8 sm:$0x3] }
 0x18b   :  { %v1211_v48 = vadd.f32 %v1210_v35, %v1169_v28  ;;  %1538 = vmatmul.bf16.gmra.mxu1 %v6443_v52  ;;  %v6479_v28 = vld [vmem:[#allocation7 + $0x38] sm:$0xff] }
 0x18c   :  { %1587 = vmatmul.bf16.gmra.mxu2 %v6447_v31 }
 0x18d   :  { %1636 = vmatmul.bf16.gmra.mxu3 %v6447_v31 }
 0x18f   :  { %v1086_v49 = vpop.f32.mrf.mxu2  ;;  %v990_v54 = vpop.f32.mrf.mxu0 }
 0x190   :  { %v1170_v56 = vmul.f32 %v1086_v49, %v988_v37  ;;  %v1135_v57 = vpop.f32.mrf.mxu3  ;;  %v1039_v58 = vpop.f32.mrf.mxu1  ;;  %v6486_v49 = vperm.slane %v2229_v45, 0 }
 0x191   :  { %v1171_v59 = vmul.f32 %v1135_v57, %v1037_v46  ;;  %v6491_v57 = vld [vmem:[#allocation8 + $0x38] sm:$0xff] }
 0x192   :  { %v1191_v38 = vadd.f32 %v1190_v47, %v1170_v56  ;;  %v6482_v47 = vperm.slane %v2231_v27, 0  ;;  %v6489_v56 = vperm.slane %v2229_v45, 1  ;;  %vm2262_vm5 = vcmp.eq.s32.totalorder %v5614_v2, %v6486_v49 }
 0x193   :  { %v1212_v42 = vadd.f32 %v1211_v48, %v1171_v59  ;;  %v6484_v48 = vperm.slane %v2231_v27, 1  ;;  %vm2264_vm6 = vcmp.eq.s32.totalorder %v5617_v3, %v6486_v49 }
 0x194   :  { %vm2376_vm0 = vcmp.eq.s32.totalorder %v5614_v2, %v6482_v47  ;;  %vm2378_vm1 = vcmp.eq.s32.totalorder %v5617_v3, %v6482_v47  ;;  %vm2263_vm7 = vcmp.eq.s32.totalorder %v5614_v2, %v6489_v56  ;;  %vm2265_vm8 = vcmp.eq.s32.totalorder %v5617_v3, %v6489_v56  ;;  %vm4918_vm12 = vmpackc.low %vm2264_vm6, %vm2262_vm5 }
 0x195   :  { %vm2377_vm2 = vcmp.eq.s32.totalorder %v5614_v2, %v6484_v48  ;;  %vm2379_vm3 = vcmp.eq.s32.totalorder %v5617_v3, %v6484_v48  ;;  %vm4950_vm4 = vmpackc.low %vm2378_vm1, %vm2376_vm0  ;;  %vm2372_vm10 = vcmp.eq.s32.totalorder %v5620_v4, %v6482_v47  ;;  %vm2374_vm11 = vcmp.eq.s32.totalorder %v5623_v5, %v6482_v47  ;;  %4919 = vmatpush.bf16.msk.msra.mxu0 %vm4918_vm12, %v5572_v12 }
 0x196   :  { %4951 = vmatpush.bf16.msk.msra.mxu2 %vm4950_vm4, %v5572_v12  ;;  %vm4966_vm9 = vmpackc.low %vm2379_vm3, %vm2377_vm2  ;;  %vm2373_vm13 = vcmp.eq.s32.totalorder %v5620_v4, %v6484_v48  ;;  %vm2375_vm14 = vcmp.eq.s32.totalorder %v5623_v5, %v6484_v48  ;;  %vm2258_vm2 = vcmp.eq.s32.totalorder %v5620_v4, %v6486_v49  ;;  %vm2260_vm3 = vcmp.eq.s32.totalorder %v5623_v5, %v6486_v49 }
 0x197   :  { %v1088_v6 = vpop.f32.mrf.mxu2  ;;  %v993_v39 = vpop.f32.mrf.mxu0  ;;  %4967 = vmatpush.bf16.msk.msra.mxu3 %vm4966_vm9, %v5572_v12  ;;  %vm4934_vm15 = vmpackc.low %vm2265_vm8, %vm2263_vm7  ;;  %vm2259_vm4 = vcmp.eq.s32.totalorder %v5620_v4, %v6489_v56  ;;  %vm2261_vm6 = vcmp.eq.s32.totalorder %v5623_v5, %v6489_v56  ;;  %vm2368_vm8 = vcmp.eq.s32.totalorder %v5655_v13, %v6482_v47  ;;  %vm2370_vm9 = vcmp.eq.s32.totalorder %v5658_v14, %v6482_v47 }
 0x198   :  { %v1172_v60 = vmul.f32 %v1088_v6, %v990_v54  ;;  %v1137_v61 = vpop.f32.mrf.mxu3  ;;  %v1042_v32 = vpop.f32.mrf.mxu1  ;;  %4935 = vmatpush.bf16.msk.msra.mxu1 %vm4934_vm15, %v5572_v12  ;;  %vm4952_vm0 = vmpackc.low %vm2374_vm11, %vm2372_vm10  ;;  %vm2369_vm10 = vcmp.eq.s32.totalorder %v5655_v13, %v6484_v48  ;;  %vm2371_vm12 = vcmp.eq.s32.totalorder %v5658_v14, %v6484_v48  ;;  %vm2256_vm15 = vcmp.eq.s32.totalorder %v5658_v14, %v6486_v49 }
 0x199   :  { %v1173_v33 = vmul.f32 %v1137_v61, %v1039_v58  ;;  %v716_v61 = vrot.slane %v6314_v44, 4  ;;  %vm4968_vm1 = vmpackc.low %vm2375_vm14, %vm2373_vm13  ;;  %vm2254_vm14 = vcmp.eq.s32.totalorder %v5655_v13, %v6486_v49 }
 0x19a   :  { %v1192_v62 = vadd.f32 %v1191_v38, %v1172_v60  ;;  %1494 = vmatmul.bf16.gmra.mxu0 %v6471_v43  ;;  %v695_v60 = vrot.slane %v6309_v29, 4  ;;  %4953 = vmatpush.bf16.msk.msra.mxu2 %vm4952_vm0, %v5572_v12  ;;  %vm4920_vm5 = vmpackc.low %vm2260_vm3, %vm2258_vm2  ;;  %vm2255_vm0 = vcmp.eq.s32.totalorder %v5655_v13, %v6489_v56  ;;  %vm2257_vm2 = vcmp.eq.s32.totalorder %v5658_v14, %v6489_v56 }
 0x19b   :  { %v1213_v63 = vadd.f32 %v1212_v42, %v1173_v33  ;;  %1543 = vmatmul.bf16.gmra.mxu1 %v6471_v43  ;;  %4969 = vmatpush.bf16.msk.msra.mxu3 %vm4968_vm1, %v5572_v12  ;;  %vm4936_vm7 = vmpackc.low %vm2261_vm6, %vm2259_vm4  ;;  %vm4236_vm3 = vcmask 1040384   ;;  %vm2366_vm6 = vcmp.eq.s32.totalorder %v5684_v16, %v6482_v47 }
 0x19c   :  { %1592 = vmatmul.bf16.gmra.mxu2 %v6475_v8  ;;  %4921 = vmatpush.bf16.msk.msra.mxu0 %vm4920_vm5, %v5572_v12  ;;  %vm4954_vm11 = vmpackc.low %vm2370_vm9, %vm2368_vm8  ;;  %vm2364_vm5 = vcmp.eq.s32.totalorder %v5681_v15, %v6482_v47  ;;  %vm2367_vm8 = vcmp.eq.s32.totalorder %v5684_v16, %v6484_v48 }
 0x19d   :  { %1641 = vmatmul.bf16.gmra.mxu3 %v6475_v8  ;;  %4937 = vmatpush.bf16.msk.msra.mxu1 %vm4936_vm7, %v5572_v12  ;;  %vm4970_vm13 = vmpackc.low %vm2371_vm12, %vm2369_vm10  ;;  %vm2365_vm7 = vcmp.eq.s32.totalorder %v5681_v15, %v6484_v48  ;;  %vm2252_vm12 = vcmp.eq.s32.totalorder %v5684_v16, %v6486_v49 }
 0x19e   :  { %4955 = vmatpush.bf16.msk.msra.mxu2 %vm4954_vm11, %v5572_v12  ;;  %vm4922_vm1 = vmpackc.low %vm2256_vm15, %vm2254_vm14  ;;  %vm2250_vm11 = vcmp.eq.s32.totalorder %v5681_v15, %v6486_v49  ;;  %vm2253_vm15 = vcmp.eq.s32.totalorder %v5684_v16, %v6489_v56 }
 0x19f   :  { %v1091_v0 = vpop.f32.mrf.mxu2  ;;  %v995_v7 = vpop.f32.mrf.mxu0  ;;  %4971 = vmatpush.bf16.msk.msra.mxu3 %vm4970_vm13, %v5572_v12  ;;  %vm4938_vm4 = vmpackc.low %vm2257_vm2, %vm2255_vm0  ;;  %vm2251_vm13 = vcmp.eq.s32.totalorder %v5681_v15, %v6489_v56  ;;  %vm2362_vm2 = vcmp.eq.s32.totalorder %v5710_v18, %v6482_v47 }
 0x1a0   :  { %v1174_v9 = vmul.f32 %v1091_v0, %v993_v39  ;;  %v1140_v50 = vpop.f32.mrf.mxu3  ;;  %v1044_v11 = vpop.f32.mrf.mxu1  ;;  %4923 = vmatpush.bf16.msk.msra.mxu0 %vm4922_vm1, %v5572_v12  ;;  %vm4956_vm9 = vmpackc.low %vm2366_vm6, %vm2364_vm5  ;;  %vm2360_vm1 = vcmp.eq.s32.totalorder %v5707_v17, %v6482_v47 }
 0x1a1   :  { %v1175_v24 = vmul.f32 %v1140_v50, %v1042_v32  ;;  %4939 = vmatpush.bf16.msk.msra.mxu1 %vm4938_vm4, %v5572_v12  ;;  %vm4972_vm10 = vmpackc.low %vm2367_vm8, %vm2365_vm7  ;;  %vm2363_vm4 = vcmp.eq.s32.totalorder %v5710_v18, %v6484_v48  ;;  %vm2246_vm7 = vcmp.eq.s32.totalorder %v5707_v17, %v6486_v49  ;;  %vm2248_vm8 = vcmp.eq.s32.totalorder %v5710_v18, %v6486_v49 }
 0x1a2   :  { %v1193_v25 = vadd.f32 %v1192_v62, %v1174_v9  ;;  %v696_v62 = vadd.f32 %v695_v60, %v6309_v29  ;;  %v6550_v29 = vld [vmem:[#allocation8] sm:$0xff]  ;;  %4957 = vmatpush.bf16.msk.msra.mxu2 %vm4956_vm9, %v5572_v12  ;;  %vm4924_vm14 = vmpackc.low %vm2252_vm12, %vm2250_vm11  ;;  %vm2247_vm9 = vcmp.eq.s32.totalorder %v5707_v17, %v6489_v56  ;;  %vm2249_vm11 = vcmp.eq.s32.totalorder %v5710_v18, %v6489_v56 }
 0x1a3   :  { %v1214_v26 = vadd.f32 %v1213_v63, %v1175_v24  ;;  %v717_v63 = vadd.f32 %v716_v61, %v6314_v44  ;;  %4973 = vmatpush.bf16.msk.msra.mxu3 %vm4972_vm10, %v5572_v12  ;;  %vm4940_vm0 = vmpackc.low %vm2253_vm15, %vm2251_vm13  ;;  %vm2356_vm13 = vcmp.eq.s32.totalorder %v5733_v19, %v6482_v47  ;;  %vm2357_vm15 = vcmp.eq.s32.totalorder %v5733_v19, %v6484_v48 }
 0x1a4   :  { %4925 = vmatpush.bf16.msk.msra.mxu0 %vm4924_vm14, %v5572_v12  ;;  %vm4958_vm5 = vmpackc.low %vm2362_vm2, %vm2360_vm1  ;;  %vm2358_vm14 = vcmp.eq.s32.totalorder %v5736_v20, %v6482_v47 }
 0x1a5   :  { %4941 = vmatpush.bf16.msk.msra.mxu1 %vm4940_vm0, %v5572_v12  ;;  %vm4926_vm10 = vmpackc.low %vm2248_vm8, %vm2246_vm7  ;;  %vm2359_vm0 = vcmp.eq.s32.totalorder %v5736_v20, %v6484_v48  ;;  %vm2245_vm7 = vcmp.eq.s32.totalorder %v5736_v20, %v6489_v56 }
 0x1a6   :  { %4959 = vmatpush.bf16.msk.msra.mxu2 %vm4958_vm5, %v5572_v12  ;;  %vm4942_vm12 = vmpackc.low %vm2249_vm11, %vm2247_vm9  ;;  %vm2243_vm5 = vcmp.eq.s32.totalorder %v5733_v19, %v6489_v56  ;;  %vm2352_vm9 = vcmp.eq.s32.totalorder %v5759_v21, %v6482_v47  ;;  %vm2353_vm11 = vcmp.eq.s32.totalorder %v5759_v21, %v6484_v48 }
 0x1a7   :  { %v1093_v40 = vpop.f32.mrf.mxu2  ;;  %v998_v41 = vpop.f32.mrf.mxu0  ;;  %vm4960_vm1 = vmpackc.low %vm2358_vm14, %vm2356_vm13 }
 0x1a8   :  { %v1176_v34 = vmul.f32 %v1093_v40, %v995_v7  ;;  %v1142_v35 = vpop.f32.mrf.mxu3  ;;  %v1047_v36 = vpop.f32.mrf.mxu1  ;;  %4927 = vmatpush.bf16.msk.msra.mxu0 %vm4926_vm10, %v5572_v12  ;;  %vm4976_vm2 = vmpackc.low %vm2359_vm0, %vm2357_vm15  ;;  %vm2354_vm10 = vcmp.eq.s32.totalorder %v5762_v22, %v6482_v47  ;;  %vm2238_vm15 = vcmp.eq.s32.totalorder %v5759_v21, %v6486_v49  ;;  %vm2240_vm0 = vcmp.eq.s32.totalorder %v5762_v22, %v6486_v49 }
 0x1a9   :  { %v1177_v37 = vmul.f32 %v1142_v35, %v1044_v11  ;;  %4943 = vmatpush.bf16.msk.msra.mxu1 %vm4942_vm12, %v5572_v12  ;;  %vm4944_vm8 = vmpackc.low %vm2245_vm7, %vm2243_vm5  ;;  %vm2355_vm12 = vcmp.eq.s32.totalorder %v5762_v22, %v6484_v48  ;;  %vm2348_vm5 = vcmp.eq.s32.totalorder %v5611_v1, %v6482_v47  ;;  %vm2349_vm7 = vcmp.eq.s32.totalorder %v5611_v1, %v6484_v48 }
 0x1aa   :  { %v1194_v46 = vadd.f32 %v1193_v25, %v1176_v34  ;;  %1499 = vmatmul.bf16.gmra.mxu0 %v6479_v28  ;;  %v697_v25 = vrot.slane %v696_v62, 2  ;;  %4961 = vmatpush.bf16.msk.msra.mxu2 %vm4960_vm1, %v5572_v12  ;;  %vm4962_vm13 = vmpackc.low %vm2354_vm10, %vm2352_vm9  ;;  %vm2239_vm1 = vcmp.eq.s32.totalorder %v5759_v21, %v6489_v56 }
 0x1ab   :  { %v1215_v54 = vadd.f32 %v1214_v26, %v1177_v37  ;;  %1548 = vmatmul.bf16.gmra.mxu1 %v6479_v28  ;;  %v718_v26 = vrot.slane %v717_v63, 2  ;;  %vm4978_vm14 = vmpackc.low %vm2355_vm12, %vm2353_vm11  ;;  %vm2234_vm11 = vcmp.eq.s32.totalorder %v5611_v1, %v6486_v49  ;;  %vm2236_vm12 = vcmp.eq.s32.totalorder %v5785_v23, %v6486_v49 }
 0x1ac   :  { %1597 = vmatmul.bf16.gmra.mxu2 %v6491_v57  ;;  %v698_v35 = vadd.f32 %v697_v25, %v696_v62 }
 0x1ad   :  { %1646 = vmatmul.bf16.gmra.mxu3 %v6491_v57  ;;  %4945 = vmatpush.bf16.msk.msra.mxu1 %vm4944_vm8, %v5572_v12  ;;  %vm2351_vm8 = vcmp.eq.s32.totalorder %v5785_v23, %v6484_v48 }
 0x1ae   :  { %4963 = vmatpush.bf16.msk.msra.mxu2 %vm4962_vm13, %v5572_v12  ;;  %vm4980_vm10 = vmpackc.low %vm2351_vm8, %vm2349_vm7  ;;  %vm2235_vm13 = vcmp.eq.s32.totalorder %v5611_v1, %v6489_v56 }
 0x1af   :  { %v1096_v58 = vpop.f32.mrf.mxu2  ;;  %v1000_v59 = vpop.f32.mrf.mxu0 }
 0x1b0   :  { %v1178_v38 = vmul.f32 %v1096_v58, %v998_v41  ;;  %v1145_v42 = vpop.f32.mrf.mxu3  ;;  %v1049_v6 = vpop.f32.mrf.mxu1 }
 0x1b1   :  { %v1179_v39 = vmul.f32 %v1145_v42, %v1047_v36  ;;  %v719_v36 = vadd.f32 %v718_v26, %v717_v63 }
 0x1b2   :  { %v1195_v32 = vadd.f32 %v1194_v46, %v1178_v38 }
 0x1b3   :  { %v1216_v33 = vadd.f32 %v1215_v54, %v1179_v39  ;;  %v720_v39 = vrot.slane %v719_v36, 1 }
 0x1b7   :  { %v1098_v0 = vpop.f32.mrf.mxu2  ;;  %v1465_v7 = vpop.f32.mrf.mxu0 }
 0x1b8   :  { %v1180_v9 = vmul.f32 %v1098_v0, %v1000_v59  ;;  %v1147_v50 = vpop.f32.mrf.mxu3  ;;  %v1514_v11 = vpop.f32.mrf.mxu1  ;;  %v721_v0 = vadd.f32 %v720_v39, %v719_v36  ;;  %v6582_v36 = vld [vmem:[#allocation8 + $0x8] sm:$0xff] }
 0x1b9   :  { %v1181_v24 = vmul.f32 %v1147_v50, %v1049_v6  ;;  %v699_v6 = vrot.slane %v698_v35, 1 }
 0x1ba   :  { %v1196_v40 = vadd.f32 %v1195_v32, %v1180_v9  ;;  %1966 = vmatmul.bf16.vlgmr.msrb.gmra.mxu0 %v6311_v30 }
 0x1bb   :  { %v1217_v41 = vadd.f32 %v1216_v33, %v1181_v24  ;;  %2015 = vmatmul.bf16.vlgmr.msrb.gmra.mxu1 %v6311_v30  ;;  %v700_v62 = vadd.f32 %v699_v6, %v698_v35 }
 0x1bc   :  { %v1197_v34 = vrot.slane %v1196_v40, 4  ;;  %2064 = vmatmul.bf16.vlgmr.msrb.gmra.mxu2 %v6550_v29 }
 0x1bd   :  { %v1218_v44 = vrot.slane %v1217_v41, 4  ;;  %2113 = vmatmul.bf16.vlgmr.msrb.gmra.mxu3 %v6550_v29 }
 0x1be   :  { %v1198_v30 = vadd.f32 %v1197_v34, %v1196_v40 }
 0x1bf   :  { %v1219_v37 = vadd.f32 %v1218_v44, %v1217_v41  ;;  %v1563_v27 = vpop.f32.mrf.mxu2  ;;  %v1467_v45 = vpop.f32.mrf.mxu0  ;;  %v6578_v44 = vld [vmem:[#allocation7 + $0x8] sm:$0xff] }
 0x1c0   :  { %v1199_v46 = vrot.slane %v1198_v30, 2  ;;  %v1652_v54 = vmul.f32 %v1563_v27, %v1465_v7  ;;  %v1612_v58 = vpop.f32.mrf.mxu3  ;;  %v1516_v59 = vpop.f32.mrf.mxu1 }
 0x1c1   :  { %v1220_v38 = vrot.slane %v1219_v37, 2  ;;  %v1653_v42 = vmul.f32 %v1612_v58, %v1514_v11 }
 0x1c2   :  { %v1200_v60 = vadd.f32 %v1199_v46, %v1198_v30 }
 0x1c3   :  { %v1221_v61 = vadd.f32 %v1220_v38, %v1219_v37 }
 0x1c4   :  { %v1201_v32 = vrot.slane %v1200_v60, 1 }
 0x1c5   :  { %v1222_v33 = vrot.slane %v1221_v61, 1 }
 0x1c6   :  { %v1202_v63 = vadd.f32 %v1201_v32, %v1200_v60 }
 0x1c7   :  { %v1223_v7 = vadd.f32 %v1222_v33, %v1221_v61  ;;  %v1565_v9 = vpop.f32.mrf.mxu2  ;;  %v1470_v50 = vpop.f32.mrf.mxu0  ;;  %v6606_v33 = vld [vmem:[#allocation7 + $0x10] sm:$0xff] }
 0x1c8   :  { %v6574_v11 = vsel %vm4236_vm3, %v700_v62, %v1202_v63  ;;  %v1654_v24 = vmul.f32 %v1565_v9, %v1467_v45  ;;  %v1614_v25 = vpop.f32.mrf.mxu3  ;;  %v1519_v26 = vpop.f32.mrf.mxu1  ;;  %v6610_v63 = vld [vmem:[#allocation8 + $0x10] sm:$0xff] }
 0x1c9   :  { %v6576_v40 = vsel %vm4236_vm3, %v721_v0, %v1223_v7  ;;  %v1655_v41 = vmul.f32 %v1614_v25, %v1516_v59  ;;  %vm2361_vm3 = vcmp.eq.s32.totalorder %v5707_v17, %v6484_v48 }
 0x1ca   :  { %v1684_v34 = vadd.f32 %v1654_v24, %v1652_v54  ;;  %1971 = vmatmul.bf16.gmra.mxu0 %v6578_v44  ;;  %vm4974_vm6 = vmpackc.low %vm2363_vm4, %vm2361_vm3  ;;  %vm2242_vm3 = vcmp.eq.s32.totalorder %v5733_v19, %v6486_v49  ;;  %vm2244_vm4 = vcmp.eq.s32.totalorder %v5736_v20, %v6486_v49 }
 0x1cb   :  { %v1705_v35 = vadd.f32 %v1655_v41, %v1653_v42  ;;  %2020 = vmatmul.bf16.gmra.mxu1 %v6578_v44  ;;  %4975 = vmatpush.bf16.msk.msra.mxu3 %vm4974_vm6, %v5572_v12  ;;  %vm4928_vm6 = vmpackc.low %vm2244_vm4, %vm2242_vm3  ;;  %vm2241_vm3 = vcmp.eq.s32.totalorder %v5762_v22, %v6489_v56 }
 0x1cc   :  { %2069 = vmatmul.bf16.gmra.mxu2 %v6582_v36  ;;  %4929 = vmatpush.bf16.msk.msra.mxu0 %vm4928_vm6, %v5572_v12  ;;  %vm4946_vm4 = vmpackc.low %vm2241_vm3, %vm2239_vm1  ;;  %vm2350_vm6 = vcmp.eq.s32.totalorder %v5785_v23, %v6482_v47 }
 0x1cd   :  { %2118 = vmatmul.bf16.gmra.mxu3 %v6582_v36  ;;  %4947 = vmatpush.bf16.msk.msra.mxu1 %vm4946_vm4, %v5572_v12  ;;  %vm4964_vm9 = vmpackc.low %vm2350_vm6, %vm2348_vm5 }
 0x1ce   :  { %4965 = vmatpush.bf16.msk.msra.mxu2 %vm4964_vm9, %v5572_v12 }
 0x1cf   :  { %v1568_v30 = vpop.f32.mrf.mxu2  ;;  %v1472_v37 = vpop.f32.mrf.mxu0  ;;  %4977 = vmatpush.bf16.msk.msra.mxu3 %vm4976_vm2, %v5572_v12  ;;  %vm4930_vm2 = vmpackc.low %vm2240_vm0, %vm2238_vm15  ;;  %vm2237_vm15 = vcmp.eq.s32.totalorder %v5785_v23, %v6489_v56 }
 0x1d0   :  { %v1656_v27 = vmul.f32 %v1568_v30, %v1470_v50  ;;  %v1617_v45 = vpop.f32.mrf.mxu3  ;;  %v1521_v46 = vpop.f32.mrf.mxu1  ;;  %4931 = vmatpush.bf16.msk.msra.mxu0 %vm4930_vm2, %v5572_v12  ;;  %vm4948_vm0 = vmpackc.low %vm2237_vm15, %vm2235_vm13 }
 0x1d1   :  { %v1657_v54 = vmul.f32 %v1617_v45, %v1519_v26  ;;  %4949 = vmatpush.bf16.msk.msra.mxu1 %vm4948_vm0, %v5572_v12 }
 0x1d2   :  { %v1685_v58 = vadd.f32 %v1684_v34, %v1656_v27 }
 0x1d3   :  { %v1706_v59 = vadd.f32 %v1705_v35, %v1657_v54  ;;  %4979 = vmatpush.bf16.msk.msra.mxu3 %vm4978_vm14, %v5572_v12  ;;  %vm4932_vm14 = vmpackc.low %vm2236_vm12, %vm2234_vm11 }
 0x1d4   :  { %4933 = vmatpush.bf16.msk.msra.mxu0 %vm4932_vm14, %v5572_v12 }
 0x1d7   :  { %v1570_v38 = vpop.f32.mrf.mxu2  ;;  %v1475_v42 = vpop.f32.mrf.mxu0  ;;  %4981 = vmatpush.bf16.msk.msra.mxu3 %vm4980_vm10, %v5572_v12 }
 0x1d8   :  { %v1658_v6 = vmul.f32 %v1570_v38, %v1472_v37  ;;  %v1619_v39 = vpop.f32.mrf.mxu3  ;;  %v1524_v60 = vpop.f32.mrf.mxu1 }
 0x1d9   :  { %v1659_v61 = vmul.f32 %v1619_v39, %v1521_v46 }
 0x1da   :  { %v1686_v32 = vadd.f32 %v1685_v58, %v1658_v6  ;;  %1976 = vmatmul.bf16.gmra.mxu0 %v6606_v33 }
 0x1db   :  { %v1707_v62 = vadd.f32 %v1706_v59, %v1659_v61  ;;  %2025 = vmatmul.bf16.gmra.mxu1 %v6606_v33 }
 0x1dc   :  { %2074 = vmatmul.bf16.gmra.mxu2 %v6610_v63 }
 0x1dd   :  { %2123 = vmatmul.bf16.gmra.mxu3 %v6610_v63 }
 0x1df   :  { %v1573_v0 = vpop.f32.mrf.mxu2  ;;  %v1477_v7 = vpop.f32.mrf.mxu0 }
 0x1e0   :  { %v1660_v9 = vmul.f32 %v1573_v0, %v1475_v42  ;;  %v1622_v50 = vpop.f32.mrf.mxu3  ;;  %v1526_v24 = vpop.f32.mrf.mxu1 }
 0x1e1   :  { %v1661_v25 = vmul.f32 %v1622_v50, %v1524_v60 }
 0x1e2   :  { %v1687_v26 = vadd.f32 %v1686_v32, %v1660_v9 }
 0x1e3   :  { %v1708_v41 = vadd.f32 %v1707_v62, %v1661_v25 }
 0x1e7   :  { %v1575_v34 = vpop.f32.mrf.mxu2  ;;  %v1480_v35 = vpop.f32.mrf.mxu0 }
 0x1e8   :  { %v1662_v30 = vmul.f32 %v1575_v34, %v1477_v7  ;;  %v1624_v37 = vpop.f32.mrf.mxu3  ;;  %v1529_v27 = vpop.f32.mrf.mxu1 }
 0x1e9   :  { %v1663_v45 = vmul.f32 %v1624_v37, %v1526_v24 }
 0x1ea   :  { %v1688_v46 = vadd.f32 %v1687_v26, %v1662_v30  ;;  %1981 = vmatmul.bf16.gmra.mxu0 %v6387_v53 }
 0x1eb   :  { %v1709_v54 = vadd.f32 %v1708_v41, %v1663_v45  ;;  %2030 = vmatmul.bf16.gmra.mxu1 %v6387_v53 }
 0x1ec   :  { %2079 = vmatmul.bf16.gmra.mxu2 %v6391_v55 }
 0x1ed   :  { %2128 = vmatmul.bf16.gmra.mxu3 %v6391_v55 }
 0x1ef   :  { %v1578_v58 = vpop.f32.mrf.mxu2  ;;  %v1482_v59 = vpop.f32.mrf.mxu0 }
 0x1f0   :  { %v1664_v53 = vmul.f32 %v1578_v58, %v1480_v35  ;;  %v1627_v55 = vpop.f32.mrf.mxu3  ;;  %v1531_v38 = vpop.f32.mrf.mxu1 }
 0x1f1   :  { %v1665_v42 = vmul.f32 %v1627_v55, %v1529_v27 }
 0x1f2   :  { %v1689_v6 = vadd.f32 %v1688_v46, %v1664_v53 }
 0x1f3   :  { %v1710_v39 = vadd.f32 %v1709_v54, %v1665_v42 }
 0x1f7   :  { %v1580_v60 = vpop.f32.mrf.mxu2  ;;  %v1485_v61 = vpop.f32.mrf.mxu0 }
 0x1f8   :  { %v1666_v32 = vmul.f32 %v1580_v60, %v1482_v59  ;;  %v1629_v62 = vpop.f32.mrf.mxu3  ;;  %v1534_v0 = vpop.f32.mrf.mxu1 }
 0x1f9   :  { %v1667_v7 = vmul.f32 %v1629_v62, %v1531_v38 }
 0x1fa   :  { %v1690_v9 = vadd.f32 %v1689_v6, %v1666_v32  ;;  %1986 = vmatmul.bf16.gmra.mxu0 %v6415_v10 }
 0x1fb   :  { %v1711_v50 = vadd.f32 %v1710_v39, %v1667_v7  ;;  %2035 = vmatmul.bf16.gmra.mxu1 %v6415_v10 }
 0x1fc   :  { %2084 = vmatmul.bf16.gmra.mxu2 %v6419_v51 }
 0x1fd   :  { %2133 = vmatmul.bf16.gmra.mxu3 %v6419_v51 }
 0x1ff   :  { %v1583_v24 = vpop.f32.mrf.mxu2  ;;  %v1487_v25 = vpop.f32.mrf.mxu0 }
 0x200   :  { %v1668_v10 = vmul.f32 %v1583_v24, %v1485_v61  ;;  %v1632_v51 = vpop.f32.mrf.mxu3  ;;  %v1536_v26 = vpop.f32.mrf.mxu1 }
 0x201   :  { %v1669_v41 = vmul.f32 %v1632_v51, %v1534_v0 }
 0x202   :  { %v1691_v34 = vadd.f32 %v1690_v9, %v1668_v10 }
 0x203   :  { %v1712_v35 = vadd.f32 %v1711_v50, %v1669_v41 }
 0x207   :  { %v1585_v30 = vpop.f32.mrf.mxu2  ;;  %v1490_v37 = vpop.f32.mrf.mxu0 }
 0x208   :  { %v1670_v27 = vmul.f32 %v1585_v30, %v1487_v25  ;;  %v1634_v45 = vpop.f32.mrf.mxu3  ;;  %v1539_v46 = vpop.f32.mrf.mxu1 }
 0x209   :  { %v1671_v54 = vmul.f32 %v1634_v45, %v1536_v26 }
 0x20a   :  { %v1692_v58 = vadd.f32 %v1691_v34, %v1670_v27  ;;  %1991 = vmatmul.bf16.gmra.mxu0 %v6443_v52  ;;  %v2733_v27 = vld [vmem:[#allocation5 + $0x5] ss:$8 sm:$0x3] }
 0x20b   :  { %v1713_v59 = vadd.f32 %v1712_v35, %v1671_v54  ;;  %2040 = vmatmul.bf16.gmra.mxu1 %v6443_v52 }
 0x20c   :  { %2089 = vmatmul.bf16.gmra.mxu2 %v6447_v31 }
 0x20d   :  { %2138 = vmatmul.bf16.gmra.mxu3 %v6447_v31 }
 0x20f   :  { %v1588_v53 = vpop.f32.mrf.mxu2  ;;  %v1492_v55 = vpop.f32.mrf.mxu0 }
 0x210   :  { %v1672_v52 = vmul.f32 %v1588_v53, %v1490_v37  ;;  %v1637_v31 = vpop.f32.mrf.mxu3  ;;  %v1541_v38 = vpop.f32.mrf.mxu1 }
 0x211   :  { %v1673_v42 = vmul.f32 %v1637_v31, %v1539_v46  ;;  %v6713_v46 = vperm.slane %v2733_v27, 1 }
 0x212   :  { %v1693_v6 = vadd.f32 %v1692_v58, %v1672_v52 }
 0x213   :  { %v1714_v47 = vadd.f32 %v1713_v59, %v1673_v42  ;;  %vm2879_vm3 = vcmp.eq.s32.totalorder %v5614_v2, %v6713_v46  ;;  %vm2881_vm4 = vcmp.eq.s32.totalorder %v5617_v3, %v6713_v46  ;;  %vm2875_vm14 = vcmp.eq.s32.totalorder %v5620_v4, %v6713_v46 }
 0x214   :  { %vm5094_vm10 = vmpackc.low %vm2881_vm4, %vm2879_vm3  ;;  %vm2877_vm15 = vcmp.eq.s32.totalorder %v5623_v5, %v6713_v46 }
 0x215   :  { %5095 = vmatpush.bf16.msk.msrb.mxu3 %vm5094_vm10, %v5572_v12 }
 0x217   :  { %v1590_v48 = vpop.f32.mrf.mxu2  ;;  %v1495_v39 = vpop.f32.mrf.mxu0 }
 0x218   :  { %v1674_v60 = vmul.f32 %v1590_v48, %v1492_v55  ;;  %v1639_v61 = vpop.f32.mrf.mxu3  ;;  %v1544_v32 = vpop.f32.mrf.mxu1 }
 0x219   :  { %v1675_v62 = vmul.f32 %v1639_v61, %v1541_v38 }
 0x21a   :  { %v1694_v0 = vadd.f32 %v1693_v6, %v1674_v60  ;;  %1996 = vmatmul.bf16.gmra.mxu0 %v6471_v43 }
 0x21b   :  { %v1715_v49 = vadd.f32 %v1714_v47, %v1675_v62  ;;  %2045 = vmatmul.bf16.gmra.mxu1 %v6471_v43  ;;  %v2731_v43 = vld [vmem:[#allocation2 + $0x5] ss:$8 sm:$0x3] }
 0x21c   :  { %2094 = vmatmul.bf16.gmra.mxu2 %v6475_v8  ;;  %v6715_v54 = vperm.slane %v2731_v43, 0  ;;  %v6718_v59 = vperm.slane %v2731_v43, 1  ;;  %v6771_v62 = vld [vmem:[#allocation7] sm:$0xff] }
 0x21d   :  { %2143 = vmatmul.bf16.gmra.mxu3 %v6475_v8  ;;  %v6711_v8 = vperm.slane %v2733_v27, 0 }
 0x21e   :  { %vm2764_vm6 = vcmp.eq.s32.totalorder %v5614_v2, %v6715_v54  ;;  %vm2766_vm7 = vcmp.eq.s32.totalorder %v5617_v3, %v6715_v54  ;;  %vm2765_vm8 = vcmp.eq.s32.totalorder %v5614_v2, %v6718_v59  ;;  %vm2767_vm9 = vcmp.eq.s32.totalorder %v5617_v3, %v6718_v59 }
 0x21f   :  { %v1593_v56 = vpop.f32.mrf.mxu2  ;;  %v1497_v7 = vpop.f32.mrf.mxu0  ;;  %vm2878_vm1 = vcmp.eq.s32.totalorder %v5614_v2, %v6711_v8  ;;  %vm2880_vm2 = vcmp.eq.s32.totalorder %v5617_v3, %v6711_v8  ;;  %vm2874_vm11 = vcmp.eq.s32.totalorder %v5620_v4, %v6711_v8  ;;  %vm2876_vm12 = vcmp.eq.s32.totalorder %v5623_v5, %v6711_v8  ;;  %vm5046_vm13 = vmpackc.low %vm2766_vm7, %vm2764_vm6 }
 0x220   :  { %v1676_v9 = vmul.f32 %v1593_v56, %v1495_v39  ;;  %v1642_v50 = vpop.f32.mrf.mxu3  ;;  %v1546_v24 = vpop.f32.mrf.mxu1  ;;  %vm5078_vm5 = vmpackc.low %vm2880_vm2, %vm2878_vm1  ;;  %5047 = vmatpush.bf16.msk.msrb.mxu0 %vm5046_vm13, %v5572_v12  ;;  %vm2760_vm3 = vcmp.eq.s32.totalorder %v5620_v4, %v6715_v54  ;;  %vm2762_vm4 = vcmp.eq.s32.totalorder %v5623_v5, %v6715_v54  ;;  %vm2763_vm7 = vcmp.eq.s32.totalorder %v5623_v5, %v6718_v59 }
 0x221   :  { %v1677_v25 = vmul.f32 %v1642_v50, %v1544_v32  ;;  %5079 = vmatpush.bf16.msk.msrb.mxu2 %vm5078_vm5, %v5572_v12  ;;  %vm5062_vm0 = vmpackc.low %vm2767_vm9, %vm2765_vm8  ;;  %vm2761_vm5 = vcmp.eq.s32.totalorder %v5620_v4, %v6718_v59  ;;  %vm2870_vm9 = vcmp.eq.s32.totalorder %v5655_v13, %v6711_v8  ;;  %vm2872_vm10 = vcmp.eq.s32.totalorder %v5658_v14, %v6711_v8 }
 0x222   :  { %v1695_v10 = vadd.f32 %v1694_v0, %v1676_v9  ;;  %5063 = vmatpush.bf16.msk.msrb.mxu1 %vm5062_vm0, %v5572_v12  ;;  %vm5080_vm1 = vmpackc.low %vm2876_vm12, %vm2874_vm11  ;;  %vm2871_vm11 = vcmp.eq.s32.totalorder %v5655_v13, %v6713_v46  ;;  %vm2873_vm13 = vcmp.eq.s32.totalorder %v5658_v14, %v6713_v46  ;;  %vm2758_vm0 = vcmp.eq.s32.totalorder %v5658_v14, %v6715_v54 }
 0x223   :  { %v1716_v51 = vadd.f32 %v1715_v49, %v1677_v25  ;;  %vm5096_vm2 = vmpackc.low %vm2877_vm15, %vm2875_vm14  ;;  %vm2756_vm15 = vcmp.eq.s32.totalorder %v5655_v13, %v6715_v54 }
 0x224   :  { %5097 = vmatpush.bf16.msk.msrb.mxu3 %vm5096_vm2, %v5572_v12  ;;  %vm5048_vm6 = vmpackc.low %vm2762_vm4, %vm2760_vm3  ;;  %vm2759_vm3 = vcmp.eq.s32.totalorder %v5658_v14, %v6718_v59  ;;  %vm4239_vm4 = vcmask 1041408  }
 0x225   :  { %5081 = vmatpush.bf16.msk.msrb.mxu2 %vm5080_vm1, %v5572_v12  ;;  %5049 = vmatpush.bf16.msk.msrb.mxu0 %vm5048_vm6, %v5572_v12  ;;  %vm5064_vm8 = vmpackc.low %vm2763_vm7, %vm2761_vm5  ;;  %vm2757_vm1 = vcmp.eq.s32.totalorder %v5655_v13, %v6718_v59  ;;  %vm2866_vm6 = vcmp.eq.s32.totalorder %v5681_v15, %v6711_v8  ;;  %vm2868_vm7 = vcmp.eq.s32.totalorder %v5684_v16, %v6711_v8 }
 0x226   :  { %5065 = vmatpush.bf16.msk.msrb.mxu1 %vm5064_vm8, %v5572_v12  ;;  %vm5082_vm12 = vmpackc.low %vm2872_vm10, %vm2870_vm9  ;;  %vm2867_vm8 = vcmp.eq.s32.totalorder %v5681_v15, %v6713_v46  ;;  %vm2869_vm9 = vcmp.eq.s32.totalorder %v5684_v16, %v6713_v46 }
 0x227   :  { %v1595_v26 = vpop.f32.mrf.mxu2  ;;  %v1500_v41 = vpop.f32.mrf.mxu0  ;;  %vm5098_vm14 = vmpackc.low %vm2873_vm13, %vm2871_vm11  ;;  %vm2754_vm13 = vcmp.eq.s32.totalorder %v5684_v16, %v6715_v54 }
 0x228   :  { %v1678_v34 = vmul.f32 %v1595_v26, %v1497_v7  ;;  %v1644_v35 = vpop.f32.mrf.mxu3  ;;  %v1549_v30 = vpop.f32.mrf.mxu1  ;;  %5099 = vmatpush.bf16.msk.msrb.mxu3 %vm5098_vm14, %v5572_v12  ;;  %vm5050_vm2 = vmpackc.low %vm2758_vm0, %vm2756_vm15  ;;  %vm2753_vm14 = vcmp.eq.s32.totalorder %v5681_v15, %v6718_v59  ;;  %vm2755_vm0 = vcmp.eq.s32.totalorder %v5684_v16, %v6718_v59 }
 0x229   :  { %v1679_v37 = vmul.f32 %v1644_v35, %v1546_v24  ;;  %5083 = vmatpush.bf16.msk.msrb.mxu2 %vm5082_vm12, %v5572_v12  ;;  %5051 = vmatpush.bf16.msk.msrb.mxu0 %vm5050_vm2, %v5572_v12  ;;  %vm5066_vm5 = vmpackc.low %vm2759_vm3, %vm2757_vm1  ;;  %vm2752_vm12 = vcmp.eq.s32.totalorder %v5681_v15, %v6715_v54  ;;  %vm2862_vm2 = vcmp.eq.s32.totalorder %v5707_v17, %v6711_v8 }
 0x22a   :  { %v1696_v45 = vadd.f32 %v1695_v10, %v1678_v34  ;;  %2001 = vmatmul.bf16.gmra.mxu0 %v6479_v28  ;;  %5067 = vmatpush.bf16.msk.msrb.mxu1 %vm5066_vm5, %v5572_v12  ;;  %vm5084_vm10 = vmpackc.low %vm2868_vm7, %vm2866_vm6  ;;  %vm2864_vm3 = vcmp.eq.s32.totalorder %v5710_v18, %v6711_v8  ;;  %vm2865_vm5 = vcmp.eq.s32.totalorder %v5710_v18, %v6713_v46 }
 0x22b   :  { %v1717_v58 = vadd.f32 %v1716_v51, %v1679_v37  ;;  %2050 = vmatmul.bf16.gmra.mxu1 %v6479_v28  ;;  %vm5100_vm11 = vmpackc.low %vm2869_vm9, %vm2867_vm8  ;;  %vm2748_vm8 = vcmp.eq.s32.totalorder %v5707_v17, %v6715_v54  ;;  %vm2750_vm9 = vcmp.eq.s32.totalorder %v5710_v18, %v6715_v54 }
 0x22c   :  { %2099 = vmatmul.bf16.gmra.mxu2 %v6491_v57  ;;  %5101 = vmatpush.bf16.msk.msrb.mxu3 %vm5100_vm11, %v5572_v12  ;;  %vm5052_vm15 = vmpackc.low %vm2754_vm13, %vm2752_vm12  ;;  %vm2751_vm12 = vcmp.eq.s32.totalorder %v5710_v18, %v6718_v59 }
 0x22d   :  { %2148 = vmatmul.bf16.gmra.mxu3 %v6491_v57  ;;  %5085 = vmatpush.bf16.msk.msrb.mxu2 %vm5084_vm10, %v5572_v12  ;;  %vm5068_vm1 = vmpackc.low %vm2755_vm0, %vm2753_vm14  ;;  %vm2749_vm10 = vcmp.eq.s32.totalorder %v5707_v17, %v6718_v59  ;;  %vm2858_vm14 = vcmp.eq.s32.totalorder %v5733_v19, %v6711_v8  ;;  %vm2859_vm0 = vcmp.eq.s32.totalorder %v5733_v19, %v6713_v46 }
 0x22e   :  { %5053 = vmatpush.bf16.msk.msrb.mxu0 %vm5052_vm15, %v5572_v12  ;;  %5069 = vmatpush.bf16.msk.msrb.mxu1 %vm5068_vm1, %v5572_v12  ;;  %vm5086_vm6 = vmpackc.low %vm2864_vm3, %vm2862_vm2  ;;  %vm2860_vm15 = vcmp.eq.s32.totalorder %v5736_v20, %v6711_v8  ;;  %vm2861_vm1 = vcmp.eq.s32.totalorder %v5736_v20, %v6713_v46 }
 0x22f   :  { %v1598_v28 = vpop.f32.mrf.mxu2  ;;  %v1502_v57 = vpop.f32.mrf.mxu0  ;;  %vm5054_vm11 = vmpackc.low %vm2750_vm9, %vm2748_vm8  ;;  %vm2747_vm8 = vcmp.eq.s32.totalorder %v5736_v20, %v6718_v59 }
 0x230   :  { %v1680_v53 = vmul.f32 %v1598_v28, %v1500_v41  ;;  %v1647_v55 = vpop.f32.mrf.mxu3  ;;  %v1551_v52 = vpop.f32.mrf.mxu1  ;;  %vm5070_vm13 = vmpackc.low %vm2751_vm12, %vm2749_vm10  ;;  %vm2854_vm10 = vcmp.eq.s32.totalorder %v5759_v21, %v6711_v8  ;;  %vm2855_vm12 = vcmp.eq.s32.totalorder %v5759_v21, %v6713_v46 }
 0x231   :  { %v1681_v31 = vmul.f32 %v1647_v55, %v1549_v30  ;;  %5087 = vmatpush.bf16.msk.msrb.mxu2 %vm5086_vm6, %v5572_v12  ;;  %vm5088_vm2 = vmpackc.low %vm2860_vm15, %vm2858_vm14  ;;  %vm2745_vm6 = vcmp.eq.s32.totalorder %v5733_v19, %v6718_v59 }
 0x232   :  { %v1697_v38 = vadd.f32 %v1696_v45, %v1680_v53  ;;  %5055 = vmatpush.bf16.msk.msrb.mxu0 %vm5054_vm11, %v5572_v12  ;;  %5071 = vmatpush.bf16.msk.msrb.mxu1 %vm5070_vm13, %v5572_v12  ;;  %vm5104_vm3 = vmpackc.low %vm2861_vm1, %vm2859_vm0  ;;  %vm2856_vm11 = vcmp.eq.s32.totalorder %v5762_v22, %v6711_v8  ;;  %vm2857_vm13 = vcmp.eq.s32.totalorder %v5762_v22, %v6713_v46 }
 0x233   :  { %v1718_v42 = vadd.f32 %v1717_v58, %v1681_v31  ;;  %vm5072_vm9 = vmpackc.low %vm2747_vm8, %vm2745_vm6  ;;  %vm2740_vm0 = vcmp.eq.s32.totalorder %v5759_v21, %v6715_v54  ;;  %vm2742_vm1 = vcmp.eq.s32.totalorder %v5762_v22, %v6715_v54  ;;  %vm2850_vm6 = vcmp.eq.s32.totalorder %v5611_v1, %v6711_v8 }
 0x234   :  { %vm5090_vm14 = vmpackc.low %vm2856_vm11, %vm2854_vm10  ;;  %vm2851_vm8 = vcmp.eq.s32.totalorder %v5611_v1, %v6713_v46 }
 0x235   :  { %5089 = vmatpush.bf16.msk.msrb.mxu2 %vm5088_vm2, %v5572_v12  ;;  %vm5106_vm15 = vmpackc.low %vm2857_vm13, %vm2855_vm12  ;;  %vm2741_vm2 = vcmp.eq.s32.totalorder %v5759_v21, %v6718_v59  ;;  %vm2736_vm12 = vcmp.eq.s32.totalorder %v5611_v1, %v6715_v54  ;;  %vm2738_vm13 = vcmp.eq.s32.totalorder %v5785_v23, %v6715_v54 }
 0x236   :  { %5073 = vmatpush.bf16.msk.msrb.mxu1 %vm5072_vm9, %v5572_v12  ;;  %vm2853_vm9 = vcmp.eq.s32.totalorder %v5785_v23, %v6713_v46 }
 0x237   :  { %v1600_v6 = vpop.f32.mrf.mxu2  ;;  %v1967_v47 = vpop.f32.mrf.mxu0  ;;  %vm5108_vm11 = vmpackc.low %vm2853_vm9, %vm2851_vm8 }
 0x238   :  { %v1682_v48 = vmul.f32 %v1600_v6, %v1502_v57  ;;  %v1649_v39 = vpop.f32.mrf.mxu3  ;;  %v2016_v60 = vpop.f32.mrf.mxu1 }
 0x239   :  { %v1683_v61 = vmul.f32 %v1649_v39, %v1551_v52  ;;  %5091 = vmatpush.bf16.msk.msrb.mxu2 %vm5090_vm14, %v5572_v12  ;;  %vm2737_vm14 = vcmp.eq.s32.totalorder %v5611_v1, %v6718_v59 }
 0x23a   :  { %v1698_v32 = vadd.f32 %v1697_v38, %v1682_v48  ;;  %2468 = vmatmul.bf16.vlgmr.msra.gmra.mxu0 %v6771_v62 }
 0x23b   :  { %v1719_v0 = vadd.f32 %v1718_v42, %v1683_v61  ;;  %2517 = vmatmul.bf16.vlgmr.msra.gmra.mxu1 %v6771_v62 }
 0x23c   :  { %v1699_v49 = vrot.slane %v1698_v32, 4  ;;  %2566 = vmatmul.bf16.vlgmr.msra.gmra.mxu2 %v6550_v29 }
 0x23d   :  { %v1720_v56 = vrot.slane %v1719_v0, 4  ;;  %2615 = vmatmul.bf16.vlgmr.msra.gmra.mxu3 %v6550_v29 }
 0x23e   :  { %v1700_v7 = vadd.f32 %v1699_v49, %v1698_v32 }
 0x23f   :  { %v1721_v9 = vadd.f32 %v1720_v56, %v1719_v0  ;;  %v2065_v50 = vpop.f32.mrf.mxu2  ;;  %v1969_v24 = vpop.f32.mrf.mxu0 }
 0x240   :  { %v1701_v29 = vrot.slane %v1700_v7, 2  ;;  %v2154_v25 = vmul.f32 %v2065_v50, %v1967_v47  ;;  %v2114_v10 = vpop.f32.mrf.mxu3  ;;  %v2018_v51 = vpop.f32.mrf.mxu1 }
 0x241   :  { %v1722_v26 = vrot.slane %v1721_v9, 2  ;;  %v2155_v41 = vmul.f32 %v2114_v10, %v2016_v60 }
 0x242   :  { %v1702_v34 = vadd.f32 %v1701_v29, %v1700_v7 }
 0x243   :  { %v1723_v35 = vadd.f32 %v1722_v26, %v1721_v9 }
 0x244   :  { %v1703_v30 = vrot.slane %v1702_v34, 1 }
 0x245   :  { %v1724_v37 = vrot.slane %v1723_v35, 1 }
 0x246   :  { %v1704_v27 = vadd.f32 %v1703_v30, %v1702_v34 }
 0x247   :  { %v1725_v43 = vadd.f32 %v1724_v37, %v1723_v35  ;;  %v2067_v45 = vpop.f32.mrf.mxu2  ;;  %v1972_v58 = vpop.f32.mrf.mxu0 }
 0x248   :  { %v6798_v28 = vsel %vm4239_vm4, %v6574_v11, %v1704_v27  ;;  %v2156_v57 = vmul.f32 %v2067_v45, %v1969_v24  ;;  %v2116_v53 = vpop.f32.mrf.mxu3  ;;  %v2021_v55 = vpop.f32.mrf.mxu1 }
 0x249   :  { %v6801_v52 = vsel %vm4239_vm4, %v6576_v40, %v1725_v43  ;;  %v2157_v31 = vmul.f32 %v2116_v53, %v2018_v51  ;;  %vm2863_vm4 = vcmp.eq.s32.totalorder %v5707_v17, %v6713_v46  ;;  %v6851_v43 = vld [vmem:[#allocation7 + $0x18] sm:$0xff] }
 0x24a   :  { %v2186_v38 = vadd.f32 %v2156_v57, %v2154_v25  ;;  %2473 = vmatmul.bf16.gmra.mxu0 %v6578_v44  ;;  %vm5102_vm7 = vmpackc.low %vm2865_vm5, %vm2863_vm4  ;;  %vm2744_vm4 = vcmp.eq.s32.totalorder %v5733_v19, %v6715_v54  ;;  %vm2746_vm5 = vcmp.eq.s32.totalorder %v5736_v20, %v6715_v54  ;;  %v6935_v54 = vld [vmem:[#allocation7 + $0x30] sm:$0xff] }
 0x24b   :  { %v2207_v42 = vadd.f32 %v2157_v31, %v2155_v41  ;;  %2522 = vmatmul.bf16.gmra.mxu1 %v6578_v44  ;;  %5103 = vmatpush.bf16.msk.msrb.mxu3 %vm5102_vm7, %v5572_v12  ;;  %vm5056_vm7 = vmpackc.low %vm2746_vm5, %vm2744_vm4  ;;  %vm2743_vm4 = vcmp.eq.s32.totalorder %v5762_v22, %v6718_v59 }
 0x24c   :  { %2571 = vmatmul.bf16.gmra.mxu2 %v6582_v36  ;;  %5057 = vmatpush.bf16.msk.msrb.mxu0 %vm5056_vm7, %v5572_v12  ;;  %vm5074_vm5 = vmpackc.low %vm2743_vm4, %vm2741_vm2  ;;  %vm2852_vm7 = vcmp.eq.s32.totalorder %v5785_v23, %v6711_v8 }
 0x24d   :  { %2620 = vmatmul.bf16.gmra.mxu3 %v6582_v36  ;;  %5075 = vmatpush.bf16.msk.msrb.mxu1 %vm5074_vm5, %v5572_v12  ;;  %vm5092_vm10 = vmpackc.low %vm2852_vm7, %vm2850_vm6 }
 0x24e   :  { %5093 = vmatpush.bf16.msk.msrb.mxu2 %vm5092_vm10, %v5572_v12 }
 0x24f   :  { %v2070_v11 = vpop.f32.mrf.mxu2  ;;  %v1974_v40 = vpop.f32.mrf.mxu0  ;;  %5105 = vmatpush.bf16.msk.msrb.mxu3 %vm5104_vm3, %v5572_v12  ;;  %vm5058_vm3 = vmpackc.low %vm2742_vm1, %vm2740_vm0  ;;  %vm2739_vm0 = vcmp.eq.s32.totalorder %v5785_v23, %v6718_v59  ;;  %v6939_v59 = vld [vmem:[#allocation8 + $0x30] sm:$0xff] }
 0x250   :  { %v2158_v44 = vmul.f32 %v2070_v11, %v1972_v58  ;;  %v2119_v36 = vpop.f32.mrf.mxu3  ;;  %v2023_v6 = vpop.f32.mrf.mxu1  ;;  %v6855_v58 = vld [vmem:[#allocation8 + $0x18] sm:$0xff]  ;;  %5059 = vmatpush.bf16.msk.msrb.mxu0 %vm5058_vm3, %v5572_v12  ;;  %vm5076_vm1 = vmpackc.low %vm2739_vm0, %vm2737_vm14 }
 0x251   :  { %v2159_v47 = vmul.f32 %v2119_v36, %v2021_v55  ;;  %5077 = vmatpush.bf16.msk.msrb.mxu1 %vm5076_vm1, %v5572_v12 }
 0x252   :  { %v2187_v48 = vadd.f32 %v2186_v38, %v2158_v44 }
 0x253   :  { %v2208_v39 = vadd.f32 %v2207_v42, %v2159_v47  ;;  %5107 = vmatpush.bf16.msk.msrb.mxu3 %vm5106_vm15, %v5572_v12  ;;  %vm5060_vm15 = vmpackc.low %vm2738_vm13, %vm2736_vm12 }
 0x254   :  { %5061 = vmatpush.bf16.msk.msrb.mxu0 %vm5060_vm15, %v5572_v12 }
 0x257   :  { %v2072_v60 = vpop.f32.mrf.mxu2  ;;  %v1977_v61 = vpop.f32.mrf.mxu0  ;;  %5109 = vmatpush.bf16.msk.msrb.mxu3 %vm5108_vm11, %v5572_v12 }
 0x258   :  { %v2160_v32 = vmul.f32 %v2072_v60, %v1974_v40  ;;  %v2121_v0 = vpop.f32.mrf.mxu3  ;;  %v2026_v49 = vpop.f32.mrf.mxu1 }
 0x259   :  { %v2161_v56 = vmul.f32 %v2121_v0, %v2023_v6  ;;  %v6883_v0 = vld [vmem:[#allocation8 + $0x20] sm:$0xff] }
 0x25a   :  { %v2188_v7 = vadd.f32 %v2187_v48, %v2160_v32  ;;  %2478 = vmatmul.bf16.gmra.mxu0 %v6606_v33 }
 0x25b   :  { %v2209_v9 = vadd.f32 %v2208_v39, %v2161_v56  ;;  %2527 = vmatmul.bf16.gmra.mxu1 %v6606_v33 }
 0x25c   :  { %2576 = vmatmul.bf16.gmra.mxu2 %v6610_v63 }
 0x25d   :  { %2625 = vmatmul.bf16.gmra.mxu3 %v6610_v63 }
 0x25f   :  { %v2075_v50 = vpop.f32.mrf.mxu2  ;;  %v1979_v24 = vpop.f32.mrf.mxu0 }
 0x260   :  { %v2162_v33 = vmul.f32 %v2075_v50, %v1977_v61  ;;  %v2124_v63 = vpop.f32.mrf.mxu3  ;;  %v2028_v29 = vpop.f32.mrf.mxu1  ;;  %v6879_v61 = vld [vmem:[#allocation7 + $0x20] sm:$0xff] }
 0x261   :  { %v2163_v25 = vmul.f32 %v2124_v63, %v2026_v49 }
 0x262   :  { %v2189_v10 = vadd.f32 %v2188_v7, %v2162_v33 }
 0x263   :  { %v2210_v51 = vadd.f32 %v2209_v9, %v2163_v25 }
 0x267   :  { %v2077_v26 = vpop.f32.mrf.mxu2  ;;  %v1982_v41 = vpop.f32.mrf.mxu0 }
 0x268   :  { %v2164_v34 = vmul.f32 %v2077_v26, %v1979_v24  ;;  %v2126_v35 = vpop.f32.mrf.mxu3  ;;  %v2031_v30 = vpop.f32.mrf.mxu1 }
 0x269   :  { %v2165_v37 = vmul.f32 %v2126_v35, %v2028_v29  ;;  %v6907_v35 = vld [vmem:[#allocation7 + $0x28] sm:$0xff] }
 0x26a   :  { %v2190_v27 = vadd.f32 %v2189_v10, %v2164_v34  ;;  %2483 = vmatmul.bf16.gmra.mxu0 %v6851_v43 }
 0x26b   :  { %v2211_v45 = vadd.f32 %v2210_v51, %v2165_v37  ;;  %2532 = vmatmul.bf16.gmra.mxu1 %v6851_v43  ;;  %v6911_v37 = vld [vmem:[#allocation8 + $0x28] sm:$0xff] }
 0x26c   :  { %2581 = vmatmul.bf16.gmra.mxu2 %v6855_v58 }
 0x26d   :  { %2630 = vmatmul.bf16.gmra.mxu3 %v6855_v58 }
 0x26f   :  { %v2080_v57 = vpop.f32.mrf.mxu2  ;;  %v1984_v53 = vpop.f32.mrf.mxu0 }
 0x270   :  { %v2166_v55 = vmul.f32 %v2080_v57, %v1982_v41  ;;  %v2129_v31 = vpop.f32.mrf.mxu3  ;;  %v2033_v38 = vpop.f32.mrf.mxu1 }
 0x271   :  { %v2167_v42 = vmul.f32 %v2129_v31, %v2031_v30 }
 0x272   :  { %v2191_v11 = vadd.f32 %v2190_v27, %v2166_v55 }
 0x273   :  { %v2212_v40 = vadd.f32 %v2211_v45, %v2167_v42 }
 0x277   :  { %v2082_v44 = vpop.f32.mrf.mxu2  ;;  %v1987_v36 = vpop.f32.mrf.mxu0 }
 0x278   :  { %v2168_v6 = vmul.f32 %v2082_v44, %v1984_v53  ;;  %v2131_v47 = vpop.f32.mrf.mxu3  ;;  %v2036_v48 = vpop.f32.mrf.mxu1 }
 0x279   :  { %v2169_v39 = vmul.f32 %v2131_v47, %v2033_v38 }
 0x27a   :  { %v2192_v60 = vadd.f32 %v2191_v11, %v2168_v6  ;;  %2488 = vmatmul.bf16.gmra.mxu0 %v6879_v61 }
 0x27b   :  { %v2213_v32 = vadd.f32 %v2212_v40, %v2169_v39  ;;  %2537 = vmatmul.bf16.gmra.mxu1 %v6879_v61 }
 0x27c   :  { %2586 = vmatmul.bf16.gmra.mxu2 %v6883_v0 }
 0x27d   :  { %2635 = vmatmul.bf16.gmra.mxu3 %v6883_v0 }
 0x27f   :  { %v2085_v49 = vpop.f32.mrf.mxu2  ;;  %v1989_v56 = vpop.f32.mrf.mxu0 }
 0x280   :  { %v2170_v7 = vmul.f32 %v2085_v49, %v1987_v36  ;;  %v2134_v9 = vpop.f32.mrf.mxu3  ;;  %v2038_v50 = vpop.f32.mrf.mxu1 }
 0x281   :  { %v2171_v24 = vmul.f32 %v2134_v9, %v2036_v48 }
 0x282   :  { %v2193_v33 = vadd.f32 %v2192_v60, %v2170_v7 }
 0x283   :  { %v2214_v63 = vadd.f32 %v2213_v32, %v2171_v24 }
 0x287   :  { %v2087_v29 = vpop.f32.mrf.mxu2  ;;  %v1992_v25 = vpop.f32.mrf.mxu0 }
 0x288   :  { %v2172_v10 = vmul.f32 %v2087_v29, %v1989_v56  ;;  %v2136_v51 = vpop.f32.mrf.mxu3  ;;  %v2041_v26 = vpop.f32.mrf.mxu1 }
 0x289   :  { %v2173_v41 = vmul.f32 %v2136_v51, %v2038_v50  ;;  %v3233_v51 = vld [vmem:[#allocation2 + $0x6] ss:$8 sm:$0x3] }
 0x28a   :  { %v2194_v34 = vadd.f32 %v2193_v33, %v2172_v10  ;;  %2493 = vmatmul.bf16.gmra.mxu0 %v6907_v35  ;;  %v3235_v10 = vld [vmem:[#allocation5 + $0x6] ss:$8 sm:$0x3] }
 0x28b   :  { %v2215_v30 = vadd.f32 %v2214_v63, %v2173_v41  ;;  %2542 = vmatmul.bf16.gmra.mxu1 %v6907_v35  ;;  %v6943_v41 = vld [vmem:[#allocation7 + $0x38] sm:$0xff] }
 0x28c   :  { %2591 = vmatmul.bf16.gmra.mxu2 %v6911_v37 }
 0x28d   :  { %2640 = vmatmul.bf16.gmra.mxu3 %v6911_v37 }
 0x28f   :  { %v2090_v27 = vpop.f32.mrf.mxu2  ;;  %v1994_v45 = vpop.f32.mrf.mxu0 }
 0x290   :  { %v2174_v57 = vmul.f32 %v2090_v27, %v1992_v25  ;;  %v2139_v53 = vpop.f32.mrf.mxu3  ;;  %v2043_v55 = vpop.f32.mrf.mxu1  ;;  %v6950_v27 = vperm.slane %v3233_v51, 0 }
 0x291   :  { %v2175_v31 = vmul.f32 %v2139_v53, %v2041_v26  ;;  %v6955_v53 = vld [vmem:[#allocation8 + $0x38] sm:$0xff] }
 0x292   :  { %v2195_v38 = vadd.f32 %v2194_v34, %v2174_v57  ;;  %v6946_v34 = vperm.slane %v3235_v10, 0  ;;  %v6953_v57 = vperm.slane %v3233_v51, 1  ;;  %vm3266_vm7 = vcmp.eq.s32.totalorder %v5614_v2, %v6950_v27 }
 0x293   :  { %v2216_v8 = vadd.f32 %v2215_v30, %v2175_v31  ;;  %v6948_v30 = vperm.slane %v3235_v10, 1  ;;  %vm3268_vm8 = vcmp.eq.s32.totalorder %v5617_v3, %v6950_v27 }
 0x294   :  { %vm3380_vm2 = vcmp.eq.s32.totalorder %v5614_v2, %v6946_v34  ;;  %vm3382_vm3 = vcmp.eq.s32.totalorder %v5617_v3, %v6946_v34  ;;  %vm3267_vm9 = vcmp.eq.s32.totalorder %v5614_v2, %v6953_v57  ;;  %vm3269_vm10 = vcmp.eq.s32.totalorder %v5617_v3, %v6953_v57  ;;  %vm5174_vm14 = vmpackc.low %vm3268_vm8, %vm3266_vm7 }
 0x295   :  { %vm3381_vm4 = vcmp.eq.s32.totalorder %v5614_v2, %v6948_v30  ;;  %vm3383_vm5 = vcmp.eq.s32.totalorder %v5617_v3, %v6948_v30  ;;  %vm5206_vm6 = vmpackc.low %vm3382_vm3, %vm3380_vm2  ;;  %vm3376_vm12 = vcmp.eq.s32.totalorder %v5620_v4, %v6946_v34  ;;  %vm3378_vm13 = vcmp.eq.s32.totalorder %v5623_v5, %v6946_v34  ;;  %5175 = vmatpush.bf16.msk.msra.mxu0 %vm5174_vm14, %v5572_v12 }
 0x296   :  { %5207 = vmatpush.bf16.msk.msra.mxu2 %vm5206_vm6, %v5572_v12  ;;  %vm5222_vm11 = vmpackc.low %vm3383_vm5, %vm3381_vm4  ;;  %vm3377_vm15 = vcmp.eq.s32.totalorder %v5620_v4, %v6948_v30  ;;  %vm3379_vm0 = vcmp.eq.s32.totalorder %v5623_v5, %v6948_v30  ;;  %vm3262_vm4 = vcmp.eq.s32.totalorder %v5620_v4, %v6950_v27  ;;  %vm3264_vm5 = vcmp.eq.s32.totalorder %v5623_v5, %v6950_v27 }
 0x297   :  { %v2092_v46 = vpop.f32.mrf.mxu2  ;;  %v1997_v42 = vpop.f32.mrf.mxu0  ;;  %5223 = vmatpush.bf16.msk.msra.mxu3 %vm5222_vm11, %v5572_v12  ;;  %vm5190_vm1 = vmpackc.low %vm3269_vm10, %vm3267_vm9  ;;  %vm3263_vm6 = vcmp.eq.s32.totalorder %v5620_v4, %v6953_v57  ;;  %vm3265_vm8 = vcmp.eq.s32.totalorder %v5623_v5, %v6953_v57  ;;  %vm3372_vm10 = vcmp.eq.s32.totalorder %v5655_v13, %v6946_v34  ;;  %vm3374_vm11 = vcmp.eq.s32.totalorder %v5658_v14, %v6946_v34 }
 0x298   :  { %v2176_v11 = vmul.f32 %v2092_v46, %v1994_v45  ;;  %v2141_v40 = vpop.f32.mrf.mxu3  ;;  %v2046_v44 = vpop.f32.mrf.mxu1  ;;  %5191 = vmatpush.bf16.msk.msra.mxu1 %vm5190_vm1, %v5572_v12  ;;  %vm5208_vm2 = vmpackc.low %vm3378_vm13, %vm3376_vm12  ;;  %vm3373_vm12 = vcmp.eq.s32.totalorder %v5655_v13, %v6948_v30  ;;  %vm3375_vm14 = vcmp.eq.s32.totalorder %v5658_v14, %v6948_v30  ;;  %vm3260_vm1 = vcmp.eq.s32.totalorder %v5658_v14, %v6950_v27 }
 0x299   :  { %v2177_v36 = vmul.f32 %v2141_v40, %v2043_v55  ;;  %vm5224_vm3 = vmpackc.low %vm3379_vm0, %vm3377_vm15  ;;  %vm3258_vm0 = vcmp.eq.s32.totalorder %v5655_v13, %v6950_v27 }
 0x29a   :  { %v2196_v6 = vadd.f32 %v2195_v38, %v2176_v11  ;;  %2498 = vmatmul.bf16.gmra.mxu0 %v6935_v54  ;;  %5209 = vmatpush.bf16.msk.msra.mxu2 %vm5208_vm2, %v5572_v12  ;;  %vm5176_vm7 = vmpackc.low %vm3264_vm5, %vm3262_vm4  ;;  %vm3259_vm2 = vcmp.eq.s32.totalorder %v5655_v13, %v6953_v57  ;;  %vm3261_vm4 = vcmp.eq.s32.totalorder %v5658_v14, %v6953_v57  ;;  %vm4242_vm5 = vcmask 1042432  }
 0x29b   :  { %v2217_v47 = vadd.f32 %v2216_v8, %v2177_v36  ;;  %2547 = vmatmul.bf16.gmra.mxu1 %v6935_v54  ;;  %5225 = vmatpush.bf16.msk.msra.mxu3 %vm5224_vm3, %v5572_v12  ;;  %vm5192_vm9 = vmpackc.low %vm3265_vm8, %vm3263_vm6  ;;  %vm3370_vm8 = vcmp.eq.s32.totalorder %v5684_v16, %v6946_v34 }
 0x29c   :  { %2596 = vmatmul.bf16.gmra.mxu2 %v6939_v59  ;;  %5177 = vmatpush.bf16.msk.msra.mxu0 %vm5176_vm7, %v5572_v12  ;;  %vm5210_vm13 = vmpackc.low %vm3374_vm11, %vm3372_vm10  ;;  %vm3368_vm7 = vcmp.eq.s32.totalorder %v5681_v15, %v6946_v34  ;;  %vm3371_vm10 = vcmp.eq.s32.totalorder %v5684_v16, %v6948_v30 }
 0x29d   :  { %2645 = vmatmul.bf16.gmra.mxu3 %v6939_v59  ;;  %5193 = vmatpush.bf16.msk.msra.mxu1 %vm5192_vm9, %v5572_v12  ;;  %vm5226_vm15 = vmpackc.low %vm3375_vm14, %vm3373_vm12  ;;  %vm3369_vm9 = vcmp.eq.s32.totalorder %v5681_v15, %v6948_v30  ;;  %vm3256_vm14 = vcmp.eq.s32.totalorder %v5684_v16, %v6950_v27 }
 0x29e   :  { %5211 = vmatpush.bf16.msk.msra.mxu2 %vm5210_vm13, %v5572_v12  ;;  %vm5178_vm3 = vmpackc.low %vm3260_vm1, %vm3258_vm0  ;;  %vm3254_vm13 = vcmp.eq.s32.totalorder %v5681_v15, %v6950_v27  ;;  %vm3257_vm1 = vcmp.eq.s32.totalorder %v5684_v16, %v6953_v57 }
 0x29f   :  { %v2095_v48 = vpop.f32.mrf.mxu2  ;;  %v1999_v39 = vpop.f32.mrf.mxu0  ;;  %5227 = vmatpush.bf16.msk.msra.mxu3 %vm5226_vm15, %v5572_v12  ;;  %vm5194_vm6 = vmpackc.low %vm3261_vm4, %vm3259_vm2  ;;  %vm3255_vm15 = vcmp.eq.s32.totalorder %v5681_v15, %v6953_v57  ;;  %vm3366_vm4 = vcmp.eq.s32.totalorder %v5710_v18, %v6946_v34 }
 0x2a0   :  { %v2178_v60 = vmul.f32 %v2095_v48, %v1997_v42  ;;  %v2144_v32 = vpop.f32.mrf.mxu3  ;;  %v2048_v49 = vpop.f32.mrf.mxu1  ;;  %5179 = vmatpush.bf16.msk.msra.mxu0 %vm5178_vm3, %v5572_v12  ;;  %vm5212_vm11 = vmpackc.low %vm3370_vm8, %vm3368_vm7  ;;  %vm3364_vm3 = vcmp.eq.s32.totalorder %v5707_v17, %v6946_v34 }
 0x2a1   :  { %v2179_v56 = vmul.f32 %v2144_v32, %v2046_v44  ;;  %5195 = vmatpush.bf16.msk.msra.mxu1 %vm5194_vm6, %v5572_v12  ;;  %vm5228_vm12 = vmpackc.low %vm3371_vm10, %vm3369_vm9  ;;  %vm3367_vm6 = vcmp.eq.s32.totalorder %v5710_v18, %v6948_v30  ;;  %vm3250_vm9 = vcmp.eq.s32.totalorder %v5707_v17, %v6950_v27  ;;  %vm3252_vm10 = vcmp.eq.s32.totalorder %v5710_v18, %v6950_v27 }
 0x2a2   :  { %v2197_v7 = vadd.f32 %v2196_v6, %v2178_v60  ;;  %5213 = vmatpush.bf16.msk.msra.mxu2 %vm5212_vm11, %v5572_v12  ;;  %vm5180_vm0 = vmpackc.low %vm3256_vm14, %vm3254_vm13  ;;  %vm3251_vm11 = vcmp.eq.s32.totalorder %v5707_v17, %v6953_v57  ;;  %vm3253_vm13 = vcmp.eq.s32.totalorder %v5710_v18, %v6953_v57 }
 0x2a3   :  { %v2218_v9 = vadd.f32 %v2217_v47, %v2179_v56  ;;  %v7010_v56 = vld [vmem:[#allocation8] sm:$0xff]  ;;  %5229 = vmatpush.bf16.msk.msra.mxu3 %vm5228_vm12, %v5572_v12  ;;  %vm5196_vm2 = vmpackc.low %vm3257_vm1, %vm3255_vm15  ;;  %vm3360_vm15 = vcmp.eq.s32.totalorder %v5733_v19, %v6946_v34  ;;  %vm3361_vm1 = vcmp.eq.s32.totalorder %v5733_v19, %v6948_v30 }
 0x2a4   :  { %5181 = vmatpush.bf16.msk.msra.mxu0 %vm5180_vm0, %v5572_v12  ;;  %vm5214_vm7 = vmpackc.low %vm3366_vm4, %vm3364_vm3  ;;  %vm3362_vm0 = vcmp.eq.s32.totalorder %v5736_v20, %v6946_v34 }
 0x2a5   :  { %5197 = vmatpush.bf16.msk.msra.mxu1 %vm5196_vm2, %v5572_v12  ;;  %vm5182_vm12 = vmpackc.low %vm3252_vm10, %vm3250_vm9  ;;  %vm3363_vm2 = vcmp.eq.s32.totalorder %v5736_v20, %v6948_v30  ;;  %vm3249_vm9 = vcmp.eq.s32.totalorder %v5736_v20, %v6953_v57 }
 0x2a6   :  { %5215 = vmatpush.bf16.msk.msra.mxu2 %vm5214_vm7, %v5572_v12  ;;  %vm5198_vm14 = vmpackc.low %vm3253_vm13, %vm3251_vm11  ;;  %vm3247_vm7 = vcmp.eq.s32.totalorder %v5733_v19, %v6953_v57  ;;  %vm3356_vm11 = vcmp.eq.s32.totalorder %v5759_v21, %v6946_v34  ;;  %vm3357_vm13 = vcmp.eq.s32.totalorder %v5759_v21, %v6948_v30 }
 0x2a7   :  { %v2097_v50 = vpop.f32.mrf.mxu2  ;;  %v2002_v24 = vpop.f32.mrf.mxu0  ;;  %vm5216_vm3 = vmpackc.low %vm3362_vm0, %vm3360_vm15 }
 0x2a8   :  { %v2180_v33 = vmul.f32 %v2097_v50, %v1999_v39  ;;  %v2146_v63 = vpop.f32.mrf.mxu3  ;;  %v2051_v29 = vpop.f32.mrf.mxu1  ;;  %5183 = vmatpush.bf16.msk.msra.mxu0 %vm5182_vm12, %v5572_v12  ;;  %vm5232_vm4 = vmpackc.low %vm3363_vm2, %vm3361_vm1  ;;  %vm3358_vm12 = vcmp.eq.s32.totalorder %v5762_v22, %v6946_v34  ;;  %vm3242_vm1 = vcmp.eq.s32.totalorder %v5759_v21, %v6950_v27  ;;  %vm3244_vm2 = vcmp.eq.s32.totalorder %v5762_v22, %v6950_v27 }
 0x2a9   :  { %v2181_v25 = vmul.f32 %v2146_v63, %v2048_v49  ;;  %5199 = vmatpush.bf16.msk.msra.mxu1 %vm5198_vm14, %v5572_v12  ;;  %vm5200_vm10 = vmpackc.low %vm3249_vm9, %vm3247_vm7  ;;  %vm3359_vm14 = vcmp.eq.s32.totalorder %v5762_v22, %v6948_v30  ;;  %vm3352_vm7 = vcmp.eq.s32.totalorder %v5611_v1, %v6946_v34  ;;  %vm3353_vm9 = vcmp.eq.s32.totalorder %v5611_v1, %v6948_v30 }
 0x2aa   :  { %v2198_v26 = vadd.f32 %v2197_v7, %v2180_v33  ;;  %2503 = vmatmul.bf16.gmra.mxu0 %v6943_v41  ;;  %5217 = vmatpush.bf16.msk.msra.mxu2 %vm5216_vm3, %v5572_v12  ;;  %vm5218_vm15 = vmpackc.low %vm3358_vm12, %vm3356_vm11  ;;  %vm3243_vm3 = vcmp.eq.s32.totalorder %v5759_v21, %v6953_v57 }
 0x2ab   :  { %v2219_v45 = vadd.f32 %v2218_v9, %v2181_v25  ;;  %2552 = vmatmul.bf16.gmra.mxu1 %v6943_v41  ;;  %vm5234_vm0 = vmpackc.low %vm3359_vm14, %vm3357_vm13  ;;  %vm3238_vm13 = vcmp.eq.s32.totalorder %v5611_v1, %v6950_v27  ;;  %vm3240_vm14 = vcmp.eq.s32.totalorder %v5785_v23, %v6950_v27 }
 0x2ac   :  { %2601 = vmatmul.bf16.gmra.mxu2 %v6955_v53 }
 0x2ad   :  { %2650 = vmatmul.bf16.gmra.mxu3 %v6955_v53  ;;  %5201 = vmatpush.bf16.msk.msra.mxu1 %vm5200_vm10, %v5572_v12  ;;  %vm3355_vm10 = vcmp.eq.s32.totalorder %v5785_v23, %v6948_v30 }
 0x2ae   :  { %5219 = vmatpush.bf16.msk.msra.mxu2 %vm5218_vm15, %v5572_v12  ;;  %vm5236_vm12 = vmpackc.low %vm3355_vm10, %vm3353_vm9  ;;  %vm3239_vm15 = vcmp.eq.s32.totalorder %v5611_v1, %v6953_v57 }
 0x2af   :  { %v2100_v55 = vpop.f32.mrf.mxu2  ;;  %v2004_v31 = vpop.f32.mrf.mxu0 }
 0x2b0   :  { %v2182_v38 = vmul.f32 %v2100_v55, %v2002_v24  ;;  %v2149_v8 = vpop.f32.mrf.mxu3  ;;  %v2053_v46 = vpop.f32.mrf.mxu1 }
 0x2b1   :  { %v2183_v42 = vmul.f32 %v2149_v8, %v2051_v29 }
 0x2b2   :  { %v2199_v11 = vadd.f32 %v2198_v26, %v2182_v38 }
 0x2b3   :  { %v2220_v40 = vadd.f32 %v2219_v45, %v2183_v42 }
 0x2b7   :  { %v2102_v44 = vpop.f32.mrf.mxu2  ;;  %v2469_v36 = vpop.f32.mrf.mxu0 }
 0x2b8   :  { %v2184_v6 = vmul.f32 %v2102_v44, %v2004_v31  ;;  %v2151_v47 = vpop.f32.mrf.mxu3  ;;  %v2518_v48 = vpop.f32.mrf.mxu1 }
 0x2b9   :  { %v2185_v39 = vmul.f32 %v2151_v47, %v2053_v46 }
 0x2ba   :  { %v2200_v60 = vadd.f32 %v2199_v11, %v2184_v6  ;;  %2970 = vmatmul.bf16.vlgmr.msrb.gmra.mxu0 %v6771_v62 }
 0x2bb   :  { %v2221_v32 = vadd.f32 %v2220_v40, %v2185_v39  ;;  %3019 = vmatmul.bf16.vlgmr.msrb.gmra.mxu1 %v6771_v62  ;;  %v7040_v39 = vld [vmem:[#allocation7 + $0x8] sm:$0xff] }
 0x2bc   :  { %v2201_v49 = vrot.slane %v2200_v60, 4  ;;  %3068 = vmatmul.bf16.vlgmr.msrb.gmra.mxu2 %v7010_v56 }
 0x2bd   :  { %v2222_v7 = vrot.slane %v2221_v32, 4  ;;  %3117 = vmatmul.bf16.vlgmr.msrb.gmra.mxu3 %v7010_v56 }
 0x2be   :  { %v2202_v9 = vadd.f32 %v2201_v49, %v2200_v60 }
 0x2bf   :  { %v2223_v62 = vadd.f32 %v2222_v7, %v2221_v32  ;;  %v2567_v50 = vpop.f32.mrf.mxu2  ;;  %v2471_v24 = vpop.f32.mrf.mxu0  ;;  %v7044_v32 = vld [vmem:[#allocation8 + $0x8] sm:$0xff] }
 0x2c0   :  { %v2203_v33 = vrot.slane %v2202_v9, 2  ;;  %v2656_v63 = vmul.f32 %v2567_v50, %v2469_v36  ;;  %v2616_v29 = vpop.f32.mrf.mxu3  ;;  %v2520_v25 = vpop.f32.mrf.mxu1 }
 0x2c1   :  { %v2224_v10 = vrot.slane %v2223_v62, 2  ;;  %v2657_v51 = vmul.f32 %v2616_v29, %v2518_v48 }
 0x2c2   :  { %v2204_v26 = vadd.f32 %v2203_v33, %v2202_v9 }
 0x2c3   :  { %v2225_v45 = vadd.f32 %v2224_v10, %v2223_v62 }
 0x2c4   :  { %v2205_v55 = vrot.slane %v2204_v26, 1 }
 0x2c5   :  { %v2226_v31 = vrot.slane %v2225_v45, 1 }
 0x2c6   :  { %v2206_v38 = vadd.f32 %v2205_v55, %v2204_v26 }
 0x2c7   :  { %v2227_v8 = vadd.f32 %v2226_v31, %v2225_v45  ;;  %v2569_v46 = vpop.f32.mrf.mxu2  ;;  %v2474_v42 = vpop.f32.mrf.mxu0  ;;  %v7068_v45 = vld [vmem:[#allocation7 + $0x10] sm:$0xff] }
 0x2c8   :  { %v7035_v11 = vsel %vm4242_vm5, %v6798_v28, %v2206_v38  ;;  %v2658_v40 = vmul.f32 %v2569_v46, %v2471_v24  ;;  %v2618_v44 = vpop.f32.mrf.mxu3  ;;  %v2523_v36 = vpop.f32.mrf.mxu1  ;;  %v7072_v31 = vld [vmem:[#allocation8 + $0x10] sm:$0xff] }
 0x2c9   :  { %v7038_v6 = vsel %vm4242_vm5, %v6801_v52, %v2227_v8  ;;  %v2659_v47 = vmul.f32 %v2618_v44, %v2520_v25  ;;  %vm3365_vm5 = vcmp.eq.s32.totalorder %v5707_v17, %v6948_v30 }
 0x2ca   :  { %v2688_v48 = vadd.f32 %v2658_v40, %v2656_v63  ;;  %2975 = vmatmul.bf16.gmra.mxu0 %v7040_v39  ;;  %vm5230_vm8 = vmpackc.low %vm3367_vm6, %vm3365_vm5  ;;  %vm3246_vm5 = vcmp.eq.s32.totalorder %v5733_v19, %v6950_v27  ;;  %vm3248_vm6 = vcmp.eq.s32.totalorder %v5736_v20, %v6950_v27 }
 0x2cb   :  { %v2709_v60 = vadd.f32 %v2659_v47, %v2657_v51  ;;  %3024 = vmatmul.bf16.gmra.mxu1 %v7040_v39  ;;  %5231 = vmatpush.bf16.msk.msra.mxu3 %vm5230_vm8, %v5572_v12  ;;  %vm5184_vm8 = vmpackc.low %vm3248_vm6, %vm3246_vm5  ;;  %vm3245_vm5 = vcmp.eq.s32.totalorder %v5762_v22, %v6953_v57 }
 0x2cc   :  { %3073 = vmatmul.bf16.gmra.mxu2 %v7044_v32  ;;  %5185 = vmatpush.bf16.msk.msra.mxu0 %vm5184_vm8, %v5572_v12  ;;  %vm5202_vm6 = vmpackc.low %vm3245_vm5, %vm3243_vm3  ;;  %vm3354_vm8 = vcmp.eq.s32.totalorder %v5785_v23, %v6946_v34 }
 0x2cd   :  { %3122 = vmatmul.bf16.gmra.mxu3 %v7044_v32  ;;  %5203 = vmatpush.bf16.msk.msra.mxu1 %vm5202_vm6, %v5572_v12  ;;  %vm5220_vm11 = vmpackc.low %vm3354_vm8, %vm3352_vm7 }
 0x2ce   :  { %5221 = vmatpush.bf16.msk.msra.mxu2 %vm5220_vm11, %v5572_v12 }
 0x2cf   :  { %v2572_v28 = vpop.f32.mrf.mxu2  ;;  %v2476_v52 = vpop.f32.mrf.mxu0  ;;  %5233 = vmatpush.bf16.msk.msra.mxu3 %vm5232_vm4, %v5572_v12  ;;  %vm5186_vm4 = vmpackc.low %vm3244_vm2, %vm3242_vm1  ;;  %vm3241_vm1 = vcmp.eq.s32.totalorder %v5785_v23, %v6953_v57 }
 0x2d0   :  { %v2660_v49 = vmul.f32 %v2572_v28, %v2474_v42  ;;  %v2621_v7 = vpop.f32.mrf.mxu3  ;;  %v2525_v9 = vpop.f32.mrf.mxu1  ;;  %5187 = vmatpush.bf16.msk.msra.mxu0 %vm5186_vm4, %v5572_v12  ;;  %vm5204_vm2 = vmpackc.low %vm3241_vm1, %vm3239_vm15 }
 0x2d1   :  { %v2661_v62 = vmul.f32 %v2621_v7, %v2523_v36  ;;  %5205 = vmatpush.bf16.msk.msra.mxu1 %vm5204_vm2, %v5572_v12 }
 0x2d2   :  { %v2689_v50 = vadd.f32 %v2688_v48, %v2660_v49 }
 0x2d3   :  { %v2710_v24 = vadd.f32 %v2709_v60, %v2661_v62  ;;  %5235 = vmatpush.bf16.msk.msra.mxu3 %vm5234_vm0, %v5572_v12  ;;  %vm5188_vm0 = vmpackc.low %vm3240_vm14, %vm3238_vm13 }
 0x2d4   :  { %5189 = vmatpush.bf16.msk.msra.mxu0 %vm5188_vm0, %v5572_v12 }
 0x2d7   :  { %v2574_v33 = vpop.f32.mrf.mxu2  ;;  %v2479_v63 = vpop.f32.mrf.mxu0  ;;  %5237 = vmatpush.bf16.msk.msra.mxu3 %vm5236_vm12, %v5572_v12 }
 0x2d8   :  { %v2662_v29 = vmul.f32 %v2574_v33, %v2476_v52  ;;  %v2623_v25 = vpop.f32.mrf.mxu3  ;;  %v2528_v10 = vpop.f32.mrf.mxu1 }
 0x2d9   :  { %v2663_v51 = vmul.f32 %v2623_v25, %v2525_v9 }
 0x2da   :  { %v2690_v26 = vadd.f32 %v2689_v50, %v2662_v29  ;;  %2980 = vmatmul.bf16.gmra.mxu0 %v7068_v45 }
 0x2db   :  { %v2711_v55 = vadd.f32 %v2710_v24, %v2663_v51  ;;  %3029 = vmatmul.bf16.gmra.mxu1 %v7068_v45 }
 0x2dc   :  { %3078 = vmatmul.bf16.gmra.mxu2 %v7072_v31 }
 0x2dd   :  { %3127 = vmatmul.bf16.gmra.mxu3 %v7072_v31 }
 0x2df   :  { %v2577_v38 = vpop.f32.mrf.mxu2  ;;  %v2481_v8 = vpop.f32.mrf.mxu0 }
 0x2e0   :  { %v2664_v46 = vmul.f32 %v2577_v38, %v2479_v63  ;;  %v2626_v42 = vpop.f32.mrf.mxu3  ;;  %v2530_v40 = vpop.f32.mrf.mxu1 }
 0x2e1   :  { %v2665_v44 = vmul.f32 %v2626_v42, %v2528_v10 }
 0x2e2   :  { %v2691_v36 = vadd.f32 %v2690_v26, %v2664_v46 }
 0x2e3   :  { %v2712_v47 = vadd.f32 %v2711_v55, %v2665_v44 }
 0x2e7   :  { %v2579_v48 = vpop.f32.mrf.mxu2  ;;  %v2484_v60 = vpop.f32.mrf.mxu0 }
 0x2e8   :  { %v2666_v28 = vmul.f32 %v2579_v48, %v2481_v8  ;;  %v2628_v52 = vpop.f32.mrf.mxu3  ;;  %v2533_v49 = vpop.f32.mrf.mxu1 }
 0x2e9   :  { %v2667_v7 = vmul.f32 %v2628_v52, %v2530_v40 }
 0x2ea   :  { %v2692_v9 = vadd.f32 %v2691_v36, %v2666_v28  ;;  %2985 = vmatmul.bf16.gmra.mxu0 %v6851_v43 }
 0x2eb   :  { %v2713_v62 = vadd.f32 %v2712_v47, %v2667_v7  ;;  %3034 = vmatmul.bf16.gmra.mxu1 %v6851_v43 }
 0x2ec   :  { %3083 = vmatmul.bf16.gmra.mxu2 %v6855_v58 }
 0x2ed   :  { %3132 = vmatmul.bf16.gmra.mxu3 %v6855_v58 }
 0x2ef   :  { %v2582_v50 = vpop.f32.mrf.mxu2  ;;  %v2486_v24 = vpop.f32.mrf.mxu0 }
 0x2f0   :  { %v2668_v43 = vmul.f32 %v2582_v50, %v2484_v60  ;;  %v2631_v58 = vpop.f32.mrf.mxu3  ;;  %v2535_v33 = vpop.f32.mrf.mxu1 }
 0x2f1   :  { %v2669_v63 = vmul.f32 %v2631_v58, %v2533_v49 }
 0x2f2   :  { %v2693_v29 = vadd.f32 %v2692_v9, %v2668_v43 }
 0x2f3   :  { %v2714_v25 = vadd.f32 %v2713_v62, %v2669_v63 }
 0x2f7   :  { %v2584_v10 = vpop.f32.mrf.mxu2  ;;  %v2489_v51 = vpop.f32.mrf.mxu0 }
 0x2f8   :  { %v2670_v26 = vmul.f32 %v2584_v10, %v2486_v24  ;;  %v2633_v55 = vpop.f32.mrf.mxu3  ;;  %v2538_v38 = vpop.f32.mrf.mxu1 }
 0x2f9   :  { %v2671_v8 = vmul.f32 %v2633_v55, %v2535_v33 }
 0x2fa   :  { %v2694_v46 = vadd.f32 %v2693_v29, %v2670_v26  ;;  %2990 = vmatmul.bf16.gmra.mxu0 %v6879_v61 }
 0x2fb   :  { %v2715_v42 = vadd.f32 %v2714_v25, %v2671_v8  ;;  %3039 = vmatmul.bf16.gmra.mxu1 %v6879_v61 }
 0x2fc   :  { %3088 = vmatmul.bf16.gmra.mxu2 %v6883_v0 }
 0x2fd   :  { %3137 = vmatmul.bf16.gmra.mxu3 %v6883_v0 }
 0x2ff   :  { %v2587_v40 = vpop.f32.mrf.mxu2  ;;  %v2491_v44 = vpop.f32.mrf.mxu0 }
 0x300   :  { %v2672_v61 = vmul.f32 %v2587_v40, %v2489_v51  ;;  %v2636_v0 = vpop.f32.mrf.mxu3  ;;  %v2540_v36 = vpop.f32.mrf.mxu1 }
 0x301   :  { %v2673_v47 = vmul.f32 %v2636_v0, %v2538_v38 }
 0x302   :  { %v2695_v48 = vadd.f32 %v2694_v46, %v2672_v61 }
 0x303   :  { %v2716_v60 = vadd.f32 %v2715_v42, %v2673_v47 }
 0x307   :  { %v2589_v28 = vpop.f32.mrf.mxu2  ;;  %v2494_v52 = vpop.f32.mrf.mxu0 }
 0x308   :  { %v2674_v49 = vmul.f32 %v2589_v28, %v2491_v44  ;;  %v2638_v7 = vpop.f32.mrf.mxu3  ;;  %v2543_v9 = vpop.f32.mrf.mxu1 }
 0x309   :  { %v2675_v62 = vmul.f32 %v2638_v7, %v2540_v36 }
 0x30a   :  { %v2696_v50 = vadd.f32 %v2695_v48, %v2674_v49  ;;  %2995 = vmatmul.bf16.gmra.mxu0 %v6907_v35  ;;  %v3737_v48 = vld [vmem:[#allocation5 + $0x7] ss:$8 sm:$0x3] }
 0x30b   :  { %v2717_v24 = vadd.f32 %v2716_v60, %v2675_v62  ;;  %3044 = vmatmul.bf16.gmra.mxu1 %v6907_v35  ;;  %v3735_v60 = vld [vmem:[#allocation2 + $0x7] ss:$8 sm:$0x3]  ;;  %v7174_v7 = vperm.slane %v3737_v48, 1 }
 0x30c   :  { %3093 = vmatmul.bf16.gmra.mxu2 %v6911_v37  ;;  %v7178_v62 = vperm.slane %v3735_v60, 1 }
 0x30d   :  { %3142 = vmatmul.bf16.gmra.mxu3 %v6911_v37  ;;  %vm3883_vm5 = vcmp.eq.s32.totalorder %v5614_v2, %v7174_v7  ;;  %vm3885_vm7 = vcmp.eq.s32.totalorder %v5617_v3, %v7174_v7  ;;  %vm3879_vm0 = vcmp.eq.s32.totalorder %v5620_v4, %v7174_v7  ;;  %vm3881_vm2 = vcmp.eq.s32.totalorder %v5623_v5, %v7174_v7 }
 0x30e   :  { %vm5350_vm10 = vmpackc.low %vm3885_vm7, %vm3883_vm5  ;;  %vm3769_vm11 = vcmp.eq.s32.totalorder %v5614_v2, %v7178_v62  ;;  %vm3771_vm12 = vcmp.eq.s32.totalorder %v5617_v3, %v7178_v62  ;;  %vm3765_vm7 = vcmp.eq.s32.totalorder %v5620_v4, %v7178_v62 }
 0x30f   :  { %v2592_v43 = vpop.f32.mrf.mxu2  ;;  %v2496_v58 = vpop.f32.mrf.mxu0  ;;  %5351 = vmatpush.bf16.msk.msrb.mxu3 %vm5350_vm10, %v5572_v12  ;;  %vm5318_vm1 = vmpackc.low %vm3771_vm12, %vm3769_vm11 }
 0x310   :  { %v2676_v35 = vmul.f32 %v2592_v43, %v2494_v52  ;;  %v2641_v37 = vpop.f32.mrf.mxu3  ;;  %v2545_v33 = vpop.f32.mrf.mxu1  ;;  %5319 = vmatpush.bf16.msk.msrb.mxu1 %vm5318_vm1, %v5572_v12 }
 0x311   :  { %v2677_v63 = vmul.f32 %v2641_v37, %v2543_v9 }
 0x312   :  { %v2697_v29 = vadd.f32 %v2696_v50, %v2676_v35 }
 0x313   :  { %v2718_v34 = vadd.f32 %v2717_v24, %v2677_v63 }
 0x317   :  { %v2594_v30 = vpop.f32.mrf.mxu2  ;;  %v2499_v25 = vpop.f32.mrf.mxu0 }
 0x318   :  { %v2678_v10 = vmul.f32 %v2594_v30, %v2496_v58  ;;  %v2643_v51 = vpop.f32.mrf.mxu3  ;;  %v2548_v26 = vpop.f32.mrf.mxu1 }
 0x319   :  { %v2679_v55 = vmul.f32 %v2643_v51, %v2545_v33  ;;  %v7224_v51 = vld [vmem:[#allocation7] sm:$0xff] }
 0x31a   :  { %v2698_v38 = vadd.f32 %v2697_v29, %v2678_v10  ;;  %3000 = vmatmul.bf16.gmra.mxu0 %v6935_v54 }
 0x31b   :  { %v2719_v27 = vadd.f32 %v2718_v34, %v2679_v55  ;;  %3049 = vmatmul.bf16.gmra.mxu1 %v6935_v54  ;;  %v7172_v54 = vperm.slane %v3737_v48, 0 }
 0x31c   :  { %3098 = vmatmul.bf16.gmra.mxu2 %v6939_v59 }
 0x31d   :  { %3147 = vmatmul.bf16.gmra.mxu3 %v6939_v59  ;;  %v7176_v59 = vperm.slane %v3735_v60, 0  ;;  %vm3882_vm3 = vcmp.eq.s32.totalorder %v5614_v2, %v7172_v54  ;;  %vm3884_vm4 = vcmp.eq.s32.totalorder %v5617_v3, %v7172_v54  ;;  %vm3878_vm14 = vcmp.eq.s32.totalorder %v5620_v4, %v7172_v54 }
 0x31e   :  { %vm5334_vm6 = vmpackc.low %vm3884_vm4, %vm3882_vm3  ;;  %vm3880_vm15 = vcmp.eq.s32.totalorder %v5623_v5, %v7172_v54  ;;  %vm3874_vm11 = vcmp.eq.s32.totalorder %v5655_v13, %v7172_v54  ;;  %vm3876_vm12 = vcmp.eq.s32.totalorder %v5658_v14, %v7172_v54 }
 0x31f   :  { %v2597_v57 = vpop.f32.mrf.mxu2  ;;  %v2501_v8 = vpop.f32.mrf.mxu0  ;;  %vm3768_vm8 = vcmp.eq.s32.totalorder %v5614_v2, %v7176_v59  ;;  %vm3770_vm9 = vcmp.eq.s32.totalorder %v5617_v3, %v7176_v59  ;;  %5335 = vmatpush.bf16.msk.msrb.mxu2 %vm5334_vm6, %v5572_v12  ;;  %vm5336_vm3 = vmpackc.low %vm3880_vm15, %vm3878_vm14  ;;  %vm3764_vm5 = vcmp.eq.s32.totalorder %v5620_v4, %v7176_v59  ;;  %vm3766_vm6 = vcmp.eq.s32.totalorder %v5623_v5, %v7176_v59 }
 0x320   :  { %v2680_v46 = vmul.f32 %v2597_v57, %v2499_v25  ;;  %v2646_v42 = vpop.f32.mrf.mxu3  ;;  %v2550_v40 = vpop.f32.mrf.mxu1  ;;  %vm5302_vm13 = vmpackc.low %vm3770_vm9, %vm3768_vm8  ;;  %vm3767_vm9 = vcmp.eq.s32.totalorder %v5623_v5, %v7178_v62  ;;  %vm3877_vm15 = vcmp.eq.s32.totalorder %v5658_v14, %v7174_v7  ;;  %vm3760_vm1 = vcmp.eq.s32.totalorder %v5655_v13, %v7176_v59 }
 0x321   :  { %v2681_v44 = vmul.f32 %v2646_v42, %v2548_v26  ;;  %5303 = vmatpush.bf16.msk.msrb.mxu0 %vm5302_vm13, %v5572_v12  ;;  %vm5352_vm4 = vmpackc.low %vm3881_vm2, %vm3879_vm0  ;;  %vm3875_vm13 = vcmp.eq.s32.totalorder %v5655_v13, %v7174_v7  ;;  %vm3762_vm2 = vcmp.eq.s32.totalorder %v5658_v14, %v7176_v59 }
 0x322   :  { %v2699_v61 = vadd.f32 %v2698_v38, %v2680_v46  ;;  %5353 = vmatpush.bf16.msk.msrb.mxu3 %vm5352_vm4, %v5572_v12  ;;  %vm5304_vm8 = vmpackc.low %vm3766_vm6, %vm3764_vm5  ;;  %vm3763_vm5 = vcmp.eq.s32.totalorder %v5658_v14, %v7178_v62 }
 0x323   :  { %v2720_v0 = vadd.f32 %v2719_v27, %v2681_v44  ;;  %5337 = vmatpush.bf16.msk.msrb.mxu2 %vm5336_vm3, %v5572_v12  ;;  %vm5320_vm10 = vmpackc.low %vm3767_vm9, %vm3765_vm7  ;;  %vm3761_vm3 = vcmp.eq.s32.totalorder %v5655_v13, %v7178_v62  ;;  %vm4245_vm7 = vcmask 1043456   ;;  %vm3872_vm9 = vcmp.eq.s32.totalorder %v5684_v16, %v7172_v54 }
 0x324   :  { %5321 = vmatpush.bf16.msk.msrb.mxu1 %vm5320_vm10, %v5572_v12  ;;  %vm5338_vm14 = vmpackc.low %vm3876_vm12, %vm3874_vm11  ;;  %vm3871_vm10 = vcmp.eq.s32.totalorder %v5681_v15, %v7174_v7  ;;  %vm3873_vm11 = vcmp.eq.s32.totalorder %v5684_v16, %v7174_v7 }
 0x325   :  { %5305 = vmatpush.bf16.msk.msrb.mxu0 %vm5304_vm8, %v5572_v12  ;;  %vm5354_vm0 = vmpackc.low %vm3877_vm15, %vm3875_vm13  ;;  %vm3870_vm8 = vcmp.eq.s32.totalorder %v5681_v15, %v7172_v54  ;;  %vm3758_vm15 = vcmp.eq.s32.totalorder %v5684_v16, %v7176_v59 }
 0x326   :  { %5355 = vmatpush.bf16.msk.msrb.mxu3 %vm5354_vm0, %v5572_v12  ;;  %vm5306_vm4 = vmpackc.low %vm3762_vm2, %vm3760_vm1  ;;  %vm3757_vm0 = vcmp.eq.s32.totalorder %v5681_v15, %v7178_v62  ;;  %vm3759_vm2 = vcmp.eq.s32.totalorder %v5684_v16, %v7178_v62 }
 0x327   :  { %v2599_v36 = vpop.f32.mrf.mxu2  ;;  %v2504_v47 = vpop.f32.mrf.mxu0  ;;  %5339 = vmatpush.bf16.msk.msrb.mxu2 %vm5338_vm14, %v5572_v12  ;;  %vm5322_vm6 = vmpackc.low %vm3763_vm5, %vm3761_vm3  ;;  %vm3756_vm14 = vcmp.eq.s32.totalorder %v5681_v15, %v7176_v59  ;;  %vm3868_vm5 = vcmp.eq.s32.totalorder %v5710_v18, %v7172_v54 }
 0x328   :  { %v2682_v28 = vmul.f32 %v2599_v36, %v2501_v8  ;;  %v2648_v52 = vpop.f32.mrf.mxu3  ;;  %v2553_v49 = vpop.f32.mrf.mxu1  ;;  %5323 = vmatpush.bf16.msk.msrb.mxu1 %vm5322_vm6, %v5572_v12  ;;  %vm5340_vm12 = vmpackc.low %vm3872_vm9, %vm3870_vm8  ;;  %vm3867_vm6 = vcmp.eq.s32.totalorder %v5707_v17, %v7174_v7 }
 0x329   :  { %v2683_v9 = vmul.f32 %v2648_v52, %v2550_v40  ;;  %5307 = vmatpush.bf16.msk.msrb.mxu0 %vm5306_vm4, %v5572_v12  ;;  %vm5356_vm13 = vmpackc.low %vm3873_vm11, %vm3871_vm10  ;;  %vm3866_vm4 = vcmp.eq.s32.totalorder %v5707_v17, %v7172_v54  ;;  %vm3752_vm10 = vcmp.eq.s32.totalorder %v5707_v17, %v7176_v59  ;;  %vm3754_vm11 = vcmp.eq.s32.totalorder %v5710_v18, %v7176_v59 }
 0x32a   :  { %v2700_v50 = vadd.f32 %v2699_v61, %v2682_v28  ;;  %3005 = vmatmul.bf16.gmra.mxu0 %v6943_v41  ;;  %5357 = vmatpush.bf16.msk.msrb.mxu3 %vm5356_vm13, %v5572_v12  ;;  %vm5308_vm1 = vmpackc.low %vm3758_vm15, %vm3756_vm14  ;;  %vm3755_vm14 = vcmp.eq.s32.totalorder %v5710_v18, %v7178_v62 }
 0x32b   :  { %v2721_v24 = vadd.f32 %v2720_v0, %v2683_v9  ;;  %3054 = vmatmul.bf16.gmra.mxu1 %v6943_v41  ;;  %5341 = vmatpush.bf16.msk.msrb.mxu2 %vm5340_vm12, %v5572_v12  ;;  %vm5324_vm3 = vmpackc.low %vm3759_vm2, %vm3757_vm0  ;;  %vm3753_vm12 = vcmp.eq.s32.totalorder %v5707_v17, %v7178_v62  ;;  %vm3862_vm0 = vcmp.eq.s32.totalorder %v5733_v19, %v7172_v54 }
 0x32c   :  { %3103 = vmatmul.bf16.gmra.mxu2 %v6955_v53  ;;  %5325 = vmatpush.bf16.msk.msrb.mxu1 %vm5324_vm3, %v5572_v12  ;;  %vm5342_vm8 = vmpackc.low %vm3868_vm5, %vm3866_vm4  ;;  %vm3863_vm2 = vcmp.eq.s32.totalorder %v5733_v19, %v7174_v7  ;;  %vm3865_vm3 = vcmp.eq.s32.totalorder %v5736_v20, %v7174_v7 }
 0x32d   :  { %3152 = vmatmul.bf16.gmra.mxu3 %v6955_v53  ;;  %5309 = vmatpush.bf16.msk.msrb.mxu0 %vm5308_vm1, %v5572_v12  ;;  %vm5310_vm13 = vmpackc.low %vm3754_vm11, %vm3752_vm10  ;;  %vm3864_vm1 = vcmp.eq.s32.totalorder %v5736_v20, %v7172_v54  ;;  %vm3751_vm10 = vcmp.eq.s32.totalorder %v5736_v20, %v7178_v62 }
 0x32e   :  { %vm5326_vm15 = vmpackc.low %vm3755_vm14, %vm3753_vm12  ;;  %vm3858_vm12 = vcmp.eq.s32.totalorder %v5759_v21, %v7172_v54  ;;  %vm3859_vm14 = vcmp.eq.s32.totalorder %v5759_v21, %v7174_v7 }
 0x32f   :  { %v2602_v2 = vpop.f32.mrf.mxu2  ;;  %v2506_v3 = vpop.f32.mrf.mxu0  ;;  %5343 = vmatpush.bf16.msk.msrb.mxu2 %vm5342_vm8, %v5572_v12  ;;  %vm5344_vm4 = vmpackc.low %vm3864_vm1, %vm3862_vm0  ;;  %vm3749_vm8 = vcmp.eq.s32.totalorder %v5733_v19, %v7178_v62 }
 0x330   :  { %v2684_v41 = vmul.f32 %v2602_v2, %v2504_v47  ;;  %v2651_v53 = vpop.f32.mrf.mxu3  ;;  %v2555_v43 = vpop.f32.mrf.mxu1  ;;  %5327 = vmatpush.bf16.msk.msrb.mxu1 %vm5326_vm15, %v5572_v12  ;;  %vm5360_vm5 = vmpackc.low %vm3865_vm3, %vm3863_vm2  ;;  %vm3861_vm15 = vcmp.eq.s32.totalorder %v5762_v22, %v7174_v7  ;;  %vm3744_vm2 = vcmp.eq.s32.totalorder %v5759_v21, %v7176_v59  ;;  %vm3746_vm3 = vcmp.eq.s32.totalorder %v5762_v22, %v7176_v59 }
 0x331   :  { %v2685_v58 = vmul.f32 %v2651_v53, %v2553_v49  ;;  %5311 = vmatpush.bf16.msk.msrb.mxu0 %vm5310_vm13, %v5572_v12  ;;  %vm5328_vm11 = vmpackc.low %vm3751_vm10, %vm3749_vm8  ;;  %vm3860_vm13 = vcmp.eq.s32.totalorder %v5762_v22, %v7172_v54  ;;  %vm3854_vm8 = vcmp.eq.s32.totalorder %v5611_v1, %v7172_v54  ;;  %vm3855_vm10 = vcmp.eq.s32.totalorder %v5611_v1, %v7174_v7 }
 0x332   :  { %v2701_v35 = vadd.f32 %v2700_v50, %v2684_v41  ;;  %vm5346_vm0 = vmpackc.low %vm3860_vm13, %vm3858_vm12 }
 0x333   :  { %v2722_v37 = vadd.f32 %v2721_v24, %v2685_v58  ;;  %5345 = vmatpush.bf16.msk.msrb.mxu2 %vm5344_vm4, %v5572_v12  ;;  %vm5362_vm1 = vmpackc.low %vm3861_vm15, %vm3859_vm14  ;;  %vm3745_vm4 = vcmp.eq.s32.totalorder %v5759_v21, %v7178_v62  ;;  %vm3740_vm14 = vcmp.eq.s32.totalorder %v5611_v1, %v7176_v59  ;;  %vm3742_vm15 = vcmp.eq.s32.totalorder %v5785_v23, %v7176_v59 }
 0x334   :  { %5329 = vmatpush.bf16.msk.msrb.mxu1 %vm5328_vm11, %v5572_v12  ;;  %vm3857_vm11 = vcmp.eq.s32.totalorder %v5785_v23, %v7174_v7 }
 0x335   :  { %vm5364_vm13 = vmpackc.low %vm3857_vm11, %vm3855_vm10 }
 0x337   :  { %v2604_v33 = vpop.f32.mrf.mxu2  ;;  %v2971_v63 = vpop.f32.mrf.mxu0  ;;  %5347 = vmatpush.bf16.msk.msrb.mxu2 %vm5346_vm0, %v5572_v12  ;;  %vm3741_vm0 = vcmp.eq.s32.totalorder %v5611_v1, %v7178_v62 }
 0x338   :  { %v2686_v29 = vmul.f32 %v2604_v33, %v2506_v3  ;;  %v2653_v34 = vpop.f32.mrf.mxu3  ;;  %v3020_v30 = vpop.f32.mrf.mxu1 }
 0x339   :  { %v2687_v25 = vmul.f32 %v2653_v34, %v2555_v43 }
 0x33a   :  { %v2702_v10 = vadd.f32 %v2701_v35, %v2686_v29  ;;  %3472 = vmatmul.bf16.vlgmr.msra.gmra.mxu0 %v7224_v51 }
 0x33b   :  { %v2723_v4 = vadd.f32 %v2722_v37, %v2687_v25  ;;  %3521 = vmatmul.bf16.vlgmr.msra.gmra.mxu1 %v7224_v51 }
 0x33c   :  { %v2703_v5 = vrot.slane %v2702_v10, 4  ;;  %3570 = vmatmul.bf16.vlgmr.msra.gmra.mxu2 %v7010_v56 }
 0x33d   :  { %v2724_v26 = vrot.slane %v2723_v4, 4  ;;  %3619 = vmatmul.bf16.vlgmr.msra.gmra.mxu3 %v7010_v56 }
 0x33e   :  { %v2704_v55 = vadd.f32 %v2703_v5, %v2702_v10 }
 0x33f   :  { %v2725_v38 = vadd.f32 %v2724_v26, %v2723_v4  ;;  %v3069_v27 = vpop.f32.mrf.mxu2  ;;  %v2973_v57 = vpop.f32.mrf.mxu0 }
 0x340   :  { %v2705_v56 = vrot.slane %v2704_v55, 2  ;;  %v3158_v8 = vmul.f32 %v3069_v27, %v2971_v63  ;;  %v3118_v46 = vpop.f32.mrf.mxu3  ;;  %v3022_v42 = vpop.f32.mrf.mxu1 }
 0x341   :  { %v2726_v40 = vrot.slane %v2725_v38, 2  ;;  %v3159_v44 = vmul.f32 %v3118_v46, %v3020_v30 }
 0x342   :  { %v2706_v61 = vadd.f32 %v2705_v56, %v2704_v55 }
 0x343   :  { %v2727_v0 = vadd.f32 %v2726_v40, %v2725_v38 }
 0x344   :  { %v2707_v36 = vrot.slane %v2706_v61, 1 }
 0x345   :  { %v2728_v47 = vrot.slane %v2727_v0, 1 }
 0x346   :  { %v2708_v48 = vadd.f32 %v2707_v36, %v2706_v61 }
 0x347   :  { %v2729_v60 = vadd.f32 %v2728_v47, %v2727_v0  ;;  %v3071_v28 = vpop.f32.mrf.mxu2  ;;  %v2976_v52 = vpop.f32.mrf.mxu0 }
 0x348   :  { %v3160_v49 = vmul.f32 %v3071_v28, %v2973_v57  ;;  %v3120_v9 = vpop.f32.mrf.mxu3  ;;  %v3025_v50 = vpop.f32.mrf.mxu1  ;;  %v7251_v13 = vsel %vm4245_vm7, %v7035_v11, %v2708_v48 }
 0x349   :  { %v3161_v24 = vmul.f32 %v3120_v9, %v3022_v42  ;;  %v7254_v14 = vsel %vm4245_vm7, %v7038_v6, %v2729_v60  ;;  %vm3869_vm7 = vcmp.eq.s32.totalorder %v5710_v18, %v7174_v7  ;;  %v7304_v42 = vld [vmem:[#allocation7 + $0x18] sm:$0xff] }
 0x34a   :  { %v3190_v2 = vadd.f32 %v3160_v49, %v3158_v8  ;;  %3477 = vmatmul.bf16.gmra.mxu0 %v7040_v39  ;;  %vm5358_vm9 = vmpackc.low %vm3869_vm7, %vm3867_vm6  ;;  %v7308_v18 = vld [vmem:[#allocation8 + $0x18] sm:$0xff]  ;;  %vm3748_vm6 = vcmp.eq.s32.totalorder %v5733_v19, %v7176_v59  ;;  %vm3750_vm7 = vcmp.eq.s32.totalorder %v5736_v20, %v7176_v59  ;;  %v7336_v20 = vld [vmem:[#allocation8 + $0x20] sm:$0xff] }
 0x34b   :  { %v3211_v3 = vadd.f32 %v3161_v24, %v3159_v44  ;;  %3526 = vmatmul.bf16.gmra.mxu1 %v7040_v39  ;;  %5359 = vmatpush.bf16.msk.msrb.mxu3 %vm5358_vm9, %v5572_v12  ;;  %vm5312_vm9 = vmpackc.low %vm3750_vm7, %vm3748_vm6  ;;  %vm3747_vm6 = vcmp.eq.s32.totalorder %v5762_v22, %v7178_v62  ;;  %v7364_v22 = vld [vmem:[#allocation8 + $0x28] sm:$0xff]  ;;  %v7388_v59 = vld [vmem:[#allocation7 + $0x30] sm:$0xff] }
 0x34c   :  { %3575 = vmatmul.bf16.gmra.mxu2 %v7044_v32  ;;  %5313 = vmatpush.bf16.msk.msrb.mxu0 %vm5312_vm9, %v5572_v12  ;;  %vm5330_vm7 = vmpackc.low %vm3747_vm6, %vm3745_vm4  ;;  %vm3856_vm9 = vcmp.eq.s32.totalorder %v5785_v23, %v7172_v54  ;;  %vm4248_vm4 = vcmask 1044480   ;;  %vm4254_vm6 = vcmask 1046528  }
 0x34d   :  { %3624 = vmatmul.bf16.gmra.mxu3 %v7044_v32  ;;  %5331 = vmatpush.bf16.msk.msrb.mxu1 %vm5330_vm7, %v5572_v12  ;;  %vm5348_vm12 = vmpackc.low %vm3856_vm9, %vm3854_vm8 }
 0x34e   :  { %5349 = vmatpush.bf16.msk.msrb.mxu2 %vm5348_vm12, %v5572_v12 }
 0x34f   :  { %v3074_v11 = vpop.f32.mrf.mxu2  ;;  %v2978_v6 = vpop.f32.mrf.mxu0  ;;  %5361 = vmatpush.bf16.msk.msrb.mxu3 %vm5360_vm5, %v5572_v12  ;;  %vm5314_vm5 = vmpackc.low %vm3746_vm3, %vm3744_vm2  ;;  %vm3743_vm2 = vcmp.eq.s32.totalorder %v5785_v23, %v7178_v62  ;;  %v7392_v23 = vld [vmem:[#allocation8 + $0x30] sm:$0xff] }
 0x350   :  { %v3162_v39 = vmul.f32 %v3074_v11, %v2976_v52  ;;  %v3123_v32 = vpop.f32.mrf.mxu3  ;;  %v3027_v41 = vpop.f32.mrf.mxu1  ;;  %5315 = vmatpush.bf16.msk.msrb.mxu0 %vm5314_vm5, %v5572_v12  ;;  %vm5332_vm3 = vmpackc.low %vm3743_vm2, %vm3741_vm0  ;;  %vm4251_vm5 = vcmask 1045504  }
 0x351   :  { %v3163_v53 = vmul.f32 %v3123_v32, %v3025_v50  ;;  %5333 = vmatpush.bf16.msk.msrb.mxu1 %vm5332_vm3, %v5572_v12 }
 0x352   :  { %v3191_v43 = vadd.f32 %v3190_v2, %v3162_v39 }
 0x353   :  { %v3212_v58 = vadd.f32 %v3211_v3, %v3163_v53  ;;  %v7332_v3 = vld [vmem:[#allocation7 + $0x20] sm:$0xff]  ;;  %5363 = vmatpush.bf16.msk.msrb.mxu3 %vm5362_vm1, %v5572_v12  ;;  %vm5316_vm1 = vmpackc.low %vm3742_vm15, %vm3740_vm14 }
 0x354   :  { %5317 = vmatpush.bf16.msk.msrb.mxu0 %vm5316_vm1, %v5572_v12 }
 0x357   :  { %v3076_v35 = vpop.f32.mrf.mxu2  ;;  %v2981_v37 = vpop.f32.mrf.mxu0  ;;  %5365 = vmatpush.bf16.msk.msrb.mxu3 %vm5364_vm13, %v5572_v12 }
 0x358   :  { %v3164_v33 = vmul.f32 %v3076_v35, %v2978_v6  ;;  %v3125_v63 = vpop.f32.mrf.mxu3  ;;  %v3030_v29 = vpop.f32.mrf.mxu1 }
 0x359   :  { %v3165_v34 = vmul.f32 %v3125_v63, %v3027_v41 }
 0x35a   :  { %v3192_v30 = vadd.f32 %v3191_v43, %v3164_v33  ;;  %3482 = vmatmul.bf16.gmra.mxu0 %v7068_v45 }
 0x35b   :  { %v3213_v25 = vadd.f32 %v3212_v58, %v3165_v34  ;;  %3531 = vmatmul.bf16.gmra.mxu1 %v7068_v45 }
 0x35c   :  { %3580 = vmatmul.bf16.gmra.mxu2 %v7072_v31 }
 0x35d   :  { %3629 = vmatmul.bf16.gmra.mxu3 %v7072_v31 }
 0x35f   :  { %v3079_v15 = vpop.f32.mrf.mxu2  ;;  %v2983_v16 = vpop.f32.mrf.mxu0 }
 0x360   :  { %v3166_v45 = vmul.f32 %v3079_v15, %v2981_v37  ;;  %v3128_v31 = vpop.f32.mrf.mxu3  ;;  %v3032_v10 = vpop.f32.mrf.mxu1 }
 0x361   :  { %v3167_v4 = vmul.f32 %v3128_v31, %v3030_v29 }
 0x362   :  { %v3193_v5 = vadd.f32 %v3192_v30, %v3166_v45 }
 0x363   :  { %v3214_v26 = vadd.f32 %v3213_v25, %v3167_v4  ;;  %v7360_v25 = vld [vmem:[#allocation7 + $0x28] sm:$0xff] }
 0x367   :  { %v3081_v55 = vpop.f32.mrf.mxu2  ;;  %v2986_v38 = vpop.f32.mrf.mxu0 }
 0x368   :  { %v3168_v27 = vmul.f32 %v3081_v55, %v2983_v16  ;;  %v3130_v57 = vpop.f32.mrf.mxu3  ;;  %v3035_v56 = vpop.f32.mrf.mxu1 }
 0x369   :  { %v3169_v8 = vmul.f32 %v3130_v57, %v3032_v10 }
 0x36a   :  { %v3194_v46 = vadd.f32 %v3193_v5, %v3168_v27  ;;  %3487 = vmatmul.bf16.gmra.mxu0 %v7304_v42 }
 0x36b   :  { %v3215_v17 = vadd.f32 %v3214_v26, %v3169_v8  ;;  %3536 = vmatmul.bf16.gmra.mxu1 %v7304_v42 }
 0x36c   :  { %3585 = vmatmul.bf16.gmra.mxu2 %v7308_v18 }
 0x36d   :  { %3634 = vmatmul.bf16.gmra.mxu3 %v7308_v18 }
 0x36f   :  { %v3084_v40 = vpop.f32.mrf.mxu2  ;;  %v2988_v44 = vpop.f32.mrf.mxu0 }
 0x370   :  { %v3170_v61 = vmul.f32 %v3084_v40, %v2986_v38  ;;  %v3133_v0 = vpop.f32.mrf.mxu3  ;;  %v3037_v36 = vpop.f32.mrf.mxu1 }
 0x371   :  { %v3171_v47 = vmul.f32 %v3133_v0, %v3035_v56 }
 0x372   :  { %v3195_v48 = vadd.f32 %v3194_v46, %v3170_v61 }
 0x373   :  { %v3216_v60 = vadd.f32 %v3215_v17, %v3171_v47 }
 0x377   :  { %v3086_v28 = vpop.f32.mrf.mxu2  ;;  %v2991_v52 = vpop.f32.mrf.mxu0 }
 0x378   :  { %v3172_v49 = vmul.f32 %v3086_v28, %v2988_v44  ;;  %v3135_v9 = vpop.f32.mrf.mxu3  ;;  %v3040_v50 = vpop.f32.mrf.mxu1 }
 0x379   :  { %v3173_v24 = vmul.f32 %v3135_v9, %v3037_v36 }
 0x37a   :  { %v3196_v2 = vadd.f32 %v3195_v48, %v3172_v49  ;;  %3492 = vmatmul.bf16.gmra.mxu0 %v7332_v3  ;;  %v7396_v49 = vld [vmem:[#allocation7 + $0x38] sm:$0xff] }
 0x37b   :  { %v3217_v19 = vadd.f32 %v3216_v60, %v3173_v24  ;;  %3541 = vmatmul.bf16.gmra.mxu1 %v7332_v3 }
 0x37c   :  { %3590 = vmatmul.bf16.gmra.mxu2 %v7336_v20 }
 0x37d   :  { %3639 = vmatmul.bf16.gmra.mxu3 %v7336_v20 }
 0x37f   :  { %v3089_v11 = vpop.f32.mrf.mxu2  ;;  %v2993_v6 = vpop.f32.mrf.mxu0 }
 0x380   :  { %v3174_v39 = vmul.f32 %v3089_v11, %v2991_v52  ;;  %v3138_v32 = vpop.f32.mrf.mxu3  ;;  %v3042_v41 = vpop.f32.mrf.mxu1 }
 0x381   :  { %v3175_v53 = vmul.f32 %v3138_v32, %v3040_v50  ;;  %v7400_v50 = vld [vmem:[#allocation8 + $0x38] sm:$0xff] }
 0x382   :  { %v3197_v43 = vadd.f32 %v3196_v2, %v3174_v39 }
 0x383   :  { %v3218_v58 = vadd.f32 %v3217_v19, %v3175_v53 }
 0x387   :  { %v3091_v35 = vpop.f32.mrf.mxu2  ;;  %v2996_v37 = vpop.f32.mrf.mxu0 }
 0x388   :  { %v3176_v33 = vmul.f32 %v3091_v35, %v2993_v6  ;;  %v3140_v63 = vpop.f32.mrf.mxu3  ;;  %v3045_v29 = vpop.f32.mrf.mxu1 }
 0x389   :  { %v3177_v34 = vmul.f32 %v3140_v63, %v3042_v41 }
 0x38a   :  { %v3198_v30 = vadd.f32 %v3197_v43, %v3176_v33  ;;  %3497 = vmatmul.bf16.gmra.mxu0 %v7360_v25 }
 0x38b   :  { %v3219_v21 = vadd.f32 %v3218_v58, %v3177_v34  ;;  %3546 = vmatmul.bf16.gmra.mxu1 %v7360_v25 }
 0x38c   :  { %3595 = vmatmul.bf16.gmra.mxu2 %v7364_v22 }
 0x38d   :  { %3644 = vmatmul.bf16.gmra.mxu3 %v7364_v22 }
 0x38f   :  { %v3094_v15 = vpop.f32.mrf.mxu2  ;;  %v2998_v16 = vpop.f32.mrf.mxu0 }
 0x390   :  { %v3178_v45 = vmul.f32 %v3094_v15, %v2996_v37  ;;  %v3143_v31 = vpop.f32.mrf.mxu3  ;;  %v3047_v10 = vpop.f32.mrf.mxu1 }
 0x391   :  { %v3179_v4 = vmul.f32 %v3143_v31, %v3045_v29 }
 0x392   :  { %v3199_v5 = vadd.f32 %v3198_v30, %v3178_v45  ;;  %v5433_v30 = vld [vmem:[#allocation8] sm:$0xff] }
 0x393   :  { %v3220_v54 = vadd.f32 %v3219_v21, %v3179_v4 }
 0x397   :  { %v3096_v7 = vpop.f32.mrf.mxu2  ;;  %v3001_v26 = vpop.f32.mrf.mxu0 }
 0x398   :  { %v3180_v55 = vmul.f32 %v3096_v7, %v2998_v16  ;;  %v3145_v38 = vpop.f32.mrf.mxu3  ;;  %v3050_v27 = vpop.f32.mrf.mxu1 }
 0x399   :  { %v3181_v57 = vmul.f32 %v3145_v38, %v3047_v10 }
 0x39a   :  { %v3200_v56 = vadd.f32 %v3199_v5, %v3180_v55  ;;  %3502 = vmatmul.bf16.gmra.mxu0 %v7388_v59 }
 0x39b   :  { %v3221_v1 = vadd.f32 %v3220_v54, %v3181_v57  ;;  %3551 = vmatmul.bf16.gmra.mxu1 %v7388_v59 }
 0x39c   :  { %3600 = vmatmul.bf16.gmra.mxu2 %v7392_v23 }
 0x39d   :  { %3649 = vmatmul.bf16.gmra.mxu3 %v7392_v23 }
 0x39f   :  { %v3099_v12 = vpop.f32.mrf.mxu2  ;;  %v3003_v62 = vpop.f32.mrf.mxu0 }
 0x3a0   :  { %v3182_v8 = vmul.f32 %v3099_v12, %v3001_v26  ;;  %v3148_v46 = vpop.f32.mrf.mxu3  ;;  %v3052_v17 = vpop.f32.mrf.mxu1 }
 0x3a1   :  { %v3183_v40 = vmul.f32 %v3148_v46, %v3050_v27 }
 0x3a2   :  { %v3201_v44 = vadd.f32 %v3200_v56, %v3182_v8 }
 0x3a3   :  { %v3222_v61 = vadd.f32 %v3221_v1, %v3183_v40 }
 0x3a7   :  { %v3101_v0 = vpop.f32.mrf.mxu2  ;;  %v3006_v36 = vpop.f32.mrf.mxu0 }
 0x3a8   :  { %v3184_v47 = vmul.f32 %v3101_v0, %v3003_v62  ;;  %v3150_v48 = vpop.f32.mrf.mxu3  ;;  %v3055_v60 = vpop.f32.mrf.mxu1  ;;  %v5434_v0 = vld [vmem:[#allocation7 + $0x8] sm:$0xff] }
 0x3a9   :  { %v3185_v28 = vmul.f32 %v3150_v48, %v3052_v17 }
 0x3aa   :  { %v3202_v52 = vadd.f32 %v3201_v44, %v3184_v47  ;;  %3507 = vmatmul.bf16.gmra.mxu0 %v7396_v49  ;;  %v5435_v47 = vld [vmem:[#allocation8 + $0x8] sm:$0xff] }
 0x3ab   :  { %v3223_v9 = vadd.f32 %v3222_v61, %v3185_v28  ;;  %3556 = vmatmul.bf16.gmra.mxu1 %v7396_v49 }
 0x3ac   :  { %3605 = vmatmul.bf16.gmra.mxu2 %v7400_v50 }
 0x3ad   :  { %3654 = vmatmul.bf16.gmra.mxu3 %v7400_v50 }
 0x3af   :  { %v3104_v24 = vpop.f32.mrf.mxu2  ;;  %v3008_v2 = vpop.f32.mrf.mxu0 }
 0x3b0   :  { %v3186_v19 = vmul.f32 %v3104_v24, %v3006_v36  ;;  %v3153_v11 = vpop.f32.mrf.mxu3  ;;  %v3057_v6 = vpop.f32.mrf.mxu1 }
 0x3b1   :  { %v3187_v39 = vmul.f32 %v3153_v11, %v3055_v60 }
 0x3b2   :  { %v3203_v32 = vadd.f32 %v3202_v52, %v3186_v19 }
 0x3b3   :  { %v3224_v41 = vadd.f32 %v3223_v9, %v3187_v39 }
 0x3b7   :  { %v3106_v53 = vpop.f32.mrf.mxu2  ;;  %v3473_v43 = vpop.f32.mrf.mxu0 }
 0x3b8   :  { %v3188_v58 = vmul.f32 %v3106_v53, %v3008_v2  ;;  %v3155_v35 = vpop.f32.mrf.mxu3  ;;  %v3522_v37 = vpop.f32.mrf.mxu1  ;;  %v5436_v53 = vld [vmem:[#allocation7 + $0x10] sm:$0xff] }
 0x3b9   :  { %v3189_v33 = vmul.f32 %v3155_v35, %v3057_v6 }
 0x3ba   :  { %v3204_v63 = vadd.f32 %v3203_v32, %v3188_v58  ;;  %3974 = vmatmul.bf16.vlgmr.msrb.gmra.mxu0 %v7224_v51  ;;  %v5437_v58 = vld [vmem:[#allocation8 + $0x10] sm:$0xff] }
 0x3bb   :  { %v3225_v29 = vadd.f32 %v3224_v41, %v3189_v33  ;;  %4023 = vmatmul.bf16.vlgmr.msrb.gmra.mxu1 %v7224_v51 }
 0x3bc   :  { %v3205_v34 = vrot.slane %v3204_v63, 4  ;;  %4072 = vmatmul.bf16.vlgmr.msrb.gmra.mxu2 %v5433_v30 }
 0x3bd   :  { %v3226_v21 = vrot.slane %v3225_v29, 4  ;;  %4121 = vmatmul.bf16.vlgmr.msrb.gmra.mxu3 %v5433_v30 }
 0x3be   :  { %v3206_v15 = vadd.f32 %v3205_v34, %v3204_v63 }
 0x3bf   :  { %v3227_v16 = vadd.f32 %v3226_v21, %v3225_v29  ;;  %v3571_v45 = vpop.f32.mrf.mxu2  ;;  %v3475_v31 = vpop.f32.mrf.mxu0 }
 0x3c0   :  { %v3207_v10 = vrot.slane %v3206_v15, 2  ;;  %v3660_v4 = vmul.f32 %v3571_v45, %v3473_v43  ;;  %v3620_v5 = vpop.f32.mrf.mxu3  ;;  %v3524_v54 = vpop.f32.mrf.mxu1 }
 0x3c1   :  { %v3228_v7 = vrot.slane %v3227_v16, 2  ;;  %v3661_v26 = vmul.f32 %v3620_v5, %v3522_v37 }
 0x3c2   :  { %v3208_v55 = vadd.f32 %v3207_v10, %v3206_v15 }
 0x3c3   :  { %v3229_v38 = vadd.f32 %v3228_v7, %v3227_v16 }
 0x3c4   :  { %v3209_v27 = vrot.slane %v3208_v55, 1 }
 0x3c5   :  { %v3230_v57 = vrot.slane %v3229_v38, 1 }
 0x3c6   :  { %v3210_v51 = vadd.f32 %v3209_v27, %v3208_v55 }
 0x3c7   :  { %v3231_v56 = vadd.f32 %v3230_v57, %v3229_v38  ;;  %v3573_v1 = vpop.f32.mrf.mxu2  ;;  %v3478_v12 = vpop.f32.mrf.mxu0 }
 0x3c8   :  { %v3662_v62 = vmul.f32 %v3573_v1, %v3475_v31  ;;  %v3622_v8 = vpop.f32.mrf.mxu3  ;;  %v3527_v46 = vpop.f32.mrf.mxu1  ;;  %v7407_v17 = vsel %vm4248_vm4, %v7251_v13, %v3210_v51 }
 0x3c9   :  { %v3663_v40 = vmul.f32 %v3622_v8, %v3524_v54  ;;  %v7410_v44 = vsel %vm4248_vm4, %v7254_v14, %v3231_v56 }
 0x3ca   :  { %v3692_v61 = vadd.f32 %v3662_v62, %v3660_v4  ;;  %3979 = vmatmul.bf16.gmra.mxu0 %v5434_v0 }
 0x3cb   :  { %v3713_v36 = vadd.f32 %v3663_v40, %v3661_v26  ;;  %4028 = vmatmul.bf16.gmra.mxu1 %v5434_v0 }
 0x3cc   :  { %4077 = vmatmul.bf16.gmra.mxu2 %v5435_v47 }
 0x3cd   :  { %4126 = vmatmul.bf16.gmra.mxu3 %v5435_v47 }
 0x3cf   :  { %v3576_v48 = vpop.f32.mrf.mxu2  ;;  %v3480_v60 = vpop.f32.mrf.mxu0 }
 0x3d0   :  { %v3664_v28 = vmul.f32 %v3576_v48, %v3478_v12  ;;  %v3625_v52 = vpop.f32.mrf.mxu3  ;;  %v3529_v9 = vpop.f32.mrf.mxu1 }
 0x3d1   :  { %v3665_v24 = vmul.f32 %v3625_v52, %v3527_v46 }
 0x3d2   :  { %v3693_v13 = vadd.f32 %v3692_v61, %v3664_v28 }
 0x3d3   :  { %v3714_v2 = vadd.f32 %v3713_v36, %v3665_v24 }
 0x3d7   :  { %v3578_v19 = vpop.f32.mrf.mxu2  ;;  %v3483_v11 = vpop.f32.mrf.mxu0 }
 0x3d8   :  { %v3666_v14 = vmul.f32 %v3578_v19, %v3480_v60  ;;  %v3627_v6 = vpop.f32.mrf.mxu3  ;;  %v3532_v39 = vpop.f32.mrf.mxu1 }
 0x3d9   :  { %v3667_v32 = vmul.f32 %v3627_v6, %v3529_v9 }
 0x3da   :  { %v3694_v41 = vadd.f32 %v3693_v13, %v3666_v14  ;;  %3984 = vmatmul.bf16.gmra.mxu0 %v5436_v53 }
 0x3db   :  { %v3715_v43 = vadd.f32 %v3714_v2, %v3667_v32  ;;  %4033 = vmatmul.bf16.gmra.mxu1 %v5436_v53 }
 0x3dc   :  { %4082 = vmatmul.bf16.gmra.mxu2 %v5437_v58 }
 0x3dd   :  { %4131 = vmatmul.bf16.gmra.mxu3 %v5437_v58 }
 0x3df   :  { %v3581_v35 = vpop.f32.mrf.mxu2  ;;  %v3485_v37 = vpop.f32.mrf.mxu0 }
 0x3e0   :  { %v3668_v33 = vmul.f32 %v3581_v35, %v3483_v11  ;;  %v3630_v63 = vpop.f32.mrf.mxu3  ;;  %v3534_v29 = vpop.f32.mrf.mxu1 }
 0x3e1   :  { %v3669_v34 = vmul.f32 %v3630_v63, %v3532_v39 }
 0x3e2   :  { %v3695_v30 = vadd.f32 %v3694_v41, %v3668_v33 }
 0x3e3   :  { %v3716_v21 = vadd.f32 %v3715_v43, %v3669_v34 }
 0x3e7   :  { %v3583_v15 = vpop.f32.mrf.mxu2  ;;  %v3488_v16 = vpop.f32.mrf.mxu0 }
 0x3e8   :  { %v3670_v45 = vmul.f32 %v3583_v15, %v3485_v37  ;;  %v3632_v31 = vpop.f32.mrf.mxu3  ;;  %v3537_v10 = vpop.f32.mrf.mxu1 }
 0x3e9   :  { %v3671_v4 = vmul.f32 %v3632_v31, %v3534_v29 }
 0x3ea   :  { %v3696_v5 = vadd.f32 %v3695_v30, %v3670_v45  ;;  %3989 = vmatmul.bf16.gmra.mxu0 %v7304_v42 }
 0x3eb   :  { %v3717_v54 = vadd.f32 %v3716_v21, %v3671_v4  ;;  %4038 = vmatmul.bf16.gmra.mxu1 %v7304_v42 }
 0x3ec   :  { %4087 = vmatmul.bf16.gmra.mxu2 %v7308_v18 }
 0x3ed   :  { %4136 = vmatmul.bf16.gmra.mxu3 %v7308_v18 }
 0x3ef   :  { %v3586_v7 = vpop.f32.mrf.mxu2  ;;  %v3490_v26 = vpop.f32.mrf.mxu0 }
 0x3f0   :  { %v3672_v55 = vmul.f32 %v3586_v7, %v3488_v16  ;;  %v3635_v38 = vpop.f32.mrf.mxu3  ;;  %v3539_v27 = vpop.f32.mrf.mxu1 }
 0x3f1   :  { %v3673_v57 = vmul.f32 %v3635_v38, %v3537_v10 }
 0x3f2   :  { %v3697_v51 = vadd.f32 %v3696_v5, %v3672_v55 }
 0x3f3   :  { %v3718_v56 = vadd.f32 %v3717_v54, %v3673_v57 }
 0x3f7   :  { %v3588_v1 = vpop.f32.mrf.mxu2  ;;  %v3493_v12 = vpop.f32.mrf.mxu0 }
 0x3f8   :  { %v3674_v62 = vmul.f32 %v3588_v1, %v3490_v26  ;;  %v3637_v8 = vpop.f32.mrf.mxu3  ;;  %v3542_v46 = vpop.f32.mrf.mxu1 }
 0x3f9   :  { %v3675_v40 = vmul.f32 %v3637_v8, %v3539_v27 }
 0x3fa   :  { %v3698_v61 = vadd.f32 %v3697_v51, %v3674_v62  ;;  %3994 = vmatmul.bf16.gmra.mxu0 %v7332_v3 }
 0x3fb   :  { %v3719_v42 = vadd.f32 %v3718_v56, %v3675_v40  ;;  %4043 = vmatmul.bf16.gmra.mxu1 %v7332_v3 }
 0x3fc   :  { %4092 = vmatmul.bf16.gmra.mxu2 %v7336_v20 }
 0x3fd   :  { %4141 = vmatmul.bf16.gmra.mxu3 %v7336_v20 }
 0x3ff   :  { %v3591_v18 = vpop.f32.mrf.mxu2  ;;  %v3495_v0 = vpop.f32.mrf.mxu0 }
 0x400   :  { %v3676_v36 = vmul.f32 %v3591_v18, %v3493_v12  ;;  %v3640_v47 = vpop.f32.mrf.mxu3  ;;  %v3544_v48 = vpop.f32.mrf.mxu1 }
 0x401   :  { %v3677_v60 = vmul.f32 %v3640_v47, %v3542_v46 }
 0x402   :  { %v3699_v28 = vadd.f32 %v3698_v61, %v3676_v36 }
 0x403   :  { %v3720_v52 = vadd.f32 %v3719_v42, %v3677_v60 }
 0x407   :  { %v3593_v9 = vpop.f32.mrf.mxu2  ;;  %v3498_v24 = vpop.f32.mrf.mxu0 }
 0x408   :  { %v3678_v13 = vmul.f32 %v3593_v9, %v3495_v0  ;;  %v3642_v2 = vpop.f32.mrf.mxu3  ;;  %v3547_v19 = vpop.f32.mrf.mxu1 }
 0x409   :  { %v3679_v11 = vmul.f32 %v3642_v2, %v3544_v48 }
 0x40a   :  { %v3700_v14 = vadd.f32 %v3699_v28, %v3678_v13  ;;  %3999 = vmatmul.bf16.gmra.mxu0 %v7360_v25 }
 0x40b   :  { %v3721_v3 = vadd.f32 %v3720_v52, %v3679_v11  ;;  %4048 = vmatmul.bf16.gmra.mxu1 %v7360_v25 }
 0x40c   :  { %4097 = vmatmul.bf16.gmra.mxu2 %v7364_v22 }
 0x40d   :  { %4146 = vmatmul.bf16.gmra.mxu3 %v7364_v22 }
 0x40f   :  { %v3596_v20 = vpop.f32.mrf.mxu2  ;;  %v3500_v6 = vpop.f32.mrf.mxu0 }
 0x410   :  { %v3680_v39 = vmul.f32 %v3596_v20, %v3498_v24  ;;  %v3645_v32 = vpop.f32.mrf.mxu3  ;;  %v3549_v41 = vpop.f32.mrf.mxu1 }
 0x411   :  { %v3681_v53 = vmul.f32 %v3645_v32, %v3547_v19 }
 0x412   :  { %v3701_v43 = vadd.f32 %v3700_v14, %v3680_v39 }
 0x413   :  { %v3722_v58 = vadd.f32 %v3721_v3, %v3681_v53 }
 0x417   :  { %v3598_v35 = vpop.f32.mrf.mxu2  ;;  %v3503_v37 = vpop.f32.mrf.mxu0 }
 0x418   :  { %v3682_v33 = vmul.f32 %v3598_v35, %v3500_v6  ;;  %v3647_v63 = vpop.f32.mrf.mxu3  ;;  %v3552_v29 = vpop.f32.mrf.mxu1 }
 0x419   :  { %v3683_v34 = vmul.f32 %v3647_v63, %v3549_v41 }
 0x41a   :  { %v3702_v30 = vadd.f32 %v3701_v43, %v3682_v33  ;;  %4004 = vmatmul.bf16.gmra.mxu0 %v7388_v59 }
 0x41b   :  { %v3723_v25 = vadd.f32 %v3722_v58, %v3683_v34  ;;  %4053 = vmatmul.bf16.gmra.mxu1 %v7388_v59 }
 0x41c   :  { %4102 = vmatmul.bf16.gmra.mxu2 %v7392_v23 }
 0x41d   :  { %4151 = vmatmul.bf16.gmra.mxu3 %v7392_v23 }
 0x41f   :  { %v3601_v22 = vpop.f32.mrf.mxu2  ;;  %v3505_v21 = vpop.f32.mrf.mxu0 }
 0x420   :  { %v3684_v15 = vmul.f32 %v3601_v22, %v3503_v37  ;;  %v3650_v16 = vpop.f32.mrf.mxu3  ;;  %v3554_v45 = vpop.f32.mrf.mxu1 }
 0x421   :  { %v3685_v31 = vmul.f32 %v3650_v16, %v3552_v29 }
 0x422   :  { %v3703_v10 = vadd.f32 %v3702_v30, %v3684_v15 }
 0x423   :  { %v3724_v4 = vadd.f32 %v3723_v25, %v3685_v31 }
 0x427   :  { %v3603_v5 = vpop.f32.mrf.mxu2  ;;  %v3508_v54 = vpop.f32.mrf.mxu0 }
 0x428   :  { %v3686_v7 = vmul.f32 %v3603_v5, %v3505_v21  ;;  %v3652_v26 = vpop.f32.mrf.mxu3  ;;  %v3557_v55 = vpop.f32.mrf.mxu1 }
 0x429   :  { %v3687_v38 = vmul.f32 %v3652_v26, %v3554_v45 }
 0x42a   :  { %v3704_v27 = vadd.f32 %v3703_v10, %v3686_v7  ;;  %4009 = vmatmul.bf16.gmra.mxu0 %v7396_v49 }
 0x42b   :  { %v3725_v59 = vadd.f32 %v3724_v4, %v3687_v38  ;;  %4058 = vmatmul.bf16.gmra.mxu1 %v7396_v49 }
 0x42c   :  { %4107 = vmatmul.bf16.gmra.mxu2 %v7400_v50 }
 0x42d   :  { %4156 = vmatmul.bf16.gmra.mxu3 %v7400_v50 }
 0x42f   :  { %v3606_v23 = vpop.f32.mrf.mxu2  ;;  %v3510_v57 = vpop.f32.mrf.mxu0 }
 0x430   :  { %v3688_v51 = vmul.f32 %v3606_v23, %v3508_v54  ;;  %v3655_v56 = vpop.f32.mrf.mxu3  ;;  %v3559_v1 = vpop.f32.mrf.mxu1 }
 0x431   :  { %v3689_v12 = vmul.f32 %v3655_v56, %v3557_v55 }
 0x432   :  { %v3705_v62 = vadd.f32 %v3704_v27, %v3688_v51 }
 0x433   :  { %v3726_v8 = vadd.f32 %v3725_v59, %v3689_v12 }
 0x437   :  { %v3608_v46 = vpop.f32.mrf.mxu2  ;;  %v3975_v40 = vpop.f32.mrf.mxu0 }
 0x438   :  { %v3690_v61 = vmul.f32 %v3608_v46, %v3510_v57  ;;  %v3657_v42 = vpop.f32.mrf.mxu3  ;;  %v4024_v18 = vpop.f32.mrf.mxu1 }
 0x439   :  { %v3691_v0 = vmul.f32 %v3657_v42, %v3559_v1 }
 0x43a   :  { %v3706_v36 = vadd.f32 %v3705_v62, %v3690_v61 }
 0x43b   :  { %v3727_v49 = vadd.f32 %v3726_v8, %v3691_v0 }
 0x43c   :  { %v3707_v47 = vrot.slane %v3706_v36, 4 }
 0x43d   :  { %v3728_v48 = vrot.slane %v3727_v49, 4 }
 0x43e   :  { %v3708_v60 = vadd.f32 %v3707_v47, %v3706_v36 }
 0x43f   :  { %v3729_v50 = vadd.f32 %v3728_v48, %v3727_v49  ;;  %v4073_v28 = vpop.f32.mrf.mxu2  ;;  %v3977_v52 = vpop.f32.mrf.mxu0 }
 0x440   :  { %v3709_v9 = vrot.slane %v3708_v60, 2  ;;  %v4162_v24 = vmul.f32 %v4073_v28, %v3975_v40  ;;  %v4122_v13 = vpop.f32.mrf.mxu3  ;;  %v4026_v2 = vpop.f32.mrf.mxu1 }
 0x441   :  { %v3730_v19 = vrot.slane %v3729_v50, 2  ;;  %v4163_v11 = vmul.f32 %v4122_v13, %v4024_v18 }
 0x442   :  { %v3710_v14 = vadd.f32 %v3709_v9, %v3708_v60 }
 0x443   :  { %v3731_v3 = vadd.f32 %v3730_v19, %v3729_v50 }
 0x444   :  { %v3711_v20 = vrot.slane %v3710_v14, 1 }
 0x445   :  { %v3732_v6 = vrot.slane %v3731_v3, 1 }
 0x446   :  { %v3712_v39 = vadd.f32 %v3711_v20, %v3710_v14 }
 0x447   :  { %v3733_v32 = vadd.f32 %v3732_v6, %v3731_v3  ;;  %v4075_v41 = vpop.f32.mrf.mxu2  ;;  %v3980_v53 = vpop.f32.mrf.mxu0 }
 0x448   :  { %v4164_v43 = vmul.f32 %v4075_v41, %v3977_v52  ;;  %v4124_v58 = vpop.f32.mrf.mxu3  ;;  %v4029_v35 = vpop.f32.mrf.mxu1  ;;  %v7433_v37 = vsel %vm4251_vm5, %v7407_v17, %v3712_v39 }
 0x449   :  { %v4165_v33 = vmul.f32 %v4124_v58, %v4026_v2  ;;  %v7436_v63 = vsel %vm4251_vm5, %v7410_v44, %v3733_v32 }
 0x44a   :  { %v4194_v29 = vadd.f32 %v4164_v43, %v4162_v24 }
 0x44b   :  { %v4215_v34 = vadd.f32 %v4165_v33, %v4163_v11 }
 0x44f   :  { %v4078_v30 = vpop.f32.mrf.mxu2  ;;  %v3982_v25 = vpop.f32.mrf.mxu0 }
 0x450   :  { %v4166_v22 = vmul.f32 %v4078_v30, %v3980_v53  ;;  %v4127_v21 = vpop.f32.mrf.mxu3  ;;  %v4031_v15 = vpop.f32.mrf.mxu1 }
 0x451   :  { %v4167_v16 = vmul.f32 %v4127_v21, %v4029_v35 }
 0x452   :  { %v4195_v45 = vadd.f32 %v4194_v29, %v4166_v22 }
 0x453   :  { %v4216_v31 = vadd.f32 %v4215_v34, %v4167_v16 }
 0x457   :  { %v4080_v10 = vpop.f32.mrf.mxu2  ;;  %v3985_v4 = vpop.f32.mrf.mxu0 }
 0x458   :  { %v4168_v5 = vmul.f32 %v4080_v10, %v3982_v25  ;;  %v4129_v54 = vpop.f32.mrf.mxu3  ;;  %v4034_v17 = vpop.f32.mrf.mxu1 }
 0x459   :  { %v4169_v7 = vmul.f32 %v4129_v54, %v4031_v15 }
 0x45a   :  { %v4196_v26 = vadd.f32 %v4195_v45, %v4168_v5 }
 0x45b   :  { %v4217_v55 = vadd.f32 %v4216_v31, %v4169_v7 }
 0x45f   :  { %v4083_v44 = vpop.f32.mrf.mxu2  ;;  %v3987_v38 = vpop.f32.mrf.mxu0 }
 0x460   :  { %v4170_v27 = vmul.f32 %v4083_v44, %v3985_v4  ;;  %v4132_v59 = vpop.f32.mrf.mxu3  ;;  %v4036_v23 = vpop.f32.mrf.mxu1 }
 0x461   :  { %v4171_v57 = vmul.f32 %v4132_v59, %v4034_v17 }
 0x462   :  { %v4197_v51 = vadd.f32 %v4196_v26, %v4170_v27 }
 0x463   :  { %v4218_v56 = vadd.f32 %v4217_v55, %v4171_v57 }
 0x467   :  { %v4085_v1 = vpop.f32.mrf.mxu2  ;;  %v3990_v12 = vpop.f32.mrf.mxu0 }
 0x468   :  { %v4134_v62 = vpop.f32.mrf.mxu3  ;;  %v4039_v8 = vpop.f32.mrf.mxu1  ;;  %v4172_v41 = vmul.f32 %v4085_v1, %v3987_v38 }
 0x469   :  { %v4173_v53 = vmul.f32 %v4134_v62, %v4036_v23 }
 0x46a   :  { %v4198_v29 = vadd.f32 %v4197_v51, %v4172_v41 }
 0x46b   :  { %v4219_v30 = vadd.f32 %v4218_v56, %v4173_v53 }
 0x46f   :  { %v4088_v46 = vpop.f32.mrf.mxu2  ;;  %v3992_v40 = vpop.f32.mrf.mxu0 }
 0x470   :  { %v4137_v61 = vpop.f32.mrf.mxu3  ;;  %v4041_v42 = vpop.f32.mrf.mxu1  ;;  %v4174_v58 = vmul.f32 %v4088_v46, %v3990_v12 }
 0x471   :  { %v4175_v33 = vmul.f32 %v4137_v61, %v4039_v8 }
 0x472   :  { %v4199_v21 = vadd.f32 %v4198_v29, %v4174_v58 }
 0x473   :  { %v4220_v45 = vadd.f32 %v4219_v30, %v4175_v33 }
 0x477   :  { %v4090_v18 = vpop.f32.mrf.mxu2  ;;  %v3995_v0 = vpop.f32.mrf.mxu0 }
 0x478   :  { %v4139_v36 = vpop.f32.mrf.mxu3  ;;  %v4044_v49 = vpop.f32.mrf.mxu1  ;;  %v4176_v34 = vmul.f32 %v4090_v18, %v3992_v40 }
 0x479   :  { %v4177_v25 = vmul.f32 %v4139_v36, %v4041_v42 }
 0x47a   :  { %v4200_v10 = vadd.f32 %v4199_v21, %v4176_v34 }
 0x47b   :  { %v4221_v5 = vadd.f32 %v4220_v45, %v4177_v25 }
 0x47f   :  { %v4093_v47 = vpop.f32.mrf.mxu2  ;;  %v3997_v48 = vpop.f32.mrf.mxu0 }
 0x480   :  { %v4142_v60 = vpop.f32.mrf.mxu3  ;;  %v4046_v50 = vpop.f32.mrf.mxu1  ;;  %v4178_v15 = vmul.f32 %v4093_v47, %v3995_v0 }
 0x481   :  { %v4179_v31 = vmul.f32 %v4142_v60, %v4044_v49 }
 0x482   :  { %v4201_v17 = vadd.f32 %v4200_v10, %v4178_v15 }
 0x483   :  { %v4222_v26 = vadd.f32 %v4221_v5, %v4179_v31 }
 0x487   :  { %v4095_v28 = vpop.f32.mrf.mxu2  ;;  %v4000_v52 = vpop.f32.mrf.mxu0 }
 0x488   :  { %v4144_v9 = vpop.f32.mrf.mxu3  ;;  %v4049_v24 = vpop.f32.mrf.mxu1  ;;  %v4180_v4 = vmul.f32 %v4095_v28, %v3997_v48 }
 0x489   :  { %v4181_v54 = vmul.f32 %v4144_v9, %v4046_v50 }
 0x48a   :  { %v4202_v38 = vadd.f32 %v4201_v17, %v4180_v4 }
 0x48b   :  { %v4223_v23 = vadd.f32 %v4222_v26, %v4181_v54 }
 0x48f   :  { %v4098_v13 = vpop.f32.mrf.mxu2  ;;  %v4002_v2 = vpop.f32.mrf.mxu0 }
 0x490   :  { %v4147_v19 = vpop.f32.mrf.mxu3  ;;  %v4051_v11 = vpop.f32.mrf.mxu1  ;;  %v4182_v7 = vmul.f32 %v4098_v13, %v4000_v52 }
 0x491   :  { %v4183_v55 = vmul.f32 %v4147_v19, %v4049_v24 }
 0x492   :  { %v4203_v56 = vadd.f32 %v4202_v38, %v4182_v7 }
 0x493   :  { %v4224_v62 = vadd.f32 %v4223_v23, %v4183_v55 }
 0x497   :  { %v4100_v14 = vpop.f32.mrf.mxu2  ;;  %v4005_v20 = vpop.f32.mrf.mxu0 }
 0x498   :  { %v4149_v3 = vpop.f32.mrf.mxu3  ;;  %v4054_v6 = vpop.f32.mrf.mxu1  ;;  %v4184_v27 = vmul.f32 %v4100_v14, %v4002_v2 }
 0x499   :  { %v4185_v57 = vmul.f32 %v4149_v3, %v4051_v11 }
 0x49a   :  { %v4204_v46 = vadd.f32 %v4203_v56, %v4184_v27 }
 0x49b   :  { %v4225_v61 = vadd.f32 %v4224_v62, %v4185_v57 }
 0x49f   :  { %v4103_v39 = vpop.f32.mrf.mxu2  ;;  %v4007_v43 = vpop.f32.mrf.mxu0 }
 0x4a0   :  { %v4152_v32 = vpop.f32.mrf.mxu3  ;;  %v4056_v35 = vpop.f32.mrf.mxu1  ;;  %v4186_v1 = vmul.f32 %v4103_v39, %v4005_v20 }
 0x4a1   :  { %v4187_v8 = vmul.f32 %v4152_v32, %v4054_v6 }
 0x4a2   :  { %v4205_v18 = vadd.f32 %v4204_v46, %v4186_v1 }
 0x4a3   :  { %v4226_v36 = vadd.f32 %v4225_v61, %v4187_v8 }
 0x4a7   :  { %v4105_v22 = vpop.f32.mrf.mxu2  ;;  %v4010_v44 = vpop.f32.mrf.mxu0 }
 0x4a8   :  { %v4154_v16 = vpop.f32.mrf.mxu3  ;;  %v4059_v59 = vpop.f32.mrf.mxu1  ;;  %v4188_v40 = vmul.f32 %v4105_v22, %v4007_v43 }
 0x4a9   :  { %v4189_v42 = vmul.f32 %v4154_v16, %v4056_v35 }
 0x4aa   :  { %v4206_v47 = vadd.f32 %v4205_v18, %v4188_v40 }
 0x4ab   :  { %v4227_v48 = vadd.f32 %v4226_v36, %v4189_v42 }
 0x4af   :  { %v4108_v51 = vpop.f32.mrf.mxu2  ;;  %v4012_v60 = vpop.f32.mrf.mxu0 }
 0x4b0   :  { %v4157_v12 = vpop.f32.mrf.mxu3  ;;  %v4190_v0 = vmul.f32 %v4108_v51, %v4010_v44  ;;  %v4061_v52 = vpop.f32.mrf.mxu1 }
 0x4b1   :  { %v4191_v49 = vmul.f32 %v4157_v12, %v4059_v59 }
 0x4b2   :  { %v4207_v28 = vadd.f32 %v4206_v47, %v4190_v0 }
 0x4b3   :  { %v4228_v13 = vadd.f32 %v4227_v48, %v4191_v49 }
 0x4b7   :  { %v4110_v50 = vpop.f32.mrf.mxu2 }
 0x4b8   :  { %v4192_v9 = vmul.f32 %v4110_v50, %v4012_v60  ;;  %v4159_v24 = vpop.f32.mrf.mxu3 }
 0x4b9   :  { %v4193_v2 = vmul.f32 %v4159_v24, %v4061_v52 }
 0x4ba   :  { %v4208_v19 = vadd.f32 %v4207_v28, %v4192_v9 }
 0x4bb   :  { %v4229_v11 = vadd.f32 %v4228_v13, %v4193_v2 }
 0x4bc   :  { %v4209_v14 = vrot.slane %v4208_v19, 4 }
 0x4bd   :  { %v4230_v3 = vrot.slane %v4229_v11, 4 }
 0x4be   :  { %v4210_v20 = vadd.f32 %v4209_v14, %v4208_v19 }
 0x4bf   :  { %v4231_v6 = vadd.f32 %v4230_v3, %v4229_v11 }
 0x4c0   :  { %v4211_v39 = vrot.slane %v4210_v20, 2 }
 0x4c1   :  { %v4232_v32 = vrot.slane %v4231_v6, 2 }
 0x4c2   :  { %v4212_v41 = vadd.f32 %v4211_v39, %v4210_v20 }
 0x4c3   :  { %v4233_v53 = vadd.f32 %v4232_v32, %v4231_v6 }
 0x4c4   :  { %v4213_v43 = vrot.slane %v4212_v41, 1 }
 0x4c5   :  { %v4234_v58 = vrot.slane %v4233_v53, 1 }
 0x4c6   :  { %v4214_v35 = vadd.f32 %v4213_v43, %v4212_v41 }
 0x4c7   :  { %v4235_v33 = vadd.f32 %v4234_v58, %v4233_v53 }
 0x4c8   :  { %v4255_v29 = vsel %vm4254_vm6, %v7433_v37, %v4214_v35 }
 0x4c9   :  { %v4256_v34 = vsel %vm4254_vm6, %v7436_v63, %v4235_v33  ;;  %4257 = vst [vmem:[#allocation10] sm:$0xff] %v4255_v29 }
 0x4ca   :  { %4258 = vst [vmem:[#allocation10 + $0x8] sm:$0xff] %v4256_v34 }
 0x4cb   :  { %4269 = dma.vmem_to_hbm [thread:$0]  %s4265_s3, 256, %s4267_s11, [#allocation4]  }
 0x4cc   :  { %5564 = dma.done.wait [#allocation4], 256  }
 0x4cd   :  { %5565 = vsyncadd [#allocation4], 4294967040 }
 0x4ce   :  { %4274 = vsyncpa [#allocation3], 1 }
 0x4cf   :  { %4275 = vsyncpa [#allocation6], 1 }
 0x4d0   :  { %4276 = vsyncpa [#allocation9], 1 }
 0x4d1   :  { %4277 = vsyncpa [#allocation4], 1 }

</bundles_post_ra>
